<compile_context>
chip_gen: v7x
topology: tpu7x:2x2x1
jax: 0.10.0
libtpu: 0.0.40
codegen_flags: <defaults>
</compile_context>

<pallas_src>
import numpy as np
import jax
import jax.numpy as jnp
from jax import lax
from jax.experimental import pallas as pl
from jax.experimental.pallas import tpu as pltpu

# ----------------------------- configuration -------------------------------
SRC_VOCAB = 37
TRG_VOCAB = 53
ENC_EMBED = 32
ENC_HIDDEN = 16        # values_size for attention (enc_bidirectional=False)
DEC_EMBED = 32
DEC_HIDDEN = 32
S_SRC = 8              # source sequence length
T_TRG = 8              # target sequence length
BATCH = 2
VOCAB_PAD = 128        # lane-dense padded vocab width for the output store

# TODO(synk): nn.Dropout is identity (eval / dropout=0.0); embedding gathers stay in XLA.


# ----------------------------- fused Pallas kernel --------------------------
def _seq2seq_kernel(src_ref, trg_ref,
                    wex_ref, weh_ref, be_ref,
                    wde_ref, wdp_ref, wdh_ref, bd_ref,
                    w1_ref, b1_ref, w2a_ref, w2h_ref, b2_ref,
                    wp_ref, bp_ref,
                    out_ref, values_scr, prev_scr):
    """Fused EncoderLSTM + AttentionDecoder forward.

    src_ref:  (S, B, Ee)   source embeddings (per-step leading-dim indexed)
    trg_ref:  (T, B, Ed)   target embeddings
    wex_ref:  (4, Ee, He)  encoder input weights per gate [i, f, g, o]
    weh_ref:  (4, He, He)  encoder recurrent weights per gate
    be_ref:   (4, 1,  He)  encoder bias per gate (b_ih + b_hh)
    wde_ref:  (4, Ed, Hd)  decoder input (embedding) weights per gate
    wdp_ref:  (4, Ed, Hd)  decoder input-feed (prev output) weights per gate
    wdh_ref:  (4, Hd, Hd)  decoder recurrent weights per gate
    bd_ref:   (4, 1,  Hd)  decoder bias per gate
    w1_ref:   (Hd, He)  b1:(1, He)   attention linear1 (query -> values_size)
    w2a_ref:  (He, Ed)  w2h:(Hd, Ed)  b2:(1, Ed)  attention linear2, split
    wp_ref:   (Ed, VPAD) bp:(1, VPAD)  xent projection, zero-padded to 128 lanes
    out_ref:  (T*B, VPAD)  dense logits (reshaped / sliced in the wrapper)
    values_scr: (S*B, He)  encoder states, row t*B+b, VMEM-resident
    prev_scr:   (T*B, Ed)  per-step attention outputs staged for the hoisted proj
    """
    f32 = jnp.float32
    S, B, _ = src_ref.shape
    T = trg_ref.shape[0]
    He = weh_ref.shape[1]
    Hd = wdh_ref.shape[1]
    Ed = w2h_ref.shape[1]

    def dot(a, b):
        return jnp.dot(a, b, preferred_element_type=f32)

    # Loop-invariant loads (hoisted).
    src = src_ref[...]
    trg = trg_ref[...]
    wex, weh, be = wex_ref[...], weh_ref[...], be_ref[...]
    wde, wdp, wdh, bd = wde_ref[...], wdp_ref[...], wdh_ref[...], bd_ref[...]
    w1, b1 = w1_ref[...], b1_ref[...]
    w2a, w2h, b2 = w2a_ref[...], w2h_ref[...], b2_ref[...]
    wp, bp = wp_ref[...], bp_ref[...]

    # ---------------- encoder (fully unrolled, per-gate weights) -------------
    h = jnp.zeros((B, He), f32)
    c = jnp.zeros((B, He), f32)
    for t in range(S):
        xt = src[t]                                    # (B, Ee): free leading index
        gi = jax.nn.sigmoid(dot(xt, wex[0]) + dot(h, weh[0]) + be[0])
        gf = jax.nn.sigmoid(dot(xt, wex[1]) + dot(h, weh[1]) + be[1])
        gg = jnp.tanh(dot(xt, wex[2]) + dot(h, weh[2]) + be[2])
        go = jax.nn.sigmoid(dot(xt, wex[3]) + dot(h, weh[3]) + be[3])
        c = gf * c + gi * gg
        h = go * jnp.tanh(c)
        values_scr[t * B:(t + 1) * B, :] = h           # row t*B+b  (off critical path)

    values = values_scr[...]                           # (S*B, He), loop-invariant

    # Hoisted batch-selection mask: flattened row l belongs to batch (l % B);
    # cross-batch attention scores get -1e30 before the softmax.
    lane_b = lax.broadcasted_iota(jnp.int32, (B, S * B), 1) % B
    row_b = lax.broadcasted_iota(jnp.int32, (B, S * B), 0)
    neg_mask = jnp.where(lane_b == row_b, 0.0, -1e30).astype(f32)   # (B, S*B)

    # ---------------- decoder (fully unrolled) --------------------------------
    h = jnp.zeros((B, Hd), f32)
    c = jnp.zeros((B, Hd), f32)
    prev = jnp.zeros((B, Ed), f32)                     # input-feed output (zeros init)
    for t in range(T):
        et = trg[t]                                    # (B, Ed)
        gi = jax.nn.sigmoid(dot(et, wde[0]) + dot(prev, wdp[0]) + dot(h, wdh[0]) + bd[0])
        gf = jax.nn.sigmoid(dot(et, wde[1]) + dot(prev, wdp[1]) + dot(h, wdh[1]) + bd[1])
        gg = jnp.tanh(dot(et, wde[2]) + dot(prev, wdp[2]) + dot(h, wdh[2]) + bd[2])
        go = jax.nn.sigmoid(dot(et, wde[3]) + dot(prev, wdp[3]) + dot(h, wdh[3]) + bd[3])
        c = gf * c + gi * gg
        h = go * jnp.tanh(c)                           # h_decoder (B, Hd)

        # GlobalAttention: both contractions on the MXU (2-D matmuls).
        q = dot(h, w1) + b1                                            # (B, He)
        scores = lax.dot_general(q, values, (((1,), (1,)), ((), ())),
                                 preferred_element_type=f32) + neg_mask  # (B, S*B)
        m = jnp.max(scores, axis=-1, keepdims=True)
        e = jnp.exp(scores - m)
        attn = e * pl.reciprocal(jnp.sum(e, axis=-1, keepdims=True), approx=True)
        attended = dot(attn, values)                                   # (B, He)

        prev = jnp.tanh(dot(attended, w2a) + dot(h, w2h) + b2)         # (B, Ed)
        prev_scr[t * B:(t + 1) * B, :] = prev          # staged for hoisted projection

    # Hoisted vocab projection: ONE (T*B, Ed)@(Ed, VPAD) matmul + ONE dense store.
    out_ref[...] = dot(prev_scr[...], wp) + bp


# ----------------------------- wrappers -------------------------------------
_VMEM_SPEC = pl.BlockSpec(memory_space=pltpu.MemorySpace.VMEM)


def prepare_kernel_params(p):
    """One-time host-side weight splitting / transposing / padding."""
    Ee, Ed, He, Hd, V = ENC_EMBED, DEC_EMBED, ENC_HIDDEN, DEC_HIDDEN, TRG_VOCAB

    def split_gates_T(w, H):                     # (4H, in) -> (4, in, H), order [i,f,g,o]
        return jnp.stack([w[k * H:(k + 1) * H, :].T for k in range(4)], axis=0)

    def split_bias(bih, bhh, H):                 # -> (4, 1, H)
        b = bih + bhh
        return jnp.stack([b[k * H:(k + 1) * H] for k in range(4)], axis=0)[:, None, :]

    kp = {}
    # encoder LSTM
    kp["wex"] = split_gates_T(p["enc_wih"], He)                 # (4, Ee, He)
    kp["weh"] = split_gates_T(p["enc_whh"], He)                 # (4, He, He)
    kp["be"] = split_bias(p["enc_bih"], p["enc_bhh"], He)       # (4, 1, He)
    # decoder LSTM (input_feed: input = [embed | prev_output])
    wih = p["dec_wih"]                                          # (4Hd, 2Ed)
    kp["wde"] = jnp.stack([wih[k * Hd:(k + 1) * Hd, :Ed].T for k in range(4)], 0)
    kp["wdp"] = jnp.stack([wih[k * Hd:(k + 1) * Hd, Ed:].T for k in range(4)], 0)
    kp["wdh"] = split_gates_T(p["dec_whh"], Hd)                 # (4, Hd, Hd)
    kp["bd"] = split_bias(p["dec_bih"], p["dec_bhh"], Hd)       # (4, 1, Hd)
    # GlobalAttention
    kp["w1"] = p["attn_w1"].T                                   # (Hd, He)
    kp["b1"] = p["attn_b1"][None, :]
    w2t = p["attn_w2"].T                                        # (He+Hd, Ed)
    kp["w2a"] = w2t[:He]                                        # acts on attended
    kp["w2h"] = w2t[He:]                                        # acts on h_decoder
    kp["b2"] = p["attn_b2"][None, :]
    # xent projection, zero-padded to 128 lanes
    kp["wp"] = jnp.zeros((Ed, VOCAB_PAD), jnp.float32).at[:, :V].set(p["proj_w"].T)
    kp["bp"] = jnp.zeros((1, VOCAB_PAD), jnp.float32).at[:, :V].set(p["proj_b"][None, :])
    return kp


def attention_encoder_decoder(src, trg, p, kp):
    """forward(src, trg) of AttentionEncoderDecoder. Returns (T, B, V) logits."""
    S, B = src.shape
    T = trg.shape[0]
    src_emb = p["enc_emb"][src]          # (S, B, Ee)  glue: gather stays in XLA
    trg_emb = p["dec_emb"][trg]          # (T, B, Ed)
    out_pad = pl.pallas_call(
        _seq2seq_kernel,
        out_shape=jax.ShapeDtypeStruct((T * B, VOCAB_PAD), jnp.float32),
        in_specs=[_VMEM_SPEC] * 16,
        out_specs=_VMEM_SPEC,
        scratch_shapes=[
            pltpu.VMEM((S * B, ENC_HIDDEN), jnp.float32),   # encoder states
            pltpu.VMEM((T * B, DEC_EMBED), jnp.float32),    # staged decoder outputs
        ],
    )(src_emb, trg_emb,
      kp["wex"], kp["weh"], kp["be"],
      kp["wde"], kp["wdp"], kp["wdh"], kp["bd"],
      kp["w1"], kp["b1"], kp["w2a"], kp["w2h"], kp["b2"],
      kp["wp"], kp["bp"])
    return out_pad.reshape(T, B, VOCAB_PAD)[:, :, :TRG_VOCAB]


# ----------------------------- parameters -----------------------------------
def init_params(key):
    ks = jax.random.split(key, 16)
    n = lambda k, shape: (0.1 * jax.random.normal(k, shape)).astype(jnp.float32)
    p = {}
    # EncoderLSTM
    p["enc_emb"] = n(ks[0], (SRC_VOCAB, ENC_EMBED))
    p["enc_wih"] = n(ks[1], (4 * ENC_HIDDEN, ENC_EMBED))
    p["enc_whh"] = n(ks[2], (4 * ENC_HIDDEN, ENC_HIDDEN))
    p["enc_bih"] = n(ks[3], (4 * ENC_HIDDEN,))
    p["enc_bhh"] = n(ks[4], (4 * ENC_HIDDEN,))
    # AttentionDecoder LSTM (input_feed=True -> input size 2*E)
    p["dec_emb"] = n(ks[5], (TRG_VOCAB, DEC_EMBED))
    p["dec_wih"] = n(ks[6], (4 * DEC_HIDDEN, 2 * DEC_EMBED))
    p["dec_whh"] = n(ks[7], (4 * DEC_HIDDEN, DEC_HIDDEN))
    p["dec_bih"] = n(ks[8], (4 * DEC_HIDDEN,))
    p["dec_bhh"] = n(ks[9], (4 * DEC_HIDDEN,))
    # GlobalAttention
    p["attn_w1"] = n(ks[10], (ENC_HIDDEN, DEC_HIDDEN))                 # Linear(Hd -> Hv)
    p["attn_b1"] = n(ks[11], (ENC_HIDDEN,))
    p["attn_w2"] = n(ks[12], (DEC_EMBED, DEC_HIDDEN + ENC_HIDDEN))     # Linear(Hv+Hd -> E)
    p["attn_b2"] = n(ks[13], (DEC_EMBED,))
    # xent projection
    p["proj_w"] = n(ks[14], (TRG_VOCAB, DEC_EMBED))
    p["proj_b"] = n(ks[15], (TRG_VOCAB,))
    return p


# ----------------------------- pure-JAX reference ---------------------------
def reference_forward(src, trg, p):
    HI = lax.Precision.HIGHEST
    lin = lambda x, w, b: jnp.dot(x, w.T, precision=HI) + b
    B = src.shape[1]

    x = p["enc_emb"][src]
    def enc_step(carry, xt):
        h, c = carry
        gates = (jnp.dot(xt, p["enc_wih"].T, precision=HI)
                 + jnp.dot(h, p["enc_whh"].T, precision=HI)
                 + p["enc_bih"] + p["enc_bhh"])
        i, f, g, o = jnp.split(gates, 4, axis=-1)
        c = jax.nn.sigmoid(f) * c + jax.nn.sigmoid(i) * jnp.tanh(g)
        h = jax.nn.sigmoid(o) * jnp.tanh(c)
        return (h, c), h
    (_, _), h_enc = lax.scan(
        enc_step, (jnp.zeros((B, ENC_HIDDEN)), jnp.zeros((B, ENC_HIDDEN))), x)

    trg_emb = p["dec_emb"][trg]
    def dec_step(carry, emb_t):
        h, c, prev = carry
        x_t = jnp.concatenate([emb_t, prev], axis=-1)
        gates = (jnp.dot(x_t, p["dec_wih"].T, precision=HI)
                 + jnp.dot(h, p["dec_whh"].T, precision=HI)
                 + p["dec_bih"] + p["dec_bhh"])
        i, f, g, o = jnp.split(gates, 4, axis=-1)
        c = jax.nn.sigmoid(f) * c + jax.nn.sigmoid(i) * jnp.tanh(g)
        h = jax.nn.sigmoid(o) * jnp.tanh(c)
        q_resize = lin(h, p["attn_w1"], p["attn_b1"])
        scores = jnp.einsum("bv,sbv->bs", q_resize, h_enc, precision=HI)
        attn = jax.nn.softmax(scores, axis=-1)
        attended = jnp.einsum("bs,sbv->bv", attn, h_enc, precision=HI)
        feed = jnp.concatenate([attended, h], axis=-1)
        out_t = jnp.tanh(lin(feed, p["attn_w2"], p["attn_b2"]))
        proj = lin(out_t, p["proj_w"], p["proj_b"])
        return (h, c, out_t), proj
    init = (jnp.zeros((B, DEC_HIDDEN)), jnp.zeros((B, DEC_HIDDEN)),
            jnp.zeros((B, DEC_EMBED)))
    (_, _, _), outs = lax.scan(dec_step, init, trg_emb)
    return outs


# ----------------------------- main ------------------------------------------
if __name__ == "__main__":
    key = jax.random.PRNGKey(0)
    kparam, ksrc, ktrg = jax.random.split(key, 3)
    params = init_params(kparam)
    kernel_params = prepare_kernel_params(params)
    src = jax.random.randint(ksrc, (S_SRC, BATCH), 0, SRC_VOCAB, dtype=jnp.int32)
    trg = jax.random.randint(ktrg, (T_TRG, BATCH), 0, TRG_VOCAB, dtype=jnp.int32)

    fwd = jax.jit(lambda s, t: attention_encoder_decoder(s, t, params, kernel_params))
    out = jax.block_until_ready(fwd(src, trg))

    ref = jax.block_until_ready(reference_forward(src, trg, params))
    np.testing.assert_allclose(np.asarray(out), np.asarray(ref),
                               atol=1e-2, rtol=1e-2)
    assert out.shape == (T_TRG, BATCH, TRG_VOCAB)
    print("KERNEL_OK")
</pallas_src>

<mosaic_0001>
module attributes {stable_mosaic.version = 11 : i64} {
  func.func @_seq2seq_kernel(%arg0: memref<8x2x32xf32, #tpu.memory_space<vmem>>, %arg1: memref<8x2x32xf32, #tpu.memory_space<vmem>>, %arg2: memref<4x32x16xf32, #tpu.memory_space<vmem>>, %arg3: memref<4x16x16xf32, #tpu.memory_space<vmem>>, %arg4: memref<4x1x16xf32, #tpu.memory_space<vmem>>, %arg5: memref<4x32x32xf32, #tpu.memory_space<vmem>>, %arg6: memref<4x32x32xf32, #tpu.memory_space<vmem>>, %arg7: memref<4x32x32xf32, #tpu.memory_space<vmem>>, %arg8: memref<4x1x32xf32, #tpu.memory_space<vmem>>, %arg9: memref<32x16xf32, #tpu.memory_space<vmem>>, %arg10: memref<1x16xf32, #tpu.memory_space<vmem>>, %arg11: memref<16x32xf32, #tpu.memory_space<vmem>>, %arg12: memref<32x32xf32, #tpu.memory_space<vmem>>, %arg13: memref<1x32xf32, #tpu.memory_space<vmem>>, %arg14: memref<32x128xf32, #tpu.memory_space<vmem>>, %arg15: memref<1x128xf32, #tpu.memory_space<vmem>>, %arg16: memref<16x128xf32, #tpu.memory_space<vmem>>, %arg17: memref<16x16xf32, #tpu.memory_space<vmem>>, %arg18: memref<16x32xf32, #tpu.memory_space<vmem>>) attributes {dimension_semantics = [], scalar_prefetch = 0 : i64, scratch_operands = 2 : i64, tpu.core_type = #tpu.core_type<tc>} {
    %c0 = arith.constant 0 : index
    %c0_0 = arith.constant 0 : index
    %c0_1 = arith.constant 0 : index
    %0 = vector.load %arg0[%c0, %c0_0, %c0_1] : memref<8x2x32xf32, #tpu.memory_space<vmem>>, vector<8x2x32xf32>
    %c0_2 = arith.constant 0 : index
    %c0_3 = arith.constant 0 : index
    %c0_4 = arith.constant 0 : index
    %1 = vector.load %arg1[%c0_2, %c0_3, %c0_4] : memref<8x2x32xf32, #tpu.memory_space<vmem>>, vector<8x2x32xf32>
    %c0_5 = arith.constant 0 : index
    %c0_6 = arith.constant 0 : index
    %c0_7 = arith.constant 0 : index
    %2 = vector.load %arg2[%c0_5, %c0_6, %c0_7] : memref<4x32x16xf32, #tpu.memory_space<vmem>>, vector<4x32x16xf32>
    %c0_8 = arith.constant 0 : index
    %c0_9 = arith.constant 0 : index
    %c0_10 = arith.constant 0 : index
    %3 = vector.load %arg3[%c0_8, %c0_9, %c0_10] : memref<4x16x16xf32, #tpu.memory_space<vmem>>, vector<4x16x16xf32>
    %c0_11 = arith.constant 0 : index
    %c0_12 = arith.constant 0 : index
    %c0_13 = arith.constant 0 : index
    %4 = vector.load %arg4[%c0_11, %c0_12, %c0_13] : memref<4x1x16xf32, #tpu.memory_space<vmem>>, vector<4x1x16xf32>
    %c0_14 = arith.constant 0 : index
    %c0_15 = arith.constant 0 : index
    %c0_16 = arith.constant 0 : index
    %5 = vector.load %arg5[%c0_14, %c0_15, %c0_16] : memref<4x32x32xf32, #tpu.memory_space<vmem>>, vector<4x32x32xf32>
    %c0_17 = arith.constant 0 : index
    %c0_18 = arith.constant 0 : index
    %c0_19 = arith.constant 0 : index
    %6 = vector.load %arg6[%c0_17, %c0_18, %c0_19] : memref<4x32x32xf32, #tpu.memory_space<vmem>>, vector<4x32x32xf32>
    %c0_20 = arith.constant 0 : index
    %c0_21 = arith.constant 0 : index
    %c0_22 = arith.constant 0 : index
    %7 = vector.load %arg7[%c0_20, %c0_21, %c0_22] : memref<4x32x32xf32, #tpu.memory_space<vmem>>, vector<4x32x32xf32>
    %c0_23 = arith.constant 0 : index
    %c0_24 = arith.constant 0 : index
    %c0_25 = arith.constant 0 : index
    %8 = vector.load %arg8[%c0_23, %c0_24, %c0_25] : memref<4x1x32xf32, #tpu.memory_space<vmem>>, vector<4x1x32xf32>
    %c0_26 = arith.constant 0 : index
    %c0_27 = arith.constant 0 : index
    %9 = vector.load %arg9[%c0_26, %c0_27] : memref<32x16xf32, #tpu.memory_space<vmem>>, vector<32x16xf32>
    %c0_28 = arith.constant 0 : index
    %c0_29 = arith.constant 0 : index
    %10 = vector.load %arg10[%c0_28, %c0_29] : memref<1x16xf32, #tpu.memory_space<vmem>>, vector<1x16xf32>
    %c0_30 = arith.constant 0 : index
    %c0_31 = arith.constant 0 : index
    %11 = vector.load %arg11[%c0_30, %c0_31] : memref<16x32xf32, #tpu.memory_space<vmem>>, vector<16x32xf32>
    %c0_32 = arith.constant 0 : index
    %c0_33 = arith.constant 0 : index
    %12 = vector.load %arg12[%c0_32, %c0_33] : memref<32x32xf32, #tpu.memory_space<vmem>>, vector<32x32xf32>
    %c0_34 = arith.constant 0 : index
    %c0_35 = arith.constant 0 : index
    %13 = vector.load %arg13[%c0_34, %c0_35] : memref<1x32xf32, #tpu.memory_space<vmem>>, vector<1x32xf32>
    %c0_36 = arith.constant 0 : index
    %c0_37 = arith.constant 0 : index
    %14 = vector.load %arg14[%c0_36, %c0_37] : memref<32x128xf32, #tpu.memory_space<vmem>>, vector<32x128xf32>
    %c0_38 = arith.constant 0 : index
    %c0_39 = arith.constant 0 : index
    %15 = vector.load %arg15[%c0_38, %c0_39] : memref<1x128xf32, #tpu.memory_space<vmem>>, vector<1x128xf32>
    %cst = arith.constant 0.000000e+00 : f32
    %16 = vector.broadcast %cst : f32 to vector<2x16xf32>
    %cst_40 = arith.constant 0.000000e+00 : f32
    %17 = vector.broadcast %cst_40 : f32 to vector<2x16xf32>
    %18 = vector.extract_strided_slice %0 {offsets = [0, 0, 0], sizes = [1, 2, 32], strides = [1, 1, 1]} : vector<8x2x32xf32> to vector<1x2x32xf32>
    %19 = vector.shape_cast %18 : vector<1x2x32xf32> to vector<2x32xf32>
    %20 = vector.extract_strided_slice %2 {offsets = [0, 0, 0], sizes = [1, 32, 16], strides = [1, 1, 1]} : vector<4x32x16xf32> to vector<1x32x16xf32>
    %21 = vector.shape_cast %20 : vector<1x32x16xf32> to vector<32x16xf32>
    %cst_41 = arith.constant dense<0.000000e+00> : vector<2x16xf32>
    %22 = tpu.matmul %19, %21, %cst_41 {dimension_numbers = #tpu.dot_dimension_numbers<[1], [0], [0], [1], [0, 0, 1, 1], [], []>} : vector<2x32xf32>, vector<32x16xf32>, vector<2x16xf32> -> vector<2x16xf32>
    %23 = vector.extract_strided_slice %3 {offsets = [0, 0, 0], sizes = [1, 16, 16], strides = [1, 1, 1]} : vector<4x16x16xf32> to vector<1x16x16xf32>
    %24 = vector.shape_cast %23 : vector<1x16x16xf32> to vector<16x16xf32>
    %cst_42 = arith.constant dense<0.000000e+00> : vector<2x16xf32>
    %25 = tpu.matmul %16, %24, %cst_42 {dimension_numbers = #tpu.dot_dimension_numbers<[1], [0], [0], [1], [0, 0, 1, 1], [], []>} : vector<2x16xf32>, vector<16x16xf32>, vector<2x16xf32> -> vector<2x16xf32>
    %26 = arith.addf %22, %25 : vector<2x16xf32>
    %27 = vector.extract_strided_slice %4 {offsets = [0, 0, 0], sizes = [1, 1, 16], strides = [1, 1, 1]} : vector<4x1x16xf32> to vector<1x1x16xf32>
    %28 = vector.shape_cast %27 : vector<1x1x16xf32> to vector<1x16xf32>
    %29 = vector.broadcast %28 : vector<1x16xf32> to vector<2x16xf32>
    %30 = arith.addf %26, %29 : vector<2x16xf32>
    %31 = arith.negf %30 : vector<2x16xf32>
    %32 = math.exp %31 : vector<2x16xf32>
    %cst_43 = arith.constant 1.000000e+00 : f32
    %33 = vector.broadcast %cst_43 : f32 to vector<2x16xf32>
    %34 = arith.addf %33, %32 : vector<2x16xf32>
    %35 = arith.divf %33, %34 : vector<2x16xf32>
    %36 = vector.extract_strided_slice %2 {offsets = [1, 0, 0], sizes = [1, 32, 16], strides = [1, 1, 1]} : vector<4x32x16xf32> to vector<1x32x16xf32>
    %37 = vector.shape_cast %36 : vector<1x32x16xf32> to vector<32x16xf32>
    %cst_44 = arith.constant dense<0.000000e+00> : vector<2x16xf32>
    %38 = tpu.matmul %19, %37, %cst_44 {dimension_numbers = #tpu.dot_dimension_numbers<[1], [0], [0], [1], [0, 0, 1, 1], [], []>} : vector<2x32xf32>, vector<32x16xf32>, vector<2x16xf32> -> vector<2x16xf32>
    %39 = vector.extract_strided_slice %3 {offsets = [1, 0, 0], sizes = [1, 16, 16], strides = [1, 1, 1]} : vector<4x16x16xf32> to vector<1x16x16xf32>
    %40 = vector.shape_cast %39 : vector<1x16x16xf32> to vector<16x16xf32>
    %cst_45 = arith.constant dense<0.000000e+00> : vector<2x16xf32>
    %41 = tpu.matmul %16, %40, %cst_45 {dimension_numbers = #tpu.dot_dimension_numbers<[1], [0], [0], [1], [0, 0, 1, 1], [], []>} : vector<2x16xf32>, vector<16x16xf32>, vector<2x16xf32> -> vector<2x16xf32>
    %42 = arith.addf %38, %41 : vector<2x16xf32>
    %43 = vector.extract_strided_slice %4 {offsets = [1, 0, 0], sizes = [1, 1, 16], strides = [1, 1, 1]} : vector<4x1x16xf32> to vector<1x1x16xf32>
    %44 = vector.shape_cast %43 : vector<1x1x16xf32> to vector<1x16xf32>
    %45 = vector.broadcast %44 : vector<1x16xf32> to vector<2x16xf32>
    %46 = arith.addf %42, %45 : vector<2x16xf32>
    %47 = arith.negf %46 : vector<2x16xf32>
    %48 = math.exp %47 : vector<2x16xf32>
    %cst_46 = arith.constant 1.000000e+00 : f32
    %49 = vector.broadcast %cst_46 : f32 to vector<2x16xf32>
    %50 = arith.addf %49, %48 : vector<2x16xf32>
    %51 = arith.divf %49, %50 : vector<2x16xf32>
    %52 = vector.extract_strided_slice %2 {offsets = [2, 0, 0], sizes = [1, 32, 16], strides = [1, 1, 1]} : vector<4x32x16xf32> to vector<1x32x16xf32>
    %53 = vector.shape_cast %52 : vector<1x32x16xf32> to vector<32x16xf32>
    %cst_47 = arith.constant dense<0.000000e+00> : vector<2x16xf32>
    %54 = tpu.matmul %19, %53, %cst_47 {dimension_numbers = #tpu.dot_dimension_numbers<[1], [0], [0], [1], [0, 0, 1, 1], [], []>} : vector<2x32xf32>, vector<32x16xf32>, vector<2x16xf32> -> vector<2x16xf32>
    %55 = vector.extract_strided_slice %3 {offsets = [2, 0, 0], sizes = [1, 16, 16], strides = [1, 1, 1]} : vector<4x16x16xf32> to vector<1x16x16xf32>
    %56 = vector.shape_cast %55 : vector<1x16x16xf32> to vector<16x16xf32>
    %cst_48 = arith.constant dense<0.000000e+00> : vector<2x16xf32>
    %57 = tpu.matmul %16, %56, %cst_48 {dimension_numbers = #tpu.dot_dimension_numbers<[1], [0], [0], [1], [0, 0, 1, 1], [], []>} : vector<2x16xf32>, vector<16x16xf32>, vector<2x16xf32> -> vector<2x16xf32>
    %58 = arith.addf %54, %57 : vector<2x16xf32>
    %59 = vector.extract_strided_slice %4 {offsets = [2, 0, 0], sizes = [1, 1, 16], strides = [1, 1, 1]} : vector<4x1x16xf32> to vector<1x1x16xf32>
    %60 = vector.shape_cast %59 : vector<1x1x16xf32> to vector<1x16xf32>
    %61 = vector.broadcast %60 : vector<1x16xf32> to vector<2x16xf32>
    %62 = arith.addf %58, %61 : vector<2x16xf32>
    %63 = math.tanh %62 : vector<2x16xf32>
    %64 = vector.extract_strided_slice %2 {offsets = [3, 0, 0], sizes = [1, 32, 16], strides = [1, 1, 1]} : vector<4x32x16xf32> to vector<1x32x16xf32>
    %65 = vector.shape_cast %64 : vector<1x32x16xf32> to vector<32x16xf32>
    %cst_49 = arith.constant dense<0.000000e+00> : vector<2x16xf32>
    %66 = tpu.matmul %19, %65, %cst_49 {dimension_numbers = #tpu.dot_dimension_numbers<[1], [0], [0], [1], [0, 0, 1, 1], [], []>} : vector<2x32xf32>, vector<32x16xf32>, vector<2x16xf32> -> vector<2x16xf32>
    %67 = vector.extract_strided_slice %3 {offsets = [3, 0, 0], sizes = [1, 16, 16], strides = [1, 1, 1]} : vector<4x16x16xf32> to vector<1x16x16xf32>
    %68 = vector.shape_cast %67 : vector<1x16x16xf32> to vector<16x16xf32>
    %cst_50 = arith.constant dense<0.000000e+00> : vector<2x16xf32>
    %69 = tpu.matmul %16, %68, %cst_50 {dimension_numbers = #tpu.dot_dimension_numbers<[1], [0], [0], [1], [0, 0, 1, 1], [], []>} : vector<2x16xf32>, vector<16x16xf32>, vector<2x16xf32> -> vector<2x16xf32>
    %70 = arith.addf %66, %69 : vector<2x16xf32>
    %71 = vector.extract_strided_slice %4 {offsets = [3, 0, 0], sizes = [1, 1, 16], strides = [1, 1, 1]} : vector<4x1x16xf32> to vector<1x1x16xf32>
    %72 = vector.shape_cast %71 : vector<1x1x16xf32> to vector<1x16xf32>
    %73 = vector.broadcast %72 : vector<1x16xf32> to vector<2x16xf32>
    %74 = arith.addf %70, %73 : vector<2x16xf32>
    %75 = arith.negf %74 : vector<2x16xf32>
    %76 = math.exp %75 : vector<2x16xf32>
    %cst_51 = arith.constant 1.000000e+00 : f32
    %77 = vector.broadcast %cst_51 : f32 to vector<2x16xf32>
    %78 = arith.addf %77, %76 : vector<2x16xf32>
    %79 = arith.divf %77, %78 : vector<2x16xf32>
    %80 = arith.mulf %51, %17 : vector<2x16xf32>
    %81 = arith.mulf %35, %63 : vector<2x16xf32>
    %82 = arith.addf %80, %81 : vector<2x16xf32>
    %83 = math.tanh %82 : vector<2x16xf32>
    %84 = arith.mulf %79, %83 : vector<2x16xf32>
    %c0_52 = arith.constant 0 : index
    %c0_53 = arith.constant 0 : index
    %85 = vector.load %arg17[%c0_52, %c0_53] : memref<16x16xf32, #tpu.memory_space<vmem>>, vector<2x16xf32>
    tpu.vector_store %arg17[%c0_52, %c0_53], %84 {strides = array<i32>} : memref<16x16xf32, #tpu.memory_space<vmem>>, vector<2x16xf32>,
    %86 = vector.extract_strided_slice %0 {offsets = [1, 0, 0], sizes = [1, 2, 32], strides = [1, 1, 1]} : vector<8x2x32xf32> to vector<1x2x32xf32>
    %87 = vector.shape_cast %86 : vector<1x2x32xf32> to vector<2x32xf32>
    %88 = vector.extract_strided_slice %2 {offsets = [0, 0, 0], sizes = [1, 32, 16], strides = [1, 1, 1]} : vector<4x32x16xf32> to vector<1x32x16xf32>
    %89 = vector.shape_cast %88 : vector<1x32x16xf32> to vector<32x16xf32>
    %cst_54 = arith.constant dense<0.000000e+00> : vector<2x16xf32>
    %90 = tpu.matmul %87, %89, %cst_54 {dimension_numbers = #tpu.dot_dimension_numbers<[1], [0], [0], [1], [0, 0, 1, 1], [], []>} : vector<2x32xf32>, vector<32x16xf32>, vector<2x16xf32> -> vector<2x16xf32>
    %91 = vector.extract_strided_slice %3 {offsets = [0, 0, 0], sizes = [1, 16, 16], strides = [1, 1, 1]} : vector<4x16x16xf32> to vector<1x16x16xf32>
    %92 = vector.shape_cast %91 : vector<1x16x16xf32> to vector<16x16xf32>
    %cst_55 = arith.constant dense<0.000000e+00> : vector<2x16xf32>
    %93 = tpu.matmul %84, %92, %cst_55 {dimension_numbers = #tpu.dot_dimension_numbers<[1], [0], [0], [1], [0, 0, 1, 1], [], []>} : vector<2x16xf32>, vector<16x16xf32>, vector<2x16xf32> -> vector<2x16xf32>
    %94 = arith.addf %90, %93 : vector<2x16xf32>
    %95 = vector.extract_strided_slice %4 {offsets = [0, 0, 0], sizes = [1, 1, 16], strides = [1, 1, 1]} : vector<4x1x16xf32> to vector<1x1x16xf32>
    %96 = vector.shape_cast %95 : vector<1x1x16xf32> to vector<1x16xf32>
    %97 = vector.broadcast %96 : vector<1x16xf32> to vector<2x16xf32>
    %98 = arith.addf %94, %97 : vector<2x16xf32>
    %99 = arith.negf %98 : vector<2x16xf32>
    %100 = math.exp %99 : vector<2x16xf32>
    %cst_56 = arith.constant 1.000000e+00 : f32
    %101 = vector.broadcast %cst_56 : f32 to vector<2x16xf32>
    %102 = arith.addf %101, %100 : vector<2x16xf32>
    %103 = arith.divf %101, %102 : vector<2x16xf32>
    %104 = vector.extract_strided_slice %2 {offsets = [1, 0, 0], sizes = [1, 32, 16], strides = [1, 1, 1]} : vector<4x32x16xf32> to vector<1x32x16xf32>
    %105 = vector.shape_cast %104 : vector<1x32x16xf32> to vector<32x16xf32>
    %cst_57 = arith.constant dense<0.000000e+00> : vector<2x16xf32>
    %106 = tpu.matmul %87, %105, %cst_57 {dimension_numbers = #tpu.dot_dimension_numbers<[1], [0], [0], [1], [0, 0, 1, 1], [], []>} : vector<2x32xf32>, vector<32x16xf32>, vector<2x16xf32> -> vector<2x16xf32>
    %107 = vector.extract_strided_slice %3 {offsets = [1, 0, 0], sizes = [1, 16, 16], strides = [1, 1, 1]} : vector<4x16x16xf32> to vector<1x16x16xf32>
    %108 = vector.shape_cast %107 : vector<1x16x16xf32> to vector<16x16xf32>
    %cst_58 = arith.constant dense<0.000000e+00> : vector<2x16xf32>
    %109 = tpu.matmul %84, %108, %cst_58 {dimension_numbers = #tpu.dot_dimension_numbers<[1], [0], [0], [1], [0, 0, 1, 1], [], []>} : vector<2x16xf32>, vector<16x16xf32>, vector<2x16xf32> -> vector<2x16xf32>
    %110 = arith.addf %106, %109 : vector<2x16xf32>
    %111 = vector.extract_strided_slice %4 {offsets = [1, 0, 0], sizes = [1, 1, 16], strides = [1, 1, 1]} : vector<4x1x16xf32> to vector<1x1x16xf32>
    %112 = vector.shape_cast %111 : vector<1x1x16xf32> to vector<1x16xf32>
    %113 = vector.broadcast %112 : vector<1x16xf32> to vector<2x16xf32>
    %114 = arith.addf %110, %113 : vector<2x16xf32>
    %115 = arith.negf %114 : vector<2x16xf32>
    %116 = math.exp %115 : vector<2x16xf32>
    %cst_59 = arith.constant 1.000000e+00 : f32
    %117 = vector.broadcast %cst_59 : f32 to vector<2x16xf32>
    %118 = arith.addf %117, %116 : vector<2x16xf32>
    %119 = arith.divf %117, %118 : vector<2x16xf32>
    %120 = vector.extract_strided_slice %2 {offsets = [2, 0, 0], sizes = [1, 32, 16], strides = [1, 1, 1]} : vector<4x32x16xf32> to vector<1x32x16xf32>
    %121 = vector.shape_cast %120 : vector<1x32x16xf32> to vector<32x16xf32>
    %cst_60 = arith.constant dense<0.000000e+00> : vector<2x16xf32>
    %122 = tpu.matmul %87, %121, %cst_60 {dimension_numbers = #tpu.dot_dimension_numbers<[1], [0], [0], [1], [0, 0, 1, 1], [], []>} : vector<2x32xf32>, vector<32x16xf32>, vector<2x16xf32> -> vector<2x16xf32>
    %123 = vector.extract_strided_slice %3 {offsets = [2, 0, 0], sizes = [1, 16, 16], strides = [1, 1, 1]} : vector<4x16x16xf32> to vector<1x16x16xf32>
    %124 = vector.shape_cast %123 : vector<1x16x16xf32> to vector<16x16xf32>
    %cst_61 = arith.constant dense<0.000000e+00> : vector<2x16xf32>
    %125 = tpu.matmul %84, %124, %cst_61 {dimension_numbers = #tpu.dot_dimension_numbers<[1], [0], [0], [1], [0, 0, 1, 1], [], []>} : vector<2x16xf32>, vector<16x16xf32>, vector<2x16xf32> -> vector<2x16xf32>
    %126 = arith.addf %122, %125 : vector<2x16xf32>
    %127 = vector.extract_strided_slice %4 {offsets = [2, 0, 0], sizes = [1, 1, 16], strides = [1, 1, 1]} : vector<4x1x16xf32> to vector<1x1x16xf32>
    %128 = vector.shape_cast %127 : vector<1x1x16xf32> to vector<1x16xf32>
    %129 = vector.broadcast %128 : vector<1x16xf32> to vector<2x16xf32>
    %130 = arith.addf %126, %129 : vector<2x16xf32>
    %131 = math.tanh %130 : vector<2x16xf32>
    %132 = vector.extract_strided_slice %2 {offsets = [3, 0, 0], sizes = [1, 32, 16], strides = [1, 1, 1]} : vector<4x32x16xf32> to vector<1x32x16xf32>
    %133 = vector.shape_cast %132 : vector<1x32x16xf32> to vector<32x16xf32>
    %cst_62 = arith.constant dense<0.000000e+00> : vector<2x16xf32>
    %134 = tpu.matmul %87, %133, %cst_62 {dimension_numbers = #tpu.dot_dimension_numbers<[1], [0], [0], [1], [0, 0, 1, 1], [], []>} : vector<2x32xf32>, vector<32x16xf32>, vector<2x16xf32> -> vector<2x16xf32>
    %135 = vector.extract_strided_slice %3 {offsets = [3, 0, 0], sizes = [1, 16, 16], strides = [1, 1, 1]} : vector<4x16x16xf32> to vector<1x16x16xf32>
    %136 = vector.shape_cast %135 : vector<1x16x16xf32> to vector<16x16xf32>
    %cst_63 = arith.constant dense<0.000000e+00> : vector<2x16xf32>
    %137 = tpu.matmul %84, %136, %cst_63 {dimension_numbers = #tpu.dot_dimension_numbers<[1], [0], [0], [1], [0, 0, 1, 1], [], []>} : vector<2x16xf32>, vector<16x16xf32>, vector<2x16xf32> -> vector<2x16xf32>
    %138 = arith.addf %134, %137 : vector<2x16xf32>
    %139 = vector.extract_strided_slice %4 {offsets = [3, 0, 0], sizes = [1, 1, 16], strides = [1, 1, 1]} : vector<4x1x16xf32> to vector<1x1x16xf32>
    %140 = vector.shape_cast %139 : vector<1x1x16xf32> to vector<1x16xf32>
    %141 = vector.broadcast %140 : vector<1x16xf32> to vector<2x16xf32>
    %142 = arith.addf %138, %141 : vector<2x16xf32>
    %143 = arith.negf %142 : vector<2x16xf32>
    %144 = math.exp %143 : vector<2x16xf32>
    %cst_64 = arith.constant 1.000000e+00 : f32
    %145 = vector.broadcast %cst_64 : f32 to vector<2x16xf32>
    %146 = arith.addf %145, %144 : vector<2x16xf32>
    %147 = arith.divf %145, %146 : vector<2x16xf32>
    %148 = arith.mulf %119, %82 : vector<2x16xf32>
    %149 = arith.mulf %103, %131 : vector<2x16xf32>
    %150 = arith.addf %148, %149 : vector<2x16xf32>
    %151 = math.tanh %150 : vector<2x16xf32>
    %152 = arith.mulf %147, %151 : vector<2x16xf32>
    %c2 = arith.constant 2 : index
    %c0_65 = arith.constant 0 : index
    %153 = vector.load %arg17[%c2, %c0_65] : memref<16x16xf32, #tpu.memory_space<vmem>>, vector<2x16xf32>
    tpu.vector_store %arg17[%c2, %c0_65], %152 {strides = array<i32>} : memref<16x16xf32, #tpu.memory_space<vmem>>, vector<2x16xf32>,
    %154 = vector.extract_strided_slice %0 {offsets = [2, 0, 0], sizes = [1, 2, 32], strides = [1, 1, 1]} : vector<8x2x32xf32> to vector<1x2x32xf32>
    %155 = vector.shape_cast %154 : vector<1x2x32xf32> to vector<2x32xf32>
    %156 = vector.extract_strided_slice %2 {offsets = [0, 0, 0], sizes = [1, 32, 16], strides = [1, 1, 1]} : vector<4x32x16xf32> to vector<1x32x16xf32>
    %157 = vector.shape_cast %156 : vector<1x32x16xf32> to vector<32x16xf32>
    %cst_66 = arith.constant dense<0.000000e+00> : vector<2x16xf32>
    %158 = tpu.matmul %155, %157, %cst_66 {dimension_numbers = #tpu.dot_dimension_numbers<[1], [0], [0], [1], [0, 0, 1, 1], [], []>} : vector<2x32xf32>, vector<32x16xf32>, vector<2x16xf32> -> vector<2x16xf32>
    %159 = vector.extract_strided_slice %3 {offsets = [0, 0, 0], sizes = [1, 16, 16], strides = [1, 1, 1]} : vector<4x16x16xf32> to vector<1x16x16xf32>
    %160 = vector.shape_cast %159 : vector<1x16x16xf32> to vector<16x16xf32>
    %cst_67 = arith.constant dense<0.000000e+00> : vector<2x16xf32>
    %161 = tpu.matmul %152, %160, %cst_67 {dimension_numbers = #tpu.dot_dimension_numbers<[1], [0], [0], [1], [0, 0, 1, 1], [], []>} : vector<2x16xf32>, vector<16x16xf32>, vector<2x16xf32> -> vector<2x16xf32>
    %162 = arith.addf %158, %161 : vector<2x16xf32>
    %163 = vector.extract_strided_slice %4 {offsets = [0, 0, 0], sizes = [1, 1, 16], strides = [1, 1, 1]} : vector<4x1x16xf32> to vector<1x1x16xf32>
    %164 = vector.shape_cast %163 : vector<1x1x16xf32> to vector<1x16xf32>
    %165 = vector.broadcast %164 : vector<1x16xf32> to vector<2x16xf32>
    %166 = arith.addf %162, %165 : vector<2x16xf32>
    %167 = arith.negf %166 : vector<2x16xf32>
    %168 = math.exp %167 : vector<2x16xf32>
    %cst_68 = arith.constant 1.000000e+00 : f32
    %169 = vector.broadcast %cst_68 : f32 to vector<2x16xf32>
    %170 = arith.addf %169, %168 : vector<2x16xf32>
    %171 = arith.divf %169, %170 : vector<2x16xf32>
    %172 = vector.extract_strided_slice %2 {offsets = [1, 0, 0], sizes = [1, 32, 16], strides = [1, 1, 1]} : vector<4x32x16xf32> to vector<1x32x16xf32>
    %173 = vector.shape_cast %172 : vector<1x32x16xf32> to vector<32x16xf32>
    %cst_69 = arith.constant dense<0.000000e+00> : vector<2x16xf32>
    %174 = tpu.matmul %155, %173, %cst_69 {dimension_numbers = #tpu.dot_dimension_numbers<[1], [0], [0], [1], [0, 0, 1, 1], [], []>} : vector<2x32xf32>, vector<32x16xf32>, vector<2x16xf32> -> vector<2x16xf32>
    %175 = vector.extract_strided_slice %3 {offsets = [1, 0, 0], sizes = [1, 16, 16], strides = [1, 1, 1]} : vector<4x16x16xf32> to vector<1x16x16xf32>
    %176 = vector.shape_cast %175 : vector<1x16x16xf32> to vector<16x16xf32>
    %cst_70 = arith.constant dense<0.000000e+00> : vector<2x16xf32>
    %177 = tpu.matmul %152, %176, %cst_70 {dimension_numbers = #tpu.dot_dimension_numbers<[1], [0], [0], [1], [0, 0, 1, 1], [], []>} : vector<2x16xf32>, vector<16x16xf32>, vector<2x16xf32> -> vector<2x16xf32>
    %178 = arith.addf %174, %177 : vector<2x16xf32>
    %179 = vector.extract_strided_slice %4 {offsets = [1, 0, 0], sizes = [1, 1, 16], strides = [1, 1, 1]} : vector<4x1x16xf32> to vector<1x1x16xf32>
    %180 = vector.shape_cast %179 : vector<1x1x16xf32> to vector<1x16xf32>
    %181 = vector.broadcast %180 : vector<1x16xf32> to vector<2x16xf32>
    %182 = arith.addf %178, %181 : vector<2x16xf32>
    %183 = arith.negf %182 : vector<2x16xf32>
    %184 = math.exp %183 : vector<2x16xf32>
    %cst_71 = arith.constant 1.000000e+00 : f32
    %185 = vector.broadcast %cst_71 : f32 to vector<2x16xf32>
    %186 = arith.addf %185, %184 : vector<2x16xf32>
    %187 = arith.divf %185, %186 : vector<2x16xf32>
    %188 = vector.extract_strided_slice %2 {offsets = [2, 0, 0], sizes = [1, 32, 16], strides = [1, 1, 1]} : vector<4x32x16xf32> to vector<1x32x16xf32>
    %189 = vector.shape_cast %188 : vector<1x32x16xf32> to vector<32x16xf32>
    %cst_72 = arith.constant dense<0.000000e+00> : vector<2x16xf32>
    %190 = tpu.matmul %155, %189, %cst_72 {dimension_numbers = #tpu.dot_dimension_numbers<[1], [0], [0], [1], [0, 0, 1, 1], [], []>} : vector<2x32xf32>, vector<32x16xf32>, vector<2x16xf32> -> vector<2x16xf32>
    %191 = vector.extract_strided_slice %3 {offsets = [2, 0, 0], sizes = [1, 16, 16], strides = [1, 1, 1]} : vector<4x16x16xf32> to vector<1x16x16xf32>
    %192 = vector.shape_cast %191 : vector<1x16x16xf32> to vector<16x16xf32>
    %cst_73 = arith.constant dense<0.000000e+00> : vector<2x16xf32>
    %193 = tpu.matmul %152, %192, %cst_73 {dimension_numbers = #tpu.dot_dimension_numbers<[1], [0], [0], [1], [0, 0, 1, 1], [], []>} : vector<2x16xf32>, vector<16x16xf32>, vector<2x16xf32> -> vector<2x16xf32>
    %194 = arith.addf %190, %193 : vector<2x16xf32>
    %195 = vector.extract_strided_slice %4 {offsets = [2, 0, 0], sizes = [1, 1, 16], strides = [1, 1, 1]} : vector<4x1x16xf32> to vector<1x1x16xf32>
    %196 = vector.shape_cast %195 : vector<1x1x16xf32> to vector<1x16xf32>
    %197 = vector.broadcast %196 : vector<1x16xf32> to vector<2x16xf32>
    %198 = arith.addf %194, %197 : vector<2x16xf32>
    %199 = math.tanh %198 : vector<2x16xf32>
    %200 = vector.extract_strided_slice %2 {offsets = [3, 0, 0], sizes = [1, 32, 16], strides = [1, 1, 1]} : vector<4x32x16xf32> to vector<1x32x16xf32>
    %201 = vector.shape_cast %200 : vector<1x32x16xf32> to vector<32x16xf32>
    %cst_74 = arith.constant dense<0.000000e+00> : vector<2x16xf32>
    %202 = tpu.matmul %155, %201, %cst_74 {dimension_numbers = #tpu.dot_dimension_numbers<[1], [0], [0], [1], [0, 0, 1, 1], [], []>} : vector<2x32xf32>, vector<32x16xf32>, vector<2x16xf32> -> vector<2x16xf32>
    %203 = vector.extract_strided_slice %3 {offsets = [3, 0, 0], sizes = [1, 16, 16], strides = [1, 1, 1]} : vector<4x16x16xf32> to vector<1x16x16xf32>
    %204 = vector.shape_cast %203 : vector<1x16x16xf32> to vector<16x16xf32>
    %cst_75 = arith.constant dense<0.000000e+00> : vector<2x16xf32>
    %205 = tpu.matmul %152, %204, %cst_75 {dimension_numbers = #tpu.dot_dimension_numbers<[1], [0], [0], [1], [0, 0, 1, 1], [], []>} : vector<2x16xf32>, vector<16x16xf32>, vector<2x16xf32> -> vector<2x16xf32>
    %206 = arith.addf %202, %205 : vector<2x16xf32>
    %207 = vector.extract_strided_slice %4 {offsets = [3, 0, 0], sizes = [1, 1, 16], strides = [1, 1, 1]} : vector<4x1x16xf32> to vector<1x1x16xf32>
    %208 = vector.shape_cast %207 : vector<1x1x16xf32> to vector<1x16xf32>
    %209 = vector.broadcast %208 : vector<1x16xf32> to vector<2x16xf32>
    %210 = arith.addf %206, %209 : vector<2x16xf32>
    %211 = arith.negf %210 : vector<2x16xf32>
    %212 = math.exp %211 : vector<2x16xf32>
    %cst_76 = arith.constant 1.000000e+00 : f32
    %213 = vector.broadcast %cst_76 : f32 to vector<2x16xf32>
    %214 = arith.addf %213, %212 : vector<2x16xf32>
    %215 = arith.divf %213, %214 : vector<2x16xf32>
    %216 = arith.mulf %187, %150 : vector<2x16xf32>
    %217 = arith.mulf %171, %199 : vector<2x16xf32>
    %218 = arith.addf %216, %217 : vector<2x16xf32>
    %219 = math.tanh %218 : vector<2x16xf32>
    %220 = arith.mulf %215, %219 : vector<2x16xf32>
    %c4 = arith.constant 4 : index
    %c0_77 = arith.constant 0 : index
    %221 = vector.load %arg17[%c4, %c0_77] : memref<16x16xf32, #tpu.memory_space<vmem>>, vector<2x16xf32>
    tpu.vector_store %arg17[%c4, %c0_77], %220 {strides = array<i32>} : memref<16x16xf32, #tpu.memory_space<vmem>>, vector<2x16xf32>,
    %222 = vector.extract_strided_slice %0 {offsets = [3, 0, 0], sizes = [1, 2, 32], strides = [1, 1, 1]} : vector<8x2x32xf32> to vector<1x2x32xf32>
    %223 = vector.shape_cast %222 : vector<1x2x32xf32> to vector<2x32xf32>
    %224 = vector.extract_strided_slice %2 {offsets = [0, 0, 0], sizes = [1, 32, 16], strides = [1, 1, 1]} : vector<4x32x16xf32> to vector<1x32x16xf32>
    %225 = vector.shape_cast %224 : vector<1x32x16xf32> to vector<32x16xf32>
    %cst_78 = arith.constant dense<0.000000e+00> : vector<2x16xf32>
    %226 = tpu.matmul %223, %225, %cst_78 {dimension_numbers = #tpu.dot_dimension_numbers<[1], [0], [0], [1], [0, 0, 1, 1], [], []>} : vector<2x32xf32>, vector<32x16xf32>, vector<2x16xf32> -> vector<2x16xf32>
    %227 = vector.extract_strided_slice %3 {offsets = [0, 0, 0], sizes = [1, 16, 16], strides = [1, 1, 1]} : vector<4x16x16xf32> to vector<1x16x16xf32>
    %228 = vector.shape_cast %227 : vector<1x16x16xf32> to vector<16x16xf32>
    %cst_79 = arith.constant dense<0.000000e+00> : vector<2x16xf32>
    %229 = tpu.matmul %220, %228, %cst_79 {dimension_numbers = #tpu.dot_dimension_numbers<[1], [0], [0], [1], [0, 0, 1, 1], [], []>} : vector<2x16xf32>, vector<16x16xf32>, vector<2x16xf32> -> vector<2x16xf32>
    %230 = arith.addf %226, %229 : vector<2x16xf32>
    %231 = vector.extract_strided_slice %4 {offsets = [0, 0, 0], sizes = [1, 1, 16], strides = [1, 1, 1]} : vector<4x1x16xf32> to vector<1x1x16xf32>
    %232 = vector.shape_cast %231 : vector<1x1x16xf32> to vector<1x16xf32>
    %233 = vector.broadcast %232 : vector<1x16xf32> to vector<2x16xf32>
    %234 = arith.addf %230, %233 : vector<2x16xf32>
    %235 = arith.negf %234 : vector<2x16xf32>
    %236 = math.exp %235 : vector<2x16xf32>
    %cst_80 = arith.constant 1.000000e+00 : f32
    %237 = vector.broadcast %cst_80 : f32 to vector<2x16xf32>
    %238 = arith.addf %237, %236 : vector<2x16xf32>
    %239 = arith.divf %237, %238 : vector<2x16xf32>
    %240 = vector.extract_strided_slice %2 {offsets = [1, 0, 0], sizes = [1, 32, 16], strides = [1, 1, 1]} : vector<4x32x16xf32> to vector<1x32x16xf32>
    %241 = vector.shape_cast %240 : vector<1x32x16xf32> to vector<32x16xf32>
    %cst_81 = arith.constant dense<0.000000e+00> : vector<2x16xf32>
    %242 = tpu.matmul %223, %241, %cst_81 {dimension_numbers = #tpu.dot_dimension_numbers<[1], [0], [0], [1], [0, 0, 1, 1], [], []>} : vector<2x32xf32>, vector<32x16xf32>, vector<2x16xf32> -> vector<2x16xf32>
    %243 = vector.extract_strided_slice %3 {offsets = [1, 0, 0], sizes = [1, 16, 16], strides = [1, 1, 1]} : vector<4x16x16xf32> to vector<1x16x16xf32>
    %244 = vector.shape_cast %243 : vector<1x16x16xf32> to vector<16x16xf32>
    %cst_82 = arith.constant dense<0.000000e+00> : vector<2x16xf32>
    %245 = tpu.matmul %220, %244, %cst_82 {dimension_numbers = #tpu.dot_dimension_numbers<[1], [0], [0], [1], [0, 0, 1, 1], [], []>} : vector<2x16xf32>, vector<16x16xf32>, vector<2x16xf32> -> vector<2x16xf32>
    %246 = arith.addf %242, %245 : vector<2x16xf32>
    %247 = vector.extract_strided_slice %4 {offsets = [1, 0, 0], sizes = [1, 1, 16], strides = [1, 1, 1]} : vector<4x1x16xf32> to vector<1x1x16xf32>
    %248 = vector.shape_cast %247 : vector<1x1x16xf32> to vector<1x16xf32>
    %249 = vector.broadcast %248 : vector<1x16xf32> to vector<2x16xf32>
    %250 = arith.addf %246, %249 : vector<2x16xf32>
    %251 = arith.negf %250 : vector<2x16xf32>
    %252 = math.exp %251 : vector<2x16xf32>
    %cst_83 = arith.constant 1.000000e+00 : f32
    %253 = vector.broadcast %cst_83 : f32 to vector<2x16xf32>
    %254 = arith.addf %253, %252 : vector<2x16xf32>
    %255 = arith.divf %253, %254 : vector<2x16xf32>
    %256 = vector.extract_strided_slice %2 {offsets = [2, 0, 0], sizes = [1, 32, 16], strides = [1, 1, 1]} : vector<4x32x16xf32> to vector<1x32x16xf32>
    %257 = vector.shape_cast %256 : vector<1x32x16xf32> to vector<32x16xf32>
    %cst_84 = arith.constant dense<0.000000e+00> : vector<2x16xf32>
    %258 = tpu.matmul %223, %257, %cst_84 {dimension_numbers = #tpu.dot_dimension_numbers<[1], [0], [0], [1], [0, 0, 1, 1], [], []>} : vector<2x32xf32>, vector<32x16xf32>, vector<2x16xf32> -> vector<2x16xf32>
    %259 = vector.extract_strided_slice %3 {offsets = [2, 0, 0], sizes = [1, 16, 16], strides = [1, 1, 1]} : vector<4x16x16xf32> to vector<1x16x16xf32>
    %260 = vector.shape_cast %259 : vector<1x16x16xf32> to vector<16x16xf32>
    %cst_85 = arith.constant dense<0.000000e+00> : vector<2x16xf32>
    %261 = tpu.matmul %220, %260, %cst_85 {dimension_numbers = #tpu.dot_dimension_numbers<[1], [0], [0], [1], [0, 0, 1, 1], [], []>} : vector<2x16xf32>, vector<16x16xf32>, vector<2x16xf32> -> vector<2x16xf32>
    %262 = arith.addf %258, %261 : vector<2x16xf32>
    %263 = vector.extract_strided_slice %4 {offsets = [2, 0, 0], sizes = [1, 1, 16], strides = [1, 1, 1]} : vector<4x1x16xf32> to vector<1x1x16xf32>
    %264 = vector.shape_cast %263 : vector<1x1x16xf32> to vector<1x16xf32>
    %265 = vector.broadcast %264 : vector<1x16xf32> to vector<2x16xf32>
    %266 = arith.addf %262, %265 : vector<2x16xf32>
    %267 = math.tanh %266 : vector<2x16xf32>
    %268 = vector.extract_strided_slice %2 {offsets = [3, 0, 0], sizes = [1, 32, 16], strides = [1, 1, 1]} : vector<4x32x16xf32> to vector<1x32x16xf32>
    %269 = vector.shape_cast %268 : vector<1x32x16xf32> to vector<32x16xf32>
    %cst_86 = arith.constant dense<0.000000e+00> : vector<2x16xf32>
    %270 = tpu.matmul %223, %269, %cst_86 {dimension_numbers = #tpu.dot_dimension_numbers<[1], [0], [0], [1], [0, 0, 1, 1], [], []>} : vector<2x32xf32>, vector<32x16xf32>, vector<2x16xf32> -> vector<2x16xf32>
    %271 = vector.extract_strided_slice %3 {offsets = [3, 0, 0], sizes = [1, 16, 16], strides = [1, 1, 1]} : vector<4x16x16xf32> to vector<1x16x16xf32>
    %272 = vector.shape_cast %271 : vector<1x16x16xf32> to vector<16x16xf32>
    %cst_87 = arith.constant dense<0.000000e+00> : vector<2x16xf32>
    %273 = tpu.matmul %220, %272, %cst_87 {dimension_numbers = #tpu.dot_dimension_numbers<[1], [0], [0], [1], [0, 0, 1, 1], [], []>} : vector<2x16xf32>, vector<16x16xf32>, vector<2x16xf32> -> vector<2x16xf32>
    %274 = arith.addf %270, %273 : vector<2x16xf32>
    %275 = vector.extract_strided_slice %4 {offsets = [3, 0, 0], sizes = [1, 1, 16], strides = [1, 1, 1]} : vector<4x1x16xf32> to vector<1x1x16xf32>
    %276 = vector.shape_cast %275 : vector<1x1x16xf32> to vector<1x16xf32>
    %277 = vector.broadcast %276 : vector<1x16xf32> to vector<2x16xf32>
    %278 = arith.addf %274, %277 : vector<2x16xf32>
    %279 = arith.negf %278 : vector<2x16xf32>
    %280 = math.exp %279 : vector<2x16xf32>
    %cst_88 = arith.constant 1.000000e+00 : f32
    %281 = vector.broadcast %cst_88 : f32 to vector<2x16xf32>
    %282 = arith.addf %281, %280 : vector<2x16xf32>
    %283 = arith.divf %281, %282 : vector<2x16xf32>
    %284 = arith.mulf %255, %218 : vector<2x16xf32>
    %285 = arith.mulf %239, %267 : vector<2x16xf32>
    %286 = arith.addf %284, %285 : vector<2x16xf32>
    %287 = math.tanh %286 : vector<2x16xf32>
    %288 = arith.mulf %283, %287 : vector<2x16xf32>
    %c6 = arith.constant 6 : index
    %c0_89 = arith.constant 0 : index
    %289 = vector.load %arg17[%c6, %c0_89] : memref<16x16xf32, #tpu.memory_space<vmem>>, vector<2x16xf32>
    tpu.vector_store %arg17[%c6, %c0_89], %288 {strides = array<i32>} : memref<16x16xf32, #tpu.memory_space<vmem>>, vector<2x16xf32>,
    %290 = vector.extract_strided_slice %0 {offsets = [4, 0, 0], sizes = [1, 2, 32], strides = [1, 1, 1]} : vector<8x2x32xf32> to vector<1x2x32xf32>
    %291 = vector.shape_cast %290 : vector<1x2x32xf32> to vector<2x32xf32>
    %292 = vector.extract_strided_slice %2 {offsets = [0, 0, 0], sizes = [1, 32, 16], strides = [1, 1, 1]} : vector<4x32x16xf32> to vector<1x32x16xf32>
    %293 = vector.shape_cast %292 : vector<1x32x16xf32> to vector<32x16xf32>
    %cst_90 = arith.constant dense<0.000000e+00> : vector<2x16xf32>
    %294 = tpu.matmul %291, %293, %cst_90 {dimension_numbers = #tpu.dot_dimension_numbers<[1], [0], [0], [1], [0, 0, 1, 1], [], []>} : vector<2x32xf32>, vector<32x16xf32>, vector<2x16xf32> -> vector<2x16xf32>
    %295 = vector.extract_strided_slice %3 {offsets = [0, 0, 0], sizes = [1, 16, 16], strides = [1, 1, 1]} : vector<4x16x16xf32> to vector<1x16x16xf32>
    %296 = vector.shape_cast %295 : vector<1x16x16xf32> to vector<16x16xf32>
    %cst_91 = arith.constant dense<0.000000e+00> : vector<2x16xf32>
    %297 = tpu.matmul %288, %296, %cst_91 {dimension_numbers = #tpu.dot_dimension_numbers<[1], [0], [0], [1], [0, 0, 1, 1], [], []>} : vector<2x16xf32>, vector<16x16xf32>, vector<2x16xf32> -> vector<2x16xf32>
    %298 = arith.addf %294, %297 : vector<2x16xf32>
    %299 = vector.extract_strided_slice %4 {offsets = [0, 0, 0], sizes = [1, 1, 16], strides = [1, 1, 1]} : vector<4x1x16xf32> to vector<1x1x16xf32>
    %300 = vector.shape_cast %299 : vector<1x1x16xf32> to vector<1x16xf32>
    %301 = vector.broadcast %300 : vector<1x16xf32> to vector<2x16xf32>
    %302 = arith.addf %298, %301 : vector<2x16xf32>
    %303 = arith.negf %302 : vector<2x16xf32>
    %304 = math.exp %303 : vector<2x16xf32>
    %cst_92 = arith.constant 1.000000e+00 : f32
    %305 = vector.broadcast %cst_92 : f32 to vector<2x16xf32>
    %306 = arith.addf %305, %304 : vector<2x16xf32>
    %307 = arith.divf %305, %306 : vector<2x16xf32>
    %308 = vector.extract_strided_slice %2 {offsets = [1, 0, 0], sizes = [1, 32, 16], strides = [1, 1, 1]} : vector<4x32x16xf32> to vector<1x32x16xf32>
    %309 = vector.shape_cast %308 : vector<1x32x16xf32> to vector<32x16xf32>
    %cst_93 = arith.constant dense<0.000000e+00> : vector<2x16xf32>
    %310 = tpu.matmul %291, %309, %cst_93 {dimension_numbers = #tpu.dot_dimension_numbers<[1], [0], [0], [1], [0, 0, 1, 1], [], []>} : vector<2x32xf32>, vector<32x16xf32>, vector<2x16xf32> -> vector<2x16xf32>
    %311 = vector.extract_strided_slice %3 {offsets = [1, 0, 0], sizes = [1, 16, 16], strides = [1, 1, 1]} : vector<4x16x16xf32> to vector<1x16x16xf32>
    %312 = vector.shape_cast %311 : vector<1x16x16xf32> to vector<16x16xf32>
    %cst_94 = arith.constant dense<0.000000e+00> : vector<2x16xf32>
    %313 = tpu.matmul %288, %312, %cst_94 {dimension_numbers = #tpu.dot_dimension_numbers<[1], [0], [0], [1], [0, 0, 1, 1], [], []>} : vector<2x16xf32>, vector<16x16xf32>, vector<2x16xf32> -> vector<2x16xf32>
    %314 = arith.addf %310, %313 : vector<2x16xf32>
    %315 = vector.extract_strided_slice %4 {offsets = [1, 0, 0], sizes = [1, 1, 16], strides = [1, 1, 1]} : vector<4x1x16xf32> to vector<1x1x16xf32>
    %316 = vector.shape_cast %315 : vector<1x1x16xf32> to vector<1x16xf32>
    %317 = vector.broadcast %316 : vector<1x16xf32> to vector<2x16xf32>
    %318 = arith.addf %314, %317 : vector<2x16xf32>
    %319 = arith.negf %318 : vector<2x16xf32>
    %320 = math.exp %319 : vector<2x16xf32>
    %cst_95 = arith.constant 1.000000e+00 : f32
    %321 = vector.broadcast %cst_95 : f32 to vector<2x16xf32>
    %322 = arith.addf %321, %320 : vector<2x16xf32>
    %323 = arith.divf %321, %322 : vector<2x16xf32>
    %324 = vector.extract_strided_slice %2 {offsets = [2, 0, 0], sizes = [1, 32, 16], strides = [1, 1, 1]} : vector<4x32x16xf32> to vector<1x32x16xf32>
    %325 = vector.shape_cast %324 : vector<1x32x16xf32> to vector<32x16xf32>
    %cst_96 = arith.constant dense<0.000000e+00> : vector<2x16xf32>
    %326 = tpu.matmul %291, %325, %cst_96 {dimension_numbers = #tpu.dot_dimension_numbers<[1], [0], [0], [1], [0, 0, 1, 1], [], []>} : vector<2x32xf32>, vector<32x16xf32>, vector<2x16xf32> -> vector<2x16xf32>
    %327 = vector.extract_strided_slice %3 {offsets = [2, 0, 0], sizes = [1, 16, 16], strides = [1, 1, 1]} : vector<4x16x16xf32> to vector<1x16x16xf32>
    %328 = vector.shape_cast %327 : vector<1x16x16xf32> to vector<16x16xf32>
    %cst_97 = arith.constant dense<0.000000e+00> : vector<2x16xf32>
    %329 = tpu.matmul %288, %328, %cst_97 {dimension_numbers = #tpu.dot_dimension_numbers<[1], [0], [0], [1], [0, 0, 1, 1], [], []>} : vector<2x16xf32>, vector<16x16xf32>, vector<2x16xf32> -> vector<2x16xf32>
    %330 = arith.addf %326, %329 : vector<2x16xf32>
    %331 = vector.extract_strided_slice %4 {offsets = [2, 0, 0], sizes = [1, 1, 16], strides = [1, 1, 1]} : vector<4x1x16xf32> to vector<1x1x16xf32>
    %332 = vector.shape_cast %331 : vector<1x1x16xf32> to vector<1x16xf32>
    %333 = vector.broadcast %332 : vector<1x16xf32> to vector<2x16xf32>
    %334 = arith.addf %330, %333 : vector<2x16xf32>
    %335 = math.tanh %334 : vector<2x16xf32>
    %336 = vector.extract_strided_slice %2 {offsets = [3, 0, 0], sizes = [1, 32, 16], strides = [1, 1, 1]} : vector<4x32x16xf32> to vector<1x32x16xf32>
    %337 = vector.shape_cast %336 : vector<1x32x16xf32> to vector<32x16xf32>
    %cst_98 = arith.constant dense<0.000000e+00> : vector<2x16xf32>
    %338 = tpu.matmul %291, %337, %cst_98 {dimension_numbers = #tpu.dot_dimension_numbers<[1], [0], [0], [1], [0, 0, 1, 1], [], []>} : vector<2x32xf32>, vector<32x16xf32>, vector<2x16xf32> -> vector<2x16xf32>
    %339 = vector.extract_strided_slice %3 {offsets = [3, 0, 0], sizes = [1, 16, 16], strides = [1, 1, 1]} : vector<4x16x16xf32> to vector<1x16x16xf32>
    %340 = vector.shape_cast %339 : vector<1x16x16xf32> to vector<16x16xf32>
    %cst_99 = arith.constant dense<0.000000e+00> : vector<2x16xf32>
    %341 = tpu.matmul %288, %340, %cst_99 {dimension_numbers = #tpu.dot_dimension_numbers<[1], [0], [0], [1], [0, 0, 1, 1], [], []>} : vector<2x16xf32>, vector<16x16xf32>, vector<2x16xf32> -> vector<2x16xf32>
    %342 = arith.addf %338, %341 : vector<2x16xf32>
    %343 = vector.extract_strided_slice %4 {offsets = [3, 0, 0], sizes = [1, 1, 16], strides = [1, 1, 1]} : vector<4x1x16xf32> to vector<1x1x16xf32>
    %344 = vector.shape_cast %343 : vector<1x1x16xf32> to vector<1x16xf32>
    %345 = vector.broadcast %344 : vector<1x16xf32> to vector<2x16xf32>
    %346 = arith.addf %342, %345 : vector<2x16xf32>
    %347 = arith.negf %346 : vector<2x16xf32>
    %348 = math.exp %347 : vector<2x16xf32>
    %cst_100 = arith.constant 1.000000e+00 : f32
    %349 = vector.broadcast %cst_100 : f32 to vector<2x16xf32>
    %350 = arith.addf %349, %348 : vector<2x16xf32>
    %351 = arith.divf %349, %350 : vector<2x16xf32>
    %352 = arith.mulf %323, %286 : vector<2x16xf32>
    %353 = arith.mulf %307, %335 : vector<2x16xf32>
    %354 = arith.addf %352, %353 : vector<2x16xf32>
    %355 = math.tanh %354 : vector<2x16xf32>
    %356 = arith.mulf %351, %355 : vector<2x16xf32>
    %c8 = arith.constant 8 : index
    %c0_101 = arith.constant 0 : index
    %357 = vector.load %arg17[%c8, %c0_101] : memref<16x16xf32, #tpu.memory_space<vmem>>, vector<2x16xf32>
    tpu.vector_store %arg17[%c8, %c0_101], %356 {strides = array<i32>} : memref<16x16xf32, #tpu.memory_space<vmem>>, vector<2x16xf32>,
    %358 = vector.extract_strided_slice %0 {offsets = [5, 0, 0], sizes = [1, 2, 32], strides = [1, 1, 1]} : vector<8x2x32xf32> to vector<1x2x32xf32>
    %359 = vector.shape_cast %358 : vector<1x2x32xf32> to vector<2x32xf32>
    %360 = vector.extract_strided_slice %2 {offsets = [0, 0, 0], sizes = [1, 32, 16], strides = [1, 1, 1]} : vector<4x32x16xf32> to vector<1x32x16xf32>
    %361 = vector.shape_cast %360 : vector<1x32x16xf32> to vector<32x16xf32>
    %cst_102 = arith.constant dense<0.000000e+00> : vector<2x16xf32>
    %362 = tpu.matmul %359, %361, %cst_102 {dimension_numbers = #tpu.dot_dimension_numbers<[1], [0], [0], [1], [0, 0, 1, 1], [], []>} : vector<2x32xf32>, vector<32x16xf32>, vector<2x16xf32> -> vector<2x16xf32>
    %363 = vector.extract_strided_slice %3 {offsets = [0, 0, 0], sizes = [1, 16, 16], strides = [1, 1, 1]} : vector<4x16x16xf32> to vector<1x16x16xf32>
    %364 = vector.shape_cast %363 : vector<1x16x16xf32> to vector<16x16xf32>
    %cst_103 = arith.constant dense<0.000000e+00> : vector<2x16xf32>
    %365 = tpu.matmul %356, %364, %cst_103 {dimension_numbers = #tpu.dot_dimension_numbers<[1], [0], [0], [1], [0, 0, 1, 1], [], []>} : vector<2x16xf32>, vector<16x16xf32>, vector<2x16xf32> -> vector<2x16xf32>
    %366 = arith.addf %362, %365 : vector<2x16xf32>
    %367 = vector.extract_strided_slice %4 {offsets = [0, 0, 0], sizes = [1, 1, 16], strides = [1, 1, 1]} : vector<4x1x16xf32> to vector<1x1x16xf32>
    %368 = vector.shape_cast %367 : vector<1x1x16xf32> to vector<1x16xf32>
    %369 = vector.broadcast %368 : vector<1x16xf32> to vector<2x16xf32>
    %370 = arith.addf %366, %369 : vector<2x16xf32>
    %371 = arith.negf %370 : vector<2x16xf32>
    %372 = math.exp %371 : vector<2x16xf32>
    %cst_104 = arith.constant 1.000000e+00 : f32
    %373 = vector.broadcast %cst_104 : f32 to vector<2x16xf32>
    %374 = arith.addf %373, %372 : vector<2x16xf32>
    %375 = arith.divf %373, %374 : vector<2x16xf32>
    %376 = vector.extract_strided_slice %2 {offsets = [1, 0, 0], sizes = [1, 32, 16], strides = [1, 1, 1]} : vector<4x32x16xf32> to vector<1x32x16xf32>
    %377 = vector.shape_cast %376 : vector<1x32x16xf32> to vector<32x16xf32>
    %cst_105 = arith.constant dense<0.000000e+00> : vector<2x16xf32>
    %378 = tpu.matmul %359, %377, %cst_105 {dimension_numbers = #tpu.dot_dimension_numbers<[1], [0], [0], [1], [0, 0, 1, 1], [], []>} : vector<2x32xf32>, vector<32x16xf32>, vector<2x16xf32> -> vector<2x16xf32>
    %379 = vector.extract_strided_slice %3 {offsets = [1, 0, 0], sizes = [1, 16, 16], strides = [1, 1, 1]} : vector<4x16x16xf32> to vector<1x16x16xf32>
    %380 = vector.shape_cast %379 : vector<1x16x16xf32> to vector<16x16xf32>
    %cst_106 = arith.constant dense<0.000000e+00> : vector<2x16xf32>
    %381 = tpu.matmul %356, %380, %cst_106 {dimension_numbers = #tpu.dot_dimension_numbers<[1], [0], [0], [1], [0, 0, 1, 1], [], []>} : vector<2x16xf32>, vector<16x16xf32>, vector<2x16xf32> -> vector<2x16xf32>
    %382 = arith.addf %378, %381 : vector<2x16xf32>
    %383 = vector.extract_strided_slice %4 {offsets = [1, 0, 0], sizes = [1, 1, 16], strides = [1, 1, 1]} : vector<4x1x16xf32> to vector<1x1x16xf32>
    %384 = vector.shape_cast %383 : vector<1x1x16xf32> to vector<1x16xf32>
    %385 = vector.broadcast %384 : vector<1x16xf32> to vector<2x16xf32>
    %386 = arith.addf %382, %385 : vector<2x16xf32>
    %387 = arith.negf %386 : vector<2x16xf32>
    %388 = math.exp %387 : vector<2x16xf32>
    %cst_107 = arith.constant 1.000000e+00 : f32
    %389 = vector.broadcast %cst_107 : f32 to vector<2x16xf32>
    %390 = arith.addf %389, %388 : vector<2x16xf32>
    %391 = arith.divf %389, %390 : vector<2x16xf32>
    %392 = vector.extract_strided_slice %2 {offsets = [2, 0, 0], sizes = [1, 32, 16], strides = [1, 1, 1]} : vector<4x32x16xf32> to vector<1x32x16xf32>
    %393 = vector.shape_cast %392 : vector<1x32x16xf32> to vector<32x16xf32>
    %cst_108 = arith.constant dense<0.000000e+00> : vector<2x16xf32>
    %394 = tpu.matmul %359, %393, %cst_108 {dimension_numbers = #tpu.dot_dimension_numbers<[1], [0], [0], [1], [0, 0, 1, 1], [], []>} : vector<2x32xf32>, vector<32x16xf32>, vector<2x16xf32> -> vector<2x16xf32>
    %395 = vector.extract_strided_slice %3 {offsets = [2, 0, 0], sizes = [1, 16, 16], strides = [1, 1, 1]} : vector<4x16x16xf32> to vector<1x16x16xf32>
    %396 = vector.shape_cast %395 : vector<1x16x16xf32> to vector<16x16xf32>
    %cst_109 = arith.constant dense<0.000000e+00> : vector<2x16xf32>
    %397 = tpu.matmul %356, %396, %cst_109 {dimension_numbers = #tpu.dot_dimension_numbers<[1], [0], [0], [1], [0, 0, 1, 1], [], []>} : vector<2x16xf32>, vector<16x16xf32>, vector<2x16xf32> -> vector<2x16xf32>
    %398 = arith.addf %394, %397 : vector<2x16xf32>
    %399 = vector.extract_strided_slice %4 {offsets = [2, 0, 0], sizes = [1, 1, 16], strides = [1, 1, 1]} : vector<4x1x16xf32> to vector<1x1x16xf32>
    %400 = vector.shape_cast %399 : vector<1x1x16xf32> to vector<1x16xf32>
    %401 = vector.broadcast %400 : vector<1x16xf32> to vector<2x16xf32>
    %402 = arith.addf %398, %401 : vector<2x16xf32>
    %403 = math.tanh %402 : vector<2x16xf32>
    %404 = vector.extract_strided_slice %2 {offsets = [3, 0, 0], sizes = [1, 32, 16], strides = [1, 1, 1]} : vector<4x32x16xf32> to vector<1x32x16xf32>
    %405 = vector.shape_cast %404 : vector<1x32x16xf32> to vector<32x16xf32>
    %cst_110 = arith.constant dense<0.000000e+00> : vector<2x16xf32>
    %406 = tpu.matmul %359, %405, %cst_110 {dimension_numbers = #tpu.dot_dimension_numbers<[1], [0], [0], [1], [0, 0, 1, 1], [], []>} : vector<2x32xf32>, vector<32x16xf32>, vector<2x16xf32> -> vector<2x16xf32>
    %407 = vector.extract_strided_slice %3 {offsets = [3, 0, 0], sizes = [1, 16, 16], strides = [1, 1, 1]} : vector<4x16x16xf32> to vector<1x16x16xf32>
    %408 = vector.shape_cast %407 : vector<1x16x16xf32> to vector<16x16xf32>
    %cst_111 = arith.constant dense<0.000000e+00> : vector<2x16xf32>
    %409 = tpu.matmul %356, %408, %cst_111 {dimension_numbers = #tpu.dot_dimension_numbers<[1], [0], [0], [1], [0, 0, 1, 1], [], []>} : vector<2x16xf32>, vector<16x16xf32>, vector<2x16xf32> -> vector<2x16xf32>
    %410 = arith.addf %406, %409 : vector<2x16xf32>
    %411 = vector.extract_strided_slice %4 {offsets = [3, 0, 0], sizes = [1, 1, 16], strides = [1, 1, 1]} : vector<4x1x16xf32> to vector<1x1x16xf32>
    %412 = vector.shape_cast %411 : vector<1x1x16xf32> to vector<1x16xf32>
    %413 = vector.broadcast %412 : vector<1x16xf32> to vector<2x16xf32>
    %414 = arith.addf %410, %413 : vector<2x16xf32>
    %415 = arith.negf %414 : vector<2x16xf32>
    %416 = math.exp %415 : vector<2x16xf32>
    %cst_112 = arith.constant 1.000000e+00 : f32
    %417 = vector.broadcast %cst_112 : f32 to vector<2x16xf32>
    %418 = arith.addf %417, %416 : vector<2x16xf32>
    %419 = arith.divf %417, %418 : vector<2x16xf32>
    %420 = arith.mulf %391, %354 : vector<2x16xf32>
    %421 = arith.mulf %375, %403 : vector<2x16xf32>
    %422 = arith.addf %420, %421 : vector<2x16xf32>
    %423 = math.tanh %422 : vector<2x16xf32>
    %424 = arith.mulf %419, %423 : vector<2x16xf32>
    %c10 = arith.constant 10 : index
    %c0_113 = arith.constant 0 : index
    %425 = vector.load %arg17[%c10, %c0_113] : memref<16x16xf32, #tpu.memory_space<vmem>>, vector<2x16xf32>
    tpu.vector_store %arg17[%c10, %c0_113], %424 {strides = array<i32>} : memref<16x16xf32, #tpu.memory_space<vmem>>, vector<2x16xf32>,
    %426 = vector.extract_strided_slice %0 {offsets = [6, 0, 0], sizes = [1, 2, 32], strides = [1, 1, 1]} : vector<8x2x32xf32> to vector<1x2x32xf32>
    %427 = vector.shape_cast %426 : vector<1x2x32xf32> to vector<2x32xf32>
    %428 = vector.extract_strided_slice %2 {offsets = [0, 0, 0], sizes = [1, 32, 16], strides = [1, 1, 1]} : vector<4x32x16xf32> to vector<1x32x16xf32>
    %429 = vector.shape_cast %428 : vector<1x32x16xf32> to vector<32x16xf32>
    %cst_114 = arith.constant dense<0.000000e+00> : vector<2x16xf32>
    %430 = tpu.matmul %427, %429, %cst_114 {dimension_numbers = #tpu.dot_dimension_numbers<[1], [0], [0], [1], [0, 0, 1, 1], [], []>} : vector<2x32xf32>, vector<32x16xf32>, vector<2x16xf32> -> vector<2x16xf32>
    %431 = vector.extract_strided_slice %3 {offsets = [0, 0, 0], sizes = [1, 16, 16], strides = [1, 1, 1]} : vector<4x16x16xf32> to vector<1x16x16xf32>
    %432 = vector.shape_cast %431 : vector<1x16x16xf32> to vector<16x16xf32>
    %cst_115 = arith.constant dense<0.000000e+00> : vector<2x16xf32>
    %433 = tpu.matmul %424, %432, %cst_115 {dimension_numbers = #tpu.dot_dimension_numbers<[1], [0], [0], [1], [0, 0, 1, 1], [], []>} : vector<2x16xf32>, vector<16x16xf32>, vector<2x16xf32> -> vector<2x16xf32>
    %434 = arith.addf %430, %433 : vector<2x16xf32>
    %435 = vector.extract_strided_slice %4 {offsets = [0, 0, 0], sizes = [1, 1, 16], strides = [1, 1, 1]} : vector<4x1x16xf32> to vector<1x1x16xf32>
    %436 = vector.shape_cast %435 : vector<1x1x16xf32> to vector<1x16xf32>
    %437 = vector.broadcast %436 : vector<1x16xf32> to vector<2x16xf32>
    %438 = arith.addf %434, %437 : vector<2x16xf32>
    %439 = arith.negf %438 : vector<2x16xf32>
    %440 = math.exp %439 : vector<2x16xf32>
    %cst_116 = arith.constant 1.000000e+00 : f32
    %441 = vector.broadcast %cst_116 : f32 to vector<2x16xf32>
    %442 = arith.addf %441, %440 : vector<2x16xf32>
    %443 = arith.divf %441, %442 : vector<2x16xf32>
    %444 = vector.extract_strided_slice %2 {offsets = [1, 0, 0], sizes = [1, 32, 16], strides = [1, 1, 1]} : vector<4x32x16xf32> to vector<1x32x16xf32>
    %445 = vector.shape_cast %444 : vector<1x32x16xf32> to vector<32x16xf32>
    %cst_117 = arith.constant dense<0.000000e+00> : vector<2x16xf32>
    %446 = tpu.matmul %427, %445, %cst_117 {dimension_numbers = #tpu.dot_dimension_numbers<[1], [0], [0], [1], [0, 0, 1, 1], [], []>} : vector<2x32xf32>, vector<32x16xf32>, vector<2x16xf32> -> vector<2x16xf32>
    %447 = vector.extract_strided_slice %3 {offsets = [1, 0, 0], sizes = [1, 16, 16], strides = [1, 1, 1]} : vector<4x16x16xf32> to vector<1x16x16xf32>
    %448 = vector.shape_cast %447 : vector<1x16x16xf32> to vector<16x16xf32>
    %cst_118 = arith.constant dense<0.000000e+00> : vector<2x16xf32>
    %449 = tpu.matmul %424, %448, %cst_118 {dimension_numbers = #tpu.dot_dimension_numbers<[1], [0], [0], [1], [0, 0, 1, 1], [], []>} : vector<2x16xf32>, vector<16x16xf32>, vector<2x16xf32> -> vector<2x16xf32>
    %450 = arith.addf %446, %449 : vector<2x16xf32>
    %451 = vector.extract_strided_slice %4 {offsets = [1, 0, 0], sizes = [1, 1, 16], strides = [1, 1, 1]} : vector<4x1x16xf32> to vector<1x1x16xf32>
    %452 = vector.shape_cast %451 : vector<1x1x16xf32> to vector<1x16xf32>
    %453 = vector.broadcast %452 : vector<1x16xf32> to vector<2x16xf32>
    %454 = arith.addf %450, %453 : vector<2x16xf32>
    %455 = arith.negf %454 : vector<2x16xf32>
    %456 = math.exp %455 : vector<2x16xf32>
    %cst_119 = arith.constant 1.000000e+00 : f32
    %457 = vector.broadcast %cst_119 : f32 to vector<2x16xf32>
    %458 = arith.addf %457, %456 : vector<2x16xf32>
    %459 = arith.divf %457, %458 : vector<2x16xf32>
    %460 = vector.extract_strided_slice %2 {offsets = [2, 0, 0], sizes = [1, 32, 16], strides = [1, 1, 1]} : vector<4x32x16xf32> to vector<1x32x16xf32>
    %461 = vector.shape_cast %460 : vector<1x32x16xf32> to vector<32x16xf32>
    %cst_120 = arith.constant dense<0.000000e+00> : vector<2x16xf32>
    %462 = tpu.matmul %427, %461, %cst_120 {dimension_numbers = #tpu.dot_dimension_numbers<[1], [0], [0], [1], [0, 0, 1, 1], [], []>} : vector<2x32xf32>, vector<32x16xf32>, vector<2x16xf32> -> vector<2x16xf32>
    %463 = vector.extract_strided_slice %3 {offsets = [2, 0, 0], sizes = [1, 16, 16], strides = [1, 1, 1]} : vector<4x16x16xf32> to vector<1x16x16xf32>
    %464 = vector.shape_cast %463 : vector<1x16x16xf32> to vector<16x16xf32>
    %cst_121 = arith.constant dense<0.000000e+00> : vector<2x16xf32>
    %465 = tpu.matmul %424, %464, %cst_121 {dimension_numbers = #tpu.dot_dimension_numbers<[1], [0], [0], [1], [0, 0, 1, 1], [], []>} : vector<2x16xf32>, vector<16x16xf32>, vector<2x16xf32> -> vector<2x16xf32>
    %466 = arith.addf %462, %465 : vector<2x16xf32>
    %467 = vector.extract_strided_slice %4 {offsets = [2, 0, 0], sizes = [1, 1, 16], strides = [1, 1, 1]} : vector<4x1x16xf32> to vector<1x1x16xf32>
    %468 = vector.shape_cast %467 : vector<1x1x16xf32> to vector<1x16xf32>
    %469 = vector.broadcast %468 : vector<1x16xf32> to vector<2x16xf32>
    %470 = arith.addf %466, %469 : vector<2x16xf32>
    %471 = math.tanh %470 : vector<2x16xf32>
    %472 = vector.extract_strided_slice %2 {offsets = [3, 0, 0], sizes = [1, 32, 16], strides = [1, 1, 1]} : vector<4x32x16xf32> to vector<1x32x16xf32>
    %473 = vector.shape_cast %472 : vector<1x32x16xf32> to vector<32x16xf32>
    %cst_122 = arith.constant dense<0.000000e+00> : vector<2x16xf32>
    %474 = tpu.matmul %427, %473, %cst_122 {dimension_numbers = #tpu.dot_dimension_numbers<[1], [0], [0], [1], [0, 0, 1, 1], [], []>} : vector<2x32xf32>, vector<32x16xf32>, vector<2x16xf32> -> vector<2x16xf32>
    %475 = vector.extract_strided_slice %3 {offsets = [3, 0, 0], sizes = [1, 16, 16], strides = [1, 1, 1]} : vector<4x16x16xf32> to vector<1x16x16xf32>
    %476 = vector.shape_cast %475 : vector<1x16x16xf32> to vector<16x16xf32>
    %cst_123 = arith.constant dense<0.000000e+00> : vector<2x16xf32>
    %477 = tpu.matmul %424, %476, %cst_123 {dimension_numbers = #tpu.dot_dimension_numbers<[1], [0], [0], [1], [0, 0, 1, 1], [], []>} : vector<2x16xf32>, vector<16x16xf32>, vector<2x16xf32> -> vector<2x16xf32>
    %478 = arith.addf %474, %477 : vector<2x16xf32>
    %479 = vector.extract_strided_slice %4 {offsets = [3, 0, 0], sizes = [1, 1, 16], strides = [1, 1, 1]} : vector<4x1x16xf32> to vector<1x1x16xf32>
    %480 = vector.shape_cast %479 : vector<1x1x16xf32> to vector<1x16xf32>
    %481 = vector.broadcast %480 : vector<1x16xf32> to vector<2x16xf32>
    %482 = arith.addf %478, %481 : vector<2x16xf32>
    %483 = arith.negf %482 : vector<2x16xf32>
    %484 = math.exp %483 : vector<2x16xf32>
    %cst_124 = arith.constant 1.000000e+00 : f32
    %485 = vector.broadcast %cst_124 : f32 to vector<2x16xf32>
    %486 = arith.addf %485, %484 : vector<2x16xf32>
    %487 = arith.divf %485, %486 : vector<2x16xf32>
    %488 = arith.mulf %459, %422 : vector<2x16xf32>
    %489 = arith.mulf %443, %471 : vector<2x16xf32>
    %490 = arith.addf %488, %489 : vector<2x16xf32>
    %491 = math.tanh %490 : vector<2x16xf32>
    %492 = arith.mulf %487, %491 : vector<2x16xf32>
    %c12 = arith.constant 12 : index
    %c0_125 = arith.constant 0 : index
    %493 = vector.load %arg17[%c12, %c0_125] : memref<16x16xf32, #tpu.memory_space<vmem>>, vector<2x16xf32>
    tpu.vector_store %arg17[%c12, %c0_125], %492 {strides = array<i32>} : memref<16x16xf32, #tpu.memory_space<vmem>>, vector<2x16xf32>,
    %494 = vector.extract_strided_slice %0 {offsets = [7, 0, 0], sizes = [1, 2, 32], strides = [1, 1, 1]} : vector<8x2x32xf32> to vector<1x2x32xf32>
    %495 = vector.shape_cast %494 : vector<1x2x32xf32> to vector<2x32xf32>
    %496 = vector.extract_strided_slice %2 {offsets = [0, 0, 0], sizes = [1, 32, 16], strides = [1, 1, 1]} : vector<4x32x16xf32> to vector<1x32x16xf32>
    %497 = vector.shape_cast %496 : vector<1x32x16xf32> to vector<32x16xf32>
    %cst_126 = arith.constant dense<0.000000e+00> : vector<2x16xf32>
    %498 = tpu.matmul %495, %497, %cst_126 {dimension_numbers = #tpu.dot_dimension_numbers<[1], [0], [0], [1], [0, 0, 1, 1], [], []>} : vector<2x32xf32>, vector<32x16xf32>, vector<2x16xf32> -> vector<2x16xf32>
    %499 = vector.extract_strided_slice %3 {offsets = [0, 0, 0], sizes = [1, 16, 16], strides = [1, 1, 1]} : vector<4x16x16xf32> to vector<1x16x16xf32>
    %500 = vector.shape_cast %499 : vector<1x16x16xf32> to vector<16x16xf32>
    %cst_127 = arith.constant dense<0.000000e+00> : vector<2x16xf32>
    %501 = tpu.matmul %492, %500, %cst_127 {dimension_numbers = #tpu.dot_dimension_numbers<[1], [0], [0], [1], [0, 0, 1, 1], [], []>} : vector<2x16xf32>, vector<16x16xf32>, vector<2x16xf32> -> vector<2x16xf32>
    %502 = arith.addf %498, %501 : vector<2x16xf32>
    %503 = vector.extract_strided_slice %4 {offsets = [0, 0, 0], sizes = [1, 1, 16], strides = [1, 1, 1]} : vector<4x1x16xf32> to vector<1x1x16xf32>
    %504 = vector.shape_cast %503 : vector<1x1x16xf32> to vector<1x16xf32>
    %505 = vector.broadcast %504 : vector<1x16xf32> to vector<2x16xf32>
    %506 = arith.addf %502, %505 : vector<2x16xf32>
    %507 = arith.negf %506 : vector<2x16xf32>
    %508 = math.exp %507 : vector<2x16xf32>
    %cst_128 = arith.constant 1.000000e+00 : f32
    %509 = vector.broadcast %cst_128 : f32 to vector<2x16xf32>
    %510 = arith.addf %509, %508 : vector<2x16xf32>
    %511 = arith.divf %509, %510 : vector<2x16xf32>
    %512 = vector.extract_strided_slice %2 {offsets = [1, 0, 0], sizes = [1, 32, 16], strides = [1, 1, 1]} : vector<4x32x16xf32> to vector<1x32x16xf32>
    %513 = vector.shape_cast %512 : vector<1x32x16xf32> to vector<32x16xf32>
    %cst_129 = arith.constant dense<0.000000e+00> : vector<2x16xf32>
    %514 = tpu.matmul %495, %513, %cst_129 {dimension_numbers = #tpu.dot_dimension_numbers<[1], [0], [0], [1], [0, 0, 1, 1], [], []>} : vector<2x32xf32>, vector<32x16xf32>, vector<2x16xf32> -> vector<2x16xf32>
    %515 = vector.extract_strided_slice %3 {offsets = [1, 0, 0], sizes = [1, 16, 16], strides = [1, 1, 1]} : vector<4x16x16xf32> to vector<1x16x16xf32>
    %516 = vector.shape_cast %515 : vector<1x16x16xf32> to vector<16x16xf32>
    %cst_130 = arith.constant dense<0.000000e+00> : vector<2x16xf32>
    %517 = tpu.matmul %492, %516, %cst_130 {dimension_numbers = #tpu.dot_dimension_numbers<[1], [0], [0], [1], [0, 0, 1, 1], [], []>} : vector<2x16xf32>, vector<16x16xf32>, vector<2x16xf32> -> vector<2x16xf32>
    %518 = arith.addf %514, %517 : vector<2x16xf32>
    %519 = vector.extract_strided_slice %4 {offsets = [1, 0, 0], sizes = [1, 1, 16], strides = [1, 1, 1]} : vector<4x1x16xf32> to vector<1x1x16xf32>
    %520 = vector.shape_cast %519 : vector<1x1x16xf32> to vector<1x16xf32>
    %521 = vector.broadcast %520 : vector<1x16xf32> to vector<2x16xf32>
    %522 = arith.addf %518, %521 : vector<2x16xf32>
    %523 = arith.negf %522 : vector<2x16xf32>
    %524 = math.exp %523 : vector<2x16xf32>
    %cst_131 = arith.constant 1.000000e+00 : f32
    %525 = vector.broadcast %cst_131 : f32 to vector<2x16xf32>
    %526 = arith.addf %525, %524 : vector<2x16xf32>
    %527 = arith.divf %525, %526 : vector<2x16xf32>
    %528 = vector.extract_strided_slice %2 {offsets = [2, 0, 0], sizes = [1, 32, 16], strides = [1, 1, 1]} : vector<4x32x16xf32> to vector<1x32x16xf32>
    %529 = vector.shape_cast %528 : vector<1x32x16xf32> to vector<32x16xf32>
    %cst_132 = arith.constant dense<0.000000e+00> : vector<2x16xf32>
    %530 = tpu.matmul %495, %529, %cst_132 {dimension_numbers = #tpu.dot_dimension_numbers<[1], [0], [0], [1], [0, 0, 1, 1], [], []>} : vector<2x32xf32>, vector<32x16xf32>, vector<2x16xf32> -> vector<2x16xf32>
    %531 = vector.extract_strided_slice %3 {offsets = [2, 0, 0], sizes = [1, 16, 16], strides = [1, 1, 1]} : vector<4x16x16xf32> to vector<1x16x16xf32>
    %532 = vector.shape_cast %531 : vector<1x16x16xf32> to vector<16x16xf32>
    %cst_133 = arith.constant dense<0.000000e+00> : vector<2x16xf32>
    %533 = tpu.matmul %492, %532, %cst_133 {dimension_numbers = #tpu.dot_dimension_numbers<[1], [0], [0], [1], [0, 0, 1, 1], [], []>} : vector<2x16xf32>, vector<16x16xf32>, vector<2x16xf32> -> vector<2x16xf32>
    %534 = arith.addf %530, %533 : vector<2x16xf32>
    %535 = vector.extract_strided_slice %4 {offsets = [2, 0, 0], sizes = [1, 1, 16], strides = [1, 1, 1]} : vector<4x1x16xf32> to vector<1x1x16xf32>
    %536 = vector.shape_cast %535 : vector<1x1x16xf32> to vector<1x16xf32>
    %537 = vector.broadcast %536 : vector<1x16xf32> to vector<2x16xf32>
    %538 = arith.addf %534, %537 : vector<2x16xf32>
    %539 = math.tanh %538 : vector<2x16xf32>
    %540 = vector.extract_strided_slice %2 {offsets = [3, 0, 0], sizes = [1, 32, 16], strides = [1, 1, 1]} : vector<4x32x16xf32> to vector<1x32x16xf32>
    %541 = vector.shape_cast %540 : vector<1x32x16xf32> to vector<32x16xf32>
    %cst_134 = arith.constant dense<0.000000e+00> : vector<2x16xf32>
    %542 = tpu.matmul %495, %541, %cst_134 {dimension_numbers = #tpu.dot_dimension_numbers<[1], [0], [0], [1], [0, 0, 1, 1], [], []>} : vector<2x32xf32>, vector<32x16xf32>, vector<2x16xf32> -> vector<2x16xf32>
    %543 = vector.extract_strided_slice %3 {offsets = [3, 0, 0], sizes = [1, 16, 16], strides = [1, 1, 1]} : vector<4x16x16xf32> to vector<1x16x16xf32>
    %544 = vector.shape_cast %543 : vector<1x16x16xf32> to vector<16x16xf32>
    %cst_135 = arith.constant dense<0.000000e+00> : vector<2x16xf32>
    %545 = tpu.matmul %492, %544, %cst_135 {dimension_numbers = #tpu.dot_dimension_numbers<[1], [0], [0], [1], [0, 0, 1, 1], [], []>} : vector<2x16xf32>, vector<16x16xf32>, vector<2x16xf32> -> vector<2x16xf32>
    %546 = arith.addf %542, %545 : vector<2x16xf32>
    %547 = vector.extract_strided_slice %4 {offsets = [3, 0, 0], sizes = [1, 1, 16], strides = [1, 1, 1]} : vector<4x1x16xf32> to vector<1x1x16xf32>
    %548 = vector.shape_cast %547 : vector<1x1x16xf32> to vector<1x16xf32>
    %549 = vector.broadcast %548 : vector<1x16xf32> to vector<2x16xf32>
    %550 = arith.addf %546, %549 : vector<2x16xf32>
    %551 = arith.negf %550 : vector<2x16xf32>
    %552 = math.exp %551 : vector<2x16xf32>
    %cst_136 = arith.constant 1.000000e+00 : f32
    %553 = vector.broadcast %cst_136 : f32 to vector<2x16xf32>
    %554 = arith.addf %553, %552 : vector<2x16xf32>
    %555 = arith.divf %553, %554 : vector<2x16xf32>
    %556 = arith.mulf %527, %490 : vector<2x16xf32>
    %557 = arith.mulf %511, %539 : vector<2x16xf32>
    %558 = arith.addf %556, %557 : vector<2x16xf32>
    %559 = math.tanh %558 : vector<2x16xf32>
    %560 = arith.mulf %555, %559 : vector<2x16xf32>
    %c14 = arith.constant 14 : index
    %c0_137 = arith.constant 0 : index
    %561 = vector.load %arg17[%c14, %c0_137] : memref<16x16xf32, #tpu.memory_space<vmem>>, vector<2x16xf32>
    tpu.vector_store %arg17[%c14, %c0_137], %560 {strides = array<i32>} : memref<16x16xf32, #tpu.memory_space<vmem>>, vector<2x16xf32>,
    %c0_138 = arith.constant 0 : index
    %c0_139 = arith.constant 0 : index
    %562 = vector.load %arg17[%c0_138, %c0_139] : memref<16x16xf32, #tpu.memory_space<vmem>>, vector<16x16xf32>
    %563 = tpu.iota {dimensions = array<i32: 1>} : vector<2x16xi32>
    %c2_i32 = arith.constant 2 : i32
    %c0_i32 = arith.constant 0 : i32
    %564 = arith.cmpi eq, %c2_i32, %c0_i32 : i32
    %c1_i32 = arith.constant 1 : i32
    %565 = arith.select %564, %c1_i32, %c2_i32 : i32
    %566 = vector.broadcast %565 : i32 to vector<2x16xi32>
    %567 = arith.remsi %563, %566 : vector<2x16xi32>
    %c0_i32_140 = arith.constant 0 : i32
    %568 = vector.broadcast %c0_i32_140 : i32 to vector<2x16xi32>
    %569 = arith.cmpi ne, %567, %568 : vector<2x16xi32>
    %c0_i32_141 = arith.constant 0 : i32
    %570 = vector.broadcast %c0_i32_141 : i32 to vector<2x16xi32>
    %571 = arith.cmpi slt, %567, %570 : vector<2x16xi32>
    %c0_i32_142 = arith.constant 0 : i32
    %572 = arith.cmpi slt, %565, %c0_i32_142 : i32
    %573 = vector.broadcast %572 : i1 to vector<2x16xi1>
    %574 = vector.broadcast %573 : vector<2x16xi1> to vector<2x16xi1>
    %575 = arith.xori %571, %574 : vector<2x16xi1>
    %576 = arith.andi %575, %569 : vector<2x16xi1>
    %577 = vector.broadcast %565 : i32 to vector<2x16xi32>
    %578 = arith.addi %567, %577 : vector<2x16xi32>
    %579 = arith.select %576, %578, %567 : vector<2x16xi1>, vector<2x16xi32>
    %580 = tpu.iota {dimensions = array<i32: 0>} : vector<2x16xi32>
    %581 = arith.cmpi eq, %579, %580 : vector<2x16xi32>
    %cst_143 = arith.constant 0.000000e+00 : f32
    %cst_144 = arith.constant -1.000000e+30 : f32
    %582 = vector.broadcast %cst_143 : f32 to vector<2x16xf32>
    %583 = vector.broadcast %cst_144 : f32 to vector<2x16xf32>
    %584 = arith.select %581, %582, %583 : vector<2x16xi1>, vector<2x16xf32>
    %cst_145 = arith.constant 0.000000e+00 : f32
    %585 = vector.broadcast %cst_145 : f32 to vector<2x32xf32>
    %cst_146 = arith.constant 0.000000e+00 : f32
    %586 = vector.broadcast %cst_146 : f32 to vector<2x32xf32>
    %cst_147 = arith.constant 0.000000e+00 : f32
    %587 = vector.broadcast %cst_147 : f32 to vector<2x32xf32>
    %588 = vector.extract_strided_slice %1 {offsets = [0, 0, 0], sizes = [1, 2, 32], strides = [1, 1, 1]} : vector<8x2x32xf32> to vector<1x2x32xf32>
    %589 = vector.shape_cast %588 : vector<1x2x32xf32> to vector<2x32xf32>
    %590 = vector.extract_strided_slice %5 {offsets = [0, 0, 0], sizes = [1, 32, 32], strides = [1, 1, 1]} : vector<4x32x32xf32> to vector<1x32x32xf32>
    %591 = vector.shape_cast %590 : vector<1x32x32xf32> to vector<32x32xf32>
    %cst_148 = arith.constant dense<0.000000e+00> : vector<2x32xf32>
    %592 = tpu.matmul %589, %591, %cst_148 {dimension_numbers = #tpu.dot_dimension_numbers<[1], [0], [0], [1], [0, 0, 1, 1], [], []>} : vector<2x32xf32>, vector<32x32xf32>, vector<2x32xf32> -> vector<2x32xf32>
    %593 = vector.extract_strided_slice %6 {offsets = [0, 0, 0], sizes = [1, 32, 32], strides = [1, 1, 1]} : vector<4x32x32xf32> to vector<1x32x32xf32>
    %594 = vector.shape_cast %593 : vector<1x32x32xf32> to vector<32x32xf32>
    %cst_149 = arith.constant dense<0.000000e+00> : vector<2x32xf32>
    %595 = tpu.matmul %587, %594, %cst_149 {dimension_numbers = #tpu.dot_dimension_numbers<[1], [0], [0], [1], [0, 0, 1, 1], [], []>} : vector<2x32xf32>, vector<32x32xf32>, vector<2x32xf32> -> vector<2x32xf32>
    %596 = arith.addf %592, %595 : vector<2x32xf32>
    %597 = vector.extract_strided_slice %7 {offsets = [0, 0, 0], sizes = [1, 32, 32], strides = [1, 1, 1]} : vector<4x32x32xf32> to vector<1x32x32xf32>
    %598 = vector.shape_cast %597 : vector<1x32x32xf32> to vector<32x32xf32>
    %cst_150 = arith.constant dense<0.000000e+00> : vector<2x32xf32>
    %599 = tpu.matmul %585, %598, %cst_150 {dimension_numbers = #tpu.dot_dimension_numbers<[1], [0], [0], [1], [0, 0, 1, 1], [], []>} : vector<2x32xf32>, vector<32x32xf32>, vector<2x32xf32> -> vector<2x32xf32>
    %600 = arith.addf %596, %599 : vector<2x32xf32>
    %601 = vector.extract_strided_slice %8 {offsets = [0, 0, 0], sizes = [1, 1, 32], strides = [1, 1, 1]} : vector<4x1x32xf32> to vector<1x1x32xf32>
    %602 = vector.shape_cast %601 : vector<1x1x32xf32> to vector<1x32xf32>
    %603 = vector.broadcast %602 : vector<1x32xf32> to vector<2x32xf32>
    %604 = arith.addf %600, %603 : vector<2x32xf32>
    %605 = arith.negf %604 : vector<2x32xf32>
    %606 = math.exp %605 : vector<2x32xf32>
    %cst_151 = arith.constant 1.000000e+00 : f32
    %607 = vector.broadcast %cst_151 : f32 to vector<2x32xf32>
    %608 = arith.addf %607, %606 : vector<2x32xf32>
    %609 = arith.divf %607, %608 : vector<2x32xf32>
    %610 = vector.extract_strided_slice %5 {offsets = [1, 0, 0], sizes = [1, 32, 32], strides = [1, 1, 1]} : vector<4x32x32xf32> to vector<1x32x32xf32>
    %611 = vector.shape_cast %610 : vector<1x32x32xf32> to vector<32x32xf32>
    %cst_152 = arith.constant dense<0.000000e+00> : vector<2x32xf32>
    %612 = tpu.matmul %589, %611, %cst_152 {dimension_numbers = #tpu.dot_dimension_numbers<[1], [0], [0], [1], [0, 0, 1, 1], [], []>} : vector<2x32xf32>, vector<32x32xf32>, vector<2x32xf32> -> vector<2x32xf32>
    %613 = vector.extract_strided_slice %6 {offsets = [1, 0, 0], sizes = [1, 32, 32], strides = [1, 1, 1]} : vector<4x32x32xf32> to vector<1x32x32xf32>
    %614 = vector.shape_cast %613 : vector<1x32x32xf32> to vector<32x32xf32>
    %cst_153 = arith.constant dense<0.000000e+00> : vector<2x32xf32>
    %615 = tpu.matmul %587, %614, %cst_153 {dimension_numbers = #tpu.dot_dimension_numbers<[1], [0], [0], [1], [0, 0, 1, 1], [], []>} : vector<2x32xf32>, vector<32x32xf32>, vector<2x32xf32> -> vector<2x32xf32>
    %616 = arith.addf %612, %615 : vector<2x32xf32>
    %617 = vector.extract_strided_slice %7 {offsets = [1, 0, 0], sizes = [1, 32, 32], strides = [1, 1, 1]} : vector<4x32x32xf32> to vector<1x32x32xf32>
    %618 = vector.shape_cast %617 : vector<1x32x32xf32> to vector<32x32xf32>
    %cst_154 = arith.constant dense<0.000000e+00> : vector<2x32xf32>
    %619 = tpu.matmul %585, %618, %cst_154 {dimension_numbers = #tpu.dot_dimension_numbers<[1], [0], [0], [1], [0, 0, 1, 1], [], []>} : vector<2x32xf32>, vector<32x32xf32>, vector<2x32xf32> -> vector<2x32xf32>
    %620 = arith.addf %616, %619 : vector<2x32xf32>
    %621 = vector.extract_strided_slice %8 {offsets = [1, 0, 0], sizes = [1, 1, 32], strides = [1, 1, 1]} : vector<4x1x32xf32> to vector<1x1x32xf32>
    %622 = vector.shape_cast %621 : vector<1x1x32xf32> to vector<1x32xf32>
    %623 = vector.broadcast %622 : vector<1x32xf32> to vector<2x32xf32>
    %624 = arith.addf %620, %623 : vector<2x32xf32>
    %625 = arith.negf %624 : vector<2x32xf32>
    %626 = math.exp %625 : vector<2x32xf32>
    %cst_155 = arith.constant 1.000000e+00 : f32
    %627 = vector.broadcast %cst_155 : f32 to vector<2x32xf32>
    %628 = arith.addf %627, %626 : vector<2x32xf32>
    %629 = arith.divf %627, %628 : vector<2x32xf32>
    %630 = vector.extract_strided_slice %5 {offsets = [2, 0, 0], sizes = [1, 32, 32], strides = [1, 1, 1]} : vector<4x32x32xf32> to vector<1x32x32xf32>
    %631 = vector.shape_cast %630 : vector<1x32x32xf32> to vector<32x32xf32>
    %cst_156 = arith.constant dense<0.000000e+00> : vector<2x32xf32>
    %632 = tpu.matmul %589, %631, %cst_156 {dimension_numbers = #tpu.dot_dimension_numbers<[1], [0], [0], [1], [0, 0, 1, 1], [], []>} : vector<2x32xf32>, vector<32x32xf32>, vector<2x32xf32> -> vector<2x32xf32>
    %633 = vector.extract_strided_slice %6 {offsets = [2, 0, 0], sizes = [1, 32, 32], strides = [1, 1, 1]} : vector<4x32x32xf32> to vector<1x32x32xf32>
    %634 = vector.shape_cast %633 : vector<1x32x32xf32> to vector<32x32xf32>
    %cst_157 = arith.constant dense<0.000000e+00> : vector<2x32xf32>
    %635 = tpu.matmul %587, %634, %cst_157 {dimension_numbers = #tpu.dot_dimension_numbers<[1], [0], [0], [1], [0, 0, 1, 1], [], []>} : vector<2x32xf32>, vector<32x32xf32>, vector<2x32xf32> -> vector<2x32xf32>
    %636 = arith.addf %632, %635 : vector<2x32xf32>
    %637 = vector.extract_strided_slice %7 {offsets = [2, 0, 0], sizes = [1, 32, 32], strides = [1, 1, 1]} : vector<4x32x32xf32> to vector<1x32x32xf32>
    %638 = vector.shape_cast %637 : vector<1x32x32xf32> to vector<32x32xf32>
    %cst_158 = arith.constant dense<0.000000e+00> : vector<2x32xf32>
    %639 = tpu.matmul %585, %638, %cst_158 {dimension_numbers = #tpu.dot_dimension_numbers<[1], [0], [0], [1], [0, 0, 1, 1], [], []>} : vector<2x32xf32>, vector<32x32xf32>, vector<2x32xf32> -> vector<2x32xf32>
    %640 = arith.addf %636, %639 : vector<2x32xf32>
    %641 = vector.extract_strided_slice %8 {offsets = [2, 0, 0], sizes = [1, 1, 32], strides = [1, 1, 1]} : vector<4x1x32xf32> to vector<1x1x32xf32>
    %642 = vector.shape_cast %641 : vector<1x1x32xf32> to vector<1x32xf32>
    %643 = vector.broadcast %642 : vector<1x32xf32> to vector<2x32xf32>
    %644 = arith.addf %640, %643 : vector<2x32xf32>
    %645 = math.tanh %644 : vector<2x32xf32>
    %646 = vector.extract_strided_slice %5 {offsets = [3, 0, 0], sizes = [1, 32, 32], strides = [1, 1, 1]} : vector<4x32x32xf32> to vector<1x32x32xf32>
    %647 = vector.shape_cast %646 : vector<1x32x32xf32> to vector<32x32xf32>
    %cst_159 = arith.constant dense<0.000000e+00> : vector<2x32xf32>
    %648 = tpu.matmul %589, %647, %cst_159 {dimension_numbers = #tpu.dot_dimension_numbers<[1], [0], [0], [1], [0, 0, 1, 1], [], []>} : vector<2x32xf32>, vector<32x32xf32>, vector<2x32xf32> -> vector<2x32xf32>
    %649 = vector.extract_strided_slice %6 {offsets = [3, 0, 0], sizes = [1, 32, 32], strides = [1, 1, 1]} : vector<4x32x32xf32> to vector<1x32x32xf32>
    %650 = vector.shape_cast %649 : vector<1x32x32xf32> to vector<32x32xf32>
    %cst_160 = arith.constant dense<0.000000e+00> : vector<2x32xf32>
    %651 = tpu.matmul %587, %650, %cst_160 {dimension_numbers = #tpu.dot_dimension_numbers<[1], [0], [0], [1], [0, 0, 1, 1], [], []>} : vector<2x32xf32>, vector<32x32xf32>, vector<2x32xf32> -> vector<2x32xf32>
    %652 = arith.addf %648, %651 : vector<2x32xf32>
    %653 = vector.extract_strided_slice %7 {offsets = [3, 0, 0], sizes = [1, 32, 32], strides = [1, 1, 1]} : vector<4x32x32xf32> to vector<1x32x32xf32>
    %654 = vector.shape_cast %653 : vector<1x32x32xf32> to vector<32x32xf32>
    %cst_161 = arith.constant dense<0.000000e+00> : vector<2x32xf32>
    %655 = tpu.matmul %585, %654, %cst_161 {dimension_numbers = #tpu.dot_dimension_numbers<[1], [0], [0], [1], [0, 0, 1, 1], [], []>} : vector<2x32xf32>, vector<32x32xf32>, vector<2x32xf32> -> vector<2x32xf32>
    %656 = arith.addf %652, %655 : vector<2x32xf32>
    %657 = vector.extract_strided_slice %8 {offsets = [3, 0, 0], sizes = [1, 1, 32], strides = [1, 1, 1]} : vector<4x1x32xf32> to vector<1x1x32xf32>
    %658 = vector.shape_cast %657 : vector<1x1x32xf32> to vector<1x32xf32>
    %659 = vector.broadcast %658 : vector<1x32xf32> to vector<2x32xf32>
    %660 = arith.addf %656, %659 : vector<2x32xf32>
    %661 = arith.negf %660 : vector<2x32xf32>
    %662 = math.exp %661 : vector<2x32xf32>
    %cst_162 = arith.constant 1.000000e+00 : f32
    %663 = vector.broadcast %cst_162 : f32 to vector<2x32xf32>
    %664 = arith.addf %663, %662 : vector<2x32xf32>
    %665 = arith.divf %663, %664 : vector<2x32xf32>
    %666 = arith.mulf %629, %586 : vector<2x32xf32>
    %667 = arith.mulf %609, %645 : vector<2x32xf32>
    %668 = arith.addf %666, %667 : vector<2x32xf32>
    %669 = math.tanh %668 : vector<2x32xf32>
    %670 = arith.mulf %665, %669 : vector<2x32xf32>
    %cst_163 = arith.constant dense<0.000000e+00> : vector<2x16xf32>
    %671 = tpu.matmul %670, %9, %cst_163 {dimension_numbers = #tpu.dot_dimension_numbers<[1], [0], [0], [1], [0, 0, 1, 1], [], []>} : vector<2x32xf32>, vector<32x16xf32>, vector<2x16xf32> -> vector<2x16xf32>
    %672 = vector.broadcast %10 : vector<1x16xf32> to vector<2x16xf32>
    %673 = arith.addf %671, %672 : vector<2x16xf32>
    %cst_164 = arith.constant dense<0.000000e+00> : vector<2x16xf32>
    %674 = tpu.matmul %673, %562, %cst_164 {dimension_numbers = #tpu.dot_dimension_numbers<[1], [1], [0], [0], [0, 0, 1, 0], [], []>} : vector<2x16xf32>, vector<16x16xf32>, vector<2x16xf32> -> vector<2x16xf32>
    %675 = arith.addf %674, %584 : vector<2x16xf32>
    %cst_165 = arith.constant dense<0xFF800000> : vector<2xf32>
    %676 = vector.multi_reduction <maximumf>, %675, %cst_165 [1] : vector<2x16xf32> to vector<2xf32>
    %677 = vector.shape_cast %676 : vector<2xf32> to vector<2x1xf32>
    %678 = vector.broadcast %677 : vector<2x1xf32> to vector<2x16xf32>
    %679 = arith.subf %675, %678 : vector<2x16xf32>
    %680 = math.exp %679 : vector<2x16xf32>
    %cst_166 = arith.constant dense<0.000000e+00> : vector<2xf32>
    %681 = vector.multi_reduction <add>, %680, %cst_166 [1] : vector<2x16xf32> to vector<2xf32>
    %682 = vector.shape_cast %681 : vector<2xf32> to vector<2x1xf32>
    %683 = tpu.reciprocal %682 {approx = true} : vector<2x1xf32> -> vector<2x1xf32>
    %684 = vector.broadcast %683 : vector<2x1xf32> to vector<2x16xf32>
    %685 = arith.mulf %680, %684 : vector<2x16xf32>
    %cst_167 = arith.constant dense<0.000000e+00> : vector<2x16xf32>
    %686 = tpu.matmul %685, %562, %cst_167 {dimension_numbers = #tpu.dot_dimension_numbers<[1], [0], [0], [1], [0, 0, 1, 1], [], []>} : vector<2x16xf32>, vector<16x16xf32>, vector<2x16xf32> -> vector<2x16xf32>
    %cst_168 = arith.constant dense<0.000000e+00> : vector<2x32xf32>
    %687 = tpu.matmul %686, %11, %cst_168 {dimension_numbers = #tpu.dot_dimension_numbers<[1], [0], [0], [1], [0, 0, 1, 1], [], []>} : vector<2x16xf32>, vector<16x32xf32>, vector<2x32xf32> -> vector<2x32xf32>
    %cst_169 = arith.constant dense<0.000000e+00> : vector<2x32xf32>
    %688 = tpu.matmul %670, %12, %cst_169 {dimension_numbers = #tpu.dot_dimension_numbers<[1], [0], [0], [1], [0, 0, 1, 1], [], []>} : vector<2x32xf32>, vector<32x32xf32>, vector<2x32xf32> -> vector<2x32xf32>
    %689 = arith.addf %687, %688 : vector<2x32xf32>
    %690 = vector.broadcast %13 : vector<1x32xf32> to vector<2x32xf32>
    %691 = arith.addf %689, %690 : vector<2x32xf32>
    %692 = math.tanh %691 : vector<2x32xf32>
    %c0_170 = arith.constant 0 : index
    %c0_171 = arith.constant 0 : index
    %693 = vector.load %arg18[%c0_170, %c0_171] : memref<16x32xf32, #tpu.memory_space<vmem>>, vector<2x32xf32>
    tpu.vector_store %arg18[%c0_170, %c0_171], %692 {strides = array<i32>} : memref<16x32xf32, #tpu.memory_space<vmem>>, vector<2x32xf32>,
    %694 = vector.extract_strided_slice %1 {offsets = [1, 0, 0], sizes = [1, 2, 32], strides = [1, 1, 1]} : vector<8x2x32xf32> to vector<1x2x32xf32>
    %695 = vector.shape_cast %694 : vector<1x2x32xf32> to vector<2x32xf32>
    %696 = vector.extract_strided_slice %5 {offsets = [0, 0, 0], sizes = [1, 32, 32], strides = [1, 1, 1]} : vector<4x32x32xf32> to vector<1x32x32xf32>
    %697 = vector.shape_cast %696 : vector<1x32x32xf32> to vector<32x32xf32>
    %cst_172 = arith.constant dense<0.000000e+00> : vector<2x32xf32>
    %698 = tpu.matmul %695, %697, %cst_172 {dimension_numbers = #tpu.dot_dimension_numbers<[1], [0], [0], [1], [0, 0, 1, 1], [], []>} : vector<2x32xf32>, vector<32x32xf32>, vector<2x32xf32> -> vector<2x32xf32>
    %699 = vector.extract_strided_slice %6 {offsets = [0, 0, 0], sizes = [1, 32, 32], strides = [1, 1, 1]} : vector<4x32x32xf32> to vector<1x32x32xf32>
    %700 = vector.shape_cast %699 : vector<1x32x32xf32> to vector<32x32xf32>
    %cst_173 = arith.constant dense<0.000000e+00> : vector<2x32xf32>
    %701 = tpu.matmul %692, %700, %cst_173 {dimension_numbers = #tpu.dot_dimension_numbers<[1], [0], [0], [1], [0, 0, 1, 1], [], []>} : vector<2x32xf32>, vector<32x32xf32>, vector<2x32xf32> -> vector<2x32xf32>
    %702 = arith.addf %698, %701 : vector<2x32xf32>
    %703 = vector.extract_strided_slice %7 {offsets = [0, 0, 0], sizes = [1, 32, 32], strides = [1, 1, 1]} : vector<4x32x32xf32> to vector<1x32x32xf32>
    %704 = vector.shape_cast %703 : vector<1x32x32xf32> to vector<32x32xf32>
    %cst_174 = arith.constant dense<0.000000e+00> : vector<2x32xf32>
    %705 = tpu.matmul %670, %704, %cst_174 {dimension_numbers = #tpu.dot_dimension_numbers<[1], [0], [0], [1], [0, 0, 1, 1], [], []>} : vector<2x32xf32>, vector<32x32xf32>, vector<2x32xf32> -> vector<2x32xf32>
    %706 = arith.addf %702, %705 : vector<2x32xf32>
    %707 = vector.extract_strided_slice %8 {offsets = [0, 0, 0], sizes = [1, 1, 32], strides = [1, 1, 1]} : vector<4x1x32xf32> to vector<1x1x32xf32>
    %708 = vector.shape_cast %707 : vector<1x1x32xf32> to vector<1x32xf32>
    %709 = vector.broadcast %708 : vector<1x32xf32> to vector<2x32xf32>
    %710 = arith.addf %706, %709 : vector<2x32xf32>
    %711 = arith.negf %710 : vector<2x32xf32>
    %712 = math.exp %711 : vector<2x32xf32>
    %cst_175 = arith.constant 1.000000e+00 : f32
    %713 = vector.broadcast %cst_175 : f32 to vector<2x32xf32>
    %714 = arith.addf %713, %712 : vector<2x32xf32>
    %715 = arith.divf %713, %714 : vector<2x32xf32>
    %716 = vector.extract_strided_slice %5 {offsets = [1, 0, 0], sizes = [1, 32, 32], strides = [1, 1, 1]} : vector<4x32x32xf32> to vector<1x32x32xf32>
    %717 = vector.shape_cast %716 : vector<1x32x32xf32> to vector<32x32xf32>
    %cst_176 = arith.constant dense<0.000000e+00> : vector<2x32xf32>
    %718 = tpu.matmul %695, %717, %cst_176 {dimension_numbers = #tpu.dot_dimension_numbers<[1], [0], [0], [1], [0, 0, 1, 1], [], []>} : vector<2x32xf32>, vector<32x32xf32>, vector<2x32xf32> -> vector<2x32xf32>
    %719 = vector.extract_strided_slice %6 {offsets = [1, 0, 0], sizes = [1, 32, 32], strides = [1, 1, 1]} : vector<4x32x32xf32> to vector<1x32x32xf32>
    %720 = vector.shape_cast %719 : vector<1x32x32xf32> to vector<32x32xf32>
    %cst_177 = arith.constant dense<0.000000e+00> : vector<2x32xf32>
    %721 = tpu.matmul %692, %720, %cst_177 {dimension_numbers = #tpu.dot_dimension_numbers<[1], [0], [0], [1], [0, 0, 1, 1], [], []>} : vector<2x32xf32>, vector<32x32xf32>, vector<2x32xf32> -> vector<2x32xf32>
    %722 = arith.addf %718, %721 : vector<2x32xf32>
    %723 = vector.extract_strided_slice %7 {offsets = [1, 0, 0], sizes = [1, 32, 32], strides = [1, 1, 1]} : vector<4x32x32xf32> to vector<1x32x32xf32>
    %724 = vector.shape_cast %723 : vector<1x32x32xf32> to vector<32x32xf32>
    %cst_178 = arith.constant dense<0.000000e+00> : vector<2x32xf32>
    %725 = tpu.matmul %670, %724, %cst_178 {dimension_numbers = #tpu.dot_dimension_numbers<[1], [0], [0], [1], [0, 0, 1, 1], [], []>} : vector<2x32xf32>, vector<32x32xf32>, vector<2x32xf32> -> vector<2x32xf32>
    %726 = arith.addf %722, %725 : vector<2x32xf32>
    %727 = vector.extract_strided_slice %8 {offsets = [1, 0, 0], sizes = [1, 1, 32], strides = [1, 1, 1]} : vector<4x1x32xf32> to vector<1x1x32xf32>
    %728 = vector.shape_cast %727 : vector<1x1x32xf32> to vector<1x32xf32>
    %729 = vector.broadcast %728 : vector<1x32xf32> to vector<2x32xf32>
    %730 = arith.addf %726, %729 : vector<2x32xf32>
    %731 = arith.negf %730 : vector<2x32xf32>
    %732 = math.exp %731 : vector<2x32xf32>
    %cst_179 = arith.constant 1.000000e+00 : f32
    %733 = vector.broadcast %cst_179 : f32 to vector<2x32xf32>
    %734 = arith.addf %733, %732 : vector<2x32xf32>
    %735 = arith.divf %733, %734 : vector<2x32xf32>
    %736 = vector.extract_strided_slice %5 {offsets = [2, 0, 0], sizes = [1, 32, 32], strides = [1, 1, 1]} : vector<4x32x32xf32> to vector<1x32x32xf32>
    %737 = vector.shape_cast %736 : vector<1x32x32xf32> to vector<32x32xf32>
    %cst_180 = arith.constant dense<0.000000e+00> : vector<2x32xf32>
    %738 = tpu.matmul %695, %737, %cst_180 {dimension_numbers = #tpu.dot_dimension_numbers<[1], [0], [0], [1], [0, 0, 1, 1], [], []>} : vector<2x32xf32>, vector<32x32xf32>, vector<2x32xf32> -> vector<2x32xf32>
    %739 = vector.extract_strided_slice %6 {offsets = [2, 0, 0], sizes = [1, 32, 32], strides = [1, 1, 1]} : vector<4x32x32xf32> to vector<1x32x32xf32>
    %740 = vector.shape_cast %739 : vector<1x32x32xf32> to vector<32x32xf32>
    %cst_181 = arith.constant dense<0.000000e+00> : vector<2x32xf32>
    %741 = tpu.matmul %692, %740, %cst_181 {dimension_numbers = #tpu.dot_dimension_numbers<[1], [0], [0], [1], [0, 0, 1, 1], [], []>} : vector<2x32xf32>, vector<32x32xf32>, vector<2x32xf32> -> vector<2x32xf32>
    %742 = arith.addf %738, %741 : vector<2x32xf32>
    %743 = vector.extract_strided_slice %7 {offsets = [2, 0, 0], sizes = [1, 32, 32], strides = [1, 1, 1]} : vector<4x32x32xf32> to vector<1x32x32xf32>
    %744 = vector.shape_cast %743 : vector<1x32x32xf32> to vector<32x32xf32>
    %cst_182 = arith.constant dense<0.000000e+00> : vector<2x32xf32>
    %745 = tpu.matmul %670, %744, %cst_182 {dimension_numbers = #tpu.dot_dimension_numbers<[1], [0], [0], [1], [0, 0, 1, 1], [], []>} : vector<2x32xf32>, vector<32x32xf32>, vector<2x32xf32> -> vector<2x32xf32>
    %746 = arith.addf %742, %745 : vector<2x32xf32>
    %747 = vector.extract_strided_slice %8 {offsets = [2, 0, 0], sizes = [1, 1, 32], strides = [1, 1, 1]} : vector<4x1x32xf32> to vector<1x1x32xf32>
    %748 = vector.shape_cast %747 : vector<1x1x32xf32> to vector<1x32xf32>
    %749 = vector.broadcast %748 : vector<1x32xf32> to vector<2x32xf32>
    %750 = arith.addf %746, %749 : vector<2x32xf32>
    %751 = math.tanh %750 : vector<2x32xf32>
    %752 = vector.extract_strided_slice %5 {offsets = [3, 0, 0], sizes = [1, 32, 32], strides = [1, 1, 1]} : vector<4x32x32xf32> to vector<1x32x32xf32>
    %753 = vector.shape_cast %752 : vector<1x32x32xf32> to vector<32x32xf32>
    %cst_183 = arith.constant dense<0.000000e+00> : vector<2x32xf32>
    %754 = tpu.matmul %695, %753, %cst_183 {dimension_numbers = #tpu.dot_dimension_numbers<[1], [0], [0], [1], [0, 0, 1, 1], [], []>} : vector<2x32xf32>, vector<32x32xf32>, vector<2x32xf32> -> vector<2x32xf32>
    %755 = vector.extract_strided_slice %6 {offsets = [3, 0, 0], sizes = [1, 32, 32], strides = [1, 1, 1]} : vector<4x32x32xf32> to vector<1x32x32xf32>
    %756 = vector.shape_cast %755 : vector<1x32x32xf32> to vector<32x32xf32>
    %cst_184 = arith.constant dense<0.000000e+00> : vector<2x32xf32>
    %757 = tpu.matmul %692, %756, %cst_184 {dimension_numbers = #tpu.dot_dimension_numbers<[1], [0], [0], [1], [0, 0, 1, 1], [], []>} : vector<2x32xf32>, vector<32x32xf32>, vector<2x32xf32> -> vector<2x32xf32>
    %758 = arith.addf %754, %757 : vector<2x32xf32>
    %759 = vector.extract_strided_slice %7 {offsets = [3, 0, 0], sizes = [1, 32, 32], strides = [1, 1, 1]} : vector<4x32x32xf32> to vector<1x32x32xf32>
    %760 = vector.shape_cast %759 : vector<1x32x32xf32> to vector<32x32xf32>
    %cst_185 = arith.constant dense<0.000000e+00> : vector<2x32xf32>
    %761 = tpu.matmul %670, %760, %cst_185 {dimension_numbers = #tpu.dot_dimension_numbers<[1], [0], [0], [1], [0, 0, 1, 1], [], []>} : vector<2x32xf32>, vector<32x32xf32>, vector<2x32xf32> -> vector<2x32xf32>
    %762 = arith.addf %758, %761 : vector<2x32xf32>
    %763 = vector.extract_strided_slice %8 {offsets = [3, 0, 0], sizes = [1, 1, 32], strides = [1, 1, 1]} : vector<4x1x32xf32> to vector<1x1x32xf32>
    %764 = vector.shape_cast %763 : vector<1x1x32xf32> to vector<1x32xf32>
    %765 = vector.broadcast %764 : vector<1x32xf32> to vector<2x32xf32>
    %766 = arith.addf %762, %765 : vector<2x32xf32>
    %767 = arith.negf %766 : vector<2x32xf32>
    %768 = math.exp %767 : vector<2x32xf32>
    %cst_186 = arith.constant 1.000000e+00 : f32
    %769 = vector.broadcast %cst_186 : f32 to vector<2x32xf32>
    %770 = arith.addf %769, %768 : vector<2x32xf32>
    %771 = arith.divf %769, %770 : vector<2x32xf32>
    %772 = arith.mulf %735, %668 : vector<2x32xf32>
    %773 = arith.mulf %715, %751 : vector<2x32xf32>
    %774 = arith.addf %772, %773 : vector<2x32xf32>
    %775 = math.tanh %774 : vector<2x32xf32>
    %776 = arith.mulf %771, %775 : vector<2x32xf32>
    %cst_187 = arith.constant dense<0.000000e+00> : vector<2x16xf32>
    %777 = tpu.matmul %776, %9, %cst_187 {dimension_numbers = #tpu.dot_dimension_numbers<[1], [0], [0], [1], [0, 0, 1, 1], [], []>} : vector<2x32xf32>, vector<32x16xf32>, vector<2x16xf32> -> vector<2x16xf32>
    %778 = vector.broadcast %10 : vector<1x16xf32> to vector<2x16xf32>
    %779 = arith.addf %777, %778 : vector<2x16xf32>
    %cst_188 = arith.constant dense<0.000000e+00> : vector<2x16xf32>
    %780 = tpu.matmul %779, %562, %cst_188 {dimension_numbers = #tpu.dot_dimension_numbers<[1], [1], [0], [0], [0, 0, 1, 0], [], []>} : vector<2x16xf32>, vector<16x16xf32>, vector<2x16xf32> -> vector<2x16xf32>
    %781 = arith.addf %780, %584 : vector<2x16xf32>
    %cst_189 = arith.constant dense<0xFF800000> : vector<2xf32>
    %782 = vector.multi_reduction <maximumf>, %781, %cst_189 [1] : vector<2x16xf32> to vector<2xf32>
    %783 = vector.shape_cast %782 : vector<2xf32> to vector<2x1xf32>
    %784 = vector.broadcast %783 : vector<2x1xf32> to vector<2x16xf32>
    %785 = arith.subf %781, %784 : vector<2x16xf32>
    %786 = math.exp %785 : vector<2x16xf32>
    %cst_190 = arith.constant dense<0.000000e+00> : vector<2xf32>
    %787 = vector.multi_reduction <add>, %786, %cst_190 [1] : vector<2x16xf32> to vector<2xf32>
    %788 = vector.shape_cast %787 : vector<2xf32> to vector<2x1xf32>
    %789 = tpu.reciprocal %788 {approx = true} : vector<2x1xf32> -> vector<2x1xf32>
    %790 = vector.broadcast %789 : vector<2x1xf32> to vector<2x16xf32>
    %791 = arith.mulf %786, %790 : vector<2x16xf32>
    %cst_191 = arith.constant dense<0.000000e+00> : vector<2x16xf32>
    %792 = tpu.matmul %791, %562, %cst_191 {dimension_numbers = #tpu.dot_dimension_numbers<[1], [0], [0], [1], [0, 0, 1, 1], [], []>} : vector<2x16xf32>, vector<16x16xf32>, vector<2x16xf32> -> vector<2x16xf32>
    %cst_192 = arith.constant dense<0.000000e+00> : vector<2x32xf32>
    %793 = tpu.matmul %792, %11, %cst_192 {dimension_numbers = #tpu.dot_dimension_numbers<[1], [0], [0], [1], [0, 0, 1, 1], [], []>} : vector<2x16xf32>, vector<16x32xf32>, vector<2x32xf32> -> vector<2x32xf32>
    %cst_193 = arith.constant dense<0.000000e+00> : vector<2x32xf32>
    %794 = tpu.matmul %776, %12, %cst_193 {dimension_numbers = #tpu.dot_dimension_numbers<[1], [0], [0], [1], [0, 0, 1, 1], [], []>} : vector<2x32xf32>, vector<32x32xf32>, vector<2x32xf32> -> vector<2x32xf32>
    %795 = arith.addf %793, %794 : vector<2x32xf32>
    %796 = vector.broadcast %13 : vector<1x32xf32> to vector<2x32xf32>
    %797 = arith.addf %795, %796 : vector<2x32xf32>
    %798 = math.tanh %797 : vector<2x32xf32>
    %c2_194 = arith.constant 2 : index
    %c0_195 = arith.constant 0 : index
    %799 = vector.load %arg18[%c2_194, %c0_195] : memref<16x32xf32, #tpu.memory_space<vmem>>, vector<2x32xf32>
    tpu.vector_store %arg18[%c2_194, %c0_195], %798 {strides = array<i32>} : memref<16x32xf32, #tpu.memory_space<vmem>>, vector<2x32xf32>,
    %800 = vector.extract_strided_slice %1 {offsets = [2, 0, 0], sizes = [1, 2, 32], strides = [1, 1, 1]} : vector<8x2x32xf32> to vector<1x2x32xf32>
    %801 = vector.shape_cast %800 : vector<1x2x32xf32> to vector<2x32xf32>
    %802 = vector.extract_strided_slice %5 {offsets = [0, 0, 0], sizes = [1, 32, 32], strides = [1, 1, 1]} : vector<4x32x32xf32> to vector<1x32x32xf32>
    %803 = vector.shape_cast %802 : vector<1x32x32xf32> to vector<32x32xf32>
    %cst_196 = arith.constant dense<0.000000e+00> : vector<2x32xf32>
    %804 = tpu.matmul %801, %803, %cst_196 {dimension_numbers = #tpu.dot_dimension_numbers<[1], [0], [0], [1], [0, 0, 1, 1], [], []>} : vector<2x32xf32>, vector<32x32xf32>, vector<2x32xf32> -> vector<2x32xf32>
    %805 = vector.extract_strided_slice %6 {offsets = [0, 0, 0], sizes = [1, 32, 32], strides = [1, 1, 1]} : vector<4x32x32xf32> to vector<1x32x32xf32>
    %806 = vector.shape_cast %805 : vector<1x32x32xf32> to vector<32x32xf32>
    %cst_197 = arith.constant dense<0.000000e+00> : vector<2x32xf32>
    %807 = tpu.matmul %798, %806, %cst_197 {dimension_numbers = #tpu.dot_dimension_numbers<[1], [0], [0], [1], [0, 0, 1, 1], [], []>} : vector<2x32xf32>, vector<32x32xf32>, vector<2x32xf32> -> vector<2x32xf32>
    %808 = arith.addf %804, %807 : vector<2x32xf32>
    %809 = vector.extract_strided_slice %7 {offsets = [0, 0, 0], sizes = [1, 32, 32], strides = [1, 1, 1]} : vector<4x32x32xf32> to vector<1x32x32xf32>
    %810 = vector.shape_cast %809 : vector<1x32x32xf32> to vector<32x32xf32>
    %cst_198 = arith.constant dense<0.000000e+00> : vector<2x32xf32>
    %811 = tpu.matmul %776, %810, %cst_198 {dimension_numbers = #tpu.dot_dimension_numbers<[1], [0], [0], [1], [0, 0, 1, 1], [], []>} : vector<2x32xf32>, vector<32x32xf32>, vector<2x32xf32> -> vector<2x32xf32>
    %812 = arith.addf %808, %811 : vector<2x32xf32>
    %813 = vector.extract_strided_slice %8 {offsets = [0, 0, 0], sizes = [1, 1, 32], strides = [1, 1, 1]} : vector<4x1x32xf32> to vector<1x1x32xf32>
    %814 = vector.shape_cast %813 : vector<1x1x32xf32> to vector<1x32xf32>
    %815 = vector.broadcast %814 : vector<1x32xf32> to vector<2x32xf32>
    %816 = arith.addf %812, %815 : vector<2x32xf32>
    %817 = arith.negf %816 : vector<2x32xf32>
    %818 = math.exp %817 : vector<2x32xf32>
    %cst_199 = arith.constant 1.000000e+00 : f32
    %819 = vector.broadcast %cst_199 : f32 to vector<2x32xf32>
    %820 = arith.addf %819, %818 : vector<2x32xf32>
    %821 = arith.divf %819, %820 : vector<2x32xf32>
    %822 = vector.extract_strided_slice %5 {offsets = [1, 0, 0], sizes = [1, 32, 32], strides = [1, 1, 1]} : vector<4x32x32xf32> to vector<1x32x32xf32>
    %823 = vector.shape_cast %822 : vector<1x32x32xf32> to vector<32x32xf32>
    %cst_200 = arith.constant dense<0.000000e+00> : vector<2x32xf32>
    %824 = tpu.matmul %801, %823, %cst_200 {dimension_numbers = #tpu.dot_dimension_numbers<[1], [0], [0], [1], [0, 0, 1, 1], [], []>} : vector<2x32xf32>, vector<32x32xf32>, vector<2x32xf32> -> vector<2x32xf32>
    %825 = vector.extract_strided_slice %6 {offsets = [1, 0, 0], sizes = [1, 32, 32], strides = [1, 1, 1]} : vector<4x32x32xf32> to vector<1x32x32xf32>
    %826 = vector.shape_cast %825 : vector<1x32x32xf32> to vector<32x32xf32>
    %cst_201 = arith.constant dense<0.000000e+00> : vector<2x32xf32>
    %827 = tpu.matmul %798, %826, %cst_201 {dimension_numbers = #tpu.dot_dimension_numbers<[1], [0], [0], [1], [0, 0, 1, 1], [], []>} : vector<2x32xf32>, vector<32x32xf32>, vector<2x32xf32> -> vector<2x32xf32>
    %828 = arith.addf %824, %827 : vector<2x32xf32>
    %829 = vector.extract_strided_slice %7 {offsets = [1, 0, 0], sizes = [1, 32, 32], strides = [1, 1, 1]} : vector<4x32x32xf32> to vector<1x32x32xf32>
    %830 = vector.shape_cast %829 : vector<1x32x32xf32> to vector<32x32xf32>
    %cst_202 = arith.constant dense<0.000000e+00> : vector<2x32xf32>
    %831 = tpu.matmul %776, %830, %cst_202 {dimension_numbers = #tpu.dot_dimension_numbers<[1], [0], [0], [1], [0, 0, 1, 1], [], []>} : vector<2x32xf32>, vector<32x32xf32>, vector<2x32xf32> -> vector<2x32xf32>
    %832 = arith.addf %828, %831 : vector<2x32xf32>
    %833 = vector.extract_strided_slice %8 {offsets = [1, 0, 0], sizes = [1, 1, 32], strides = [1, 1, 1]} : vector<4x1x32xf32> to vector<1x1x32xf32>
    %834 = vector.shape_cast %833 : vector<1x1x32xf32> to vector<1x32xf32>
    %835 = vector.broadcast %834 : vector<1x32xf32> to vector<2x32xf32>
    %836 = arith.addf %832, %835 : vector<2x32xf32>
    %837 = arith.negf %836 : vector<2x32xf32>
    %838 = math.exp %837 : vector<2x32xf32>
    %cst_203 = arith.constant 1.000000e+00 : f32
    %839 = vector.broadcast %cst_203 : f32 to vector<2x32xf32>
    %840 = arith.addf %839, %838 : vector<2x32xf32>
    %841 = arith.divf %839, %840 : vector<2x32xf32>
    %842 = vector.extract_strided_slice %5 {offsets = [2, 0, 0], sizes = [1, 32, 32], strides = [1, 1, 1]} : vector<4x32x32xf32> to vector<1x32x32xf32>
    %843 = vector.shape_cast %842 : vector<1x32x32xf32> to vector<32x32xf32>
    %cst_204 = arith.constant dense<0.000000e+00> : vector<2x32xf32>
    %844 = tpu.matmul %801, %843, %cst_204 {dimension_numbers = #tpu.dot_dimension_numbers<[1], [0], [0], [1], [0, 0, 1, 1], [], []>} : vector<2x32xf32>, vector<32x32xf32>, vector<2x32xf32> -> vector<2x32xf32>
    %845 = vector.extract_strided_slice %6 {offsets = [2, 0, 0], sizes = [1, 32, 32], strides = [1, 1, 1]} : vector<4x32x32xf32> to vector<1x32x32xf32>
    %846 = vector.shape_cast %845 : vector<1x32x32xf32> to vector<32x32xf32>
    %cst_205 = arith.constant dense<0.000000e+00> : vector<2x32xf32>
    %847 = tpu.matmul %798, %846, %cst_205 {dimension_numbers = #tpu.dot_dimension_numbers<[1], [0], [0], [1], [0, 0, 1, 1], [], []>} : vector<2x32xf32>, vector<32x32xf32>, vector<2x32xf32> -> vector<2x32xf32>
    %848 = arith.addf %844, %847 : vector<2x32xf32>
    %849 = vector.extract_strided_slice %7 {offsets = [2, 0, 0], sizes = [1, 32, 32], strides = [1, 1, 1]} : vector<4x32x32xf32> to vector<1x32x32xf32>
    %850 = vector.shape_cast %849 : vector<1x32x32xf32> to vector<32x32xf32>
    %cst_206 = arith.constant dense<0.000000e+00> : vector<2x32xf32>
    %851 = tpu.matmul %776, %850, %cst_206 {dimension_numbers = #tpu.dot_dimension_numbers<[1], [0], [0], [1], [0, 0, 1, 1], [], []>} : vector<2x32xf32>, vector<32x32xf32>, vector<2x32xf32> -> vector<2x32xf32>
    %852 = arith.addf %848, %851 : vector<2x32xf32>
    %853 = vector.extract_strided_slice %8 {offsets = [2, 0, 0], sizes = [1, 1, 32], strides = [1, 1, 1]} : vector<4x1x32xf32> to vector<1x1x32xf32>
    %854 = vector.shape_cast %853 : vector<1x1x32xf32> to vector<1x32xf32>
    %855 = vector.broadcast %854 : vector<1x32xf32> to vector<2x32xf32>
    %856 = arith.addf %852, %855 : vector<2x32xf32>
    %857 = math.tanh %856 : vector<2x32xf32>
    %858 = vector.extract_strided_slice %5 {offsets = [3, 0, 0], sizes = [1, 32, 32], strides = [1, 1, 1]} : vector<4x32x32xf32> to vector<1x32x32xf32>
    %859 = vector.shape_cast %858 : vector<1x32x32xf32> to vector<32x32xf32>
    %cst_207 = arith.constant dense<0.000000e+00> : vector<2x32xf32>
    %860 = tpu.matmul %801, %859, %cst_207 {dimension_numbers = #tpu.dot_dimension_numbers<[1], [0], [0], [1], [0, 0, 1, 1], [], []>} : vector<2x32xf32>, vector<32x32xf32>, vector<2x32xf32> -> vector<2x32xf32>
    %861 = vector.extract_strided_slice %6 {offsets = [3, 0, 0], sizes = [1, 32, 32], strides = [1, 1, 1]} : vector<4x32x32xf32> to vector<1x32x32xf32>
    %862 = vector.shape_cast %861 : vector<1x32x32xf32> to vector<32x32xf32>
    %cst_208 = arith.constant dense<0.000000e+00> : vector<2x32xf32>
    %863 = tpu.matmul %798, %862, %cst_208 {dimension_numbers = #tpu.dot_dimension_numbers<[1], [0], [0], [1], [0, 0, 1, 1], [], []>} : vector<2x32xf32>, vector<32x32xf32>, vector<2x32xf32> -> vector<2x32xf32>
    %864 = arith.addf %860, %863 : vector<2x32xf32>
    %865 = vector.extract_strided_slice %7 {offsets = [3, 0, 0], sizes = [1, 32, 32], strides = [1, 1, 1]} : vector<4x32x32xf32> to vector<1x32x32xf32>
    %866 = vector.shape_cast %865 : vector<1x32x32xf32> to vector<32x32xf32>
    %cst_209 = arith.constant dense<0.000000e+00> : vector<2x32xf32>
    %867 = tpu.matmul %776, %866, %cst_209 {dimension_numbers = #tpu.dot_dimension_numbers<[1], [0], [0], [1], [0, 0, 1, 1], [], []>} : vector<2x32xf32>, vector<32x32xf32>, vector<2x32xf32> -> vector<2x32xf32>
    %868 = arith.addf %864, %867 : vector<2x32xf32>
    %869 = vector.extract_strided_slice %8 {offsets = [3, 0, 0], sizes = [1, 1, 32], strides = [1, 1, 1]} : vector<4x1x32xf32> to vector<1x1x32xf32>
    %870 = vector.shape_cast %869 : vector<1x1x32xf32> to vector<1x32xf32>
    %871 = vector.broadcast %870 : vector<1x32xf32> to vector<2x32xf32>
    %872 = arith.addf %868, %871 : vector<2x32xf32>
    %873 = arith.negf %872 : vector<2x32xf32>
    %874 = math.exp %873 : vector<2x32xf32>
    %cst_210 = arith.constant 1.000000e+00 : f32
    %875 = vector.broadcast %cst_210 : f32 to vector<2x32xf32>
    %876 = arith.addf %875, %874 : vector<2x32xf32>
    %877 = arith.divf %875, %876 : vector<2x32xf32>
    %878 = arith.mulf %841, %774 : vector<2x32xf32>
    %879 = arith.mulf %821, %857 : vector<2x32xf32>
    %880 = arith.addf %878, %879 : vector<2x32xf32>
    %881 = math.tanh %880 : vector<2x32xf32>
    %882 = arith.mulf %877, %881 : vector<2x32xf32>
    %cst_211 = arith.constant dense<0.000000e+00> : vector<2x16xf32>
    %883 = tpu.matmul %882, %9, %cst_211 {dimension_numbers = #tpu.dot_dimension_numbers<[1], [0], [0], [1], [0, 0, 1, 1], [], []>} : vector<2x32xf32>, vector<32x16xf32>, vector<2x16xf32> -> vector<2x16xf32>
    %884 = vector.broadcast %10 : vector<1x16xf32> to vector<2x16xf32>
    %885 = arith.addf %883, %884 : vector<2x16xf32>
    %cst_212 = arith.constant dense<0.000000e+00> : vector<2x16xf32>
    %886 = tpu.matmul %885, %562, %cst_212 {dimension_numbers = #tpu.dot_dimension_numbers<[1], [1], [0], [0], [0, 0, 1, 0], [], []>} : vector<2x16xf32>, vector<16x16xf32>, vector<2x16xf32> -> vector<2x16xf32>
    %887 = arith.addf %886, %584 : vector<2x16xf32>
    %cst_213 = arith.constant dense<0xFF800000> : vector<2xf32>
    %888 = vector.multi_reduction <maximumf>, %887, %cst_213 [1] : vector<2x16xf32> to vector<2xf32>
    %889 = vector.shape_cast %888 : vector<2xf32> to vector<2x1xf32>
    %890 = vector.broadcast %889 : vector<2x1xf32> to vector<2x16xf32>
    %891 = arith.subf %887, %890 : vector<2x16xf32>
    %892 = math.exp %891 : vector<2x16xf32>
    %cst_214 = arith.constant dense<0.000000e+00> : vector<2xf32>
    %893 = vector.multi_reduction <add>, %892, %cst_214 [1] : vector<2x16xf32> to vector<2xf32>
    %894 = vector.shape_cast %893 : vector<2xf32> to vector<2x1xf32>
    %895 = tpu.reciprocal %894 {approx = true} : vector<2x1xf32> -> vector<2x1xf32>
    %896 = vector.broadcast %895 : vector<2x1xf32> to vector<2x16xf32>
    %897 = arith.mulf %892, %896 : vector<2x16xf32>
    %cst_215 = arith.constant dense<0.000000e+00> : vector<2x16xf32>
    %898 = tpu.matmul %897, %562, %cst_215 {dimension_numbers = #tpu.dot_dimension_numbers<[1], [0], [0], [1], [0, 0, 1, 1], [], []>} : vector<2x16xf32>, vector<16x16xf32>, vector<2x16xf32> -> vector<2x16xf32>
    %cst_216 = arith.constant dense<0.000000e+00> : vector<2x32xf32>
    %899 = tpu.matmul %898, %11, %cst_216 {dimension_numbers = #tpu.dot_dimension_numbers<[1], [0], [0], [1], [0, 0, 1, 1], [], []>} : vector<2x16xf32>, vector<16x32xf32>, vector<2x32xf32> -> vector<2x32xf32>
    %cst_217 = arith.constant dense<0.000000e+00> : vector<2x32xf32>
    %900 = tpu.matmul %882, %12, %cst_217 {dimension_numbers = #tpu.dot_dimension_numbers<[1], [0], [0], [1], [0, 0, 1, 1], [], []>} : vector<2x32xf32>, vector<32x32xf32>, vector<2x32xf32> -> vector<2x32xf32>
    %901 = arith.addf %899, %900 : vector<2x32xf32>
    %902 = vector.broadcast %13 : vector<1x32xf32> to vector<2x32xf32>
    %903 = arith.addf %901, %902 : vector<2x32xf32>
    %904 = math.tanh %903 : vector<2x32xf32>
    %c4_218 = arith.constant 4 : index
    %c0_219 = arith.constant 0 : index
    %905 = vector.load %arg18[%c4_218, %c0_219] : memref<16x32xf32, #tpu.memory_space<vmem>>, vector<2x32xf32>
    tpu.vector_store %arg18[%c4_218, %c0_219], %904 {strides = array<i32>} : memref<16x32xf32, #tpu.memory_space<vmem>>, vector<2x32xf32>,
    %906 = vector.extract_strided_slice %1 {offsets = [3, 0, 0], sizes = [1, 2, 32], strides = [1, 1, 1]} : vector<8x2x32xf32> to vector<1x2x32xf32>
    %907 = vector.shape_cast %906 : vector<1x2x32xf32> to vector<2x32xf32>
    %908 = vector.extract_strided_slice %5 {offsets = [0, 0, 0], sizes = [1, 32, 32], strides = [1, 1, 1]} : vector<4x32x32xf32> to vector<1x32x32xf32>
    %909 = vector.shape_cast %908 : vector<1x32x32xf32> to vector<32x32xf32>
    %cst_220 = arith.constant dense<0.000000e+00> : vector<2x32xf32>
    %910 = tpu.matmul %907, %909, %cst_220 {dimension_numbers = #tpu.dot_dimension_numbers<[1], [0], [0], [1], [0, 0, 1, 1], [], []>} : vector<2x32xf32>, vector<32x32xf32>, vector<2x32xf32> -> vector<2x32xf32>
    %911 = vector.extract_strided_slice %6 {offsets = [0, 0, 0], sizes = [1, 32, 32], strides = [1, 1, 1]} : vector<4x32x32xf32> to vector<1x32x32xf32>
    %912 = vector.shape_cast %911 : vector<1x32x32xf32> to vector<32x32xf32>
    %cst_221 = arith.constant dense<0.000000e+00> : vector<2x32xf32>
    %913 = tpu.matmul %904, %912, %cst_221 {dimension_numbers = #tpu.dot_dimension_numbers<[1], [0], [0], [1], [0, 0, 1, 1], [], []>} : vector<2x32xf32>, vector<32x32xf32>, vector<2x32xf32> -> vector<2x32xf32>
    %914 = arith.addf %910, %913 : vector<2x32xf32>
    %915 = vector.extract_strided_slice %7 {offsets = [0, 0, 0], sizes = [1, 32, 32], strides = [1, 1, 1]} : vector<4x32x32xf32> to vector<1x32x32xf32>
    %916 = vector.shape_cast %915 : vector<1x32x32xf32> to vector<32x32xf32>
    %cst_222 = arith.constant dense<0.000000e+00> : vector<2x32xf32>
    %917 = tpu.matmul %882, %916, %cst_222 {dimension_numbers = #tpu.dot_dimension_numbers<[1], [0], [0], [1], [0, 0, 1, 1], [], []>} : vector<2x32xf32>, vector<32x32xf32>, vector<2x32xf32> -> vector<2x32xf32>
    %918 = arith.addf %914, %917 : vector<2x32xf32>
    %919 = vector.extract_strided_slice %8 {offsets = [0, 0, 0], sizes = [1, 1, 32], strides = [1, 1, 1]} : vector<4x1x32xf32> to vector<1x1x32xf32>
    %920 = vector.shape_cast %919 : vector<1x1x32xf32> to vector<1x32xf32>
    %921 = vector.broadcast %920 : vector<1x32xf32> to vector<2x32xf32>
    %922 = arith.addf %918, %921 : vector<2x32xf32>
    %923 = arith.negf %922 : vector<2x32xf32>
    %924 = math.exp %923 : vector<2x32xf32>
    %cst_223 = arith.constant 1.000000e+00 : f32
    %925 = vector.broadcast %cst_223 : f32 to vector<2x32xf32>
    %926 = arith.addf %925, %924 : vector<2x32xf32>
    %927 = arith.divf %925, %926 : vector<2x32xf32>
    %928 = vector.extract_strided_slice %5 {offsets = [1, 0, 0], sizes = [1, 32, 32], strides = [1, 1, 1]} : vector<4x32x32xf32> to vector<1x32x32xf32>
    %929 = vector.shape_cast %928 : vector<1x32x32xf32> to vector<32x32xf32>
    %cst_224 = arith.constant dense<0.000000e+00> : vector<2x32xf32>
    %930 = tpu.matmul %907, %929, %cst_224 {dimension_numbers = #tpu.dot_dimension_numbers<[1], [0], [0], [1], [0, 0, 1, 1], [], []>} : vector<2x32xf32>, vector<32x32xf32>, vector<2x32xf32> -> vector<2x32xf32>
    %931 = vector.extract_strided_slice %6 {offsets = [1, 0, 0], sizes = [1, 32, 32], strides = [1, 1, 1]} : vector<4x32x32xf32> to vector<1x32x32xf32>
    %932 = vector.shape_cast %931 : vector<1x32x32xf32> to vector<32x32xf32>
    %cst_225 = arith.constant dense<0.000000e+00> : vector<2x32xf32>
    %933 = tpu.matmul %904, %932, %cst_225 {dimension_numbers = #tpu.dot_dimension_numbers<[1], [0], [0], [1], [0, 0, 1, 1], [], []>} : vector<2x32xf32>, vector<32x32xf32>, vector<2x32xf32> -> vector<2x32xf32>
    %934 = arith.addf %930, %933 : vector<2x32xf32>
    %935 = vector.extract_strided_slice %7 {offsets = [1, 0, 0], sizes = [1, 32, 32], strides = [1, 1, 1]} : vector<4x32x32xf32> to vector<1x32x32xf32>
    %936 = vector.shape_cast %935 : vector<1x32x32xf32> to vector<32x32xf32>
    %cst_226 = arith.constant dense<0.000000e+00> : vector<2x32xf32>
    %937 = tpu.matmul %882, %936, %cst_226 {dimension_numbers = #tpu.dot_dimension_numbers<[1], [0], [0], [1], [0, 0, 1, 1], [], []>} : vector<2x32xf32>, vector<32x32xf32>, vector<2x32xf32> -> vector<2x32xf32>
    %938 = arith.addf %934, %937 : vector<2x32xf32>
    %939 = vector.extract_strided_slice %8 {offsets = [1, 0, 0], sizes = [1, 1, 32], strides = [1, 1, 1]} : vector<4x1x32xf32> to vector<1x1x32xf32>
    %940 = vector.shape_cast %939 : vector<1x1x32xf32> to vector<1x32xf32>
    %941 = vector.broadcast %940 : vector<1x32xf32> to vector<2x32xf32>
    %942 = arith.addf %938, %941 : vector<2x32xf32>
    %943 = arith.negf %942 : vector<2x32xf32>
    %944 = math.exp %943 : vector<2x32xf32>
    %cst_227 = arith.constant 1.000000e+00 : f32
    %945 = vector.broadcast %cst_227 : f32 to vector<2x32xf32>
    %946 = arith.addf %945, %944 : vector<2x32xf32>
    %947 = arith.divf %945, %946 : vector<2x32xf32>
    %948 = vector.extract_strided_slice %5 {offsets = [2, 0, 0], sizes = [1, 32, 32], strides = [1, 1, 1]} : vector<4x32x32xf32> to vector<1x32x32xf32>
    %949 = vector.shape_cast %948 : vector<1x32x32xf32> to vector<32x32xf32>
    %cst_228 = arith.constant dense<0.000000e+00> : vector<2x32xf32>
    %950 = tpu.matmul %907, %949, %cst_228 {dimension_numbers = #tpu.dot_dimension_numbers<[1], [0], [0], [1], [0, 0, 1, 1], [], []>} : vector<2x32xf32>, vector<32x32xf32>, vector<2x32xf32> -> vector<2x32xf32>
    %951 = vector.extract_strided_slice %6 {offsets = [2, 0, 0], sizes = [1, 32, 32], strides = [1, 1, 1]} : vector<4x32x32xf32> to vector<1x32x32xf32>
    %952 = vector.shape_cast %951 : vector<1x32x32xf32> to vector<32x32xf32>
    %cst_229 = arith.constant dense<0.000000e+00> : vector<2x32xf32>
    %953 = tpu.matmul %904, %952, %cst_229 {dimension_numbers = #tpu.dot_dimension_numbers<[1], [0], [0], [1], [0, 0, 1, 1], [], []>} : vector<2x32xf32>, vector<32x32xf32>, vector<2x32xf32> -> vector<2x32xf32>
    %954 = arith.addf %950, %953 : vector<2x32xf32>
    %955 = vector.extract_strided_slice %7 {offsets = [2, 0, 0], sizes = [1, 32, 32], strides = [1, 1, 1]} : vector<4x32x32xf32> to vector<1x32x32xf32>
    %956 = vector.shape_cast %955 : vector<1x32x32xf32> to vector<32x32xf32>
    %cst_230 = arith.constant dense<0.000000e+00> : vector<2x32xf32>
    %957 = tpu.matmul %882, %956, %cst_230 {dimension_numbers = #tpu.dot_dimension_numbers<[1], [0], [0], [1], [0, 0, 1, 1], [], []>} : vector<2x32xf32>, vector<32x32xf32>, vector<2x32xf32> -> vector<2x32xf32>
    %958 = arith.addf %954, %957 : vector<2x32xf32>
    %959 = vector.extract_strided_slice %8 {offsets = [2, 0, 0], sizes = [1, 1, 32], strides = [1, 1, 1]} : vector<4x1x32xf32> to vector<1x1x32xf32>
    %960 = vector.shape_cast %959 : vector<1x1x32xf32> to vector<1x32xf32>
    %961 = vector.broadcast %960 : vector<1x32xf32> to vector<2x32xf32>
    %962 = arith.addf %958, %961 : vector<2x32xf32>
    %963 = math.tanh %962 : vector<2x32xf32>
    %964 = vector.extract_strided_slice %5 {offsets = [3, 0, 0], sizes = [1, 32, 32], strides = [1, 1, 1]} : vector<4x32x32xf32> to vector<1x32x32xf32>
    %965 = vector.shape_cast %964 : vector<1x32x32xf32> to vector<32x32xf32>
    %cst_231 = arith.constant dense<0.000000e+00> : vector<2x32xf32>
    %966 = tpu.matmul %907, %965, %cst_231 {dimension_numbers = #tpu.dot_dimension_numbers<[1], [0], [0], [1], [0, 0, 1, 1], [], []>} : vector<2x32xf32>, vector<32x32xf32>, vector<2x32xf32> -> vector<2x32xf32>
    %967 = vector.extract_strided_slice %6 {offsets = [3, 0, 0], sizes = [1, 32, 32], strides = [1, 1, 1]} : vector<4x32x32xf32> to vector<1x32x32xf32>
    %968 = vector.shape_cast %967 : vector<1x32x32xf32> to vector<32x32xf32>
    %cst_232 = arith.constant dense<0.000000e+00> : vector<2x32xf32>
    %969 = tpu.matmul %904, %968, %cst_232 {dimension_numbers = #tpu.dot_dimension_numbers<[1], [0], [0], [1], [0, 0, 1, 1], [], []>} : vector<2x32xf32>, vector<32x32xf32>, vector<2x32xf32> -> vector<2x32xf32>
    %970 = arith.addf %966, %969 : vector<2x32xf32>
    %971 = vector.extract_strided_slice %7 {offsets = [3, 0, 0], sizes = [1, 32, 32], strides = [1, 1, 1]} : vector<4x32x32xf32> to vector<1x32x32xf32>
    %972 = vector.shape_cast %971 : vector<1x32x32xf32> to vector<32x32xf32>
    %cst_233 = arith.constant dense<0.000000e+00> : vector<2x32xf32>
    %973 = tpu.matmul %882, %972, %cst_233 {dimension_numbers = #tpu.dot_dimension_numbers<[1], [0], [0], [1], [0, 0, 1, 1], [], []>} : vector<2x32xf32>, vector<32x32xf32>, vector<2x32xf32> -> vector<2x32xf32>
    %974 = arith.addf %970, %973 : vector<2x32xf32>
    %975 = vector.extract_strided_slice %8 {offsets = [3, 0, 0], sizes = [1, 1, 32], strides = [1, 1, 1]} : vector<4x1x32xf32> to vector<1x1x32xf32>
    %976 = vector.shape_cast %975 : vector<1x1x32xf32> to vector<1x32xf32>
    %977 = vector.broadcast %976 : vector<1x32xf32> to vector<2x32xf32>
    %978 = arith.addf %974, %977 : vector<2x32xf32>
    %979 = arith.negf %978 : vector<2x32xf32>
    %980 = math.exp %979 : vector<2x32xf32>
    %cst_234 = arith.constant 1.000000e+00 : f32
    %981 = vector.broadcast %cst_234 : f32 to vector<2x32xf32>
    %982 = arith.addf %981, %980 : vector<2x32xf32>
    %983 = arith.divf %981, %982 : vector<2x32xf32>
    %984 = arith.mulf %947, %880 : vector<2x32xf32>
    %985 = arith.mulf %927, %963 : vector<2x32xf32>
    %986 = arith.addf %984, %985 : vector<2x32xf32>
    %987 = math.tanh %986 : vector<2x32xf32>
    %988 = arith.mulf %983, %987 : vector<2x32xf32>
    %cst_235 = arith.constant dense<0.000000e+00> : vector<2x16xf32>
    %989 = tpu.matmul %988, %9, %cst_235 {dimension_numbers = #tpu.dot_dimension_numbers<[1], [0], [0], [1], [0, 0, 1, 1], [], []>} : vector<2x32xf32>, vector<32x16xf32>, vector<2x16xf32> -> vector<2x16xf32>
    %990 = vector.broadcast %10 : vector<1x16xf32> to vector<2x16xf32>
    %991 = arith.addf %989, %990 : vector<2x16xf32>
    %cst_236 = arith.constant dense<0.000000e+00> : vector<2x16xf32>
    %992 = tpu.matmul %991, %562, %cst_236 {dimension_numbers = #tpu.dot_dimension_numbers<[1], [1], [0], [0], [0, 0, 1, 0], [], []>} : vector<2x16xf32>, vector<16x16xf32>, vector<2x16xf32> -> vector<2x16xf32>
    %993 = arith.addf %992, %584 : vector<2x16xf32>
    %cst_237 = arith.constant dense<0xFF800000> : vector<2xf32>
    %994 = vector.multi_reduction <maximumf>, %993, %cst_237 [1] : vector<2x16xf32> to vector<2xf32>
    %995 = vector.shape_cast %994 : vector<2xf32> to vector<2x1xf32>
    %996 = vector.broadcast %995 : vector<2x1xf32> to vector<2x16xf32>
    %997 = arith.subf %993, %996 : vector<2x16xf32>
    %998 = math.exp %997 : vector<2x16xf32>
    %cst_238 = arith.constant dense<0.000000e+00> : vector<2xf32>
    %999 = vector.multi_reduction <add>, %998, %cst_238 [1] : vector<2x16xf32> to vector<2xf32>
    %1000 = vector.shape_cast %999 : vector<2xf32> to vector<2x1xf32>
    %1001 = tpu.reciprocal %1000 {approx = true} : vector<2x1xf32> -> vector<2x1xf32>
    %1002 = vector.broadcast %1001 : vector<2x1xf32> to vector<2x16xf32>
    %1003 = arith.mulf %998, %1002 : vector<2x16xf32>
    %cst_239 = arith.constant dense<0.000000e+00> : vector<2x16xf32>
    %1004 = tpu.matmul %1003, %562, %cst_239 {dimension_numbers = #tpu.dot_dimension_numbers<[1], [0], [0], [1], [0, 0, 1, 1], [], []>} : vector<2x16xf32>, vector<16x16xf32>, vector<2x16xf32> -> vector<2x16xf32>
    %cst_240 = arith.constant dense<0.000000e+00> : vector<2x32xf32>
    %1005 = tpu.matmul %1004, %11, %cst_240 {dimension_numbers = #tpu.dot_dimension_numbers<[1], [0], [0], [1], [0, 0, 1, 1], [], []>} : vector<2x16xf32>, vector<16x32xf32>, vector<2x32xf32> -> vector<2x32xf32>
    %cst_241 = arith.constant dense<0.000000e+00> : vector<2x32xf32>
    %1006 = tpu.matmul %988, %12, %cst_241 {dimension_numbers = #tpu.dot_dimension_numbers<[1], [0], [0], [1], [0, 0, 1, 1], [], []>} : vector<2x32xf32>, vector<32x32xf32>, vector<2x32xf32> -> vector<2x32xf32>
    %1007 = arith.addf %1005, %1006 : vector<2x32xf32>
    %1008 = vector.broadcast %13 : vector<1x32xf32> to vector<2x32xf32>
    %1009 = arith.addf %1007, %1008 : vector<2x32xf32>
    %1010 = math.tanh %1009 : vector<2x32xf32>
    %c6_242 = arith.constant 6 : index
    %c0_243 = arith.constant 0 : index
    %1011 = vector.load %arg18[%c6_242, %c0_243] : memref<16x32xf32, #tpu.memory_space<vmem>>, vector<2x32xf32>
    tpu.vector_store %arg18[%c6_242, %c0_243], %1010 {strides = array<i32>} : memref<16x32xf32, #tpu.memory_space<vmem>>, vector<2x32xf32>,
    %1012 = vector.extract_strided_slice %1 {offsets = [4, 0, 0], sizes = [1, 2, 32], strides = [1, 1, 1]} : vector<8x2x32xf32> to vector<1x2x32xf32>
    %1013 = vector.shape_cast %1012 : vector<1x2x32xf32> to vector<2x32xf32>
    %1014 = vector.extract_strided_slice %5 {offsets = [0, 0, 0], sizes = [1, 32, 32], strides = [1, 1, 1]} : vector<4x32x32xf32> to vector<1x32x32xf32>
    %1015 = vector.shape_cast %1014 : vector<1x32x32xf32> to vector<32x32xf32>
    %cst_244 = arith.constant dense<0.000000e+00> : vector<2x32xf32>
    %1016 = tpu.matmul %1013, %1015, %cst_244 {dimension_numbers = #tpu.dot_dimension_numbers<[1], [0], [0], [1], [0, 0, 1, 1], [], []>} : vector<2x32xf32>, vector<32x32xf32>, vector<2x32xf32> -> vector<2x32xf32>
    %1017 = vector.extract_strided_slice %6 {offsets = [0, 0, 0], sizes = [1, 32, 32], strides = [1, 1, 1]} : vector<4x32x32xf32> to vector<1x32x32xf32>
    %1018 = vector.shape_cast %1017 : vector<1x32x32xf32> to vector<32x32xf32>
    %cst_245 = arith.constant dense<0.000000e+00> : vector<2x32xf32>
    %1019 = tpu.matmul %1010, %1018, %cst_245 {dimension_numbers = #tpu.dot_dimension_numbers<[1], [0], [0], [1], [0, 0, 1, 1], [], []>} : vector<2x32xf32>, vector<32x32xf32>, vector<2x32xf32> -> vector<2x32xf32>
    %1020 = arith.addf %1016, %1019 : vector<2x32xf32>
    %1021 = vector.extract_strided_slice %7 {offsets = [0, 0, 0], sizes = [1, 32, 32], strides = [1, 1, 1]} : vector<4x32x32xf32> to vector<1x32x32xf32>
    %1022 = vector.shape_cast %1021 : vector<1x32x32xf32> to vector<32x32xf32>
    %cst_246 = arith.constant dense<0.000000e+00> : vector<2x32xf32>
    %1023 = tpu.matmul %988, %1022, %cst_246 {dimension_numbers = #tpu.dot_dimension_numbers<[1], [0], [0], [1], [0, 0, 1, 1], [], []>} : vector<2x32xf32>, vector<32x32xf32>, vector<2x32xf32> -> vector<2x32xf32>
    %1024 = arith.addf %1020, %1023 : vector<2x32xf32>
    %1025 = vector.extract_strided_slice %8 {offsets = [0, 0, 0], sizes = [1, 1, 32], strides = [1, 1, 1]} : vector<4x1x32xf32> to vector<1x1x32xf32>
    %1026 = vector.shape_cast %1025 : vector<1x1x32xf32> to vector<1x32xf32>
    %1027 = vector.broadcast %1026 : vector<1x32xf32> to vector<2x32xf32>
    %1028 = arith.addf %1024, %1027 : vector<2x32xf32>
    %1029 = arith.negf %1028 : vector<2x32xf32>
    %1030 = math.exp %1029 : vector<2x32xf32>
    %cst_247 = arith.constant 1.000000e+00 : f32
    %1031 = vector.broadcast %cst_247 : f32 to vector<2x32xf32>
    %1032 = arith.addf %1031, %1030 : vector<2x32xf32>
    %1033 = arith.divf %1031, %1032 : vector<2x32xf32>
    %1034 = vector.extract_strided_slice %5 {offsets = [1, 0, 0], sizes = [1, 32, 32], strides = [1, 1, 1]} : vector<4x32x32xf32> to vector<1x32x32xf32>
    %1035 = vector.shape_cast %1034 : vector<1x32x32xf32> to vector<32x32xf32>
    %cst_248 = arith.constant dense<0.000000e+00> : vector<2x32xf32>
    %1036 = tpu.matmul %1013, %1035, %cst_248 {dimension_numbers = #tpu.dot_dimension_numbers<[1], [0], [0], [1], [0, 0, 1, 1], [], []>} : vector<2x32xf32>, vector<32x32xf32>, vector<2x32xf32> -> vector<2x32xf32>
    %1037 = vector.extract_strided_slice %6 {offsets = [1, 0, 0], sizes = [1, 32, 32], strides = [1, 1, 1]} : vector<4x32x32xf32> to vector<1x32x32xf32>
    %1038 = vector.shape_cast %1037 : vector<1x32x32xf32> to vector<32x32xf32>
    %cst_249 = arith.constant dense<0.000000e+00> : vector<2x32xf32>
    %1039 = tpu.matmul %1010, %1038, %cst_249 {dimension_numbers = #tpu.dot_dimension_numbers<[1], [0], [0], [1], [0, 0, 1, 1], [], []>} : vector<2x32xf32>, vector<32x32xf32>, vector<2x32xf32> -> vector<2x32xf32>
    %1040 = arith.addf %1036, %1039 : vector<2x32xf32>
    %1041 = vector.extract_strided_slice %7 {offsets = [1, 0, 0], sizes = [1, 32, 32], strides = [1, 1, 1]} : vector<4x32x32xf32> to vector<1x32x32xf32>
    %1042 = vector.shape_cast %1041 : vector<1x32x32xf32> to vector<32x32xf32>
    %cst_250 = arith.constant dense<0.000000e+00> : vector<2x32xf32>
    %1043 = tpu.matmul %988, %1042, %cst_250 {dimension_numbers = #tpu.dot_dimension_numbers<[1], [0], [0], [1], [0, 0, 1, 1], [], []>} : vector<2x32xf32>, vector<32x32xf32>, vector<2x32xf32> -> vector<2x32xf32>
    %1044 = arith.addf %1040, %1043 : vector<2x32xf32>
    %1045 = vector.extract_strided_slice %8 {offsets = [1, 0, 0], sizes = [1, 1, 32], strides = [1, 1, 1]} : vector<4x1x32xf32> to vector<1x1x32xf32>
    %1046 = vector.shape_cast %1045 : vector<1x1x32xf32> to vector<1x32xf32>
    %1047 = vector.broadcast %1046 : vector<1x32xf32> to vector<2x32xf32>
    %1048 = arith.addf %1044, %1047 : vector<2x32xf32>
    %1049 = arith.negf %1048 : vector<2x32xf32>
    %1050 = math.exp %1049 : vector<2x32xf32>
    %cst_251 = arith.constant 1.000000e+00 : f32
    %1051 = vector.broadcast %cst_251 : f32 to vector<2x32xf32>
    %1052 = arith.addf %1051, %1050 : vector<2x32xf32>
    %1053 = arith.divf %1051, %1052 : vector<2x32xf32>
    %1054 = vector.extract_strided_slice %5 {offsets = [2, 0, 0], sizes = [1, 32, 32], strides = [1, 1, 1]} : vector<4x32x32xf32> to vector<1x32x32xf32>
    %1055 = vector.shape_cast %1054 : vector<1x32x32xf32> to vector<32x32xf32>
    %cst_252 = arith.constant dense<0.000000e+00> : vector<2x32xf32>
    %1056 = tpu.matmul %1013, %1055, %cst_252 {dimension_numbers = #tpu.dot_dimension_numbers<[1], [0], [0], [1], [0, 0, 1, 1], [], []>} : vector<2x32xf32>, vector<32x32xf32>, vector<2x32xf32> -> vector<2x32xf32>
    %1057 = vector.extract_strided_slice %6 {offsets = [2, 0, 0], sizes = [1, 32, 32], strides = [1, 1, 1]} : vector<4x32x32xf32> to vector<1x32x32xf32>
    %1058 = vector.shape_cast %1057 : vector<1x32x32xf32> to vector<32x32xf32>
    %cst_253 = arith.constant dense<0.000000e+00> : vector<2x32xf32>
    %1059 = tpu.matmul %1010, %1058, %cst_253 {dimension_numbers = #tpu.dot_dimension_numbers<[1], [0], [0], [1], [0, 0, 1, 1], [], []>} : vector<2x32xf32>, vector<32x32xf32>, vector<2x32xf32> -> vector<2x32xf32>
    %1060 = arith.addf %1056, %1059 : vector<2x32xf32>
    %1061 = vector.extract_strided_slice %7 {offsets = [2, 0, 0], sizes = [1, 32, 32], strides = [1, 1, 1]} : vector<4x32x32xf32> to vector<1x32x32xf32>
    %1062 = vector.shape_cast %1061 : vector<1x32x32xf32> to vector<32x32xf32>
    %cst_254 = arith.constant dense<0.000000e+00> : vector<2x32xf32>
    %1063 = tpu.matmul %988, %1062, %cst_254 {dimension_numbers = #tpu.dot_dimension_numbers<[1], [0], [0], [1], [0, 0, 1, 1], [], []>} : vector<2x32xf32>, vector<32x32xf32>, vector<2x32xf32> -> vector<2x32xf32>
    %1064 = arith.addf %1060, %1063 : vector<2x32xf32>
    %1065 = vector.extract_strided_slice %8 {offsets = [2, 0, 0], sizes = [1, 1, 32], strides = [1, 1, 1]} : vector<4x1x32xf32> to vector<1x1x32xf32>
    %1066 = vector.shape_cast %1065 : vector<1x1x32xf32> to vector<1x32xf32>
    %1067 = vector.broadcast %1066 : vector<1x32xf32> to vector<2x32xf32>
    %1068 = arith.addf %1064, %1067 : vector<2x32xf32>
    %1069 = math.tanh %1068 : vector<2x32xf32>
    %1070 = vector.extract_strided_slice %5 {offsets = [3, 0, 0], sizes = [1, 32, 32], strides = [1, 1, 1]} : vector<4x32x32xf32> to vector<1x32x32xf32>
    %1071 = vector.shape_cast %1070 : vector<1x32x32xf32> to vector<32x32xf32>
    %cst_255 = arith.constant dense<0.000000e+00> : vector<2x32xf32>
    %1072 = tpu.matmul %1013, %1071, %cst_255 {dimension_numbers = #tpu.dot_dimension_numbers<[1], [0], [0], [1], [0, 0, 1, 1], [], []>} : vector<2x32xf32>, vector<32x32xf32>, vector<2x32xf32> -> vector<2x32xf32>
    %1073 = vector.extract_strided_slice %6 {offsets = [3, 0, 0], sizes = [1, 32, 32], strides = [1, 1, 1]} : vector<4x32x32xf32> to vector<1x32x32xf32>
    %1074 = vector.shape_cast %1073 : vector<1x32x32xf32> to vector<32x32xf32>
    %cst_256 = arith.constant dense<0.000000e+00> : vector<2x32xf32>
    %1075 = tpu.matmul %1010, %1074, %cst_256 {dimension_numbers = #tpu.dot_dimension_numbers<[1], [0], [0], [1], [0, 0, 1, 1], [], []>} : vector<2x32xf32>, vector<32x32xf32>, vector<2x32xf32> -> vector<2x32xf32>
    %1076 = arith.addf %1072, %1075 : vector<2x32xf32>
    %1077 = vector.extract_strided_slice %7 {offsets = [3, 0, 0], sizes = [1, 32, 32], strides = [1, 1, 1]} : vector<4x32x32xf32> to vector<1x32x32xf32>
    %1078 = vector.shape_cast %1077 : vector<1x32x32xf32> to vector<32x32xf32>
    %cst_257 = arith.constant dense<0.000000e+00> : vector<2x32xf32>
    %1079 = tpu.matmul %988, %1078, %cst_257 {dimension_numbers = #tpu.dot_dimension_numbers<[1], [0], [0], [1], [0, 0, 1, 1], [], []>} : vector<2x32xf32>, vector<32x32xf32>, vector<2x32xf32> -> vector<2x32xf32>
    %1080 = arith.addf %1076, %1079 : vector<2x32xf32>
    %1081 = vector.extract_strided_slice %8 {offsets = [3, 0, 0], sizes = [1, 1, 32], strides = [1, 1, 1]} : vector<4x1x32xf32> to vector<1x1x32xf32>
    %1082 = vector.shape_cast %1081 : vector<1x1x32xf32> to vector<1x32xf32>
    %1083 = vector.broadcast %1082 : vector<1x32xf32> to vector<2x32xf32>
    %1084 = arith.addf %1080, %1083 : vector<2x32xf32>
    %1085 = arith.negf %1084 : vector<2x32xf32>
    %1086 = math.exp %1085 : vector<2x32xf32>
    %cst_258 = arith.constant 1.000000e+00 : f32
    %1087 = vector.broadcast %cst_258 : f32 to vector<2x32xf32>
    %1088 = arith.addf %1087, %1086 : vector<2x32xf32>
    %1089 = arith.divf %1087, %1088 : vector<2x32xf32>
    %1090 = arith.mulf %1053, %986 : vector<2x32xf32>
    %1091 = arith.mulf %1033, %1069 : vector<2x32xf32>
    %1092 = arith.addf %1090, %1091 : vector<2x32xf32>
    %1093 = math.tanh %1092 : vector<2x32xf32>
    %1094 = arith.mulf %1089, %1093 : vector<2x32xf32>
    %cst_259 = arith.constant dense<0.000000e+00> : vector<2x16xf32>
    %1095 = tpu.matmul %1094, %9, %cst_259 {dimension_numbers = #tpu.dot_dimension_numbers<[1], [0], [0], [1], [0, 0, 1, 1], [], []>} : vector<2x32xf32>, vector<32x16xf32>, vector<2x16xf32> -> vector<2x16xf32>
    %1096 = vector.broadcast %10 : vector<1x16xf32> to vector<2x16xf32>
    %1097 = arith.addf %1095, %1096 : vector<2x16xf32>
    %cst_260 = arith.constant dense<0.000000e+00> : vector<2x16xf32>
    %1098 = tpu.matmul %1097, %562, %cst_260 {dimension_numbers = #tpu.dot_dimension_numbers<[1], [1], [0], [0], [0, 0, 1, 0], [], []>} : vector<2x16xf32>, vector<16x16xf32>, vector<2x16xf32> -> vector<2x16xf32>
    %1099 = arith.addf %1098, %584 : vector<2x16xf32>
    %cst_261 = arith.constant dense<0xFF800000> : vector<2xf32>
    %1100 = vector.multi_reduction <maximumf>, %1099, %cst_261 [1] : vector<2x16xf32> to vector<2xf32>
    %1101 = vector.shape_cast %1100 : vector<2xf32> to vector<2x1xf32>
    %1102 = vector.broadcast %1101 : vector<2x1xf32> to vector<2x16xf32>
    %1103 = arith.subf %1099, %1102 : vector<2x16xf32>
    %1104 = math.exp %1103 : vector<2x16xf32>
    %cst_262 = arith.constant dense<0.000000e+00> : vector<2xf32>
    %1105 = vector.multi_reduction <add>, %1104, %cst_262 [1] : vector<2x16xf32> to vector<2xf32>
    %1106 = vector.shape_cast %1105 : vector<2xf32> to vector<2x1xf32>
    %1107 = tpu.reciprocal %1106 {approx = true} : vector<2x1xf32> -> vector<2x1xf32>
    %1108 = vector.broadcast %1107 : vector<2x1xf32> to vector<2x16xf32>
    %1109 = arith.mulf %1104, %1108 : vector<2x16xf32>
    %cst_263 = arith.constant dense<0.000000e+00> : vector<2x16xf32>
    %1110 = tpu.matmul %1109, %562, %cst_263 {dimension_numbers = #tpu.dot_dimension_numbers<[1], [0], [0], [1], [0, 0, 1, 1], [], []>} : vector<2x16xf32>, vector<16x16xf32>, vector<2x16xf32> -> vector<2x16xf32>
    %cst_264 = arith.constant dense<0.000000e+00> : vector<2x32xf32>
    %1111 = tpu.matmul %1110, %11, %cst_264 {dimension_numbers = #tpu.dot_dimension_numbers<[1], [0], [0], [1], [0, 0, 1, 1], [], []>} : vector<2x16xf32>, vector<16x32xf32>, vector<2x32xf32> -> vector<2x32xf32>
    %cst_265 = arith.constant dense<0.000000e+00> : vector<2x32xf32>
    %1112 = tpu.matmul %1094, %12, %cst_265 {dimension_numbers = #tpu.dot_dimension_numbers<[1], [0], [0], [1], [0, 0, 1, 1], [], []>} : vector<2x32xf32>, vector<32x32xf32>, vector<2x32xf32> -> vector<2x32xf32>
    %1113 = arith.addf %1111, %1112 : vector<2x32xf32>
    %1114 = vector.broadcast %13 : vector<1x32xf32> to vector<2x32xf32>
    %1115 = arith.addf %1113, %1114 : vector<2x32xf32>
    %1116 = math.tanh %1115 : vector<2x32xf32>
    %c8_266 = arith.constant 8 : index
    %c0_267 = arith.constant 0 : index
    %1117 = vector.load %arg18[%c8_266, %c0_267] : memref<16x32xf32, #tpu.memory_space<vmem>>, vector<2x32xf32>
    tpu.vector_store %arg18[%c8_266, %c0_267], %1116 {strides = array<i32>} : memref<16x32xf32, #tpu.memory_space<vmem>>, vector<2x32xf32>,
    %1118 = vector.extract_strided_slice %1 {offsets = [5, 0, 0], sizes = [1, 2, 32], strides = [1, 1, 1]} : vector<8x2x32xf32> to vector<1x2x32xf32>
    %1119 = vector.shape_cast %1118 : vector<1x2x32xf32> to vector<2x32xf32>
    %1120 = vector.extract_strided_slice %5 {offsets = [0, 0, 0], sizes = [1, 32, 32], strides = [1, 1, 1]} : vector<4x32x32xf32> to vector<1x32x32xf32>
    %1121 = vector.shape_cast %1120 : vector<1x32x32xf32> to vector<32x32xf32>
    %cst_268 = arith.constant dense<0.000000e+00> : vector<2x32xf32>
    %1122 = tpu.matmul %1119, %1121, %cst_268 {dimension_numbers = #tpu.dot_dimension_numbers<[1], [0], [0], [1], [0, 0, 1, 1], [], []>} : vector<2x32xf32>, vector<32x32xf32>, vector<2x32xf32> -> vector<2x32xf32>
    %1123 = vector.extract_strided_slice %6 {offsets = [0, 0, 0], sizes = [1, 32, 32], strides = [1, 1, 1]} : vector<4x32x32xf32> to vector<1x32x32xf32>
    %1124 = vector.shape_cast %1123 : vector<1x32x32xf32> to vector<32x32xf32>
    %cst_269 = arith.constant dense<0.000000e+00> : vector<2x32xf32>
    %1125 = tpu.matmul %1116, %1124, %cst_269 {dimension_numbers = #tpu.dot_dimension_numbers<[1], [0], [0], [1], [0, 0, 1, 1], [], []>} : vector<2x32xf32>, vector<32x32xf32>, vector<2x32xf32> -> vector<2x32xf32>
    %1126 = arith.addf %1122, %1125 : vector<2x32xf32>
    %1127 = vector.extract_strided_slice %7 {offsets = [0, 0, 0], sizes = [1, 32, 32], strides = [1, 1, 1]} : vector<4x32x32xf32> to vector<1x32x32xf32>
    %1128 = vector.shape_cast %1127 : vector<1x32x32xf32> to vector<32x32xf32>
    %cst_270 = arith.constant dense<0.000000e+00> : vector<2x32xf32>
    %1129 = tpu.matmul %1094, %1128, %cst_270 {dimension_numbers = #tpu.dot_dimension_numbers<[1], [0], [0], [1], [0, 0, 1, 1], [], []>} : vector<2x32xf32>, vector<32x32xf32>, vector<2x32xf32> -> vector<2x32xf32>
    %1130 = arith.addf %1126, %1129 : vector<2x32xf32>
    %1131 = vector.extract_strided_slice %8 {offsets = [0, 0, 0], sizes = [1, 1, 32], strides = [1, 1, 1]} : vector<4x1x32xf32> to vector<1x1x32xf32>
    %1132 = vector.shape_cast %1131 : vector<1x1x32xf32> to vector<1x32xf32>
    %1133 = vector.broadcast %1132 : vector<1x32xf32> to vector<2x32xf32>
    %1134 = arith.addf %1130, %1133 : vector<2x32xf32>
    %1135 = arith.negf %1134 : vector<2x32xf32>
    %1136 = math.exp %1135 : vector<2x32xf32>
    %cst_271 = arith.constant 1.000000e+00 : f32
    %1137 = vector.broadcast %cst_271 : f32 to vector<2x32xf32>
    %1138 = arith.addf %1137, %1136 : vector<2x32xf32>
    %1139 = arith.divf %1137, %1138 : vector<2x32xf32>
    %1140 = vector.extract_strided_slice %5 {offsets = [1, 0, 0], sizes = [1, 32, 32], strides = [1, 1, 1]} : vector<4x32x32xf32> to vector<1x32x32xf32>
    %1141 = vector.shape_cast %1140 : vector<1x32x32xf32> to vector<32x32xf32>
    %cst_272 = arith.constant dense<0.000000e+00> : vector<2x32xf32>
    %1142 = tpu.matmul %1119, %1141, %cst_272 {dimension_numbers = #tpu.dot_dimension_numbers<[1], [0], [0], [1], [0, 0, 1, 1], [], []>} : vector<2x32xf32>, vector<32x32xf32>, vector<2x32xf32> -> vector<2x32xf32>
    %1143 = vector.extract_strided_slice %6 {offsets = [1, 0, 0], sizes = [1, 32, 32], strides = [1, 1, 1]} : vector<4x32x32xf32> to vector<1x32x32xf32>
    %1144 = vector.shape_cast %1143 : vector<1x32x32xf32> to vector<32x32xf32>
    %cst_273 = arith.constant dense<0.000000e+00> : vector<2x32xf32>
    %1145 = tpu.matmul %1116, %1144, %cst_273 {dimension_numbers = #tpu.dot_dimension_numbers<[1], [0], [0], [1], [0, 0, 1, 1], [], []>} : vector<2x32xf32>, vector<32x32xf32>, vector<2x32xf32> -> vector<2x32xf32>
    %1146 = arith.addf %1142, %1145 : vector<2x32xf32>
    %1147 = vector.extract_strided_slice %7 {offsets = [1, 0, 0], sizes = [1, 32, 32], strides = [1, 1, 1]} : vector<4x32x32xf32> to vector<1x32x32xf32>
    %1148 = vector.shape_cast %1147 : vector<1x32x32xf32> to vector<32x32xf32>
    %cst_274 = arith.constant dense<0.000000e+00> : vector<2x32xf32>
    %1149 = tpu.matmul %1094, %1148, %cst_274 {dimension_numbers = #tpu.dot_dimension_numbers<[1], [0], [0], [1], [0, 0, 1, 1], [], []>} : vector<2x32xf32>, vector<32x32xf32>, vector<2x32xf32> -> vector<2x32xf32>
    %1150 = arith.addf %1146, %1149 : vector<2x32xf32>
    %1151 = vector.extract_strided_slice %8 {offsets = [1, 0, 0], sizes = [1, 1, 32], strides = [1, 1, 1]} : vector<4x1x32xf32> to vector<1x1x32xf32>
    %1152 = vector.shape_cast %1151 : vector<1x1x32xf32> to vector<1x32xf32>
    %1153 = vector.broadcast %1152 : vector<1x32xf32> to vector<2x32xf32>
    %1154 = arith.addf %1150, %1153 : vector<2x32xf32>
    %1155 = arith.negf %1154 : vector<2x32xf32>
    %1156 = math.exp %1155 : vector<2x32xf32>
    %cst_275 = arith.constant 1.000000e+00 : f32
    %1157 = vector.broadcast %cst_275 : f32 to vector<2x32xf32>
    %1158 = arith.addf %1157, %1156 : vector<2x32xf32>
    %1159 = arith.divf %1157, %1158 : vector<2x32xf32>
    %1160 = vector.extract_strided_slice %5 {offsets = [2, 0, 0], sizes = [1, 32, 32], strides = [1, 1, 1]} : vector<4x32x32xf32> to vector<1x32x32xf32>
    %1161 = vector.shape_cast %1160 : vector<1x32x32xf32> to vector<32x32xf32>
    %cst_276 = arith.constant dense<0.000000e+00> : vector<2x32xf32>
    %1162 = tpu.matmul %1119, %1161, %cst_276 {dimension_numbers = #tpu.dot_dimension_numbers<[1], [0], [0], [1], [0, 0, 1, 1], [], []>} : vector<2x32xf32>, vector<32x32xf32>, vector<2x32xf32> -> vector<2x32xf32>
    %1163 = vector.extract_strided_slice %6 {offsets = [2, 0, 0], sizes = [1, 32, 32], strides = [1, 1, 1]} : vector<4x32x32xf32> to vector<1x32x32xf32>
    %1164 = vector.shape_cast %1163 : vector<1x32x32xf32> to vector<32x32xf32>
    %cst_277 = arith.constant dense<0.000000e+00> : vector<2x32xf32>
    %1165 = tpu.matmul %1116, %1164, %cst_277 {dimension_numbers = #tpu.dot_dimension_numbers<[1], [0], [0], [1], [0, 0, 1, 1], [], []>} : vector<2x32xf32>, vector<32x32xf32>, vector<2x32xf32> -> vector<2x32xf32>
    %1166 = arith.addf %1162, %1165 : vector<2x32xf32>
    %1167 = vector.extract_strided_slice %7 {offsets = [2, 0, 0], sizes = [1, 32, 32], strides = [1, 1, 1]} : vector<4x32x32xf32> to vector<1x32x32xf32>
    %1168 = vector.shape_cast %1167 : vector<1x32x32xf32> to vector<32x32xf32>
    %cst_278 = arith.constant dense<0.000000e+00> : vector<2x32xf32>
    %1169 = tpu.matmul %1094, %1168, %cst_278 {dimension_numbers = #tpu.dot_dimension_numbers<[1], [0], [0], [1], [0, 0, 1, 1], [], []>} : vector<2x32xf32>, vector<32x32xf32>, vector<2x32xf32> -> vector<2x32xf32>
    %1170 = arith.addf %1166, %1169 : vector<2x32xf32>
    %1171 = vector.extract_strided_slice %8 {offsets = [2, 0, 0], sizes = [1, 1, 32], strides = [1, 1, 1]} : vector<4x1x32xf32> to vector<1x1x32xf32>
    %1172 = vector.shape_cast %1171 : vector<1x1x32xf32> to vector<1x32xf32>
    %1173 = vector.broadcast %1172 : vector<1x32xf32> to vector<2x32xf32>
    %1174 = arith.addf %1170, %1173 : vector<2x32xf32>
    %1175 = math.tanh %1174 : vector<2x32xf32>
    %1176 = vector.extract_strided_slice %5 {offsets = [3, 0, 0], sizes = [1, 32, 32], strides = [1, 1, 1]} : vector<4x32x32xf32> to vector<1x32x32xf32>
    %1177 = vector.shape_cast %1176 : vector<1x32x32xf32> to vector<32x32xf32>
    %cst_279 = arith.constant dense<0.000000e+00> : vector<2x32xf32>
    %1178 = tpu.matmul %1119, %1177, %cst_279 {dimension_numbers = #tpu.dot_dimension_numbers<[1], [0], [0], [1], [0, 0, 1, 1], [], []>} : vector<2x32xf32>, vector<32x32xf32>, vector<2x32xf32> -> vector<2x32xf32>
    %1179 = vector.extract_strided_slice %6 {offsets = [3, 0, 0], sizes = [1, 32, 32], strides = [1, 1, 1]} : vector<4x32x32xf32> to vector<1x32x32xf32>
    %1180 = vector.shape_cast %1179 : vector<1x32x32xf32> to vector<32x32xf32>
    %cst_280 = arith.constant dense<0.000000e+00> : vector<2x32xf32>
    %1181 = tpu.matmul %1116, %1180, %cst_280 {dimension_numbers = #tpu.dot_dimension_numbers<[1], [0], [0], [1], [0, 0, 1, 1], [], []>} : vector<2x32xf32>, vector<32x32xf32>, vector<2x32xf32> -> vector<2x32xf32>
    %1182 = arith.addf %1178, %1181 : vector<2x32xf32>
    %1183 = vector.extract_strided_slice %7 {offsets = [3, 0, 0], sizes = [1, 32, 32], strides = [1, 1, 1]} : vector<4x32x32xf32> to vector<1x32x32xf32>
    %1184 = vector.shape_cast %1183 : vector<1x32x32xf32> to vector<32x32xf32>
    %cst_281 = arith.constant dense<0.000000e+00> : vector<2x32xf32>
    %1185 = tpu.matmul %1094, %1184, %cst_281 {dimension_numbers = #tpu.dot_dimension_numbers<[1], [0], [0], [1], [0, 0, 1, 1], [], []>} : vector<2x32xf32>, vector<32x32xf32>, vector<2x32xf32> -> vector<2x32xf32>
    %1186 = arith.addf %1182, %1185 : vector<2x32xf32>
    %1187 = vector.extract_strided_slice %8 {offsets = [3, 0, 0], sizes = [1, 1, 32], strides = [1, 1, 1]} : vector<4x1x32xf32> to vector<1x1x32xf32>
    %1188 = vector.shape_cast %1187 : vector<1x1x32xf32> to vector<1x32xf32>
    %1189 = vector.broadcast %1188 : vector<1x32xf32> to vector<2x32xf32>
    %1190 = arith.addf %1186, %1189 : vector<2x32xf32>
    %1191 = arith.negf %1190 : vector<2x32xf32>
    %1192 = math.exp %1191 : vector<2x32xf32>
    %cst_282 = arith.constant 1.000000e+00 : f32
    %1193 = vector.broadcast %cst_282 : f32 to vector<2x32xf32>
    %1194 = arith.addf %1193, %1192 : vector<2x32xf32>
    %1195 = arith.divf %1193, %1194 : vector<2x32xf32>
    %1196 = arith.mulf %1159, %1092 : vector<2x32xf32>
    %1197 = arith.mulf %1139, %1175 : vector<2x32xf32>
    %1198 = arith.addf %1196, %1197 : vector<2x32xf32>
    %1199 = math.tanh %1198 : vector<2x32xf32>
    %1200 = arith.mulf %1195, %1199 : vector<2x32xf32>
    %cst_283 = arith.constant dense<0.000000e+00> : vector<2x16xf32>
    %1201 = tpu.matmul %1200, %9, %cst_283 {dimension_numbers = #tpu.dot_dimension_numbers<[1], [0], [0], [1], [0, 0, 1, 1], [], []>} : vector<2x32xf32>, vector<32x16xf32>, vector<2x16xf32> -> vector<2x16xf32>
    %1202 = vector.broadcast %10 : vector<1x16xf32> to vector<2x16xf32>
    %1203 = arith.addf %1201, %1202 : vector<2x16xf32>
    %cst_284 = arith.constant dense<0.000000e+00> : vector<2x16xf32>
    %1204 = tpu.matmul %1203, %562, %cst_284 {dimension_numbers = #tpu.dot_dimension_numbers<[1], [1], [0], [0], [0, 0, 1, 0], [], []>} : vector<2x16xf32>, vector<16x16xf32>, vector<2x16xf32> -> vector<2x16xf32>
    %1205 = arith.addf %1204, %584 : vector<2x16xf32>
    %cst_285 = arith.constant dense<0xFF800000> : vector<2xf32>
    %1206 = vector.multi_reduction <maximumf>, %1205, %cst_285 [1] : vector<2x16xf32> to vector<2xf32>
    %1207 = vector.shape_cast %1206 : vector<2xf32> to vector<2x1xf32>
    %1208 = vector.broadcast %1207 : vector<2x1xf32> to vector<2x16xf32>
    %1209 = arith.subf %1205, %1208 : vector<2x16xf32>
    %1210 = math.exp %1209 : vector<2x16xf32>
    %cst_286 = arith.constant dense<0.000000e+00> : vector<2xf32>
    %1211 = vector.multi_reduction <add>, %1210, %cst_286 [1] : vector<2x16xf32> to vector<2xf32>
    %1212 = vector.shape_cast %1211 : vector<2xf32> to vector<2x1xf32>
    %1213 = tpu.reciprocal %1212 {approx = true} : vector<2x1xf32> -> vector<2x1xf32>
    %1214 = vector.broadcast %1213 : vector<2x1xf32> to vector<2x16xf32>
    %1215 = arith.mulf %1210, %1214 : vector<2x16xf32>
    %cst_287 = arith.constant dense<0.000000e+00> : vector<2x16xf32>
    %1216 = tpu.matmul %1215, %562, %cst_287 {dimension_numbers = #tpu.dot_dimension_numbers<[1], [0], [0], [1], [0, 0, 1, 1], [], []>} : vector<2x16xf32>, vector<16x16xf32>, vector<2x16xf32> -> vector<2x16xf32>
    %cst_288 = arith.constant dense<0.000000e+00> : vector<2x32xf32>
    %1217 = tpu.matmul %1216, %11, %cst_288 {dimension_numbers = #tpu.dot_dimension_numbers<[1], [0], [0], [1], [0, 0, 1, 1], [], []>} : vector<2x16xf32>, vector<16x32xf32>, vector<2x32xf32> -> vector<2x32xf32>
    %cst_289 = arith.constant dense<0.000000e+00> : vector<2x32xf32>
    %1218 = tpu.matmul %1200, %12, %cst_289 {dimension_numbers = #tpu.dot_dimension_numbers<[1], [0], [0], [1], [0, 0, 1, 1], [], []>} : vector<2x32xf32>, vector<32x32xf32>, vector<2x32xf32> -> vector<2x32xf32>
    %1219 = arith.addf %1217, %1218 : vector<2x32xf32>
    %1220 = vector.broadcast %13 : vector<1x32xf32> to vector<2x32xf32>
    %1221 = arith.addf %1219, %1220 : vector<2x32xf32>
    %1222 = math.tanh %1221 : vector<2x32xf32>
    %c10_290 = arith.constant 10 : index
    %c0_291 = arith.constant 0 : index
    %1223 = vector.load %arg18[%c10_290, %c0_291] : memref<16x32xf32, #tpu.memory_space<vmem>>, vector<2x32xf32>
    tpu.vector_store %arg18[%c10_290, %c0_291], %1222 {strides = array<i32>} : memref<16x32xf32, #tpu.memory_space<vmem>>, vector<2x32xf32>,
    %1224 = vector.extract_strided_slice %1 {offsets = [6, 0, 0], sizes = [1, 2, 32], strides = [1, 1, 1]} : vector<8x2x32xf32> to vector<1x2x32xf32>
    %1225 = vector.shape_cast %1224 : vector<1x2x32xf32> to vector<2x32xf32>
    %1226 = vector.extract_strided_slice %5 {offsets = [0, 0, 0], sizes = [1, 32, 32], strides = [1, 1, 1]} : vector<4x32x32xf32> to vector<1x32x32xf32>
    %1227 = vector.shape_cast %1226 : vector<1x32x32xf32> to vector<32x32xf32>
    %cst_292 = arith.constant dense<0.000000e+00> : vector<2x32xf32>
    %1228 = tpu.matmul %1225, %1227, %cst_292 {dimension_numbers = #tpu.dot_dimension_numbers<[1], [0], [0], [1], [0, 0, 1, 1], [], []>} : vector<2x32xf32>, vector<32x32xf32>, vector<2x32xf32> -> vector<2x32xf32>
    %1229 = vector.extract_strided_slice %6 {offsets = [0, 0, 0], sizes = [1, 32, 32], strides = [1, 1, 1]} : vector<4x32x32xf32> to vector<1x32x32xf32>
    %1230 = vector.shape_cast %1229 : vector<1x32x32xf32> to vector<32x32xf32>
    %cst_293 = arith.constant dense<0.000000e+00> : vector<2x32xf32>
    %1231 = tpu.matmul %1222, %1230, %cst_293 {dimension_numbers = #tpu.dot_dimension_numbers<[1], [0], [0], [1], [0, 0, 1, 1], [], []>} : vector<2x32xf32>, vector<32x32xf32>, vector<2x32xf32> -> vector<2x32xf32>
    %1232 = arith.addf %1228, %1231 : vector<2x32xf32>
    %1233 = vector.extract_strided_slice %7 {offsets = [0, 0, 0], sizes = [1, 32, 32], strides = [1, 1, 1]} : vector<4x32x32xf32> to vector<1x32x32xf32>
    %1234 = vector.shape_cast %1233 : vector<1x32x32xf32> to vector<32x32xf32>
    %cst_294 = arith.constant dense<0.000000e+00> : vector<2x32xf32>
    %1235 = tpu.matmul %1200, %1234, %cst_294 {dimension_numbers = #tpu.dot_dimension_numbers<[1], [0], [0], [1], [0, 0, 1, 1], [], []>} : vector<2x32xf32>, vector<32x32xf32>, vector<2x32xf32> -> vector<2x32xf32>
    %1236 = arith.addf %1232, %1235 : vector<2x32xf32>
    %1237 = vector.extract_strided_slice %8 {offsets = [0, 0, 0], sizes = [1, 1, 32], strides = [1, 1, 1]} : vector<4x1x32xf32> to vector<1x1x32xf32>
    %1238 = vector.shape_cast %1237 : vector<1x1x32xf32> to vector<1x32xf32>
    %1239 = vector.broadcast %1238 : vector<1x32xf32> to vector<2x32xf32>
    %1240 = arith.addf %1236, %1239 : vector<2x32xf32>
    %1241 = arith.negf %1240 : vector<2x32xf32>
    %1242 = math.exp %1241 : vector<2x32xf32>
    %cst_295 = arith.constant 1.000000e+00 : f32
    %1243 = vector.broadcast %cst_295 : f32 to vector<2x32xf32>
    %1244 = arith.addf %1243, %1242 : vector<2x32xf32>
    %1245 = arith.divf %1243, %1244 : vector<2x32xf32>
    %1246 = vector.extract_strided_slice %5 {offsets = [1, 0, 0], sizes = [1, 32, 32], strides = [1, 1, 1]} : vector<4x32x32xf32> to vector<1x32x32xf32>
    %1247 = vector.shape_cast %1246 : vector<1x32x32xf32> to vector<32x32xf32>
    %cst_296 = arith.constant dense<0.000000e+00> : vector<2x32xf32>
    %1248 = tpu.matmul %1225, %1247, %cst_296 {dimension_numbers = #tpu.dot_dimension_numbers<[1], [0], [0], [1], [0, 0, 1, 1], [], []>} : vector<2x32xf32>, vector<32x32xf32>, vector<2x32xf32> -> vector<2x32xf32>
    %1249 = vector.extract_strided_slice %6 {offsets = [1, 0, 0], sizes = [1, 32, 32], strides = [1, 1, 1]} : vector<4x32x32xf32> to vector<1x32x32xf32>
    %1250 = vector.shape_cast %1249 : vector<1x32x32xf32> to vector<32x32xf32>
    %cst_297 = arith.constant dense<0.000000e+00> : vector<2x32xf32>
    %1251 = tpu.matmul %1222, %1250, %cst_297 {dimension_numbers = #tpu.dot_dimension_numbers<[1], [0], [0], [1], [0, 0, 1, 1], [], []>} : vector<2x32xf32>, vector<32x32xf32>, vector<2x32xf32> -> vector<2x32xf32>
    %1252 = arith.addf %1248, %1251 : vector<2x32xf32>
    %1253 = vector.extract_strided_slice %7 {offsets = [1, 0, 0], sizes = [1, 32, 32], strides = [1, 1, 1]} : vector<4x32x32xf32> to vector<1x32x32xf32>
    %1254 = vector.shape_cast %1253 : vector<1x32x32xf32> to vector<32x32xf32>
    %cst_298 = arith.constant dense<0.000000e+00> : vector<2x32xf32>
    %1255 = tpu.matmul %1200, %1254, %cst_298 {dimension_numbers = #tpu.dot_dimension_numbers<[1], [0], [0], [1], [0, 0, 1, 1], [], []>} : vector<2x32xf32>, vector<32x32xf32>, vector<2x32xf32> -> vector<2x32xf32>
    %1256 = arith.addf %1252, %1255 : vector<2x32xf32>
    %1257 = vector.extract_strided_slice %8 {offsets = [1, 0, 0], sizes = [1, 1, 32], strides = [1, 1, 1]} : vector<4x1x32xf32> to vector<1x1x32xf32>
    %1258 = vector.shape_cast %1257 : vector<1x1x32xf32> to vector<1x32xf32>
    %1259 = vector.broadcast %1258 : vector<1x32xf32> to vector<2x32xf32>
    %1260 = arith.addf %1256, %1259 : vector<2x32xf32>
    %1261 = arith.negf %1260 : vector<2x32xf32>
    %1262 = math.exp %1261 : vector<2x32xf32>
    %cst_299 = arith.constant 1.000000e+00 : f32
    %1263 = vector.broadcast %cst_299 : f32 to vector<2x32xf32>
    %1264 = arith.addf %1263, %1262 : vector<2x32xf32>
    %1265 = arith.divf %1263, %1264 : vector<2x32xf32>
    %1266 = vector.extract_strided_slice %5 {offsets = [2, 0, 0], sizes = [1, 32, 32], strides = [1, 1, 1]} : vector<4x32x32xf32> to vector<1x32x32xf32>
    %1267 = vector.shape_cast %1266 : vector<1x32x32xf32> to vector<32x32xf32>
    %cst_300 = arith.constant dense<0.000000e+00> : vector<2x32xf32>
    %1268 = tpu.matmul %1225, %1267, %cst_300 {dimension_numbers = #tpu.dot_dimension_numbers<[1], [0], [0], [1], [0, 0, 1, 1], [], []>} : vector<2x32xf32>, vector<32x32xf32>, vector<2x32xf32> -> vector<2x32xf32>
    %1269 = vector.extract_strided_slice %6 {offsets = [2, 0, 0], sizes = [1, 32, 32], strides = [1, 1, 1]} : vector<4x32x32xf32> to vector<1x32x32xf32>
    %1270 = vector.shape_cast %1269 : vector<1x32x32xf32> to vector<32x32xf32>
    %cst_301 = arith.constant dense<0.000000e+00> : vector<2x32xf32>
    %1271 = tpu.matmul %1222, %1270, %cst_301 {dimension_numbers = #tpu.dot_dimension_numbers<[1], [0], [0], [1], [0, 0, 1, 1], [], []>} : vector<2x32xf32>, vector<32x32xf32>, vector<2x32xf32> -> vector<2x32xf32>
    %1272 = arith.addf %1268, %1271 : vector<2x32xf32>
    %1273 = vector.extract_strided_slice %7 {offsets = [2, 0, 0], sizes = [1, 32, 32], strides = [1, 1, 1]} : vector<4x32x32xf32> to vector<1x32x32xf32>
    %1274 = vector.shape_cast %1273 : vector<1x32x32xf32> to vector<32x32xf32>
    %cst_302 = arith.constant dense<0.000000e+00> : vector<2x32xf32>
    %1275 = tpu.matmul %1200, %1274, %cst_302 {dimension_numbers = #tpu.dot_dimension_numbers<[1], [0], [0], [1], [0, 0, 1, 1], [], []>} : vector<2x32xf32>, vector<32x32xf32>, vector<2x32xf32> -> vector<2x32xf32>
    %1276 = arith.addf %1272, %1275 : vector<2x32xf32>
    %1277 = vector.extract_strided_slice %8 {offsets = [2, 0, 0], sizes = [1, 1, 32], strides = [1, 1, 1]} : vector<4x1x32xf32> to vector<1x1x32xf32>
    %1278 = vector.shape_cast %1277 : vector<1x1x32xf32> to vector<1x32xf32>
    %1279 = vector.broadcast %1278 : vector<1x32xf32> to vector<2x32xf32>
    %1280 = arith.addf %1276, %1279 : vector<2x32xf32>
    %1281 = math.tanh %1280 : vector<2x32xf32>
    %1282 = vector.extract_strided_slice %5 {offsets = [3, 0, 0], sizes = [1, 32, 32], strides = [1, 1, 1]} : vector<4x32x32xf32> to vector<1x32x32xf32>
    %1283 = vector.shape_cast %1282 : vector<1x32x32xf32> to vector<32x32xf32>
    %cst_303 = arith.constant dense<0.000000e+00> : vector<2x32xf32>
    %1284 = tpu.matmul %1225, %1283, %cst_303 {dimension_numbers = #tpu.dot_dimension_numbers<[1], [0], [0], [1], [0, 0, 1, 1], [], []>} : vector<2x32xf32>, vector<32x32xf32>, vector<2x32xf32> -> vector<2x32xf32>
    %1285 = vector.extract_strided_slice %6 {offsets = [3, 0, 0], sizes = [1, 32, 32], strides = [1, 1, 1]} : vector<4x32x32xf32> to vector<1x32x32xf32>
    %1286 = vector.shape_cast %1285 : vector<1x32x32xf32> to vector<32x32xf32>
    %cst_304 = arith.constant dense<0.000000e+00> : vector<2x32xf32>
    %1287 = tpu.matmul %1222, %1286, %cst_304 {dimension_numbers = #tpu.dot_dimension_numbers<[1], [0], [0], [1], [0, 0, 1, 1], [], []>} : vector<2x32xf32>, vector<32x32xf32>, vector<2x32xf32> -> vector<2x32xf32>
    %1288 = arith.addf %1284, %1287 : vector<2x32xf32>
    %1289 = vector.extract_strided_slice %7 {offsets = [3, 0, 0], sizes = [1, 32, 32], strides = [1, 1, 1]} : vector<4x32x32xf32> to vector<1x32x32xf32>
    %1290 = vector.shape_cast %1289 : vector<1x32x32xf32> to vector<32x32xf32>
    %cst_305 = arith.constant dense<0.000000e+00> : vector<2x32xf32>
    %1291 = tpu.matmul %1200, %1290, %cst_305 {dimension_numbers = #tpu.dot_dimension_numbers<[1], [0], [0], [1], [0, 0, 1, 1], [], []>} : vector<2x32xf32>, vector<32x32xf32>, vector<2x32xf32> -> vector<2x32xf32>
    %1292 = arith.addf %1288, %1291 : vector<2x32xf32>
    %1293 = vector.extract_strided_slice %8 {offsets = [3, 0, 0], sizes = [1, 1, 32], strides = [1, 1, 1]} : vector<4x1x32xf32> to vector<1x1x32xf32>
    %1294 = vector.shape_cast %1293 : vector<1x1x32xf32> to vector<1x32xf32>
    %1295 = vector.broadcast %1294 : vector<1x32xf32> to vector<2x32xf32>
    %1296 = arith.addf %1292, %1295 : vector<2x32xf32>
    %1297 = arith.negf %1296 : vector<2x32xf32>
    %1298 = math.exp %1297 : vector<2x32xf32>
    %cst_306 = arith.constant 1.000000e+00 : f32
    %1299 = vector.broadcast %cst_306 : f32 to vector<2x32xf32>
    %1300 = arith.addf %1299, %1298 : vector<2x32xf32>
    %1301 = arith.divf %1299, %1300 : vector<2x32xf32>
    %1302 = arith.mulf %1265, %1198 : vector<2x32xf32>
    %1303 = arith.mulf %1245, %1281 : vector<2x32xf32>
    %1304 = arith.addf %1302, %1303 : vector<2x32xf32>
    %1305 = math.tanh %1304 : vector<2x32xf32>
    %1306 = arith.mulf %1301, %1305 : vector<2x32xf32>
    %cst_307 = arith.constant dense<0.000000e+00> : vector<2x16xf32>
    %1307 = tpu.matmul %1306, %9, %cst_307 {dimension_numbers = #tpu.dot_dimension_numbers<[1], [0], [0], [1], [0, 0, 1, 1], [], []>} : vector<2x32xf32>, vector<32x16xf32>, vector<2x16xf32> -> vector<2x16xf32>
    %1308 = vector.broadcast %10 : vector<1x16xf32> to vector<2x16xf32>
    %1309 = arith.addf %1307, %1308 : vector<2x16xf32>
    %cst_308 = arith.constant dense<0.000000e+00> : vector<2x16xf32>
    %1310 = tpu.matmul %1309, %562, %cst_308 {dimension_numbers = #tpu.dot_dimension_numbers<[1], [1], [0], [0], [0, 0, 1, 0], [], []>} : vector<2x16xf32>, vector<16x16xf32>, vector<2x16xf32> -> vector<2x16xf32>
    %1311 = arith.addf %1310, %584 : vector<2x16xf32>
    %cst_309 = arith.constant dense<0xFF800000> : vector<2xf32>
    %1312 = vector.multi_reduction <maximumf>, %1311, %cst_309 [1] : vector<2x16xf32> to vector<2xf32>
    %1313 = vector.shape_cast %1312 : vector<2xf32> to vector<2x1xf32>
    %1314 = vector.broadcast %1313 : vector<2x1xf32> to vector<2x16xf32>
    %1315 = arith.subf %1311, %1314 : vector<2x16xf32>
    %1316 = math.exp %1315 : vector<2x16xf32>
    %cst_310 = arith.constant dense<0.000000e+00> : vector<2xf32>
    %1317 = vector.multi_reduction <add>, %1316, %cst_310 [1] : vector<2x16xf32> to vector<2xf32>
    %1318 = vector.shape_cast %1317 : vector<2xf32> to vector<2x1xf32>
    %1319 = tpu.reciprocal %1318 {approx = true} : vector<2x1xf32> -> vector<2x1xf32>
    %1320 = vector.broadcast %1319 : vector<2x1xf32> to vector<2x16xf32>
    %1321 = arith.mulf %1316, %1320 : vector<2x16xf32>
    %cst_311 = arith.constant dense<0.000000e+00> : vector<2x16xf32>
    %1322 = tpu.matmul %1321, %562, %cst_311 {dimension_numbers = #tpu.dot_dimension_numbers<[1], [0], [0], [1], [0, 0, 1, 1], [], []>} : vector<2x16xf32>, vector<16x16xf32>, vector<2x16xf32> -> vector<2x16xf32>
    %cst_312 = arith.constant dense<0.000000e+00> : vector<2x32xf32>
    %1323 = tpu.matmul %1322, %11, %cst_312 {dimension_numbers = #tpu.dot_dimension_numbers<[1], [0], [0], [1], [0, 0, 1, 1], [], []>} : vector<2x16xf32>, vector<16x32xf32>, vector<2x32xf32> -> vector<2x32xf32>
    %cst_313 = arith.constant dense<0.000000e+00> : vector<2x32xf32>
    %1324 = tpu.matmul %1306, %12, %cst_313 {dimension_numbers = #tpu.dot_dimension_numbers<[1], [0], [0], [1], [0, 0, 1, 1], [], []>} : vector<2x32xf32>, vector<32x32xf32>, vector<2x32xf32> -> vector<2x32xf32>
    %1325 = arith.addf %1323, %1324 : vector<2x32xf32>
    %1326 = vector.broadcast %13 : vector<1x32xf32> to vector<2x32xf32>
    %1327 = arith.addf %1325, %1326 : vector<2x32xf32>
    %1328 = math.tanh %1327 : vector<2x32xf32>
    %c12_314 = arith.constant 12 : index
    %c0_315 = arith.constant 0 : index
    %1329 = vector.load %arg18[%c12_314, %c0_315] : memref<16x32xf32, #tpu.memory_space<vmem>>, vector<2x32xf32>
    tpu.vector_store %arg18[%c12_314, %c0_315], %1328 {strides = array<i32>} : memref<16x32xf32, #tpu.memory_space<vmem>>, vector<2x32xf32>,
    %1330 = vector.extract_strided_slice %1 {offsets = [7, 0, 0], sizes = [1, 2, 32], strides = [1, 1, 1]} : vector<8x2x32xf32> to vector<1x2x32xf32>
    %1331 = vector.shape_cast %1330 : vector<1x2x32xf32> to vector<2x32xf32>
    %1332 = vector.extract_strided_slice %5 {offsets = [0, 0, 0], sizes = [1, 32, 32], strides = [1, 1, 1]} : vector<4x32x32xf32> to vector<1x32x32xf32>
    %1333 = vector.shape_cast %1332 : vector<1x32x32xf32> to vector<32x32xf32>
    %cst_316 = arith.constant dense<0.000000e+00> : vector<2x32xf32>
    %1334 = tpu.matmul %1331, %1333, %cst_316 {dimension_numbers = #tpu.dot_dimension_numbers<[1], [0], [0], [1], [0, 0, 1, 1], [], []>} : vector<2x32xf32>, vector<32x32xf32>, vector<2x32xf32> -> vector<2x32xf32>
    %1335 = vector.extract_strided_slice %6 {offsets = [0, 0, 0], sizes = [1, 32, 32], strides = [1, 1, 1]} : vector<4x32x32xf32> to vector<1x32x32xf32>
    %1336 = vector.shape_cast %1335 : vector<1x32x32xf32> to vector<32x32xf32>
    %cst_317 = arith.constant dense<0.000000e+00> : vector<2x32xf32>
    %1337 = tpu.matmul %1328, %1336, %cst_317 {dimension_numbers = #tpu.dot_dimension_numbers<[1], [0], [0], [1], [0, 0, 1, 1], [], []>} : vector<2x32xf32>, vector<32x32xf32>, vector<2x32xf32> -> vector<2x32xf32>
    %1338 = arith.addf %1334, %1337 : vector<2x32xf32>
    %1339 = vector.extract_strided_slice %7 {offsets = [0, 0, 0], sizes = [1, 32, 32], strides = [1, 1, 1]} : vector<4x32x32xf32> to vector<1x32x32xf32>
    %1340 = vector.shape_cast %1339 : vector<1x32x32xf32> to vector<32x32xf32>
    %cst_318 = arith.constant dense<0.000000e+00> : vector<2x32xf32>
    %1341 = tpu.matmul %1306, %1340, %cst_318 {dimension_numbers = #tpu.dot_dimension_numbers<[1], [0], [0], [1], [0, 0, 1, 1], [], []>} : vector<2x32xf32>, vector<32x32xf32>, vector<2x32xf32> -> vector<2x32xf32>
    %1342 = arith.addf %1338, %1341 : vector<2x32xf32>
    %1343 = vector.extract_strided_slice %8 {offsets = [0, 0, 0], sizes = [1, 1, 32], strides = [1, 1, 1]} : vector<4x1x32xf32> to vector<1x1x32xf32>
    %1344 = vector.shape_cast %1343 : vector<1x1x32xf32> to vector<1x32xf32>
    %1345 = vector.broadcast %1344 : vector<1x32xf32> to vector<2x32xf32>
    %1346 = arith.addf %1342, %1345 : vector<2x32xf32>
    %1347 = arith.negf %1346 : vector<2x32xf32>
    %1348 = math.exp %1347 : vector<2x32xf32>
    %cst_319 = arith.constant 1.000000e+00 : f32
    %1349 = vector.broadcast %cst_319 : f32 to vector<2x32xf32>
    %1350 = arith.addf %1349, %1348 : vector<2x32xf32>
    %1351 = arith.divf %1349, %1350 : vector<2x32xf32>
    %1352 = vector.extract_strided_slice %5 {offsets = [1, 0, 0], sizes = [1, 32, 32], strides = [1, 1, 1]} : vector<4x32x32xf32> to vector<1x32x32xf32>
    %1353 = vector.shape_cast %1352 : vector<1x32x32xf32> to vector<32x32xf32>
    %cst_320 = arith.constant dense<0.000000e+00> : vector<2x32xf32>
    %1354 = tpu.matmul %1331, %1353, %cst_320 {dimension_numbers = #tpu.dot_dimension_numbers<[1], [0], [0], [1], [0, 0, 1, 1], [], []>} : vector<2x32xf32>, vector<32x32xf32>, vector<2x32xf32> -> vector<2x32xf32>
    %1355 = vector.extract_strided_slice %6 {offsets = [1, 0, 0], sizes = [1, 32, 32], strides = [1, 1, 1]} : vector<4x32x32xf32> to vector<1x32x32xf32>
    %1356 = vector.shape_cast %1355 : vector<1x32x32xf32> to vector<32x32xf32>
    %cst_321 = arith.constant dense<0.000000e+00> : vector<2x32xf32>
    %1357 = tpu.matmul %1328, %1356, %cst_321 {dimension_numbers = #tpu.dot_dimension_numbers<[1], [0], [0], [1], [0, 0, 1, 1], [], []>} : vector<2x32xf32>, vector<32x32xf32>, vector<2x32xf32> -> vector<2x32xf32>
    %1358 = arith.addf %1354, %1357 : vector<2x32xf32>
    %1359 = vector.extract_strided_slice %7 {offsets = [1, 0, 0], sizes = [1, 32, 32], strides = [1, 1, 1]} : vector<4x32x32xf32> to vector<1x32x32xf32>
    %1360 = vector.shape_cast %1359 : vector<1x32x32xf32> to vector<32x32xf32>
    %cst_322 = arith.constant dense<0.000000e+00> : vector<2x32xf32>
    %1361 = tpu.matmul %1306, %1360, %cst_322 {dimension_numbers = #tpu.dot_dimension_numbers<[1], [0], [0], [1], [0, 0, 1, 1], [], []>} : vector<2x32xf32>, vector<32x32xf32>, vector<2x32xf32> -> vector<2x32xf32>
    %1362 = arith.addf %1358, %1361 : vector<2x32xf32>
    %1363 = vector.extract_strided_slice %8 {offsets = [1, 0, 0], sizes = [1, 1, 32], strides = [1, 1, 1]} : vector<4x1x32xf32> to vector<1x1x32xf32>
    %1364 = vector.shape_cast %1363 : vector<1x1x32xf32> to vector<1x32xf32>
    %1365 = vector.broadcast %1364 : vector<1x32xf32> to vector<2x32xf32>
    %1366 = arith.addf %1362, %1365 : vector<2x32xf32>
    %1367 = arith.negf %1366 : vector<2x32xf32>
    %1368 = math.exp %1367 : vector<2x32xf32>
    %cst_323 = arith.constant 1.000000e+00 : f32
    %1369 = vector.broadcast %cst_323 : f32 to vector<2x32xf32>
    %1370 = arith.addf %1369, %1368 : vector<2x32xf32>
    %1371 = arith.divf %1369, %1370 : vector<2x32xf32>
    %1372 = vector.extract_strided_slice %5 {offsets = [2, 0, 0], sizes = [1, 32, 32], strides = [1, 1, 1]} : vector<4x32x32xf32> to vector<1x32x32xf32>
    %1373 = vector.shape_cast %1372 : vector<1x32x32xf32> to vector<32x32xf32>
    %cst_324 = arith.constant dense<0.000000e+00> : vector<2x32xf32>
    %1374 = tpu.matmul %1331, %1373, %cst_324 {dimension_numbers = #tpu.dot_dimension_numbers<[1], [0], [0], [1], [0, 0, 1, 1], [], []>} : vector<2x32xf32>, vector<32x32xf32>, vector<2x32xf32> -> vector<2x32xf32>
    %1375 = vector.extract_strided_slice %6 {offsets = [2, 0, 0], sizes = [1, 32, 32], strides = [1, 1, 1]} : vector<4x32x32xf32> to vector<1x32x32xf32>
    %1376 = vector.shape_cast %1375 : vector<1x32x32xf32> to vector<32x32xf32>
    %cst_325 = arith.constant dense<0.000000e+00> : vector<2x32xf32>
    %1377 = tpu.matmul %1328, %1376, %cst_325 {dimension_numbers = #tpu.dot_dimension_numbers<[1], [0], [0], [1], [0, 0, 1, 1], [], []>} : vector<2x32xf32>, vector<32x32xf32>, vector<2x32xf32> -> vector<2x32xf32>
    %1378 = arith.addf %1374, %1377 : vector<2x32xf32>
    %1379 = vector.extract_strided_slice %7 {offsets = [2, 0, 0], sizes = [1, 32, 32], strides = [1, 1, 1]} : vector<4x32x32xf32> to vector<1x32x32xf32>
    %1380 = vector.shape_cast %1379 : vector<1x32x32xf32> to vector<32x32xf32>
    %cst_326 = arith.constant dense<0.000000e+00> : vector<2x32xf32>
    %1381 = tpu.matmul %1306, %1380, %cst_326 {dimension_numbers = #tpu.dot_dimension_numbers<[1], [0], [0], [1], [0, 0, 1, 1], [], []>} : vector<2x32xf32>, vector<32x32xf32>, vector<2x32xf32> -> vector<2x32xf32>
    %1382 = arith.addf %1378, %1381 : vector<2x32xf32>
    %1383 = vector.extract_strided_slice %8 {offsets = [2, 0, 0], sizes = [1, 1, 32], strides = [1, 1, 1]} : vector<4x1x32xf32> to vector<1x1x32xf32>
    %1384 = vector.shape_cast %1383 : vector<1x1x32xf32> to vector<1x32xf32>
    %1385 = vector.broadcast %1384 : vector<1x32xf32> to vector<2x32xf32>
    %1386 = arith.addf %1382, %1385 : vector<2x32xf32>
    %1387 = math.tanh %1386 : vector<2x32xf32>
    %1388 = vector.extract_strided_slice %5 {offsets = [3, 0, 0], sizes = [1, 32, 32], strides = [1, 1, 1]} : vector<4x32x32xf32> to vector<1x32x32xf32>
    %1389 = vector.shape_cast %1388 : vector<1x32x32xf32> to vector<32x32xf32>
    %cst_327 = arith.constant dense<0.000000e+00> : vector<2x32xf32>
    %1390 = tpu.matmul %1331, %1389, %cst_327 {dimension_numbers = #tpu.dot_dimension_numbers<[1], [0], [0], [1], [0, 0, 1, 1], [], []>} : vector<2x32xf32>, vector<32x32xf32>, vector<2x32xf32> -> vector<2x32xf32>
    %1391 = vector.extract_strided_slice %6 {offsets = [3, 0, 0], sizes = [1, 32, 32], strides = [1, 1, 1]} : vector<4x32x32xf32> to vector<1x32x32xf32>
    %1392 = vector.shape_cast %1391 : vector<1x32x32xf32> to vector<32x32xf32>
    %cst_328 = arith.constant dense<0.000000e+00> : vector<2x32xf32>
    %1393 = tpu.matmul %1328, %1392, %cst_328 {dimension_numbers = #tpu.dot_dimension_numbers<[1], [0], [0], [1], [0, 0, 1, 1], [], []>} : vector<2x32xf32>, vector<32x32xf32>, vector<2x32xf32> -> vector<2x32xf32>
    %1394 = arith.addf %1390, %1393 : vector<2x32xf32>
    %1395 = vector.extract_strided_slice %7 {offsets = [3, 0, 0], sizes = [1, 32, 32], strides = [1, 1, 1]} : vector<4x32x32xf32> to vector<1x32x32xf32>
    %1396 = vector.shape_cast %1395 : vector<1x32x32xf32> to vector<32x32xf32>
    %cst_329 = arith.constant dense<0.000000e+00> : vector<2x32xf32>
    %1397 = tpu.matmul %1306, %1396, %cst_329 {dimension_numbers = #tpu.dot_dimension_numbers<[1], [0], [0], [1], [0, 0, 1, 1], [], []>} : vector<2x32xf32>, vector<32x32xf32>, vector<2x32xf32> -> vector<2x32xf32>
    %1398 = arith.addf %1394, %1397 : vector<2x32xf32>
    %1399 = vector.extract_strided_slice %8 {offsets = [3, 0, 0], sizes = [1, 1, 32], strides = [1, 1, 1]} : vector<4x1x32xf32> to vector<1x1x32xf32>
    %1400 = vector.shape_cast %1399 : vector<1x1x32xf32> to vector<1x32xf32>
    %1401 = vector.broadcast %1400 : vector<1x32xf32> to vector<2x32xf32>
    %1402 = arith.addf %1398, %1401 : vector<2x32xf32>
    %1403 = arith.negf %1402 : vector<2x32xf32>
    %1404 = math.exp %1403 : vector<2x32xf32>
    %cst_330 = arith.constant 1.000000e+00 : f32
    %1405 = vector.broadcast %cst_330 : f32 to vector<2x32xf32>
    %1406 = arith.addf %1405, %1404 : vector<2x32xf32>
    %1407 = arith.divf %1405, %1406 : vector<2x32xf32>
    %1408 = arith.mulf %1371, %1304 : vector<2x32xf32>
    %1409 = arith.mulf %1351, %1387 : vector<2x32xf32>
    %1410 = arith.addf %1408, %1409 : vector<2x32xf32>
    %1411 = math.tanh %1410 : vector<2x32xf32>
    %1412 = arith.mulf %1407, %1411 : vector<2x32xf32>
    %cst_331 = arith.constant dense<0.000000e+00> : vector<2x16xf32>
    %1413 = tpu.matmul %1412, %9, %cst_331 {dimension_numbers = #tpu.dot_dimension_numbers<[1], [0], [0], [1], [0, 0, 1, 1], [], []>} : vector<2x32xf32>, vector<32x16xf32>, vector<2x16xf32> -> vector<2x16xf32>
    %1414 = vector.broadcast %10 : vector<1x16xf32> to vector<2x16xf32>
    %1415 = arith.addf %1413, %1414 : vector<2x16xf32>
    %cst_332 = arith.constant dense<0.000000e+00> : vector<2x16xf32>
    %1416 = tpu.matmul %1415, %562, %cst_332 {dimension_numbers = #tpu.dot_dimension_numbers<[1], [1], [0], [0], [0, 0, 1, 0], [], []>} : vector<2x16xf32>, vector<16x16xf32>, vector<2x16xf32> -> vector<2x16xf32>
    %1417 = arith.addf %1416, %584 : vector<2x16xf32>
    %cst_333 = arith.constant dense<0xFF800000> : vector<2xf32>
    %1418 = vector.multi_reduction <maximumf>, %1417, %cst_333 [1] : vector<2x16xf32> to vector<2xf32>
    %1419 = vector.shape_cast %1418 : vector<2xf32> to vector<2x1xf32>
    %1420 = vector.broadcast %1419 : vector<2x1xf32> to vector<2x16xf32>
    %1421 = arith.subf %1417, %1420 : vector<2x16xf32>
    %1422 = math.exp %1421 : vector<2x16xf32>
    %cst_334 = arith.constant dense<0.000000e+00> : vector<2xf32>
    %1423 = vector.multi_reduction <add>, %1422, %cst_334 [1] : vector<2x16xf32> to vector<2xf32>
    %1424 = vector.shape_cast %1423 : vector<2xf32> to vector<2x1xf32>
    %1425 = tpu.reciprocal %1424 {approx = true} : vector<2x1xf32> -> vector<2x1xf32>
    %1426 = vector.broadcast %1425 : vector<2x1xf32> to vector<2x16xf32>
    %1427 = arith.mulf %1422, %1426 : vector<2x16xf32>
    %cst_335 = arith.constant dense<0.000000e+00> : vector<2x16xf32>
    %1428 = tpu.matmul %1427, %562, %cst_335 {dimension_numbers = #tpu.dot_dimension_numbers<[1], [0], [0], [1], [0, 0, 1, 1], [], []>} : vector<2x16xf32>, vector<16x16xf32>, vector<2x16xf32> -> vector<2x16xf32>
    %cst_336 = arith.constant dense<0.000000e+00> : vector<2x32xf32>
    %1429 = tpu.matmul %1428, %11, %cst_336 {dimension_numbers = #tpu.dot_dimension_numbers<[1], [0], [0], [1], [0, 0, 1, 1], [], []>} : vector<2x16xf32>, vector<16x32xf32>, vector<2x32xf32> -> vector<2x32xf32>
    %cst_337 = arith.constant dense<0.000000e+00> : vector<2x32xf32>
    %1430 = tpu.matmul %1412, %12, %cst_337 {dimension_numbers = #tpu.dot_dimension_numbers<[1], [0], [0], [1], [0, 0, 1, 1], [], []>} : vector<2x32xf32>, vector<32x32xf32>, vector<2x32xf32> -> vector<2x32xf32>
    %1431 = arith.addf %1429, %1430 : vector<2x32xf32>
    %1432 = vector.broadcast %13 : vector<1x32xf32> to vector<2x32xf32>
    %1433 = arith.addf %1431, %1432 : vector<2x32xf32>
    %1434 = math.tanh %1433 : vector<2x32xf32>
    %c14_338 = arith.constant 14 : index
    %c0_339 = arith.constant 0 : index
    %1435 = vector.load %arg18[%c14_338, %c0_339] : memref<16x32xf32, #tpu.memory_space<vmem>>, vector<2x32xf32>
    tpu.vector_store %arg18[%c14_338, %c0_339], %1434 {strides = array<i32>} : memref<16x32xf32, #tpu.memory_space<vmem>>, vector<2x32xf32>,
    %c0_340 = arith.constant 0 : index
    %c0_341 = arith.constant 0 : index
    %1436 = vector.load %arg18[%c0_340, %c0_341] : memref<16x32xf32, #tpu.memory_space<vmem>>, vector<16x32xf32>
    %cst_342 = arith.constant dense<0.000000e+00> : vector<16x128xf32>
    %1437 = tpu.matmul %1436, %14, %cst_342 {dimension_numbers = #tpu.dot_dimension_numbers<[1], [0], [0], [1], [0, 0, 1, 1], [], []>} : vector<16x32xf32>, vector<32x128xf32>, vector<16x128xf32> -> vector<16x128xf32>
    %1438 = vector.broadcast %15 : vector<1x128xf32> to vector<16x128xf32>
    %1439 = arith.addf %1437, %1438 : vector<16x128xf32>
    %c0_343 = arith.constant 0 : index
    %c0_344 = arith.constant 0 : index
    %1440 = vector.load %arg16[%c0_343, %c0_344] : memref<16x128xf32, #tpu.memory_space<vmem>>, vector<16x128xf32>
    tpu.vector_store %arg16[%c0_343, %c0_344], %1439 {strides = array<i32>} : memref<16x128xf32, #tpu.memory_space<vmem>>, vector<16x128xf32>,
    return
  }
}

</mosaic_0001>

<bundles_post_ra>
// kernel: _lambda_.1
= control target key start
LH: loop header
LB: loop body
LE: loop exit
PB: predicated region body
PF: predicated region fallthrough
CT: control target
= control target key end

     0   :  { %s22223_s0 = inlined_call_operand.vmem [shape: f32[8,2,32], index: 0, kind: input, shape index: {}]   ;;  %s22224_s1 = inlined_call_operand.vmem [shape: f32[8,2,32], index: 1, kind: input, shape index: {}]   ;;  %s22225_s2 = inlined_call_operand.hbm [shape: f32[4,32,16], index: 2, kind: input, shape index: {}]   ;;  %s22226_s3 = inlined_call_operand.vmem [shape: f32[4,16,16], index: 3, kind: input, shape index: {}]   ;;  %s22227_s4 = inlined_call_operand.vmem [shape: f32[4,1,16], index: 4, kind: input, shape index: {}]   ;;  %s22228_s5 = inlined_call_operand.hbm [shape: f32[4,32,32], index: 5, kind: input, shape index: {}]   ;;  %s22229_s6 = inlined_call_operand.vmem [shape: f32[4,32,32], index: 6, kind: input, shape index: {}]   ;;  %s22230_s7 = inlined_call_operand.vmem [shape: f32[4,32,32], index: 7, kind: input, shape index: {}]   ;;  %s22231_s8 = inlined_call_operand.vmem [shape: f32[4,1,32], index: 8, kind: input, shape index: {}]   ;;  %s22232_s9 = inlined_call_operand.hbm [shape: f32[32,16], index: 9, kind: input, shape index: {}]   ;;  %s22233_s10 = inlined_call_operand.hbm [shape: f32[1,16], index: 10, kind: input, shape index: {}]   ;;  %s22234_s11 = inlined_call_operand.hbm [shape: f32[16,32], index: 11, kind: input, shape index: {}]   ;;  %s22235_s12 = inlined_call_operand.hbm [shape: f32[32,32], index: 12, kind: input, shape index: {}]   ;;  %s22236_s13 = inlined_call_operand.hbm [shape: f32[1,32], index: 13, kind: input, shape index: {}]   ;;  %s22237_s14 = inlined_call_operand.hbm [shape: f32[32,128], index: 14, kind: input, shape index: {}]   ;;  %s22238_s15 = inlined_call_operand.vmem [shape: f32[1,128], index: 15, kind: input, shape index: {}]   ;;  %s22239_s16 = inlined_call_operand.hbm [shape: f32[16,128], index: 16, kind: output, shape index: {}]  }
   0x1   :  { %22241 = sst [smem:[#allocation25_spill]] %s22223_s0 }
   0x2   :  { %21 = vsyncpa [#allocation5], 0 }
   0x3   :  { %22 = vsyncpa [#allocation8], 0 }
   0x4   :  { %23 = vsyncpa [#allocation11], 0 }
   0x5   :  { %24 = vsyncpa [#allocation14], 0 }
   0x6   :  { %25 = vsyncpa [#allocation17], 0 }
   0x7   :  { %26 = vsyncpa [#allocation6], 0  ;;  %s20004_s21 = smov [#allocation7]   ;;  %s20005_s23 = smov [#allocation10]  }
   0x8   :  { %s52_s22 = sshll.u32 %s20004_s21, 4  ;;  %s83_s24 = sshll.u32 %s20005_s23, 4  ;;  %s53_s22 = int_to_ptr.vmem [resolvable:$true] %s52_s22  ;;  %s20104_s24 = int_to_ptr.vmem [resolvable:$true] %s83_s24 }
   0x9   :  { %s19794_s27 = scalar_lea.hbm %s22228_s5, 2048 }
   0xa   :  { %p19795_p0 = scmp.ne.s32.totalorder %s22228_s5, %s19794_s27  ;;  %p19798_p1 = scmp.lt.u32.totalorder %s19794_s27, %s22228_s5 }
   0xc   :  { %p19800_p2 = pnand %p19798_p1, %p19795_p0 }
   0xe   :  { %19803 = shalt.err (!%p19800_p2)
}
   0xf   :  { %s19804_s17 = scalar_lea.vmem %s53_s22, 2048  ;;  %p19809_p4 = scmp.lt.s32.totalorder %s53_s22, %s53_s22 }
  0x10   :  { %p19805_p3 = scmp.ne.s32.totalorder %s53_s22, %s19804_s17  ;;  %p19810_p5 = scmp.lt.s32.totalorder %s19804_s17, %s19804_s17 }
  0x12   :  { %p19811_p6 = por %p19810_p5, %p19809_p4 }
  0x14   :  { %p19812_p7 = pnand %p19811_p6, %p19805_p3 }
  0x16   :  { %19815 = shalt.err (!%p19812_p7)
}
  0x17   :  { %s20006_s18 = smov 128   ;;  %s20007_s19 = smov 8  }
  0x18   :  { %58 = dma.hbm_to_vmem [thread:$0]  %s22228_s5, 2048, %s53_s22, [#allocation8], %s20006_s18, %s20006_s18, %s20007_s19  }
  0x19   :  { %s19816_s26 = scalar_lea.hbm %s22233_s10, 16 }
  0x1a   :  { %p19817_p8 = scmp.ne.s32.totalorder %s22233_s10, %s19816_s26  ;;  %p19820_p9 = scmp.lt.u32.totalorder %s19816_s26, %s22233_s10 }
  0x1c   :  { %p19822_p10 = pnand %p19820_p9, %p19817_p8 }
  0x1e   :  { %19825 = shalt.err (!%p19822_p10)
}
  0x1f   :  { %s19826_s0 = scalar_lea.vmem %s20104_s24, 16  ;;  %s19830_s5 = scalar_lea.vmem %s20104_s24, 32 }
  0x20   :  { %p19827_p11 = scmp.ne.s32.totalorder %s20104_s24, %s19826_s0  ;;  %p19831_p12 = scmp.lt.s32.totalorder %s20104_s24, %s20104_s24 }
  0x21   :  { %p19832_p13 = scmp.lt.s32.totalorder %s19830_s5, %s19826_s0 }
  0x23   :  { %p19833_p0 = por %p19832_p13, %p19831_p12 }
  0x25   :  { %p19834_p1 = pnand %p19833_p0, %p19827_p11 }
  0x27   :  { %19837 = shalt.err (!%p19834_p1)
}
  0x28   :  { %86 = dma.hbm_to_vmem [thread:$0]  %s22233_s10, 16, %s20104_s24, [#allocation11]  }
  0x29   :  { %s20008_s20 = smov [#allocation13]   ;;  %s20009_s23 = smov [#allocation4]  }
  0x2a   :  { %s104_s21 = sshll.u32 %s20008_s20, 4  ;;  %s36_s25 = sshll.u32 %s20009_s23, 4  ;;  %s105_s21 = int_to_ptr.vmem [resolvable:$true] %s104_s21  ;;  %s20139_s25 = int_to_ptr.vmem [resolvable:$true] %s36_s25 }
  0x2b   :  { %s19838_s28 = scalar_lea.hbm %s22235_s12, 512 }
  0x2c   :  { %p19839_p2 = scmp.ne.s32.totalorder %s22235_s12, %s19838_s28  ;;  %p19842_p3 = scmp.lt.u32.totalorder %s19838_s28, %s22235_s12 }
  0x2e   :  { %p19844_p4 = pnand %p19842_p3, %p19839_p2 }
  0x30   :  { %19847 = shalt.err (!%p19844_p4)
}
  0x31   :  { %s19848_s10 = scalar_lea.vmem %s105_s21, 512  ;;  %p19853_p6 = scmp.lt.s32.totalorder %s105_s21, %s105_s21 }
  0x32   :  { %p19849_p5 = scmp.ne.s32.totalorder %s105_s21, %s19848_s10  ;;  %p19854_p7 = scmp.lt.s32.totalorder %s19848_s10, %s19848_s10 }
  0x34   :  { %p19855_p8 = por %p19854_p7, %p19853_p6 }
  0x36   :  { %p19856_p9 = pnand %p19855_p8, %p19849_p5 }
  0x38   :  { %19859 = shalt.err (!%p19856_p9)
}
  0x39   :  { %110 = dma.hbm_to_vmem [thread:$0]  %s22235_s12, 512, %s105_s21, [#allocation14], %s20006_s18, %s20006_s18, %s20007_s19  }
  0x3a   :  { %s19860_s23 = scalar_lea.hbm %s22225_s2, 2048 }
  0x3b   :  { %p19861_p10 = scmp.ne.s32.totalorder %s22225_s2, %s19860_s23  ;;  %p19864_p11 = scmp.lt.u32.totalorder %s19860_s23, %s22225_s2 }
  0x3d   :  { %p19866_p12 = pnand %p19864_p11, %p19861_p10 }
  0x3f   :  { %19869 = shalt.err (!%p19866_p12)
}
  0x40   :  { %s19870_s30 = scalar_lea.vmem %s20139_s25, 2048  ;;  %p19875_p0 = scmp.lt.s32.totalorder %s20139_s25, %s20139_s25 }
  0x41   :  { %p19871_p13 = scmp.ne.s32.totalorder %s20139_s25, %s19870_s30  ;;  %p19876_p1 = scmp.lt.s32.totalorder %s19870_s30, %s19870_s30 }
  0x43   :  { %p19877_p2 = por %p19876_p1, %p19875_p0 }
  0x45   :  { %p19878_p3 = pnand %p19877_p2, %p19871_p13 }
  0x47   :  { %19881 = shalt.err (!%p19878_p3)
}
  0x48   :  { %42 = dma.hbm_to_vmem [thread:$0]  %s22225_s2, 2048, %s20139_s25, [#allocation5], %s20006_s18, %s20006_s18, %s20007_s19  }
  0x49   :  { %s20010_s0 = smov [#allocation9]   ;;  %s20011_s10 = smov [#allocation12]  }
  0x4a   :  { %s70_s5 = sshll.u32 %s20010_s0, 4  ;;  %s92_s24 = sshll.u32 %s20011_s10, 4  ;;  %s71_s5 = int_to_ptr.vmem [resolvable:$true] %s70_s5  ;;  %s20176_s24 = int_to_ptr.vmem [resolvable:$true] %s92_s24 }
  0x4b   :  { %s19882_s20 = scalar_lea.hbm %s22232_s9, 512 }
  0x4c   :  { %p19883_p4 = scmp.ne.s32.totalorder %s22232_s9, %s19882_s20  ;;  %p19886_p5 = scmp.lt.u32.totalorder %s19882_s20, %s22232_s9 }
  0x4e   :  { %p19888_p6 = pnand %p19886_p5, %p19883_p4 }
  0x50   :  { %19891 = shalt.err (!%p19888_p6)
}
  0x51   :  { %s19892_s2 = scalar_lea.vmem %s71_s5, 512  ;;  %p19897_p8 = scmp.lt.s32.totalorder %s71_s5, %s71_s5 }
  0x52   :  { %p19893_p7 = scmp.ne.s32.totalorder %s71_s5, %s19892_s2  ;;  %p19898_p9 = scmp.lt.s32.totalorder %s19892_s2, %s19892_s2 }
  0x54   :  { %p19899_p10 = por %p19898_p9, %p19897_p8 }
  0x56   :  { %p19900_p11 = pnand %p19899_p10, %p19893_p7 }
  0x58   :  { %19903 = shalt.err (!%p19900_p11)
}
  0x59   :  { %76 = dma.hbm_to_vmem [thread:$0]  %s22232_s9, 512, %s71_s5, [#allocation8], %s20006_s18, %s20006_s18, %s20007_s19  }
  0x5a   :  { %s19904_s21 = scalar_lea.hbm %s22234_s11, 256 }
  0x5b   :  { %p19905_p12 = scmp.ne.s32.totalorder %s22234_s11, %s19904_s21  ;;  %p19908_p13 = scmp.lt.u32.totalorder %s19904_s21, %s22234_s11 }
  0x5d   :  { %p19910_p0 = pnand %p19908_p13, %p19905_p12 }
  0x5f   :  { %19913 = shalt.err (!%p19910_p0)
}
  0x60   :  { %s19914_s20 = scalar_lea.vmem %s20176_s24, 256  ;;  %p19919_p2 = scmp.lt.s32.totalorder %s20176_s24, %s20176_s24 }
  0x61   :  { %p19915_p1 = scmp.ne.s32.totalorder %s20176_s24, %s19914_s20  ;;  %p19920_p3 = scmp.lt.s32.totalorder %s19914_s20, %s19914_s20 }
  0x63   :  { %p19921_p4 = por %p19920_p3, %p19919_p2 }
  0x65   :  { %p19922_p5 = pnand %p19921_p4, %p19915_p1 }
  0x67   :  { %19925 = shalt.err (!%p19922_p5)
}
  0x68   :  { %98 = dma.hbm_to_vmem [thread:$0]  %s22234_s11, 256, %s20176_s24, [#allocation11], %s20006_s18, %s20006_s18, %s20007_s19  }
  0x69   :  { %s20012_s23 = smov [#allocation15]   ;;  %s20013_s27 = smov [#allocation16]  }
  0x6a   :  { %s117_s26 = sshll.u32 %s20012_s23, 4  ;;  %s126_s28 = sshll.u32 %s20013_s27, 4  ;;  %s118_s26 = int_to_ptr.vmem [resolvable:$true] %s117_s26  ;;  %s20213_s28 = int_to_ptr.vmem [resolvable:$true] %s126_s28 }
  0x6b   :  { %s19926_s29 = scalar_lea.hbm %s22236_s13, 16 }
  0x6c   :  { %p19927_p6 = scmp.ne.s32.totalorder %s22236_s13, %s19926_s29  ;;  %p19930_p7 = scmp.lt.u32.totalorder %s19926_s29, %s22236_s13 }
  0x6e   :  { %p19932_p8 = pnand %p19930_p7, %p19927_p6 }
  0x70   :  { %19935 = shalt.err (!%p19932_p8)
}
  0x71   :  { %s19936_s11 = scalar_lea.vmem %s118_s26, 16  ;;  %s19940_s24 = scalar_lea.vmem %s118_s26, 32 }
  0x72   :  { %p19937_p9 = scmp.ne.s32.totalorder %s118_s26, %s19936_s11  ;;  %p19941_p10 = scmp.lt.s32.totalorder %s118_s26, %s118_s26 }
  0x73   :  { %p19942_p11 = scmp.lt.s32.totalorder %s19940_s24, %s19936_s11 }
  0x75   :  { %p19943_p12 = por %p19942_p11, %p19941_p10 }
  0x77   :  { %p19944_p13 = pnand %p19943_p12, %p19937_p9 }
  0x79   :  { %19947 = shalt.err (!%p19944_p13)
}
  0x7a   :  { %120 = dma.hbm_to_vmem [thread:$0]  %s22236_s13, 16, %s118_s26, [#allocation14]  }
  0x7b   :  { %s19948_s9 = scalar_lea.hbm %s22237_s14, 512 }
  0x7c   :  { %p19949_p0 = scmp.ne.s32.totalorder %s22237_s14, %s19948_s9  ;;  %p19952_p1 = scmp.lt.u32.totalorder %s19948_s9, %s22237_s14 }
  0x7e   :  { %p19954_p2 = pnand %p19952_p1, %p19949_p0 }
  0x80   :  { %19957 = shalt.err (!%p19954_p2)
}
  0x81   :  { %s19958_s25 = scalar_lea.vmem %s20213_s28, 512  ;;  %p19963_p4 = scmp.lt.s32.totalorder %s20213_s28, %s20213_s28 }
  0x82   :  { %p19959_p3 = scmp.ne.s32.totalorder %s20213_s28, %s19958_s25  ;;  %p19964_p5 = scmp.lt.s32.totalorder %s19958_s25, %s19958_s25 }
  0x84   :  { %p19965_p6 = por %p19964_p5, %p19963_p4 }
  0x86   :  { %p19966_p7 = pnand %p19965_p6, %p19959_p3 }
  0x88   :  { %19969 = shalt.err (!%p19966_p7)
}
  0x89   :  { %132 = dma.hbm_to_vmem [thread:$0]  %s22237_s14, 512, %s20213_s28, [#allocation17], %s20006_s18, %s20006_s18, %s20007_s19  }
  0x8a   :  { %19992 = dma.done.wait [#allocation5], 2048  }
  0x8b   :  { %19993 = vsyncadd [#allocation5], 4294965248 }
  0x8c   :  { %19994 = dma.done.wait [#allocation8], 2560  }
  0x8d   :  { %19995 = vsyncadd [#allocation8], 4294964736 }
  0x8e   :  { %19996 = dma.done.wait [#allocation11], 272  }
  0x8f   :  { %19997 = vsyncadd [#allocation11], 4294967024 }
  0x90   :  { %19998 = dma.done.wait [#allocation14], 528  }
  0x91   :  { %19999 = vsyncadd [#allocation14], 4294966768 }
  0x92   :  { %20000 = dma.done.wait [#allocation17], 512  }
  0x93   :  { %20001 = vsyncadd [#allocation17], 4294966784  ;;  %v20014_v0 = vmov 0.0|0.0   ;;  %vm20015_vm0 = vmmov 0   ;;  %v20016_v1 = vmov 0.0   ;;  %v191_v2 = vld [vmem:[%s22226_s3] sm:$0xff] }
  0x94   :  { %18411 = vmatprep.subr.bf16.mxu1 %v20014_v0  ;;  %18420 = vmatprep.subr.bf16.mxu0 %v20014_v0  ;;  %v192_v3 = vld [vmem:[%s22226_s3 + $0x8] sm:$0xff]  ;;  %v193_v4 = vld [vmem:[%s22226_s3 + $0x10] sm:$0xff]  ;;  %v194_v6 = vld [vmem:[%s22226_s3 + $0x18] sm:$0xff]  ;;  %s22242_s25 = sld [smem:[#allocation25_spill]]  ;;  %vm346_vm1 = vcmask 261120   ;;  %vm272_vm2 = vcmask 130048  }
  0x95   :  { %16428 = vmatprep.mubr.msk.f32.mxu1 %vm20015_vm0, %v20016_v1  ;;  %16446 = vmatprep.mubr.msk.f32.mxu0 %vm20015_vm0, %v20016_v1  ;;  %v20262_v5 = vpack.c.bf16 %v192_v3, %v191_v2  ;;  %v175_v7 = vld [vmem:[#allocation4] sm:$0xff]  ;;  %v176_v8 = vld [vmem:[#allocation4 + $0x8] sm:$0xff]  ;;  %v20267_v9 = vpack.c.bf16 %v194_v6, %v193_v4  ;;  %v177_v14 = vld [vmem:[#allocation4 + $0x10] sm:$0xff]  ;;  %vm892_vm3 = vcmask 123904   ;;  %vm6373_vm6 = vcmask 254976   ;;  %s20018_s20 = smov [#allocation18]  }
  0x96   :  { %v179_v10 = vld [vmem:[#allocation4 + $0x20] sm:$0xff]  ;;  %v180_v11 = vld [vmem:[#allocation4 + $0x28] sm:$0xff]  ;;  %v20270_v12 = vpack.c.bf16 %v176_v8, %v175_v7  ;;  %v178_v15 = vld [vmem:[#allocation4 + $0x18] sm:$0xff]  ;;  %s15249_s9 = sshll.u32 %s20018_s20, 4  ;;  %s15250_s9 = int_to_ptr.vmem [resolvable:$true] %s15249_s9 }
  0x97   :  { %18413 = vmatpush3.bf16.msra.mxu1 %v20262_v5  ;;  %18422 = vmatpush3.bf16.msra.mxu0 %v20267_v9  ;;  %v20274_v13 = vpack.c.bf16 %v180_v11, %v179_v10  ;;  %v181_v16 = vld [vmem:[#allocation4 + $0x30] sm:$0xff]  ;;  %v182_v17 = vld [vmem:[#allocation4 + $0x38] sm:$0xff]  ;;  %v20280_v18 = vpack.c.bf16 %v178_v15, %v177_v14  ;;  %v195_v20 = vld [vmem:[%s22226_s3 + $0x20] sm:$0xff]  ;;  %s19970_s5 = scalar_lea.vmem %s15250_s9, 256  ;;  %p19975_p9 = scmp.lt.s32.totalorder %s15250_s9, %s15250_s9 }
  0x98   :  { %18414 = vmatprep.subr.bf16.mxu1 %v20014_v0  ;;  %18423 = vmatprep.subr.bf16.mxu0 %v20014_v0  ;;  %v20284_v19 = vpack.c.bf16 %v182_v17, %v181_v16  ;;  %v196_v21 = vld [vmem:[%s22226_s3 + $0x28] sm:$0xff]  ;;  %v197_v22 = vld [vmem:[%s22226_s3 + $0x30] sm:$0xff]  ;;  %v198_v23 = vld [vmem:[%s22226_s3 + $0x38] sm:$0xff]  ;;  %p19971_p8 = scmp.ne.s32.totalorder %s15250_s9, %s19970_s5  ;;  %p19976_p10 = scmp.lt.s32.totalorder %s19970_s5, %s19970_s5 }
  0x99   :  { %v20307_v25 = vpack.c.bf16 %v196_v21, %v195_v20  ;;  %v20311_v26 = vpack.c.bf16 %v198_v23, %v197_v22  ;;  %v183_v27 = vld [vmem:[#allocation4 + $0x40] sm:$0xff]  ;;  %v184_v28 = vld [vmem:[#allocation4 + $0x48] sm:$0xff]  ;;  %v185_v33 = vld [vmem:[#allocation4 + $0x50] sm:$0xff] }
  0x9a   :  { %16429 = vmatmul.mubr.f32.vlgmr.msra.gmra.mrb[0].mxu1 %v20016_v1  ;;  %16447 = vmatmul.mubr.f32.vlgmr.msra.gmra.mrb[0].mxu0 %v20016_v1  ;;  %v159_v24 = vld [vmem:[%s22242_s25] sm:$0x3]  ;;  %v188_v30 = vld [vmem:[#allocation4 + $0x68] sm:$0xff]  ;;  %v20317_v31 = vpack.c.bf16 %v184_v28, %v183_v27  ;;  %v186_v34 = vld [vmem:[#allocation4 + $0x58] sm:$0xff]  ;;  %p19977_p11 = por %p19976_p10, %p19975_p9 }
  0x9b   :  { %18416 = vmatpush3.bf16.msra.mxu1 %v20270_v12  ;;  %18425 = vmatpush3.bf16.msra.mxu0 %v20274_v13  ;;  %v187_v29 = vld [vmem:[#allocation4 + $0x60] sm:$0xff]  ;;  %v189_v35 = vld [vmem:[#allocation4 + $0x70] sm:$0xff]  ;;  %v190_v36 = vld [vmem:[#allocation4 + $0x78] sm:$0xff]  ;;  %v20331_v37 = vpack.c.bf16 %v186_v34, %v185_v33 }
  0x9c   :  { %18417 = vmatprep.subr.bf16.mxu1 %v20014_v0  ;;  %18426 = vmatprep.subr.bf16.mxu0 %v20014_v0  ;;  %v20322_v32 = vpack.c.bf16 %v188_v30, %v187_v29  ;;  %v20335_v38 = vpack.c.bf16 %v190_v36, %v189_v35  ;;  %v20359_v43 = vld [vmem:[%s22227_s4] ss:$0 sm:$0xff]  ;;  %v20364_v46 = vld [vmem:[%s22227_s4 + $0x1] ss:$0 sm:$0xff]  ;;  %v20371_v59 = vld [vmem:[%s22227_s4 + $0x2] ss:$0 sm:$0xff]  ;;  %p19978_p12 = pnand %p19977_p11, %p19971_p8 }
  0x9d   :  { %16439 = vmatprep.mubr.msk.f32.mxu1 %vm20015_vm0, %v20016_v1  ;;  %16457 = vmatprep.mubr.msk.f32.mxu0 %vm20015_vm0, %v20016_v1  ;;  %v20376_v62 = vld [vmem:[%s22227_s4 + $0x3] ss:$0 sm:$0xff]  ;;  %vm21082_vm4 = vmpackc.low %vm272_vm2, %vm272_vm2 }
  0x9e   :  { %v160_v33 = vld [vmem:[%s22242_s25 + $0x2] sm:$0x3] }
  0x9f   :  { %18419 = vmatpush3.bf16.msra.mxu1 %v20280_v18  ;;  %18428 = vmatpush3.bf16.msra.mxu0 %v20284_v19 }
  0xa0   :  { %18429 = vmatprep.subr.bf16.mxu1 %v20014_v0  ;;  %18438 = vmatprep.subr.bf16.mxu0 %v20014_v0 }
  0xa2   :  { %16440 = vmatmul.mubr.msk.f32.vlgmr.msra.gmra.mrb[2].mxu1 %vm346_vm1, %v159_v24  ;;  %16458 = vmatmul.mubr.msk.f32.vlgmr.msra.gmra.mrb[2].mxu0 %vm346_vm1, %v159_v24 }
  0xa3   :  { %18431 = vmatpush3.bf16.msra.mxu1 %v20307_v25  ;;  %18440 = vmatpush3.bf16.msra.mxu0 %v20311_v26 }
  0xa4   :  { %16464 = vmatprep.mubr.msk.f32.mxu1 %vm20015_vm0, %v20016_v1  ;;  %18432 = vmatprep.subr.bf16.mxu1 %v20014_v0 }
  0xa5   :  { %16482 = vmatprep.mubr.msk.f32.mxu0 %vm20015_vm0, %v20016_v1  ;;  %18441 = vmatprep.subr.bf16.mxu0 %v20014_v0 }
  0xa6   :  { %16465 = vmatmul.mubr.f32.vlgmr.msra.gmra.mrb[4].mxu1 %v20016_v1  ;;  %16483 = vmatmul.mubr.f32.vlgmr.msra.gmra.mrb[4].mxu0 %v20016_v1 }
  0xa7   :  { %18434 = vmatpush3.bf16.msra.mxu1 %v20317_v31  ;;  %18443 = vmatpush3.bf16.msra.mxu0 %v20322_v32 }
  0xa8   :  { %18435 = vmatprep.subr.bf16.mxu1 %v20014_v0  ;;  %18444 = vmatprep.subr.bf16.mxu0 %v20014_v0 }
  0xa9   :  { %16475 = vmatprep.mubr.msk.f32.mxu1 %vm20015_vm0, %v20016_v1  ;;  %16493 = vmatprep.mubr.msk.f32.mxu0 %vm20015_vm0, %v20016_v1 }
  0xab   :  { %18437 = vmatpush3.bf16.msra.mxu1 %v20331_v37  ;;  %18446 = vmatpush3.bf16.msra.mxu0 %v20335_v38 }
  0xac   :  { %18447 = vmatprep.subr.bf16.mxu1 %v20014_v0  ;;  %18456 = vmatprep.subr.bf16.mxu0 %v20014_v0 }
  0xae   :  { %16476 = vmatmul.mubr.msk.f32.vlgmr.msra.gmra.mrb[6].mxu1 %vm346_vm1, %v159_v24  ;;  %16494 = vmatmul.mubr.msk.f32.vlgmr.msra.gmra.mrb[6].mxu0 %vm346_vm1, %v159_v24 }
  0xaf   :  { %18449 = vmatpush3.bf16.msra.mxu1 %v20262_v5  ;;  %18458 = vmatpush3.bf16.msra.mxu0 %v20267_v9 }
  0xb0   :  { %16500 = vmatprep.mubr.msk.f32.mxu1 %vm20015_vm0, %v20016_v1  ;;  %18450 = vmatprep.subr.bf16.mxu1 %v20014_v0 }
  0xb1   :  { %16518 = vmatprep.mubr.msk.f32.mxu0 %vm20015_vm0, %v20016_v1  ;;  %18459 = vmatprep.subr.bf16.mxu0 %v20014_v0 }
 0x16d   :  { %v342_v39 = vpop.f32.mrb[0].mxu1  ;;  %v499_v40 = vpop.f32.mrb[0].mxu0 }
 0x16e   :  { %v16430_v41 = vpop.f32.mrb[1].mxu1  ;;  %v16448_v42 = vpop.f32.mrb[1].mxu0 }
 0x175   :  { %v416_v44 = vpop.f32.mrb[2].mxu1  ;;  %v569_v47 = vpop.f32.mrb[2].mxu0 }
 0x176   :  { %v417_v45 = vadd.f32 %v416_v44, %v342_v39  ;;  %v16441_v48 = vpop.f32.mrb[3].mxu1  ;;  %v570_v49 = vadd.f32 %v569_v47, %v499_v40  ;;  %v16459_v50 = vpop.f32.mrb[3].mxu0 }
 0x178   :  { %v426_v51 = vadd.f32 %v20359_v43, %v417_v45  ;;  %v579_v52 = vadd.f32 %v20364_v46, %v570_v49 }
 0x179   :  { %v652_v53 = vpop.f32.mrb[4].mxu1  ;;  %v800_v55 = vpop.f32.mrb[4].mxu0 }
 0x17a   :  { %v15267_v54 = vmul.f32 -1.442695, %v426_v51  ;;  %v16466_v56 = vpop.f32.mrb[5].mxu1  ;;  %v15270_v57 = vmul.f32 -1.442695, %v579_v52  ;;  %v16484_v58 = vpop.f32.mrb[5].mxu0 }
 0x17c   :  { %19474 = vpow2.f32 %v15267_v54 }
 0x17d   :  { %19476 = vpow2.f32 %v15270_v57 }
 0x181   :  { %v722_v60 = vpop.f32.mrb[6].mxu1  ;;  %v870_v63 = vpop.f32.mrb[6].mxu0 }
 0x182   :  { %v723_v61 = vadd.f32 %v722_v60, %v652_v53  ;;  %v16477_v2 = vpop.f32.mrb[7].mxu1  ;;  %v871_v3 = vadd.f32 %v870_v63, %v800_v55  ;;  %v16495_v4 = vpop.f32.mrb[7].mxu0 }
 0x184   :  { %v732_v6 = vadd.f32 %v20371_v59, %v723_v61  ;;  %v880_v7 = vadd.f32 %v20376_v62, %v871_v3 }
 0x186   :  { %v19475_v8 = vpop.eup %19474  ;;  %v15275_v14 = vmul.f32 -1.442695, %v880_v7  ;;  %19478 = vtanh.f32 %v732_v6 }
 0x187   :  { %v19477_v10 = vpop.eup %19476  ;;  %v430_v11 = vadd.f32 1.0, %v19475_v8 }
 0x188   :  { %v583_v15 = vadd.f32 1.0, %v19477_v10 }
 0x189   :  { %19480 = vrcp.f32 %v430_v11 }
 0x18a   :  { %19482 = vrcp.f32 %v583_v15 }
 0x18b   :  { %19484 = vpow2.f32 %v15275_v14 }
 0x190   :  { %v19479_v16 = vpop.eup %19478 }
 0x193   :  { %v19481_v17 = vpop.eup %19480 }
 0x194   :  { %v19483_v20 = vpop.eup %19482  ;;  %v888_v21 = vmul.f32 %v19481_v17, %v19479_v16 }
 0x195   :  { %v19485_v22 = vpop.eup %19484  ;;  %v887_v23 = vmul.f32 0.0, %v19483_v20 }
 0x196   :  { %v884_v24 = vadd.f32 1.0, %v19485_v22 }
 0x197   :  { %v20380_v27 = vadd.f32 %v888_v21, %v887_v23 }
 0x198   :  { %19486 = vrcp.f32 %v884_v24 }
 0x199   :  { %19488 = vtanh.f32 %v20380_v27 }
 0x1a2   :  { %v19487_v28 = vpop.eup %19486 }
 0x1a3   :  { %v19489_v29 = vpop.eup %19488 }
 0x1a4   :  { %v891_v30 = vmul.f32 %v19489_v29, %v19487_v28 }
 0x1a6   :  { %893 = vst.msk [vmem:[#allocation2] sm:$0x3] %vm892_vm3, %v891_v30  ;;  %16501 = vmatmul.mubr.msk.f32.vlgmr.msra.gmra.mrb[8].mxu1 %vm272_vm2, %v891_v30  ;;  %16519 = vmatmul.mubr.msk.f32.vlgmr.msra.gmra.mrb[8].mxu0 %vm272_vm2, %v891_v30 }
 0x1a7   :  { %18452 = vmatpush3.bf16.msra.mxu1 %v20270_v12  ;;  %18461 = vmatpush3.bf16.msra.mxu0 %v20274_v13 }
 0x1a8   :  { %18453 = vmatprep.subr.bf16.mxu1 %v20014_v0  ;;  %18462 = vmatprep.subr.bf16.mxu0 %v20014_v0 }
 0x1a9   :  { %16511 = vmatprep.mubr.msk.f32.mxu1 %vm20015_vm0, %v20016_v1  ;;  %16529 = vmatprep.mubr.msk.f32.mxu0 %vm20015_vm0, %v20016_v1 }
 0x1ab   :  { %18455 = vmatpush3.bf16.msra.mxu1 %v20280_v18  ;;  %18464 = vmatpush3.bf16.msra.mxu0 %v20284_v19 }
 0x1ac   :  { %18465 = vmatprep.subr.bf16.mxu1 %v20014_v0  ;;  %18474 = vmatprep.subr.bf16.mxu0 %v20014_v0 }
 0x1ae   :  { %16512 = vmatmul.mubr.msk.f32.vlgmr.msra.gmra.mrb[10].mxu1 %vm346_vm1, %v160_v33  ;;  %16530 = vmatmul.mubr.msk.f32.vlgmr.msra.gmra.mrb[10].mxu0 %vm346_vm1, %v160_v33 }
 0x1af   :  { %18467 = vmatpush3.bf16.msra.mxu1 %v20307_v25  ;;  %18476 = vmatpush3.bf16.msra.mxu0 %v20311_v26 }
 0x1b0   :  { %16536 = vmatprep.mubr.msk.f32.mxu1 %vm20015_vm0, %v20016_v1  ;;  %16554 = vmatprep.mubr.msk.f32.mxu0 %vm20015_vm0, %v20016_v1 }
 0x1b1   :  { %18468 = vmatprep.subr.bf16.mxu1 %v20014_v0  ;;  %18477 = vmatprep.subr.bf16.mxu0 %v20014_v0 }
 0x1b2   :  { %16537 = vmatmul.mubr.msk.f32.vlgmr.msra.gmra.mrb[12].mxu1 %vm272_vm2, %v891_v30  ;;  %16555 = vmatmul.mubr.msk.f32.vlgmr.msra.gmra.mrb[12].mxu0 %vm272_vm2, %v891_v30 }
 0x1b3   :  { %18470 = vmatpush3.bf16.msra.mxu1 %v20317_v31  ;;  %18479 = vmatpush3.bf16.msra.mxu0 %v20322_v32 }
 0x1b4   :  { %18471 = vmatprep.subr.bf16.mxu1 %v20014_v0  ;;  %18480 = vmatprep.subr.bf16.mxu0 %v20014_v0 }
 0x1b5   :  { %16547 = vmatprep.mubr.msk.f32.mxu1 %vm20015_vm0, %v20016_v1  ;;  %16565 = vmatprep.mubr.msk.f32.mxu0 %vm20015_vm0, %v20016_v1 }
 0x1b7   :  { %18473 = vmatpush3.bf16.msra.mxu1 %v20331_v37  ;;  %18482 = vmatpush3.bf16.msra.mxu0 %v20335_v38 }
 0x1b8   :  { %18483 = vmatprep.subr.bf16.mxu1 %v20014_v0  ;;  %18492 = vmatprep.subr.bf16.mxu0 %v20014_v0 }
 0x1ba   :  { %16548 = vmatmul.mubr.msk.f32.vlgmr.msra.gmra.mrb[14].mxu1 %vm346_vm1, %v160_v33  ;;  %16566 = vmatmul.mubr.msk.f32.vlgmr.msra.gmra.mrb[14].mxu0 %vm346_vm1, %v160_v33 }
 0x1bb   :  { %18485 = vmatpush3.bf16.msra.mxu1 %v20262_v5  ;;  %18494 = vmatpush3.bf16.msra.mxu0 %v20267_v9 }
 0x1bc   :  { %16572 = vmatprep.mubr.msk.f32.mxu1 %vm20015_vm0, %v20016_v1  ;;  %18486 = vmatprep.subr.bf16.mxu1 %v20014_v0 }
 0x1bd   :  { %16590 = vmatprep.mubr.msk.f32.mxu0 %vm20015_vm0, %v20016_v1  ;;  %18495 = vmatprep.subr.bf16.mxu0 %v20014_v0 }
 0x279   :  { %v963_v34 = vpop.f32.mrb[8].mxu1  ;;  %v1113_v35 = vpop.f32.mrb[8].mxu0 }
 0x27a   :  { %v16502_v36 = vpop.f32.mrb[9].mxu1  ;;  %v16520_v39 = vpop.f32.mrb[9].mxu0 }
 0x281   :  { %v1036_v40 = vpop.f32.mrb[10].mxu1  ;;  %v1183_v41 = vpop.f32.mrb[10].mxu0 }
 0x282   :  { %v1037_v42 = vadd.f32 %v1036_v40, %v963_v34  ;;  %v1184_v44 = vadd.f32 %v1183_v41, %v1113_v35  ;;  %v16513_v45 = vpop.f32.mrb[11].mxu1  ;;  %v16531_v47 = vpop.f32.mrb[11].mxu0 }
 0x284   :  { %v1040_v48 = vadd.f32 %v20359_v43, %v1037_v42  ;;  %v1187_v49 = vadd.f32 %v20364_v46, %v1184_v44 }
 0x285   :  { %v1260_v50 = vpop.f32.mrb[12].mxu1  ;;  %v1402_v51 = vpop.f32.mrb[12].mxu0 }
 0x286   :  { %v15278_v52 = vmul.f32 -1.442695, %v1040_v48  ;;  %v15281_v53 = vmul.f32 -1.442695, %v1187_v49  ;;  %v16538_v54 = vpop.f32.mrb[13].mxu1  ;;  %v16556_v55 = vpop.f32.mrb[13].mxu0 }
 0x288   :  { %19490 = vpow2.f32 %v15278_v52 }
 0x289   :  { %19492 = vpow2.f32 %v15281_v53 }
 0x28d   :  { %v1330_v56 = vpop.f32.mrb[14].mxu1  ;;  %v1472_v57 = vpop.f32.mrb[14].mxu0 }
 0x28e   :  { %v1331_v58 = vadd.f32 %v1330_v56, %v1260_v50  ;;  %v1473_v60 = vadd.f32 %v1472_v57, %v1402_v51  ;;  %v16549_v61 = vpop.f32.mrb[15].mxu1  ;;  %v16567_v63 = vpop.f32.mrb[15].mxu0 }
 0x290   :  { %v1334_v2 = vadd.f32 %v20371_v59, %v1331_v58  ;;  %v1476_v3 = vadd.f32 %v20376_v62, %v1473_v60 }
 0x292   :  { %v19491_v4 = vpop.eup %19490  ;;  %v15286_v6 = vmul.f32 -1.442695, %v1476_v3  ;;  %19494 = vtanh.f32 %v1334_v2 }
 0x293   :  { %v19493_v7 = vpop.eup %19492  ;;  %v1044_v8 = vadd.f32 1.0, %v19491_v4 }
 0x294   :  { %v1191_v10 = vadd.f32 1.0, %v19493_v7  ;;  %19496 = vpow2.f32 %v15286_v6 }
 0x295   :  { %19498 = vrcp.f32 %v1044_v8 }
 0x296   :  { %19500 = vrcp.f32 %v1191_v10 }
 0x29c   :  { %v19495_v11 = vpop.eup %19494 }
 0x29e   :  { %v19497_v14 = vpop.eup %19496 }
 0x29f   :  { %v19499_v15 = vpop.eup %19498  ;;  %v1480_v20 = vadd.f32 1.0, %v19497_v14 }
 0x2a0   :  { %v19501_v16 = vpop.eup %19500  ;;  %v1484_v17 = vmul.f32 %v19499_v15, %v19495_v11 }
 0x2a1   :  { %v1483_v21 = vmul.f32 %v19501_v16, %v20380_v27  ;;  %19502 = vrcp.f32 %v1480_v20  ;;  %v161_v27 = vld [vmem:[%s22242_s25 + $0x4] sm:$0x3] }
 0x2a3   :  { %v20440_v22 = vadd.f32 %v1484_v17, %v1483_v21 }
 0x2a5   :  { %19504 = vtanh.f32 %v20440_v22 }
 0x2ab   :  { %v19503_v23 = vpop.eup %19502 }
 0x2af   :  { %v19505_v24 = vpop.eup %19504 }
 0x2b0   :  { %v1487_v28 = vmul.f32 %v19505_v24, %v19503_v23 }
 0x2b2   :  { %1488 = vst.msk [vmem:[#allocation2 + $0x2] sm:$0x3] %vm892_vm3, %v1487_v28  ;;  %16573 = vmatmul.mubr.msk.f32.vlgmr.msra.gmra.mrb[16].mxu1 %vm272_vm2, %v1487_v28  ;;  %16591 = vmatmul.mubr.msk.f32.vlgmr.msra.gmra.mrb[16].mxu0 %vm272_vm2, %v1487_v28 }
 0x2b3   :  { %18488 = vmatpush3.bf16.msra.mxu1 %v20270_v12  ;;  %18497 = vmatpush3.bf16.msra.mxu0 %v20274_v13 }
 0x2b4   :  { %18489 = vmatprep.subr.bf16.mxu1 %v20014_v0  ;;  %18498 = vmatprep.subr.bf16.mxu0 %v20014_v0 }
 0x2b5   :  { %16583 = vmatprep.mubr.msk.f32.mxu1 %vm20015_vm0, %v20016_v1  ;;  %16601 = vmatprep.mubr.msk.f32.mxu0 %vm20015_vm0, %v20016_v1 }
 0x2b7   :  { %18491 = vmatpush3.bf16.msra.mxu1 %v20280_v18  ;;  %18500 = vmatpush3.bf16.msra.mxu0 %v20284_v19 }
 0x2b8   :  { %18501 = vmatprep.subr.bf16.mxu1 %v20014_v0  ;;  %18510 = vmatprep.subr.bf16.mxu0 %v20014_v0 }
 0x2ba   :  { %16584 = vmatmul.mubr.msk.f32.vlgmr.msra.gmra.mrb[18].mxu1 %vm346_vm1, %v161_v27  ;;  %16602 = vmatmul.mubr.msk.f32.vlgmr.msra.gmra.mrb[18].mxu0 %vm346_vm1, %v161_v27 }
 0x2bb   :  { %18503 = vmatpush3.bf16.msra.mxu1 %v20307_v25  ;;  %18512 = vmatpush3.bf16.msra.mxu0 %v20311_v26 }
 0x2bc   :  { %16608 = vmatprep.mubr.msk.f32.mxu1 %vm20015_vm0, %v20016_v1  ;;  %16626 = vmatprep.mubr.msk.f32.mxu0 %vm20015_vm0, %v20016_v1 }
 0x2bd   :  { %18504 = vmatprep.subr.bf16.mxu1 %v20014_v0  ;;  %18513 = vmatprep.subr.bf16.mxu0 %v20014_v0 }
 0x2be   :  { %16609 = vmatmul.mubr.msk.f32.vlgmr.msra.gmra.mrb[20].mxu1 %vm272_vm2, %v1487_v28  ;;  %16627 = vmatmul.mubr.msk.f32.vlgmr.msra.gmra.mrb[20].mxu0 %vm272_vm2, %v1487_v28 }
 0x2bf   :  { %18506 = vmatpush3.bf16.msra.mxu1 %v20317_v31  ;;  %18515 = vmatpush3.bf16.msra.mxu0 %v20322_v32 }
 0x2c0   :  { %18507 = vmatprep.subr.bf16.mxu1 %v20014_v0  ;;  %18516 = vmatprep.subr.bf16.mxu0 %v20014_v0 }
 0x2c1   :  { %16619 = vmatprep.mubr.msk.f32.mxu1 %vm20015_vm0, %v20016_v1  ;;  %16637 = vmatprep.mubr.msk.f32.mxu0 %vm20015_vm0, %v20016_v1 }
 0x2c3   :  { %18509 = vmatpush3.bf16.msra.mxu1 %v20331_v37  ;;  %18518 = vmatpush3.bf16.msra.mxu0 %v20335_v38 }
 0x2c4   :  { %18519 = vmatprep.subr.bf16.mxu1 %v20014_v0  ;;  %18528 = vmatprep.subr.bf16.mxu0 %v20014_v0 }
 0x2c6   :  { %16620 = vmatmul.mubr.msk.f32.vlgmr.msra.gmra.mrb[22].mxu1 %vm346_vm1, %v161_v27  ;;  %16638 = vmatmul.mubr.msk.f32.vlgmr.msra.gmra.mrb[22].mxu0 %vm346_vm1, %v161_v27 }
 0x2c7   :  { %18521 = vmatpush3.bf16.msra.mxu1 %v20262_v5  ;;  %18530 = vmatpush3.bf16.msra.mxu0 %v20267_v9 }
 0x2c8   :  { %16644 = vmatprep.mubr.msk.f32.mxu1 %vm20015_vm0, %v20016_v1  ;;  %18522 = vmatprep.subr.bf16.mxu1 %v20014_v0 }
 0x2c9   :  { %16662 = vmatprep.mubr.msk.f32.mxu0 %vm20015_vm0, %v20016_v1  ;;  %18531 = vmatprep.subr.bf16.mxu0 %v20014_v0 }
 0x385   :  { %v1558_v29 = vpop.f32.mrb[16].mxu1  ;;  %v1708_v30 = vpop.f32.mrb[16].mxu0 }
 0x386   :  { %v16574_v33 = vpop.f32.mrb[17].mxu1  ;;  %v16592_v34 = vpop.f32.mrb[17].mxu0 }
 0x38d   :  { %v1631_v35 = vpop.f32.mrb[18].mxu1  ;;  %v1778_v36 = vpop.f32.mrb[18].mxu0 }
 0x38e   :  { %v1632_v39 = vadd.f32 %v1631_v35, %v1558_v29  ;;  %v1779_v40 = vadd.f32 %v1778_v36, %v1708_v30  ;;  %v16585_v41 = vpop.f32.mrb[19].mxu1  ;;  %v16603_v42 = vpop.f32.mrb[19].mxu0 }
 0x390   :  { %v1635_v44 = vadd.f32 %v20359_v43, %v1632_v39  ;;  %v1782_v45 = vadd.f32 %v20364_v46, %v1779_v40 }
 0x391   :  { %v1855_v47 = vpop.f32.mrb[20].mxu1  ;;  %v1997_v48 = vpop.f32.mrb[20].mxu0 }
 0x392   :  { %v15289_v49 = vmul.f32 -1.442695, %v1635_v44  ;;  %v15292_v50 = vmul.f32 -1.442695, %v1782_v45  ;;  %v16610_v51 = vpop.f32.mrb[21].mxu1  ;;  %v16628_v52 = vpop.f32.mrb[21].mxu0 }
 0x394   :  { %19506 = vpow2.f32 %v15289_v49 }
 0x395   :  { %19508 = vpow2.f32 %v15292_v50 }
 0x399   :  { %v1925_v53 = vpop.f32.mrb[22].mxu1  ;;  %v2067_v54 = vpop.f32.mrb[22].mxu0 }
 0x39a   :  { %v1926_v55 = vadd.f32 %v1925_v53, %v1855_v47  ;;  %v2068_v56 = vadd.f32 %v2067_v54, %v1997_v48  ;;  %v16621_v57 = vpop.f32.mrb[23].mxu1  ;;  %v16639_v58 = vpop.f32.mrb[23].mxu0 }
 0x39c   :  { %v1929_v60 = vadd.f32 %v20371_v59, %v1926_v55  ;;  %v2071_v61 = vadd.f32 %v20376_v62, %v2068_v56 }
 0x39e   :  { %v19507_v63 = vpop.eup %19506  ;;  %v15297_v2 = vmul.f32 -1.442695, %v2071_v61  ;;  %19510 = vtanh.f32 %v1929_v60 }
 0x39f   :  { %v19509_v3 = vpop.eup %19508  ;;  %v1639_v4 = vadd.f32 1.0, %v19507_v63 }
 0x3a0   :  { %v1786_v6 = vadd.f32 1.0, %v19509_v3  ;;  %19512 = vpow2.f32 %v15297_v2 }
 0x3a1   :  { %19514 = vrcp.f32 %v1639_v4 }
 0x3a2   :  { %19516 = vrcp.f32 %v1786_v6 }
 0x3a8   :  { %v19511_v7 = vpop.eup %19510 }
 0x3aa   :  { %v19513_v8 = vpop.eup %19512 }
 0x3ab   :  { %v19515_v10 = vpop.eup %19514  ;;  %v2075_v15 = vadd.f32 1.0, %v19513_v8 }
 0x3ac   :  { %v19517_v11 = vpop.eup %19516  ;;  %v2079_v14 = vmul.f32 %v19515_v10, %v19511_v7 }
 0x3ad   :  { %v2078_v16 = vmul.f32 %v19517_v11, %v20440_v22  ;;  %19518 = vrcp.f32 %v2075_v15  ;;  %v162_v22 = vld [vmem:[%s22242_s25 + $0x6] sm:$0x3] }
 0x3af   :  { %v20500_v17 = vadd.f32 %v2079_v14, %v2078_v16 }
 0x3b1   :  { %19520 = vtanh.f32 %v20500_v17 }
 0x3b7   :  { %v19519_v20 = vpop.eup %19518 }
 0x3bb   :  { %v19521_v21 = vpop.eup %19520 }
 0x3bc   :  { %v2082_v23 = vmul.f32 %v19521_v21, %v19519_v20 }
 0x3be   :  { %2083 = vst.msk [vmem:[#allocation2 + $0x4] sm:$0x3] %vm892_vm3, %v2082_v23  ;;  %16645 = vmatmul.mubr.msk.f32.vlgmr.msra.gmra.mrb[24].mxu1 %vm272_vm2, %v2082_v23  ;;  %16663 = vmatmul.mubr.msk.f32.vlgmr.msra.gmra.mrb[24].mxu0 %vm272_vm2, %v2082_v23 }
 0x3bf   :  { %18524 = vmatpush3.bf16.msra.mxu1 %v20270_v12  ;;  %18533 = vmatpush3.bf16.msra.mxu0 %v20274_v13 }
 0x3c0   :  { %18525 = vmatprep.subr.bf16.mxu1 %v20014_v0  ;;  %18534 = vmatprep.subr.bf16.mxu0 %v20014_v0 }
 0x3c1   :  { %16655 = vmatprep.mubr.msk.f32.mxu1 %vm20015_vm0, %v20016_v1  ;;  %16673 = vmatprep.mubr.msk.f32.mxu0 %vm20015_vm0, %v20016_v1 }
 0x3c3   :  { %18527 = vmatpush3.bf16.msra.mxu1 %v20280_v18  ;;  %18536 = vmatpush3.bf16.msra.mxu0 %v20284_v19 }
 0x3c4   :  { %18537 = vmatprep.subr.bf16.mxu1 %v20014_v0  ;;  %18546 = vmatprep.subr.bf16.mxu0 %v20014_v0 }
 0x3c6   :  { %16656 = vmatmul.mubr.msk.f32.vlgmr.msra.gmra.mrb[26].mxu1 %vm346_vm1, %v162_v22  ;;  %16674 = vmatmul.mubr.msk.f32.vlgmr.msra.gmra.mrb[26].mxu0 %vm346_vm1, %v162_v22 }
 0x3c7   :  { %18539 = vmatpush3.bf16.msra.mxu1 %v20307_v25  ;;  %18548 = vmatpush3.bf16.msra.mxu0 %v20311_v26 }
 0x3c8   :  { %16680 = vmatprep.mubr.msk.f32.mxu1 %vm20015_vm0, %v20016_v1  ;;  %16698 = vmatprep.mubr.msk.f32.mxu0 %vm20015_vm0, %v20016_v1 }
 0x3c9   :  { %18540 = vmatprep.subr.bf16.mxu1 %v20014_v0  ;;  %18549 = vmatprep.subr.bf16.mxu0 %v20014_v0 }
 0x3ca   :  { %16681 = vmatmul.mubr.msk.f32.vlgmr.msra.gmra.mrb[28].mxu1 %vm272_vm2, %v2082_v23  ;;  %16699 = vmatmul.mubr.msk.f32.vlgmr.msra.gmra.mrb[28].mxu0 %vm272_vm2, %v2082_v23 }
 0x3cb   :  { %18542 = vmatpush3.bf16.msra.mxu1 %v20317_v31  ;;  %18551 = vmatpush3.bf16.msra.mxu0 %v20322_v32 }
 0x3cc   :  { %18543 = vmatprep.subr.bf16.mxu1 %v20014_v0  ;;  %18552 = vmatprep.subr.bf16.mxu0 %v20014_v0 }
 0x3cd   :  { %16691 = vmatprep.mubr.msk.f32.mxu1 %vm20015_vm0, %v20016_v1  ;;  %16709 = vmatprep.mubr.msk.f32.mxu0 %vm20015_vm0, %v20016_v1 }
 0x3cf   :  { %18545 = vmatpush3.bf16.msra.mxu1 %v20331_v37  ;;  %18554 = vmatpush3.bf16.msra.mxu0 %v20335_v38 }
 0x3d0   :  { %18555 = vmatprep.subr.bf16.mxu1 %v20014_v0  ;;  %18564 = vmatprep.subr.bf16.mxu0 %v20014_v0 }
 0x3d2   :  { %16692 = vmatmul.mubr.msk.f32.vlgmr.msra.gmra.mrb[30].mxu1 %vm346_vm1, %v162_v22  ;;  %16710 = vmatmul.mubr.msk.f32.vlgmr.msra.gmra.mrb[30].mxu0 %vm346_vm1, %v162_v22 }
 0x3d3   :  { %18557 = vmatpush3.bf16.msra.mxu1 %v20262_v5  ;;  %18566 = vmatpush3.bf16.msra.mxu0 %v20267_v9 }
 0x3d4   :  { %16716 = vmatprep.mubr.msk.f32.mxu1 %vm20015_vm0, %v20016_v1  ;;  %18558 = vmatprep.subr.bf16.mxu1 %v20014_v0 }
 0x3d5   :  { %16734 = vmatprep.mubr.msk.f32.mxu0 %vm20015_vm0, %v20016_v1  ;;  %18567 = vmatprep.subr.bf16.mxu0 %v20014_v0 }
 0x491   :  { %v2153_v24 = vpop.f32.mrb[24].mxu1  ;;  %v2303_v28 = vpop.f32.mrb[24].mxu0 }
 0x492   :  { %v16646_v27 = vpop.f32.mrb[25].mxu1  ;;  %v16664_v29 = vpop.f32.mrb[25].mxu0 }
 0x499   :  { %v2226_v30 = vpop.f32.mrb[26].mxu1  ;;  %v2373_v33 = vpop.f32.mrb[26].mxu0 }
 0x49a   :  { %v2227_v34 = vadd.f32 %v2226_v30, %v2153_v24  ;;  %v2374_v35 = vadd.f32 %v2373_v33, %v2303_v28  ;;  %v16657_v36 = vpop.f32.mrb[27].mxu1  ;;  %v16675_v39 = vpop.f32.mrb[27].mxu0 }
 0x49c   :  { %v2230_v40 = vadd.f32 %v20359_v43, %v2227_v34  ;;  %v2377_v41 = vadd.f32 %v20364_v46, %v2374_v35 }
 0x49d   :  { %v2450_v42 = vpop.f32.mrb[28].mxu1  ;;  %v2592_v44 = vpop.f32.mrb[28].mxu0 }
 0x49e   :  { %v15300_v45 = vmul.f32 -1.442695, %v2230_v40  ;;  %v15303_v47 = vmul.f32 -1.442695, %v2377_v41  ;;  %v16682_v48 = vpop.f32.mrb[29].mxu1  ;;  %v16700_v49 = vpop.f32.mrb[29].mxu0 }
 0x4a0   :  { %19522 = vpow2.f32 %v15300_v45 }
 0x4a1   :  { %19524 = vpow2.f32 %v15303_v47 }
 0x4a5   :  { %v2520_v50 = vpop.f32.mrb[30].mxu1  ;;  %v2662_v51 = vpop.f32.mrb[30].mxu0 }
 0x4a6   :  { %v2521_v52 = vadd.f32 %v2520_v50, %v2450_v42  ;;  %v2663_v53 = vadd.f32 %v2662_v51, %v2592_v44  ;;  %v16693_v54 = vpop.f32.mrb[31].mxu1  ;;  %v16711_v55 = vpop.f32.mrb[31].mxu0 }
 0x4a8   :  { %v2524_v56 = vadd.f32 %v20371_v59, %v2521_v52  ;;  %v2666_v57 = vadd.f32 %v20376_v62, %v2663_v53 }
 0x4aa   :  { %v19523_v58 = vpop.eup %19522  ;;  %v15308_v60 = vmul.f32 -1.442695, %v2666_v57  ;;  %19526 = vtanh.f32 %v2524_v56 }
 0x4ab   :  { %v19525_v61 = vpop.eup %19524  ;;  %v2234_v63 = vadd.f32 1.0, %v19523_v58 }
 0x4ac   :  { %v2381_v2 = vadd.f32 1.0, %v19525_v61  ;;  %19528 = vpow2.f32 %v15308_v60 }
 0x4ad   :  { %19530 = vrcp.f32 %v2234_v63 }
 0x4ae   :  { %19532 = vrcp.f32 %v2381_v2 }
 0x4b4   :  { %v19527_v3 = vpop.eup %19526 }
 0x4b6   :  { %v19529_v4 = vpop.eup %19528 }
 0x4b7   :  { %v19531_v6 = vpop.eup %19530  ;;  %v2670_v10 = vadd.f32 1.0, %v19529_v4 }
 0x4b8   :  { %v19533_v7 = vpop.eup %19532  ;;  %v2674_v8 = vmul.f32 %v19531_v6, %v19527_v3 }
 0x4b9   :  { %v2673_v11 = vmul.f32 %v19533_v7, %v20500_v17  ;;  %19534 = vrcp.f32 %v2670_v10  ;;  %v163_v17 = vld [vmem:[%s22242_s25 + $0x8] sm:$0x3] }
 0x4bb   :  { %v20560_v14 = vadd.f32 %v2674_v8, %v2673_v11 }
 0x4bd   :  { %19536 = vtanh.f32 %v20560_v14 }
 0x4c3   :  { %v19535_v15 = vpop.eup %19534 }
 0x4c7   :  { %v19537_v16 = vpop.eup %19536 }
 0x4c8   :  { %v2677_v20 = vmul.f32 %v19537_v16, %v19535_v15 }
 0x4ca   :  { %2678 = vst.msk [vmem:[#allocation2 + $0x6] sm:$0x3] %vm892_vm3, %v2677_v20  ;;  %16717 = vmatmul.mubr.msk.f32.vlgmr.msra.gmra.mrb[32].mxu1 %vm272_vm2, %v2677_v20  ;;  %16735 = vmatmul.mubr.msk.f32.vlgmr.msra.gmra.mrb[32].mxu0 %vm272_vm2, %v2677_v20 }
 0x4cb   :  { %18560 = vmatpush3.bf16.msra.mxu1 %v20270_v12  ;;  %18569 = vmatpush3.bf16.msra.mxu0 %v20274_v13 }
 0x4cc   :  { %18561 = vmatprep.subr.bf16.mxu1 %v20014_v0  ;;  %18570 = vmatprep.subr.bf16.mxu0 %v20014_v0 }
 0x4cd   :  { %16727 = vmatprep.mubr.msk.f32.mxu1 %vm20015_vm0, %v20016_v1  ;;  %16745 = vmatprep.mubr.msk.f32.mxu0 %vm20015_vm0, %v20016_v1 }
 0x4cf   :  { %18563 = vmatpush3.bf16.msra.mxu1 %v20280_v18  ;;  %18572 = vmatpush3.bf16.msra.mxu0 %v20284_v19 }
 0x4d0   :  { %18573 = vmatprep.subr.bf16.mxu1 %v20014_v0  ;;  %18582 = vmatprep.subr.bf16.mxu0 %v20014_v0 }
 0x4d2   :  { %16728 = vmatmul.mubr.msk.f32.vlgmr.msra.gmra.mrb[34].mxu1 %vm346_vm1, %v163_v17  ;;  %16746 = vmatmul.mubr.msk.f32.vlgmr.msra.gmra.mrb[34].mxu0 %vm346_vm1, %v163_v17 }
 0x4d3   :  { %18575 = vmatpush3.bf16.msra.mxu1 %v20307_v25  ;;  %18584 = vmatpush3.bf16.msra.mxu0 %v20311_v26 }
 0x4d4   :  { %16752 = vmatprep.mubr.msk.f32.mxu1 %vm20015_vm0, %v20016_v1  ;;  %16770 = vmatprep.mubr.msk.f32.mxu0 %vm20015_vm0, %v20016_v1 }
 0x4d5   :  { %18576 = vmatprep.subr.bf16.mxu1 %v20014_v0  ;;  %18585 = vmatprep.subr.bf16.mxu0 %v20014_v0 }
 0x4d6   :  { %16753 = vmatmul.mubr.msk.f32.vlgmr.msra.gmra.mrb[36].mxu1 %vm272_vm2, %v2677_v20  ;;  %16771 = vmatmul.mubr.msk.f32.vlgmr.msra.gmra.mrb[36].mxu0 %vm272_vm2, %v2677_v20 }
 0x4d7   :  { %18578 = vmatpush3.bf16.msra.mxu1 %v20317_v31  ;;  %18587 = vmatpush3.bf16.msra.mxu0 %v20322_v32 }
 0x4d8   :  { %18579 = vmatprep.subr.bf16.mxu1 %v20014_v0  ;;  %18588 = vmatprep.subr.bf16.mxu0 %v20014_v0 }
 0x4d9   :  { %16763 = vmatprep.mubr.msk.f32.mxu1 %vm20015_vm0, %v20016_v1  ;;  %16781 = vmatprep.mubr.msk.f32.mxu0 %vm20015_vm0, %v20016_v1 }
 0x4db   :  { %18581 = vmatpush3.bf16.msra.mxu1 %v20331_v37  ;;  %18590 = vmatpush3.bf16.msra.mxu0 %v20335_v38 }
 0x4dc   :  { %18591 = vmatprep.subr.bf16.mxu1 %v20014_v0  ;;  %18600 = vmatprep.subr.bf16.mxu0 %v20014_v0 }
 0x4de   :  { %16764 = vmatmul.mubr.msk.f32.vlgmr.msra.gmra.mrb[38].mxu1 %vm346_vm1, %v163_v17  ;;  %16782 = vmatmul.mubr.msk.f32.vlgmr.msra.gmra.mrb[38].mxu0 %vm346_vm1, %v163_v17 }
 0x4df   :  { %18593 = vmatpush3.bf16.msra.mxu1 %v20262_v5  ;;  %18602 = vmatpush3.bf16.msra.mxu0 %v20267_v9 }
 0x4e0   :  { %16788 = vmatprep.mubr.msk.f32.mxu1 %vm20015_vm0, %v20016_v1  ;;  %18594 = vmatprep.subr.bf16.mxu1 %v20014_v0 }
 0x4e1   :  { %16806 = vmatprep.mubr.msk.f32.mxu0 %vm20015_vm0, %v20016_v1  ;;  %18603 = vmatprep.subr.bf16.mxu0 %v20014_v0 }
 0x59d   :  { %v2748_v21 = vpop.f32.mrb[32].mxu1  ;;  %v2898_v23 = vpop.f32.mrb[32].mxu0 }
 0x59e   :  { %v16718_v22 = vpop.f32.mrb[33].mxu1  ;;  %v16736_v24 = vpop.f32.mrb[33].mxu0 }
 0x5a5   :  { %v2821_v28 = vpop.f32.mrb[34].mxu1  ;;  %v2968_v27 = vpop.f32.mrb[34].mxu0 }
 0x5a6   :  { %v2822_v29 = vadd.f32 %v2821_v28, %v2748_v21  ;;  %v2969_v30 = vadd.f32 %v2968_v27, %v2898_v23  ;;  %v16729_v33 = vpop.f32.mrb[35].mxu1  ;;  %v16747_v34 = vpop.f32.mrb[35].mxu0 }
 0x5a8   :  { %v2825_v35 = vadd.f32 %v20359_v43, %v2822_v29  ;;  %v2972_v36 = vadd.f32 %v20364_v46, %v2969_v30 }
 0x5a9   :  { %v3045_v39 = vpop.f32.mrb[36].mxu1  ;;  %v3187_v40 = vpop.f32.mrb[36].mxu0 }
 0x5aa   :  { %v15311_v41 = vmul.f32 -1.442695, %v2825_v35  ;;  %v15314_v42 = vmul.f32 -1.442695, %v2972_v36  ;;  %v16754_v44 = vpop.f32.mrb[37].mxu1  ;;  %v16772_v45 = vpop.f32.mrb[37].mxu0 }
 0x5ac   :  { %19538 = vpow2.f32 %v15311_v41 }
 0x5ad   :  { %19540 = vpow2.f32 %v15314_v42 }
 0x5b1   :  { %v3115_v47 = vpop.f32.mrb[38].mxu1  ;;  %v3257_v48 = vpop.f32.mrb[38].mxu0 }
 0x5b2   :  { %v3116_v49 = vadd.f32 %v3115_v47, %v3045_v39  ;;  %v3258_v50 = vadd.f32 %v3257_v48, %v3187_v40  ;;  %v16765_v51 = vpop.f32.mrb[39].mxu1  ;;  %v16783_v52 = vpop.f32.mrb[39].mxu0 }
 0x5b4   :  { %v3119_v53 = vadd.f32 %v20371_v59, %v3116_v49  ;;  %v3261_v54 = vadd.f32 %v20376_v62, %v3258_v50 }
 0x5b6   :  { %v19539_v55 = vpop.eup %19538  ;;  %v15319_v56 = vmul.f32 -1.442695, %v3261_v54  ;;  %19542 = vtanh.f32 %v3119_v53 }
 0x5b7   :  { %v19541_v57 = vpop.eup %19540  ;;  %v2829_v58 = vadd.f32 1.0, %v19539_v55 }
 0x5b8   :  { %v2976_v60 = vadd.f32 1.0, %v19541_v57  ;;  %19544 = vpow2.f32 %v15319_v56 }
 0x5b9   :  { %19546 = vrcp.f32 %v2829_v58 }
 0x5ba   :  { %19548 = vrcp.f32 %v2976_v60 }
 0x5c0   :  { %v19543_v61 = vpop.eup %19542 }
 0x5c2   :  { %v19545_v63 = vpop.eup %19544 }
 0x5c3   :  { %v19547_v2 = vpop.eup %19546  ;;  %v3265_v6 = vadd.f32 1.0, %v19545_v63 }
 0x5c4   :  { %v19549_v3 = vpop.eup %19548  ;;  %v3269_v4 = vmul.f32 %v19547_v2, %v19543_v61 }
 0x5c5   :  { %v3268_v7 = vmul.f32 %v19549_v3, %v20560_v14  ;;  %19550 = vrcp.f32 %v3265_v6  ;;  %v164_v14 = vld [vmem:[%s22242_s25 + $0xa] sm:$0x3] }
 0x5c7   :  { %v20620_v8 = vadd.f32 %v3269_v4, %v3268_v7  ;;  %v165_v4 = vld [vmem:[%s22242_s25 + $0xc] sm:$0x3] }
 0x5c9   :  { %19552 = vtanh.f32 %v20620_v8 }
 0x5cf   :  { %v19551_v10 = vpop.eup %19550 }
 0x5d3   :  { %v19553_v11 = vpop.eup %19552 }
 0x5d4   :  { %v3272_v15 = vmul.f32 %v19553_v11, %v19551_v10 }
 0x5d6   :  { %3273 = vst.msk [vmem:[#allocation2 + $0x8] sm:$0x3] %vm892_vm3, %v3272_v15  ;;  %16789 = vmatmul.mubr.msk.f32.vlgmr.msra.gmra.mrb[40].mxu1 %vm272_vm2, %v3272_v15  ;;  %16807 = vmatmul.mubr.msk.f32.vlgmr.msra.gmra.mrb[40].mxu0 %vm272_vm2, %v3272_v15 }
 0x5d7   :  { %18596 = vmatpush3.bf16.msra.mxu1 %v20270_v12  ;;  %18605 = vmatpush3.bf16.msra.mxu0 %v20274_v13 }
 0x5d8   :  { %18597 = vmatprep.subr.bf16.mxu1 %v20014_v0  ;;  %18606 = vmatprep.subr.bf16.mxu0 %v20014_v0 }
 0x5d9   :  { %16799 = vmatprep.mubr.msk.f32.mxu1 %vm20015_vm0, %v20016_v1  ;;  %16817 = vmatprep.mubr.msk.f32.mxu0 %vm20015_vm0, %v20016_v1 }
 0x5db   :  { %18599 = vmatpush3.bf16.msra.mxu1 %v20280_v18  ;;  %18608 = vmatpush3.bf16.msra.mxu0 %v20284_v19 }
 0x5dc   :  { %18609 = vmatprep.subr.bf16.mxu1 %v20014_v0  ;;  %18618 = vmatprep.subr.bf16.mxu0 %v20014_v0 }
 0x5de   :  { %16800 = vmatmul.mubr.msk.f32.vlgmr.msra.gmra.mrb[42].mxu1 %vm346_vm1, %v164_v14  ;;  %16818 = vmatmul.mubr.msk.f32.vlgmr.msra.gmra.mrb[42].mxu0 %vm346_vm1, %v164_v14 }
 0x5df   :  { %18611 = vmatpush3.bf16.msra.mxu1 %v20307_v25  ;;  %18620 = vmatpush3.bf16.msra.mxu0 %v20311_v26 }
 0x5e0   :  { %16824 = vmatprep.mubr.msk.f32.mxu1 %vm20015_vm0, %v20016_v1  ;;  %16842 = vmatprep.mubr.msk.f32.mxu0 %vm20015_vm0, %v20016_v1 }
 0x5e1   :  { %18612 = vmatprep.subr.bf16.mxu1 %v20014_v0  ;;  %18621 = vmatprep.subr.bf16.mxu0 %v20014_v0 }
 0x5e2   :  { %16825 = vmatmul.mubr.msk.f32.vlgmr.msra.gmra.mrb[44].mxu1 %vm272_vm2, %v3272_v15  ;;  %16843 = vmatmul.mubr.msk.f32.vlgmr.msra.gmra.mrb[44].mxu0 %vm272_vm2, %v3272_v15 }
 0x5e3   :  { %18614 = vmatpush3.bf16.msra.mxu1 %v20317_v31  ;;  %18623 = vmatpush3.bf16.msra.mxu0 %v20322_v32 }
 0x5e4   :  { %18615 = vmatprep.subr.bf16.mxu1 %v20014_v0  ;;  %18624 = vmatprep.subr.bf16.mxu0 %v20014_v0 }
 0x5e5   :  { %16835 = vmatprep.mubr.msk.f32.mxu1 %vm20015_vm0, %v20016_v1  ;;  %16853 = vmatprep.mubr.msk.f32.mxu0 %vm20015_vm0, %v20016_v1 }
 0x5e7   :  { %18617 = vmatpush3.bf16.msra.mxu1 %v20331_v37  ;;  %18626 = vmatpush3.bf16.msra.mxu0 %v20335_v38 }
 0x5e8   :  { %18627 = vmatprep.subr.bf16.mxu1 %v20014_v0  ;;  %18636 = vmatprep.subr.bf16.mxu0 %v20014_v0 }
 0x5ea   :  { %16836 = vmatmul.mubr.msk.f32.vlgmr.msra.gmra.mrb[46].mxu1 %vm346_vm1, %v164_v14  ;;  %16854 = vmatmul.mubr.msk.f32.vlgmr.msra.gmra.mrb[46].mxu0 %vm346_vm1, %v164_v14 }
 0x5eb   :  { %18629 = vmatpush3.bf16.msra.mxu1 %v20262_v5  ;;  %18638 = vmatpush3.bf16.msra.mxu0 %v20267_v9 }
 0x5ec   :  { %16860 = vmatprep.mubr.msk.f32.mxu1 %vm20015_vm0, %v20016_v1  ;;  %18630 = vmatprep.subr.bf16.mxu1 %v20014_v0 }
 0x5ed   :  { %16878 = vmatprep.mubr.msk.f32.mxu0 %vm20015_vm0, %v20016_v1  ;;  %18639 = vmatprep.subr.bf16.mxu0 %v20014_v0 }
 0x6a9   :  { %v3343_v16 = vpop.f32.mrb[40].mxu1  ;;  %v3493_v20 = vpop.f32.mrb[40].mxu0 }
 0x6aa   :  { %v16790_v17 = vpop.f32.mrb[41].mxu1  ;;  %v16808_v21 = vpop.f32.mrb[41].mxu0 }
 0x6ab   :  { %v20744_v21 = vld [vmem:[%s22227_s4 + $0x1] ss:$0 sm:$0xff] }
 0x6b1   :  { %v3416_v23 = vpop.f32.mrb[42].mxu1  ;;  %v3563_v22 = vpop.f32.mrb[42].mxu0 }
 0x6b2   :  { %v3417_v24 = vadd.f32 %v3416_v23, %v3343_v16  ;;  %v3564_v28 = vadd.f32 %v3563_v22, %v3493_v20  ;;  %v16801_v27 = vpop.f32.mrb[43].mxu1  ;;  %v16819_v29 = vpop.f32.mrb[43].mxu0  ;;  %v20738_v20 = vld [vmem:[%s22227_s4] ss:$0 sm:$0xff] }
 0x6b4   :  { %v3420_v30 = vadd.f32 %v20359_v43, %v3417_v24  ;;  %v3567_v33 = vadd.f32 %v20364_v46, %v3564_v28 }
 0x6b5   :  { %v3640_v34 = vpop.f32.mrb[44].mxu1  ;;  %v3782_v35 = vpop.f32.mrb[44].mxu0 }
 0x6b6   :  { %v15322_v36 = vmul.f32 -1.442695, %v3420_v30  ;;  %v15325_v39 = vmul.f32 -1.442695, %v3567_v33  ;;  %v16826_v40 = vpop.f32.mrb[45].mxu1  ;;  %v16844_v41 = vpop.f32.mrb[45].mxu0 }
 0x6b7   :  { %v20750_v41 = vld [vmem:[%s22227_s4 + $0x2] ss:$0 sm:$0xff] }
 0x6b8   :  { %19554 = vpow2.f32 %v15322_v36 }
 0x6b9   :  { %19556 = vpow2.f32 %v15325_v39 }
 0x6bd   :  { %v3710_v42 = vpop.f32.mrb[46].mxu1  ;;  %v3852_v44 = vpop.f32.mrb[46].mxu0 }
 0x6be   :  { %v3711_v45 = vadd.f32 %v3710_v42, %v3640_v34  ;;  %v3853_v47 = vadd.f32 %v3852_v44, %v3782_v35  ;;  %v16837_v48 = vpop.f32.mrb[47].mxu1  ;;  %v16855_v49 = vpop.f32.mrb[47].mxu0  ;;  %v20756_v44 = vld [vmem:[%s22227_s4 + $0x3] ss:$0 sm:$0xff] }
 0x6c0   :  { %v3714_v50 = vadd.f32 %v20371_v59, %v3711_v45  ;;  %v3856_v43 = vadd.f32 %v20376_v62, %v3853_v47 }
 0x6c2   :  { %v19555_v51 = vpop.eup %19554  ;;  %v15330_v46 = vmul.f32 -1.442695, %v3856_v43  ;;  %19558 = vtanh.f32 %v3714_v50 }
 0x6c3   :  { %v19557_v52 = vpop.eup %19556  ;;  %v3424_v53 = vadd.f32 1.0, %v19555_v51 }
 0x6c4   :  { %v3571_v54 = vadd.f32 1.0, %v19557_v52  ;;  %19560 = vpow2.f32 %v15330_v46 }
 0x6c5   :  { %19562 = vrcp.f32 %v3424_v53 }
 0x6c6   :  { %19564 = vrcp.f32 %v3571_v54 }
 0x6cc   :  { %v19559_v55 = vpop.eup %19558 }
 0x6ce   :  { %v19561_v56 = vpop.eup %19560 }
 0x6cf   :  { %v19563_v57 = vpop.eup %19562  ;;  %v3860_v61 = vadd.f32 1.0, %v19561_v56 }
 0x6d0   :  { %v19565_v58 = vpop.eup %19564  ;;  %v3864_v60 = vmul.f32 %v19563_v57, %v19559_v55 }
 0x6d1   :  { %v3863_v63 = vmul.f32 %v19565_v58, %v20620_v8  ;;  %19566 = vrcp.f32 %v3860_v61 }
 0x6d3   :  { %v20680_v59 = vadd.f32 %v3864_v60, %v3863_v63  ;;  %v222_v63 = vld [vmem:[%s22229_s6 + $0x18] sm:$0xff] }
 0x6d5   :  { %19568 = vtanh.f32 %v20680_v59 }
 0x6db   :  { %v19567_v62 = vpop.eup %19566 }
 0x6df   :  { %v19569_v2 = vpop.eup %19568 }
 0x6e0   :  { %v3867_v3 = vmul.f32 %v19569_v2, %v19567_v62  ;;  %v235_v2 = vld [vmem:[%s22230_s7] sm:$0xff] }
 0x6e2   :  { %3868 = vst.msk [vmem:[#allocation2 + $0xa] sm:$0x3] %vm892_vm3, %v3867_v3  ;;  %16861 = vmatmul.mubr.msk.f32.vlgmr.msra.gmra.mrb[48].mxu1 %vm272_vm2, %v3867_v3  ;;  %16879 = vmatmul.mubr.msk.f32.vlgmr.msra.gmra.mrb[48].mxu0 %vm272_vm2, %v3867_v3 }
 0x6e3   :  { %18632 = vmatpush3.bf16.msra.mxu1 %v20270_v12  ;;  %18641 = vmatpush3.bf16.msra.mxu0 %v20274_v13 }
 0x6e4   :  { %18633 = vmatprep.subr.bf16.mxu1 %v20014_v0  ;;  %18642 = vmatprep.subr.bf16.mxu0 %v20014_v0 }
 0x6e5   :  { %16871 = vmatprep.mubr.msk.f32.mxu1 %vm20015_vm0, %v20016_v1  ;;  %16889 = vmatprep.mubr.msk.f32.mxu0 %vm20015_vm0, %v20016_v1 }
 0x6e7   :  { %18635 = vmatpush3.bf16.msra.mxu1 %v20280_v18  ;;  %18644 = vmatpush3.bf16.msra.mxu0 %v20284_v19 }
 0x6e8   :  { %18645 = vmatprep.subr.bf16.mxu1 %v20014_v0  ;;  %18654 = vmatprep.subr.bf16.mxu0 %v20014_v0 }
 0x6ea   :  { %16872 = vmatmul.mubr.msk.f32.vlgmr.msra.gmra.mrb[50].mxu1 %vm346_vm1, %v165_v4  ;;  %16890 = vmatmul.mubr.msk.f32.vlgmr.msra.gmra.mrb[50].mxu0 %vm346_vm1, %v165_v4 }
 0x6eb   :  { %18647 = vmatpush3.bf16.msra.mxu1 %v20307_v25  ;;  %18656 = vmatpush3.bf16.msra.mxu0 %v20311_v26 }
 0x6ec   :  { %16896 = vmatprep.mubr.msk.f32.mxu1 %vm20015_vm0, %v20016_v1  ;;  %16914 = vmatprep.mubr.msk.f32.mxu0 %vm20015_vm0, %v20016_v1 }
 0x6ed   :  { %18648 = vmatprep.subr.bf16.mxu1 %v20014_v0  ;;  %18657 = vmatprep.subr.bf16.mxu0 %v20014_v0 }
 0x6ee   :  { %16897 = vmatmul.mubr.msk.f32.vlgmr.msra.gmra.mrb[52].mxu1 %vm272_vm2, %v3867_v3  ;;  %16915 = vmatmul.mubr.msk.f32.vlgmr.msra.gmra.mrb[52].mxu0 %vm272_vm2, %v3867_v3  ;;  %v236_v3 = vld [vmem:[%s22230_s7 + $0x8] sm:$0xff] }
 0x6ef   :  { %18650 = vmatpush3.bf16.msra.mxu1 %v20317_v31  ;;  %18659 = vmatpush3.bf16.msra.mxu0 %v20322_v32 }
 0x6f0   :  { %18651 = vmatprep.subr.bf16.mxu1 %v20014_v0  ;;  %18660 = vmatprep.subr.bf16.mxu0 %v20014_v0 }
 0x6f1   :  { %16907 = vmatprep.mubr.msk.f32.mxu1 %vm20015_vm0, %v20016_v1  ;;  %16925 = vmatprep.mubr.msk.f32.mxu0 %vm20015_vm0, %v20016_v1 }
 0x6f3   :  { %18653 = vmatpush3.bf16.msra.mxu1 %v20331_v37  ;;  %18662 = vmatpush3.bf16.msra.mxu0 %v20335_v38 }
 0x6f4   :  { %18663 = vmatprep.subr.bf16.mxu1 %v20014_v0  ;;  %18672 = vmatprep.subr.bf16.mxu0 %v20014_v0 }
 0x6f6   :  { %16908 = vmatmul.mubr.msk.f32.vlgmr.msra.gmra.mrb[54].mxu1 %vm346_vm1, %v165_v4  ;;  %16926 = vmatmul.mubr.msk.f32.vlgmr.msra.gmra.mrb[54].mxu0 %vm346_vm1, %v165_v4  ;;  %v223_v4 = vld [vmem:[%s22229_s6 + $0x20] sm:$0xff] }
 0x6f7   :  { %18665 = vmatpush3.bf16.msra.mxu1 %v20262_v5  ;;  %18674 = vmatpush3.bf16.msra.mxu0 %v20267_v9 }
 0x6f8   :  { %16932 = vmatprep.mubr.msk.f32.mxu1 %vm20015_vm0, %v20016_v1  ;;  %18666 = vmatprep.subr.bf16.mxu1 %v20014_v0 }
 0x6f9   :  { %16950 = vmatprep.mubr.msk.f32.mxu0 %vm20015_vm0, %v20016_v1  ;;  %18675 = vmatprep.subr.bf16.mxu0 %v20014_v0 }
 0x7b5   :  { %v3938_v6 = vpop.f32.mrb[48].mxu1  ;;  %v4088_v7 = vpop.f32.mrb[48].mxu0 }
 0x7b6   :  { %v16862_v8 = vpop.f32.mrb[49].mxu1  ;;  %v16880_v10 = vpop.f32.mrb[49].mxu0 }
 0x7b7   :  { %v20854_v8 = vpack.c.bf16 %v236_v3, %v235_v2 }
 0x7bd   :  { %v4011_v11 = vpop.f32.mrb[50].mxu1  ;;  %v4158_v15 = vpop.f32.mrb[50].mxu0 }
 0x7be   :  { %v4012_v14 = vadd.f32 %v4011_v11, %v3938_v6  ;;  %v4159_v5 = vadd.f32 %v4158_v15, %v4088_v7  ;;  %v16873_v16 = vpop.f32.mrb[51].mxu1  ;;  %v16891_v9 = vpop.f32.mrb[51].mxu0  ;;  %v224_v6 = vld [vmem:[%s22229_s6 + $0x28] sm:$0xff]  ;;  %v20852_v7 = vld [vmem:[%s22224_s1] sm:$0x3]  ;;  %v237_v11 = vld [vmem:[%s22230_s7 + $0x10] sm:$0xff] }
 0x7bf   :  { %v20856_v10 = vpack.c.bf16 %v224_v6, %v223_v4  ;;  %v238_v15 = vld [vmem:[%s22230_s7 + $0x18] sm:$0xff]  ;;  %v217_v4 = vld [vmem:[#allocation7 + $0x70] sm:$0xff] }
 0x7c0   :  { %v4015_v17 = vadd.f32 %v20738_v20, %v4012_v14  ;;  %v4162_v23 = vadd.f32 %v20744_v21, %v4159_v5  ;;  %v225_v14 = vld [vmem:[%s22229_s6 + $0x30] sm:$0xff]  ;;  %v226_v5 = vld [vmem:[%s22229_s6 + $0x38] sm:$0xff]  ;;  %v20877_v16 = vpack.c.bf16 %v238_v15, %v237_v11 }
 0x7c1   :  { %v4235_v22 = vpop.f32.mrb[52].mxu1  ;;  %v4377_v24 = vpop.f32.mrb[52].mxu0  ;;  %v20879_v9 = vpack.c.bf16 %v226_v5, %v225_v14  ;;  %v218_v6 = vld [vmem:[#allocation7 + $0x78] sm:$0xff]  ;;  %v249_v11 = vld [vmem:[%s22230_s7 + $0x70] sm:$0xff] }
 0x7c2   :  { %v15333_v28 = vmul.f32 -1.442695, %v4015_v17  ;;  %v15336_v27 = vmul.f32 -1.442695, %v4162_v23  ;;  %v16898_v29 = vpop.f32.mrb[53].mxu1  ;;  %v16916_v30 = vpop.f32.mrb[53].mxu0  ;;  %v21027_v14 = vpack.c.bf16 %v218_v6, %v217_v4 }
 0x7c3   :  { %v207_v17 = vld [vmem:[#allocation7 + $0x20] sm:$0xff]  ;;  %v208_v23 = vld [vmem:[#allocation7 + $0x28] sm:$0xff]  ;;  %v209_v29 = vld [vmem:[#allocation7 + $0x30] sm:$0xff] }
 0x7c4   :  { %19570 = vpow2.f32 %v15333_v28  ;;  %v20895_v28 = vpack.c.bf16 %v208_v23, %v207_v17  ;;  %v210_v30 = vld [vmem:[#allocation7 + $0x38] sm:$0xff]  ;;  %v255_v17 = vld [vmem:[#allocation9] sm:$0xff]  ;;  %v256_v23 = vld [vmem:[#allocation9 + $0x8] sm:$0xff] }
 0x7c5   :  { %19572 = vpow2.f32 %v15336_v27  ;;  %v250_v15 = vld [vmem:[%s22230_s7 + $0x78] sm:$0xff] }
 0x7c6   :  { %v21029_v5 = vpack.c.bf16 %v250_v15, %v249_v11 }
 0x7c9   :  { %v4305_v33 = vpop.f32.mrb[54].mxu1  ;;  %v4447_v34 = vpop.f32.mrb[54].mxu0 }
 0x7ca   :  { %v4306_v35 = vadd.f32 %v4305_v33, %v4235_v22  ;;  %v4448_v36 = vadd.f32 %v4447_v34, %v4377_v24  ;;  %v16909_v39 = vpop.f32.mrb[55].mxu1  ;;  %v16927_v40 = vpop.f32.mrb[55].mxu0  ;;  %v239_v22 = vld [vmem:[%s22230_s7 + $0x20] sm:$0xff]  ;;  %v240_v24 = vld [vmem:[%s22230_s7 + $0x28] sm:$0xff]  ;;  %v241_v33 = vld [vmem:[%s22230_s7 + $0x30] sm:$0xff] }
 0x7cb   :  { %v20897_v27 = vpack.c.bf16 %v240_v24, %v239_v22  ;;  %v242_v34 = vld [vmem:[%s22230_s7 + $0x38] sm:$0xff]  ;;  %v227_v39 = vld [vmem:[%s22229_s6 + $0x40] sm:$0xff]  ;;  %v228_v40 = vld [vmem:[%s22229_s6 + $0x48] sm:$0xff]  ;;  %v21048_v24 = vpack.c.bf16 %v256_v23, %v255_v17 }
 0x7cc   :  { %v4309_v42 = vadd.f32 %v20750_v41, %v4306_v35  ;;  %v4451_v45 = vadd.f32 %v20756_v44, %v4448_v36  ;;  %v20911_v35 = vpack.c.bf16 %v210_v30, %v209_v29  ;;  %v20913_v36 = vpack.c.bf16 %v242_v34, %v241_v33  ;;  %v257_v22 = vld [vmem:[#allocation9 + $0x10] sm:$0xff]  ;;  %v258_v29 = vld [vmem:[#allocation9 + $0x18] sm:$0xff] }
 0x7cd   :  { %v21051_v30 = vpack.c.bf16 %v258_v29, %v257_v22 }
 0x7ce   :  { %v19571_v47 = vpop.eup %19570  ;;  %v15341_v48 = vmul.f32 -1.442695, %v4451_v45  ;;  %19574 = vtanh.f32 %v4309_v42  ;;  %v211_v42 = vld [vmem:[#allocation7 + $0x40] sm:$0xff]  ;;  %v212_v45 = vld [vmem:[#allocation7 + $0x48] sm:$0xff] }
 0x7cf   :  { %v19573_v49 = vpop.eup %19572  ;;  %v4019_v50 = vadd.f32 1.0, %v19571_v47  ;;  %v20929_v47 = vpack.c.bf16 %v228_v40, %v227_v39 }
 0x7d0   :  { %v4166_v43 = vadd.f32 1.0, %v19573_v49  ;;  %19576 = vpow2.f32 %v15341_v48  ;;  %v20931_v48 = vpack.c.bf16 %v212_v45, %v211_v42  ;;  %v229_v49 = vld [vmem:[%s22229_s6 + $0x50] sm:$0xff] }
 0x7d1   :  { %19578 = vrcp.f32 %v4019_v50  ;;  %v230_v50 = vld [vmem:[%s22229_s6 + $0x58] sm:$0xff] }
 0x7d2   :  { %19580 = vrcp.f32 %v4166_v43  ;;  %v213_v43 = vld [vmem:[#allocation7 + $0x50] sm:$0xff] }
 0x7d8   :  { %v19575_v51 = vpop.eup %19574 }
 0x7da   :  { %v19577_v46 = vpop.eup %19576 }
 0x7db   :  { %v19579_v52 = vpop.eup %19578  ;;  %v4455_v55 = vadd.f32 1.0, %v19577_v46  ;;  %v20946_v46 = vpack.c.bf16 %v230_v50, %v229_v49 }
 0x7dc   :  { %v19581_v53 = vpop.eup %19580  ;;  %v4459_v54 = vmul.f32 %v19579_v52, %v19575_v51  ;;  %v214_v51 = vld [vmem:[#allocation7 + $0x58] sm:$0xff] }
 0x7dd   :  { %v4458_v56 = vmul.f32 %v19581_v53, %v20680_v59  ;;  %19582 = vrcp.f32 %v4455_v55  ;;  %v205_v59 = vld [vmem:[#allocation7 + $0x10] sm:$0xff]  ;;  %v20948_v52 = vpack.c.bf16 %v214_v51, %v213_v43  ;;  %v243_v53 = vld [vmem:[%s22230_s7 + $0x40] sm:$0xff] }
 0x7de   :  { %v231_v55 = vld [vmem:[%s22229_s6 + $0x60] sm:$0xff] }
 0x7df   :  { %v20760_v57 = vadd.f32 %v4459_v54, %v4458_v56  ;;  %v244_v54 = vld [vmem:[%s22230_s7 + $0x48] sm:$0xff] }
 0x7e0   :  { %v232_v56 = vld [vmem:[%s22229_s6 + $0x68] sm:$0xff] }
 0x7e1   :  { %19584 = vtanh.f32 %v20760_v57 }
 0x7e7   :  { %v19583_v58 = vpop.eup %19582 }
 0x7eb   :  { %v19585_v60 = vpop.eup %19584 }
 0x7ec   :  { %v4462_v61 = vmul.f32 %v19585_v60, %v19583_v58  ;;  %v20970_v58 = vpack.c.bf16 %v244_v54, %v243_v53  ;;  %v20972_v60 = vpack.c.bf16 %v232_v56, %v231_v55 }
 0x7ee   :  { %4463 = vst.msk [vmem:[#allocation2 + $0xc] sm:$0x3] %vm892_vm3, %v4462_v61  ;;  %16933 = vmatmul.mubr.msk.f32.vlgmr.msra.gmra.mrb[56].mxu1 %vm272_vm2, %v4462_v61  ;;  %16951 = vmatmul.mubr.msk.f32.vlgmr.msra.gmra.mrb[56].mxu0 %vm272_vm2, %v4462_v61 }
 0x7ef   :  { %18668 = vmatpush3.bf16.msra.mxu1 %v20270_v12  ;;  %18677 = vmatpush3.bf16.msra.mxu0 %v20274_v13  ;;  %v166_v12 = vld [vmem:[%s22242_s25 + $0xe] sm:$0x3]  ;;  %v219_v13 = vld [vmem:[%s22229_s6] sm:$0xff] }
 0x7f0   :  { %18669 = vmatprep.subr.bf16.mxu1 %v20014_v0  ;;  %18678 = vmatprep.subr.bf16.mxu0 %v20014_v0 }
 0x7f1   :  { %16943 = vmatprep.mubr.msk.f32.mxu1 %vm20015_vm0, %v20016_v1  ;;  %16961 = vmatprep.mubr.msk.f32.mxu0 %vm20015_vm0, %v20016_v1 }
 0x7f3   :  { %18671 = vmatpush3.bf16.msra.mxu1 %v20280_v18  ;;  %18680 = vmatpush3.bf16.msra.mxu0 %v20284_v19  ;;  %v220_v18 = vld [vmem:[%s22229_s6 + $0x8] sm:$0xff]  ;;  %v203_v19 = vld [vmem:[#allocation7] sm:$0xff] }
 0x7f4   :  { %18681 = vmatprep.subr.bf16.mxu1 %v20014_v0  ;;  %18690 = vmatprep.subr.bf16.mxu0 %v20014_v0 }
 0x7f6   :  { %16944 = vmatmul.mubr.msk.f32.vlgmr.msra.gmra.mrb[58].mxu1 %vm346_vm1, %v166_v12  ;;  %16962 = vmatmul.mubr.msk.f32.vlgmr.msra.gmra.mrb[58].mxu0 %vm346_vm1, %v166_v12 }
 0x7f7   :  { %18683 = vmatpush3.bf16.msra.mxu1 %v20307_v25  ;;  %18692 = vmatpush3.bf16.msra.mxu0 %v20311_v26  ;;  %v204_v25 = vld [vmem:[#allocation7 + $0x8] sm:$0xff]  ;;  %v20809_v26 = vpack.c.bf16 %v220_v18, %v219_v13  ;;  %v233_v13 = vld [vmem:[%s22229_s6 + $0x70] sm:$0xff]  ;;  %v234_v18 = vld [vmem:[%s22229_s6 + $0x78] sm:$0xff] }
 0x7f8   :  { %16968 = vmatprep.mubr.msk.f32.mxu1 %vm20015_vm0, %v20016_v1  ;;  %16986 = vmatprep.mubr.msk.f32.mxu0 %vm20015_vm0, %v20016_v1 }
 0x7f9   :  { %18684 = vmatprep.subr.bf16.mxu1 %v20014_v0  ;;  %18693 = vmatprep.subr.bf16.mxu0 %v20014_v0 }
 0x7fa   :  { %16969 = vmatmul.mubr.msk.f32.vlgmr.msra.gmra.mrb[60].mxu1 %vm272_vm2, %v4462_v61  ;;  %16987 = vmatmul.mubr.msk.f32.vlgmr.msra.gmra.mrb[60].mxu0 %vm272_vm2, %v4462_v61  ;;  %v245_v61 = vld [vmem:[%s22230_s7 + $0x50] sm:$0xff] }
 0x7fb   :  { %18686 = vmatpush3.bf16.msra.mxu1 %v20317_v31  ;;  %18695 = vmatpush3.bf16.msra.mxu0 %v20322_v32  ;;  %v20811_v31 = vpack.c.bf16 %v204_v25, %v203_v19  ;;  %v221_v32 = vld [vmem:[%s22229_s6 + $0x10] sm:$0xff]  ;;  %v20995_v25 = vpack.c.bf16 %v234_v18, %v233_v13 }
 0x7fc   :  { %18687 = vmatprep.subr.bf16.mxu1 %v20014_v0  ;;  %18696 = vmatprep.subr.bf16.mxu0 %v20014_v0 }
 0x7fd   :  { %16979 = vmatprep.mubr.msk.f32.mxu1 %vm20015_vm0, %v20016_v1  ;;  %16997 = vmatprep.mubr.msk.f32.mxu0 %vm20015_vm0, %v20016_v1 }
 0x7ff   :  { %18689 = vmatpush3.bf16.msra.mxu1 %v20331_v37  ;;  %18698 = vmatpush3.bf16.msra.mxu0 %v20335_v38  ;;  %v206_v37 = vld [vmem:[#allocation7 + $0x18] sm:$0xff]  ;;  %v20825_v38 = vpack.c.bf16 %v222_v63, %v221_v32  ;;  %v215_v32 = vld [vmem:[#allocation7 + $0x60] sm:$0xff]  ;;  %v216_v63 = vld [vmem:[#allocation7 + $0x68] sm:$0xff] }
 0x800   :  { %18699 = vmatprep.subr.bf16.mxu1 %v20014_v0  ;;  %18705 = vmatprep.subr.bf16.mxu0 %v20014_v0  ;;  %v20827_v62 = vpack.c.bf16 %v206_v37, %v205_v59  ;;  %v247_v59 = vld [vmem:[%s22230_s7 + $0x60] sm:$0xff]  ;;  %v248_v37 = vld [vmem:[%s22230_s7 + $0x68] sm:$0xff]  ;;  %v21011_v2 = vpack.c.bf16 %v216_v63, %v215_v32 }
 0x801   :  { %v21013_v3 = vpack.c.bf16 %v248_v37, %v247_v59 }
 0x802   :  { %16980 = vmatmul.mubr.msk.f32.vlgmr.msra.gmra.mrb[62].mxu1 %vm346_vm1, %v166_v12  ;;  %16998 = vmatmul.mubr.msk.f32.vlgmr.msra.gmra.mrb[62].mxu0 %vm346_vm1, %v166_v12  ;;  %v246_v12 = vld [vmem:[%s22230_s7 + $0x58] sm:$0xff] }
 0x803   :  { %18701 = vmatpush3.bf16.msra.mxu1 %v20809_v26  ;;  %18707 = vmatpush3.bf16.msra.mxu0 %v20811_v31  ;;  %v20993_v19 = vpack.c.bf16 %v246_v12, %v245_v61 }
 0x804   :  { %18702 = vmatprep.subr.bf16.mxu1 %v20014_v0  ;;  %18708 = vmatprep.subr.bf16.mxu0 %v20014_v0 }
 0x805   :  { %17008 = vmatprep.mubr.msk.f32.mxu1 %vm20015_vm0, %v20016_v1  ;;  %17019 = vmatprep.mubr.msk.f32.mxu0 %vm20015_vm0, %v20016_v1 }
 0x807   :  { %18704 = vmatpush3.bf16.msra.mxu1 %v20825_v38  ;;  %18710 = vmatpush3.bf16.msra.mxu0 %v20827_v62 }
 0x808   :  { %18711 = vmatprep.subr.bf16.mxu1 %v20014_v0  ;;  %18717 = vmatprep.subr.bf16.mxu0 %v20014_v0 }
 0x80a   :  { %17009 = vmatmul.mubr.f32.vlgmr.msra.gmra.mrb[64].mxu1 %v20016_v1  ;;  %17020 = vmatmul.mubr.msk.f32.vlgmr.msra.gmra.mrb[64].mxu0 %vm346_vm1, %v20852_v7 }
 0x80b   :  { %18713 = vmatpush3.bf16.msra.mxu1 %v20854_v8  ;;  %18719 = vmatpush3.bf16.msra.mxu0 %v20856_v10 }
 0x80c   :  { %18714 = vmatprep.subr.bf16.mxu1 %v20014_v0  ;;  %18720 = vmatprep.subr.bf16.mxu0 %v20014_v0 }
 0x80d   :  { %17030 = vmatprep.mubr.msk.f32.mxu1 %vm20015_vm0, %v20016_v1  ;;  %17041 = vmatprep.mubr.msk.f32.mxu0 %vm20015_vm0, %v20016_v1 }
 0x80f   :  { %18716 = vmatpush3.bf16.msra.mxu1 %v20877_v16  ;;  %18722 = vmatpush3.bf16.msra.mxu0 %v20879_v9 }
 0x810   :  { %18723 = vmatprep.subr.bf16.mxu1 %v20014_v0  ;;  %18729 = vmatprep.subr.bf16.mxu0 %v20014_v0 }
 0x812   :  { %17031 = vmatmul.mubr.f32.vlgmr.msra.gmra.mrb[66].mxu1 %v20016_v1  ;;  %17042 = vmatmul.mubr.f32.vlgmr.msra.gmra.mrb[66].mxu0 %v20016_v1 }
 0x813   :  { %18725 = vmatpush3.bf16.msra.mxu1 %v20895_v28  ;;  %18731 = vmatpush3.bf16.msra.mxu0 %v20897_v27 }
 0x814   :  { %18726 = vmatprep.subr.bf16.mxu1 %v20014_v0  ;;  %18732 = vmatprep.subr.bf16.mxu0 %v20014_v0 }
 0x815   :  { %17052 = vmatprep.mubr.msk.f32.mxu1 %vm20015_vm0, %v20016_v1  ;;  %17063 = vmatprep.mubr.msk.f32.mxu0 %vm20015_vm0, %v20016_v1 }
 0x817   :  { %18728 = vmatpush3.bf16.msra.mxu1 %v20911_v35  ;;  %18734 = vmatpush3.bf16.msra.mxu0 %v20913_v36 }
 0x818   :  { %18735 = vmatprep.subr.bf16.mxu1 %v20014_v0  ;;  %18741 = vmatprep.subr.bf16.mxu0 %v20014_v0 }
 0x81a   :  { %17053 = vmatmul.mubr.msk.f32.vlgmr.msra.gmra.mrb[68].mxu1 %vm346_vm1, %v20852_v7  ;;  %17064 = vmatmul.mubr.f32.vlgmr.msra.gmra.mrb[68].mxu0 %v20016_v1 }
 0x81b   :  { %18737 = vmatpush3.bf16.msra.mxu1 %v20929_v47  ;;  %18743 = vmatpush3.bf16.msra.mxu0 %v20931_v48 }
 0x81c   :  { %18738 = vmatprep.subr.bf16.mxu1 %v20014_v0  ;;  %18744 = vmatprep.subr.bf16.mxu0 %v20014_v0 }
 0x81d   :  { %17074 = vmatprep.mubr.msk.f32.mxu1 %vm20015_vm0, %v20016_v1  ;;  %17085 = vmatprep.mubr.msk.f32.mxu0 %vm20015_vm0, %v20016_v1 }
 0x81f   :  { %18740 = vmatpush3.bf16.msra.mxu1 %v20946_v46  ;;  %18746 = vmatpush3.bf16.msra.mxu0 %v20948_v52 }
 0x820   :  { %18747 = vmatprep.subr.bf16.mxu1 %v20014_v0  ;;  %18753 = vmatprep.subr.bf16.mxu0 %v20014_v0 }
 0x822   :  { %17075 = vmatmul.mubr.f32.vlgmr.msra.gmra.mrb[70].mxu1 %v20016_v1  ;;  %17086 = vmatmul.mubr.msk.f32.vlgmr.msra.gmra.mrb[70].mxu0 %vm346_vm1, %v20852_v7 }
 0x823   :  { %18749 = vmatpush3.bf16.msra.mxu1 %v20970_v58  ;;  %18755 = vmatpush3.bf16.msra.mxu0 %v20972_v60 }
 0x824   :  { %18750 = vmatprep.subr.bf16.mxu1 %v20014_v0  ;;  %18756 = vmatprep.subr.bf16.mxu0 %v20014_v0 }
 0x825   :  { %17096 = vmatprep.mubr.msk.f32.mxu1 %vm20015_vm0, %v20016_v1  ;;  %17107 = vmatprep.mubr.msk.f32.mxu0 %vm20015_vm0, %v20016_v1 }
 0x827   :  { %18752 = vmatpush3.bf16.msra.mxu1 %v20993_v19  ;;  %18758 = vmatpush3.bf16.msra.mxu0 %v20995_v25 }
 0x828   :  { %18759 = vmatprep.subr.bf16.mxu1 %v20014_v0  ;;  %18765 = vmatprep.subr.bf16.mxu0 %v20014_v0 }
 0x82a   :  { %17097 = vmatmul.mubr.f32.vlgmr.msra.gmra.mrb[72].mxu1 %v20016_v1  ;;  %17108 = vmatmul.mubr.f32.vlgmr.msra.gmra.mrb[72].mxu0 %v20016_v1 }
 0x82b   :  { %18761 = vmatpush3.bf16.msra.mxu1 %v21011_v2  ;;  %18767 = vmatpush3.bf16.msra.mxu0 %v21013_v3 }
 0x82c   :  { %18762 = vmatprep.subr.bf16.mxu1 %v20014_v0  ;;  %18768 = vmatprep.subr.bf16.mxu0 %v20014_v0 }
 0x82d   :  { %17118 = vmatprep.mubr.msk.f32.mxu1 %vm20015_vm0, %v20016_v1  ;;  %17129 = vmatprep.mubr.msk.f32.mxu0 %vm20015_vm0, %v20016_v1 }
 0x82f   :  { %18764 = vmatpush3.bf16.msra.mxu1 %v21027_v14  ;;  %18770 = vmatpush3.bf16.msra.mxu0 %v21029_v5 }
 0x830   :  { %18777 = vmatprep.subr.bf16.mxu0 %v20014_v0  ;;  %18771 = vmatprep.subr.bf16.mxu1 %v20014_v0 }
 0x832   :  { %17119 = vmatmul.mubr.msk.f32.vlgmr.msra.gmra.mrb[74].mxu1 %vm346_vm1, %v20852_v7  ;;  %17130 = vmatmul.mubr.f32.vlgmr.msra.gmra.mrb[74].mxu0 %v20016_v1 }
 0x833   :  { %17140 = vmatprep.mubr.msk.f32.mxu1 %vm20015_vm0, %v20016_v1  ;;  %17147 = vmatprep.mubr.msk.f32.mxu0 %vm20015_vm0, %v20016_v1 }
 0x834   :  { %18773 = vmatpush3.bf16.msra.mxu1 %v21048_v24 }
 0x835   :  { %18774 = vmatprep.subr.bf16.mxu1 %v20014_v0 }
 0x838   :  { %18776 = vmatpush3.bf16.msra.mxu1 %v21051_v30 }
 0x839   :  { %18781 = vmatprep.subr.bf16.mxu1 %v20014_v0 }
 0x8c1   :  { %v4533_v7 = vpop.f32.mrb[56].mxu1  ;;  %v4683_v33 = vpop.f32.mrb[56].mxu0 }
 0x8c2   :  { %v16934_v34 = vpop.f32.mrb[57].mxu1  ;;  %v16952_v39 = vpop.f32.mrb[57].mxu0 }
 0x8c9   :  { %v4606_v40 = vpop.f32.mrb[58].mxu1  ;;  %v4753_v42 = vpop.f32.mrb[58].mxu0 }
 0x8ca   :  { %v4607_v45 = vadd.f32 %v4606_v40, %v4533_v7  ;;  %v4754_v49 = vadd.f32 %v4753_v42, %v4683_v33  ;;  %v16945_v50 = vpop.f32.mrb[59].mxu1  ;;  %v16963_v43 = vpop.f32.mrb[59].mxu0 }
 0x8cc   :  { %v4610_v51 = vadd.f32 %v20738_v20, %v4607_v45  ;;  %v4757_v53 = vadd.f32 %v20744_v21, %v4754_v49 }
 0x8cd   :  { %v4830_v54 = vpop.f32.mrb[60].mxu1  ;;  %v4972_v55 = vpop.f32.mrb[60].mxu0 }
 0x8ce   :  { %v15344_v56 = vmul.f32 -1.442695, %v4610_v51  ;;  %v15347_v61 = vmul.f32 -1.442695, %v4757_v53  ;;  %v16970_v12 = vpop.f32.mrb[61].mxu1  ;;  %v16988_v13 = vpop.f32.mrb[61].mxu0 }
 0x8d0   :  { %19586 = vpow2.f32 %v15344_v56 }
 0x8d1   :  { %19588 = vpow2.f32 %v15347_v61 }
 0x8d5   :  { %v4900_v18 = vpop.f32.mrb[62].mxu1  ;;  %v5042_v32 = vpop.f32.mrb[62].mxu0 }
 0x8d6   :  { %v4901_v63 = vadd.f32 %v4900_v18, %v4830_v54  ;;  %v5043_v59 = vadd.f32 %v5042_v32, %v4972_v55  ;;  %v16981_v37 = vpop.f32.mrb[63].mxu1  ;;  %v16999_v4 = vpop.f32.mrb[63].mxu0 }
 0x8d7   :  { %v21070_v37 = vld [vmem:[%s22231_s8 + $0x1] ss:$0 sm:$0xff] }
 0x8d8   :  { %v4904_v6 = vadd.f32 %v20750_v41, %v4901_v63  ;;  %v5046_v20 = vadd.f32 %v20756_v44, %v5043_v59  ;;  %v21063_v41 = vld [vmem:[%s22231_s8] ss:$0 sm:$0xff] }
 0x8da   :  { %v19587_v11 = vpop.eup %19586  ;;  %v15352_v21 = vmul.f32 -1.442695, %v5046_v20  ;;  %19590 = vtanh.f32 %v4904_v6 }
 0x8db   :  { %v19589_v15 = vpop.eup %19588  ;;  %v4614_v17 = vadd.f32 1.0, %v19587_v11 }
 0x8dc   :  { %v4761_v23 = vadd.f32 1.0, %v19589_v15  ;;  %19592 = vpow2.f32 %v15352_v21 }
 0x8dd   :  { %19594 = vrcp.f32 %v4614_v17  ;;  %v5147_v22 = vpop.f32.mrb[64].mxu1  ;;  %v5220_v29 = vpop.f32.mrb[64].mxu0 }
 0x8de   :  { %19596 = vrcp.f32 %v4761_v23  ;;  %v17010_v7 = vpop.f32.mrb[65].mxu1  ;;  %v5221_v33 = vadd.f32 %v5220_v29, %v5147_v22  ;;  %v17021_v34 = vpop.f32.mrb[65].mxu0 }
 0x8df   :  { %v21077_v34 = vld [vmem:[%s22231_s8 + $0x2] ss:$0 sm:$0xff] }
 0x8e4   :  { %v19591_v39 = vpop.eup %19590 }
 0x8e5   :  { %v5290_v44 = vpop.f32.mrb[66].mxu1  ;;  %v5374_v40 = vpop.f32.mrb[66].mxu0 }
 0x8e6   :  { %v19593_v42 = vpop.eup %19592  ;;  %v5294_v45 = vadd.f32 %v5290_v44, %v5221_v33  ;;  %v17032_v49 = vpop.f32.mrb[67].mxu1 }
 0x8e7   :  { %v17043_v50 = vpop.f32.mrb[67].mxu0  ;;  %v19595_v43 = vpop.eup %19594  ;;  %v5050_v54 = vadd.f32 1.0, %v19593_v42 }
 0x8e8   :  { %v19597_v51 = vpop.eup %19596  ;;  %v5054_v53 = vmul.f32 %v19595_v43, %v19591_v39  ;;  %v5301_v55 = vadd.f32 %v21063_v41, %v5294_v45  ;;  %v5059_v43 = vld [vmem:[#allocation2] sm:$0xff] }
 0x8e9   :  { %v5053_v56 = vmul.f32 %v19597_v51, %v20760_v57  ;;  %19598 = vrcp.f32 %v5050_v54 }
 0x8ea   :  { %v15355_v12 = vmul.f32 -1.442695, %v5301_v55 }
 0x8eb   :  { %v5055_v61 = vadd.f32 %v5054_v53, %v5053_v56 }
 0x8ed   :  { %19600 = vtanh.f32 %v5055_v61  ;;  %v5444_v13 = vpop.f32.mrb[68].mxu1  ;;  %v5514_v18 = vpop.f32.mrb[68].mxu0 }
 0x8ee   :  { %v5445_v32 = vadd.f32 %v5444_v13, %v5374_v40  ;;  %v17054_v63 = vpop.f32.mrb[69].mxu1  ;;  %v17065_v59 = vpop.f32.mrb[69].mxu0  ;;  %19602 = vpow2.f32 %v15355_v12 }
 0x8f0   :  { %v5518_v4 = vadd.f32 %v5514_v18, %v5445_v32  ;;  %v21095_v32 = vld [vmem:[%s22231_s8 + $0x3] ss:$0 sm:$0xff] }
 0x8f2   :  { %v5525_v6 = vadd.f32 %v21070_v37, %v5518_v4 }
 0x8f3   :  { %v19599_v21 = vpop.eup %19598 }
 0x8f4   :  { %v15358_v20 = vmul.f32 -1.442695, %v5525_v6 }
 0x8f5   :  { %v5598_v57 = vpop.f32.mrb[70].mxu1  ;;  %v5668_v11 = vpop.f32.mrb[70].mxu0 }
 0x8f6   :  { %19604 = vpow2.f32 %v15358_v20  ;;  %v17076_v15 = vpop.f32.mrb[71].mxu1  ;;  %v5669_v17 = vadd.f32 %v5668_v11, %v5598_v57  ;;  %v17087_v23 = vpop.f32.mrb[71].mxu0 }
 0x8f7   :  { %v19601_v22 = vpop.eup %19600 }
 0x8f8   :  { %v5057_v29 = vmul.f32 %v19601_v22, %v19599_v21  ;;  %v19603_v7 = vpop.eup %19602 }
 0x8f9   :  { %v5305_v33 = vadd.f32 1.0, %v19603_v7 }
 0x8fa   :  { %5058 = vst.msk [vmem:[#allocation2 + $0xe] sm:$0x3] %vm892_vm3, %v5057_v29 }
 0x8fb   :  { %19606 = vrcp.f32 %v5305_v33  ;;  %v21109_v33 = vld [vmem:[#allocation10] ss:$0 sm:$0xff] }
 0x8fd   :  { %v5738_v39 = vpop.f32.mrb[72].mxu1  ;;  %v5817_v44 = vpop.f32.mrb[72].mxu0 }
 0x8fe   :  { %v5742_v40 = vadd.f32 %v5738_v39, %v5669_v17  ;;  %v17098_v42 = vpop.f32.mrb[73].mxu1  ;;  %v17109_v45 = vpop.f32.mrb[73].mxu0 }
 0x8ff   :  { %v5061_v42 = vlaneseq }
 0x900   :  { %v19605_v49 = vpop.eup %19604  ;;  %v5749_v50 = vadd.f32 %v21077_v34, %v5742_v40 }
 0x901   :  { %v5060_v51 = vld [vmem:[#allocation2 + $0x8] sm:$0xff]  ;;  %v5529_v53 = vadd.f32 1.0, %v19605_v49  ;;  %v5062_v45 = vand.u32 127, %v5061_v42 }
 0x902   :  { %v21086_v55 = vpack.c.bf16 %v5060_v51, %v5059_v43  ;;  %19608 = vtanh.f32 %v5749_v50  ;;  %v5076_v50 = vshrl.u32 %v5061_v42, 7  ;;  %v20017_v43 = vmov -1e+30  }
 0x903   :  { %19610 = vrcp.f32 %v5529_v53  ;;  %v5067_v49 = vand.u32 1, %v5062_v45 }
 0x904   :  { %18780 = vmatpush3.bf16.xpose.msk.msra.mxu0 %vm21082_vm4, %v21086_v55 }
 0x905   :  { %v5887_v56 = vpop.f32.mrb[74].mxu1  ;;  %v5957_v61 = vpop.f32.mrb[74].mxu0  ;;  %18790 = vmatprep.subr.bf16.mxu0 %v20014_v0  ;;  %vm5077_vm5 = vcmp.eq.s32.totalorder %v5067_v49, %v5076_v50 }
 0x906   :  { %v5888_v12 = vadd.f32 %v5887_v56, %v5817_v44  ;;  %v17120_v13 = vpop.f32.mrb[75].mxu1  ;;  %v17131_v18 = vpop.f32.mrb[75].mxu0  ;;  %v21115_v51 = vsel %vm5077_vm5, 0.0, %v20017_v43  ;;  %v21153_v43 = vld [vmem:[%s22224_s1 + $0x2] sm:$0x3] }
 0x907   :  { %v19607_v4 = vpop.eup %19606 }
 0x908   :  { %v5961_v63 = vadd.f32 %v5957_v61, %v5888_v12 }
 0x90a   :  { %v5968_v59 = vadd.f32 %v21095_v32, %v5961_v63 }
 0x90c   :  { %v19609_v6 = vpop.eup %19608  ;;  %v15363_v20 = vmul.f32 -1.442695, %v5968_v59 }
 0x90d   :  { %v19611_v57 = vpop.eup %19610  ;;  %v5976_v11 = vmul.f32 %v19609_v6, %v19607_v4  ;;  %v260_v6 = vld [vmem:[#allocation12] sm:$0xff] }
 0x90e   :  { %v5975_v21 = vmul.f32 0.0, %v19611_v57  ;;  %19612 = vpow2.f32 %v15363_v20  ;;  %v261_v20 = vld [vmem:[#allocation12 + $0x8] sm:$0xff] }
 0x90f   :  { %v21120_v57 = vpack.c.bf16 %v261_v20, %v260_v6 }
 0x910   :  { %v21098_v15 = vadd.f32 %v5976_v11, %v5975_v21  ;;  %v262_v21 = vld [vmem:[#allocation13] sm:$0xff] }
 0x912   :  { %19614 = vtanh.f32 %v21098_v15 }
 0x918   :  { %v19613_v17 = vpop.eup %19612 }
 0x919   :  { %v5972_v23 = vadd.f32 1.0, %v19613_v17  ;;  %v263_v17 = vld [vmem:[#allocation13 + $0x8] sm:$0xff] }
 0x91b   :  { %19616 = vrcp.f32 %v5972_v23 }
 0x91c   :  { %v19615_v22 = vpop.eup %19614 }
 0x925   :  { %v19617_v29 = vpop.eup %19616 }
 0x926   :  { %v21101_v7 = vmul.f32 %v19617_v29, %v19615_v22  ;;  %v21124_v22 = vpack.c.bf16 %v263_v17, %v262_v21 }
 0x928   :  { %17141 = vmatmul.mubr.msk.f32.vlgmr.msra.gmra.mrb[76].mxu1 %vm346_vm1, %v21101_v7 }
 0x929   :  { %18783 = vmatpush3.bf16.msra.mxu1 %v21086_v55  ;;  %17154 = vmatprep.mubr.msk.f32.mxu1 %vm20015_vm0, %v20016_v1 }
 0x92a   :  { %18784 = vmatprep.subr.bf16.mxu1 %v20014_v0 }
 0x9fb   :  { %v6055_v39 = vpop.f32.mrb[76].mxu1 }
 0x9fc   :  { %v6056_v44 = vadd.f32 %v21109_v33, %v6055_v39  ;;  %v17142_v40 = vpop.f32.mrb[77].mxu1  ;;  %v264_v39 = vld [vmem:[#allocation13 + $0x10] sm:$0xff] }
 0x9fe   :  { %17148 = vmatmul.mubr.msk.f32.vlgmr.msra.gmra.mrb[76].mxu0 %vm272_vm2, %v6056_v44  ;;  %v265_v44 = vld [vmem:[#allocation13 + $0x18] sm:$0xff] }
 0x9ff   :  { %17172 = vmatprep.mubr.msk.f32.mxu0 %vm20015_vm0, %v20016_v1  ;;  %18792 = vmatpush3.bf16.msra.mxu0 %v21120_v57  ;;  %v21128_v40 = vpack.c.bf16 %v265_v44, %v264_v39 }
 0xa00   :  { %18793 = vmatprep.subr.bf16.mxu0 %v20014_v0 }
 0xad1   :  { %v6134_v53 = vpop.f32.mrb[76].mxu0 }
 0xad2   :  { %v6135_v56 = vadd.f32 %v6134_v53, %v21115_v51  ;;  %v17149_v61 = vpop.f32.mrb[77].mxu0  ;;  %v21163_v53 = vld [vmem:[#allocation15] ss:$0 sm:$0xff] }
 0xad4   :  { %v6138_v12 = vsel %vm892_vm3, %v6135_v56, -inf }
 0xad5   :  { %6139 = vmax.xlane.f32.xlu0 %v6138_v12 }
 0xb62   :  { %v6140_v13 = vpop.xlane.xlu0 %6139 }
 0xb63   :  { %v6141_v18 = vsub.f32 %v6135_v56, %v6140_v13 }
 0xb65   :  { %v6142_v63 = vmul.f32 1.442695, %v6141_v18 }
 0xb67   :  { %19618 = vpow2.f32 %v6142_v63 }
 0xb71   :  { %v19619_v59 = vpop.eup %19618 }
 0xb72   :  { %v6144_v4 = vsel %vm892_vm3, %v19619_v59, 0.0 }
 0xb73   :  { %6145 = vadd.xlane.f32.xlu0 %v6144_v4 }
 0xc00   :  { %v6146_v11 = vpop.xlane.xlu0 %6145 }
 0xc01   :  { %19620 = vrcp.f32 %v6146_v11 }
 0xc0b   :  { %v19621_v23 = vpop.eup %19620 }
 0xc0c   :  { %v6148_v29 = vmul.f32 %v19621_v23, %v19619_v59 }
 0xc0e   :  { %17155 = vmatmul.mubr.msk.f32.vlgmr.msra.gmra.mrb[78].mxu1 %vm272_vm2, %v6148_v29 }
 0xc0f   :  { %18786 = vmatpush3.bf16.msra.mxu1 %v21124_v22  ;;  %17165 = vmatprep.mubr.msk.f32.mxu1 %vm20015_vm0, %v20016_v1 }
 0xc10   :  { %18787 = vmatprep.subr.bf16.mxu1 %v20014_v0 }
 0xc13   :  { %18789 = vmatpush3.bf16.msra.mxu1 %v21128_v40 }
 0xc14   :  { %18799 = vmatprep.subr.bf16.mxu1 %v20014_v0 }
 0xc16   :  { %17166 = vmatmul.mubr.msk.f32.vlgmr.msra.gmra.mrb[80].mxu1 %vm346_vm1, %v21101_v7 }
 0xc17   :  { %18801 = vmatpush3.bf16.msra.mxu1 %v20811_v31  ;;  %17194 = vmatprep.mubr.msk.f32.mxu1 %vm20015_vm0, %v20016_v1 }
 0xc18   :  { %18802 = vmatprep.subr.bf16.mxu1 %v20014_v0 }
 0xc1b   :  { %18804 = vmatpush3.bf16.msra.mxu1 %v20827_v62 }
 0xc1c   :  { %18811 = vmatprep.subr.bf16.mxu1 %v20014_v0 }
 0xc1e   :  { %17195 = vmatmul.mubr.msk.f32.vlgmr.msra.gmra.mrb[82].mxu1 %vm346_vm1, %v21153_v43 }
 0xc1f   :  { %18813 = vmatpush3.bf16.msra.mxu1 %v20856_v10  ;;  %17216 = vmatprep.mubr.msk.f32.mxu1 %vm20015_vm0, %v20016_v1 }
 0xc20   :  { %18814 = vmatprep.subr.bf16.mxu1 %v20014_v0 }
 0xc23   :  { %18816 = vmatpush3.bf16.msra.mxu1 %v20879_v9 }
 0xc24   :  { %18823 = vmatprep.subr.bf16.mxu1 %v20014_v0 }
 0xce1   :  { %v6218_v42 = vpop.f32.mrb[78].mxu1 }
 0xce2   :  { %v17156_v45 = vpop.f32.mrb[79].mxu1  ;;  %17173 = vmatmul.mubr.msk.f32.vlgmr.msra.gmra.mrb[78].mxu0 %vm272_vm2, %v6218_v42 }
 0xce3   :  { %18795 = vmatpush3.bf16.msra.mxu0 %v20809_v26  ;;  %17183 = vmatprep.mubr.msk.f32.mxu0 %vm20015_vm0, %v20016_v1 }
 0xce4   :  { %18796 = vmatprep.subr.bf16.mxu0 %v20014_v0 }
 0xce7   :  { %18798 = vmatpush3.bf16.msra.mxu0 %v20825_v38 }
 0xce8   :  { %18805 = vmatprep.subr.bf16.mxu0 %v20014_v0 }
 0xce9   :  { %v6288_v49 = vpop.f32.mrb[80].mxu1 }
 0xcea   :  { %v17167_v50 = vpop.f32.mrb[81].mxu1 }
 0xdb5   :  { %v6361_v56 = vpop.f32.mrb[78].mxu0 }
 0xdb6   :  { %v6362_v61 = vadd.f32 %v6361_v56, %v6288_v49  ;;  %v17174_v12 = vpop.f32.mrb[79].mxu0 }
 0xdb8   :  { %v6371_v13 = vadd.f32 %v21163_v53, %v6362_v61 }
 0xdba   :  { %19622 = vtanh.f32 %v6371_v13 }
 0xdc4   :  { %v19623_v18 = vpop.eup %19622 }
 0xdc5   :  { %17184 = vmatmul.mubr.msk.f32.vlgmr.msra.gmra.mrb[80].mxu0 %vm346_vm1, %v19623_v18  ;;  %17217 = vmatmul.mubr.msk.f32.vlgmr.msra.gmra.mrb[84].mxu1 %vm346_vm1, %v19623_v18  ;;  %6374 = vst.msk [vmem:[#allocation3] sm:$0x3] %vm6373_vm6, %v19623_v18 }
 0xdc6   :  { %18807 = vmatpush3.bf16.msra.mxu0 %v20854_v8  ;;  %18825 = vmatpush3.bf16.msra.mxu1 %v20897_v27 }
 0xdc7   :  { %18808 = vmatprep.subr.bf16.mxu0 %v20014_v0  ;;  %18826 = vmatprep.subr.bf16.mxu1 %v20014_v0 }
 0xdc8   :  { %17205 = vmatprep.mubr.msk.f32.mxu0 %vm20015_vm0, %v20016_v1  ;;  %17238 = vmatprep.mubr.msk.f32.mxu1 %vm20015_vm0, %v20016_v1 }
 0xdca   :  { %18810 = vmatpush3.bf16.msra.mxu0 %v20877_v16  ;;  %18828 = vmatpush3.bf16.msra.mxu1 %v20913_v36 }
 0xdcb   :  { %18817 = vmatprep.subr.bf16.mxu0 %v20014_v0  ;;  %18835 = vmatprep.subr.bf16.mxu1 %v20014_v0 }
 0xdcd   :  { %17206 = vmatmul.mubr.msk.f32.vlgmr.msra.gmra.mrb[82].mxu0 %vm346_vm1, %v21101_v7  ;;  %17239 = vmatmul.mubr.msk.f32.vlgmr.msra.gmra.mrb[86].mxu1 %vm346_vm1, %v21101_v7 }
 0xdce   :  { %18819 = vmatpush3.bf16.msra.mxu0 %v20895_v28  ;;  %18837 = vmatpush3.bf16.msra.mxu1 %v20931_v48 }
 0xdcf   :  { %18820 = vmatprep.subr.bf16.mxu0 %v20014_v0  ;;  %18838 = vmatprep.subr.bf16.mxu1 %v20014_v0 }
 0xdd0   :  { %17227 = vmatprep.mubr.msk.f32.mxu0 %vm20015_vm0, %v20016_v1  ;;  %17260 = vmatprep.mubr.msk.f32.mxu1 %vm20015_vm0, %v20016_v1 }
 0xdd2   :  { %18822 = vmatpush3.bf16.msra.mxu0 %v20911_v35  ;;  %18840 = vmatpush3.bf16.msra.mxu1 %v20948_v52 }
 0xdd3   :  { %18829 = vmatprep.subr.bf16.mxu0 %v20014_v0  ;;  %18847 = vmatprep.subr.bf16.mxu1 %v20014_v0 }
 0xdd5   :  { %17228 = vmatmul.mubr.msk.f32.vlgmr.msra.gmra.mrb[84].mxu0 %vm346_vm1, %v21153_v43  ;;  %17261 = vmatmul.mubr.msk.f32.vlgmr.msra.gmra.mrb[88].mxu1 %vm346_vm1, %v21153_v43 }
 0xdd6   :  { %18831 = vmatpush3.bf16.msra.mxu0 %v20929_v47  ;;  %18849 = vmatpush3.bf16.msra.mxu1 %v20972_v60 }
 0xdd7   :  { %18832 = vmatprep.subr.bf16.mxu0 %v20014_v0  ;;  %18850 = vmatprep.subr.bf16.mxu1 %v20014_v0 }
 0xdd8   :  { %17249 = vmatprep.mubr.msk.f32.mxu0 %vm20015_vm0, %v20016_v1  ;;  %17282 = vmatprep.mubr.msk.f32.mxu1 %vm20015_vm0, %v20016_v1 }
 0xdda   :  { %18834 = vmatpush3.bf16.msra.mxu0 %v20946_v46  ;;  %18852 = vmatpush3.bf16.msra.mxu1 %v20995_v25 }
 0xddb   :  { %18841 = vmatprep.subr.bf16.mxu0 %v20014_v0  ;;  %18859 = vmatprep.subr.bf16.mxu1 %v20014_v0 }
 0xddd   :  { %17250 = vmatmul.mubr.msk.f32.vlgmr.msra.gmra.mrb[86].mxu0 %vm346_vm1, %v19623_v18  ;;  %17283 = vmatmul.mubr.msk.f32.vlgmr.msra.gmra.mrb[90].mxu1 %vm346_vm1, %v19623_v18 }
 0xdde   :  { %18843 = vmatpush3.bf16.msra.mxu0 %v20970_v58  ;;  %18861 = vmatpush3.bf16.msra.mxu1 %v21013_v3 }
 0xddf   :  { %18844 = vmatprep.subr.bf16.mxu0 %v20014_v0  ;;  %18862 = vmatprep.subr.bf16.mxu1 %v20014_v0 }
 0xde0   :  { %17271 = vmatprep.mubr.msk.f32.mxu0 %vm20015_vm0, %v20016_v1  ;;  %17304 = vmatprep.mubr.msk.f32.mxu1 %vm20015_vm0, %v20016_v1 }
 0xde2   :  { %18846 = vmatpush3.bf16.msra.mxu0 %v20993_v19  ;;  %18864 = vmatpush3.bf16.msra.mxu1 %v21029_v5 }
 0xde3   :  { %18853 = vmatprep.subr.bf16.mxu0 %v20014_v0  ;;  %18871 = vmatprep.subr.bf16.mxu1 %v20014_v0 }
 0xde5   :  { %17272 = vmatmul.mubr.msk.f32.vlgmr.msra.gmra.mrb[88].mxu0 %vm346_vm1, %v21101_v7  ;;  %17305 = vmatmul.mubr.msk.f32.vlgmr.msra.gmra.mrb[92].mxu1 %vm346_vm1, %v21101_v7  ;;  %v6517_v7 = vpop.f32.mrb[82].mxu1 }
 0xde6   :  { %18855 = vmatpush3.bf16.msra.mxu0 %v21011_v2  ;;  %17293 = vmatprep.mubr.msk.f32.mxu0 %vm20015_vm0, %v20016_v1  ;;  %v17196_v63 = vpop.f32.mrb[83].mxu1 }
 0xde7   :  { %18856 = vmatprep.subr.bf16.mxu0 %v20014_v0  ;;  %17322 = vmatprep.mubr.msk.f32.mxu1 %vm20015_vm0, %v20016_v1 }
 0xdea   :  { %18858 = vmatpush3.bf16.msra.mxu0 %v21027_v14 }
 0xdeb   :  { %18874 = vmatpush3.bf16.xpose.msk.msra.mxu1 %vm21082_vm4, %v21086_v55  ;;  %18865 = vmatprep.subr.bf16.mxu0 %v20014_v0 }
 0xdec   :  { %18878 = vmatprep.subr.bf16.mxu1 %v20014_v0 }
 0xded   :  { %17294 = vmatmul.mubr.msk.f32.vlgmr.msra.gmra.mrb[90].mxu0 %vm346_vm1, %v21153_v43 }
 0xdee   :  { %18867 = vmatpush3.bf16.msra.mxu0 %v21048_v24  ;;  %17315 = vmatprep.mubr.msk.f32.mxu0 %vm20015_vm0, %v20016_v1 }
 0xdef   :  { %18868 = vmatprep.subr.bf16.mxu0 %v20014_v0 }
 0xdf2   :  { %18870 = vmatpush3.bf16.msra.mxu0 %v21051_v30 }
 0xdf3   :  { %18875 = vmatprep.subr.bf16.mxu0 %v20014_v0 }
 0xe98   :  { %v6444_v59 = vpop.f32.mrb[80].mxu0  ;;  %v6665_v4 = vpop.f32.mrb[84].mxu1 }
 0xe99   :  { %v6518_v6 = vadd.f32 %v6517_v7, %v6444_v59  ;;  %v17185_v20 = vpop.f32.mrb[81].mxu0  ;;  %v17218_v11 = vpop.f32.mrb[85].mxu1 }
 0xea0   :  { %v6587_v21 = vpop.f32.mrb[82].mxu0  ;;  %v6805_v17 = vpop.f32.mrb[86].mxu1 }
 0xea1   :  { %v6591_v23 = vadd.f32 %v6587_v21, %v6518_v6  ;;  %v17207_v29 = vpop.f32.mrb[83].mxu0  ;;  %v17240_v39 = vpop.f32.mrb[87].mxu1 }
 0xea3   :  { %v6592_v44 = vadd.f32 %v21063_v41, %v6591_v23 }
 0xea5   :  { %v15376_v42 = vmul.f32 -1.442695, %v6592_v44 }
 0xea7   :  { %19624 = vpow2.f32 %v15376_v42 }
 0xea8   :  { %v6735_v45 = vpop.f32.mrb[84].mxu0  ;;  %v6953_v49 = vpop.f32.mrb[88].mxu1 }
 0xea9   :  { %v6736_v50 = vadd.f32 %v6735_v45, %v6665_v4  ;;  %v17229_v43 = vpop.f32.mrb[85].mxu0  ;;  %v17262_v56 = vpop.f32.mrb[89].mxu1 }
 0xeab   :  { %v6809_v61 = vadd.f32 %v6805_v17, %v6736_v50 }
 0xead   :  { %v6810_v12 = vadd.f32 %v21070_v37, %v6809_v61 }
 0xeaf   :  { %v15380_v13 = vmul.f32 -1.442695, %v6810_v12 }
 0xeb0   :  { %v6883_v18 = vpop.f32.mrb[86].mxu0  ;;  %v7096_v7 = vpop.f32.mrb[90].mxu1 }
 0xeb1   :  { %19626 = vpow2.f32 %v15380_v13  ;;  %v6954_v63 = vadd.f32 %v6953_v49, %v6883_v18  ;;  %v17251_v59 = vpop.f32.mrb[87].mxu0  ;;  %v17284_v6 = vpop.f32.mrb[91].mxu1 }
 0xeb2   :  { %v19625_v20 = vpop.eup %19624 }
 0xeb3   :  { %v6596_v11 = vadd.f32 1.0, %v19625_v20 }
 0xeb5   :  { %19628 = vrcp.f32 %v6596_v11 }
 0xeb8   :  { %v7023_v21 = vpop.f32.mrb[88].mxu0  ;;  %v7236_v23 = vpop.f32.mrb[92].mxu1 }
 0xeb9   :  { %v7027_v29 = vadd.f32 %v7023_v21, %v6954_v63  ;;  %v17273_v39 = vpop.f32.mrb[89].mxu0  ;;  %v17306_v4 = vpop.f32.mrb[93].mxu1 }
 0xebb   :  { %v19627_v44 = vpop.eup %19626  ;;  %v7028_v42 = vadd.f32 %v21077_v34, %v7027_v29 }
 0xebc   :  { %v6814_v17 = vadd.f32 1.0, %v19627_v44 }
 0xebd   :  { %19630 = vtanh.f32 %v7028_v42 }
 0xebe   :  { %19632 = vrcp.f32 %v6814_v17 }
 0xebf   :  { %v19629_v61 = vpop.eup %19628 }
 0xec0   :  { %v7166_v45 = vpop.f32.mrb[90].mxu0 }
 0xec1   :  { %v7167_v50 = vadd.f32 %v7166_v45, %v7096_v7  ;;  %v17295_v43 = vpop.f32.mrb[91].mxu0 }
 0xec3   :  { %v7240_v49 = vadd.f32 %v7236_v23, %v7167_v50 }
 0xec5   :  { %v7241_v56 = vadd.f32 %v21095_v32, %v7240_v49 }
 0xec7   :  { %v19631_v12 = vpop.eup %19630  ;;  %v15387_v13 = vmul.f32 -1.442695, %v7241_v56 }
 0xec8   :  { %v19633_v18 = vpop.eup %19632  ;;  %v7249_v63 = vmul.f32 %v19631_v12, %v19629_v61 }
 0xec9   :  { %v7248_v59 = vmul.f32 %v19633_v18, %v21098_v15  ;;  %19634 = vpow2.f32 %v15387_v13 }
 0xecb   :  { %v21256_v6 = vadd.f32 %v7249_v63, %v7248_v59 }
 0xecd   :  { %19636 = vtanh.f32 %v21256_v6 }
 0xed3   :  { %v19635_v20 = vpop.eup %19634 }
 0xed4   :  { %v7245_v11 = vadd.f32 1.0, %v19635_v20 }
 0xed6   :  { %19638 = vrcp.f32 %v7245_v11  ;;  %v21301_v11 = vld [vmem:[%s22224_s1 + $0x4] sm:$0x3] }
 0xed7   :  { %v19637_v7 = vpop.eup %19636 }
 0xee0   :  { %v19639_v21 = vpop.eup %19638 }
 0xee1   :  { %v21259_v23 = vmul.f32 %v19639_v21, %v19637_v7 }
 0xee3   :  { %17316 = vmatmul.mubr.msk.f32.vlgmr.msra.gmra.mrb[92].mxu0 %vm346_vm1, %v21259_v23 }
 0xee4   :  { %18877 = vmatpush3.bf16.msra.mxu0 %v21086_v55  ;;  %17329 = vmatprep.mubr.msk.f32.mxu0 %vm20015_vm0, %v20016_v1 }
 0xee5   :  { %18884 = vmatprep.subr.bf16.mxu0 %v20014_v0 }
 0xfb6   :  { %v7322_v15 = vpop.f32.mrb[92].mxu0 }
 0xfb7   :  { %v7323_v29 = vadd.f32 %v21109_v33, %v7322_v15  ;;  %v17317_v39 = vpop.f32.mrb[93].mxu0 }
 0xfb9   :  { %17323 = vmatmul.mubr.msk.f32.vlgmr.msra.gmra.mrb[94].mxu1 %vm272_vm2, %v7323_v29 }
 0xfba   :  { %18880 = vmatpush3.bf16.msra.mxu1 %v21124_v22  ;;  %17340 = vmatprep.mubr.msk.f32.mxu1 %vm20015_vm0, %v20016_v1 }
 0xfbb   :  { %18881 = vmatprep.subr.bf16.mxu1 %v20014_v0 }
 0xfbe   :  { %18883 = vmatpush3.bf16.msra.mxu1 %v21128_v40 }
 0xfbf   :  { %18893 = vmatprep.subr.bf16.mxu1 %v20014_v0 }
 0xfc1   :  { %17341 = vmatmul.mubr.msk.f32.vlgmr.msra.gmra.mrb[96].mxu1 %vm346_vm1, %v21259_v23 }
 0xfc2   :  { %18895 = vmatpush3.bf16.msra.mxu1 %v20811_v31  ;;  %17369 = vmatprep.mubr.msk.f32.mxu1 %vm20015_vm0, %v20016_v1 }
 0xfc3   :  { %18896 = vmatprep.subr.bf16.mxu1 %v20014_v0 }
 0xfc6   :  { %18898 = vmatpush3.bf16.msra.mxu1 %v20827_v62 }
 0xfc7   :  { %18905 = vmatprep.subr.bf16.mxu1 %v20014_v0 }
 0xfc9   :  { %17370 = vmatmul.mubr.msk.f32.vlgmr.msra.gmra.mrb[98].mxu1 %vm346_vm1, %v21301_v11 }
 0xfca   :  { %18907 = vmatpush3.bf16.msra.mxu1 %v20856_v10  ;;  %17391 = vmatprep.mubr.msk.f32.mxu1 %vm20015_vm0, %v20016_v1 }
 0xfcb   :  { %18908 = vmatprep.subr.bf16.mxu1 %v20014_v0 }
 0xfce   :  { %18910 = vmatpush3.bf16.msra.mxu1 %v20879_v9 }
 0xfcf   :  { %18917 = vmatprep.subr.bf16.mxu1 %v20014_v0 }
0x108c   :  { %v7395_v4 = vpop.f32.mrb[94].mxu1 }
0x108d   :  { %v7396_v44 = vadd.f32 %v7395_v4, %v21115_v51  ;;  %v17324_v42 = vpop.f32.mrb[95].mxu1 }
0x108f   :  { %v7399_v17 = vsel %vm892_vm3, %v7396_v44, -inf }
0x1090   :  { %7400 = vmax.xlane.f32.xlu1 %v7399_v17 }
0x1094   :  { %v7549_v45 = vpop.f32.mrb[96].mxu1 }
0x1095   :  { %v17342_v50 = vpop.f32.mrb[97].mxu1 }
0x111d   :  { %v7401_v43 = vpop.xlane.xlu1 %7400 }
0x111e   :  { %v7402_v49 = vsub.f32 %v7396_v44, %v7401_v43 }
0x1120   :  { %v7403_v56 = vmul.f32 1.442695, %v7402_v49 }
0x1122   :  { %19640 = vpow2.f32 %v7403_v56 }
0x112c   :  { %v19641_v61 = vpop.eup %19640 }
0x112d   :  { %v7405_v12 = vsel %vm892_vm3, %v19641_v61, 0.0 }
0x112e   :  { %7406 = vadd.xlane.f32.xlu1 %v7405_v12 }
0x11bb   :  { %v7407_v13 = vpop.xlane.xlu1 %7406 }
0x11bc   :  { %19642 = vrcp.f32 %v7407_v13 }
0x11c6   :  { %v19643_v18 = vpop.eup %19642 }
0x11c7   :  { %v7409_v63 = vmul.f32 %v19643_v18, %v19641_v61 }
0x11c9   :  { %17330 = vmatmul.mubr.msk.f32.vlgmr.msra.gmra.mrb[94].mxu0 %vm272_vm2, %v7409_v63 }
0x11ca   :  { %18886 = vmatpush3.bf16.msra.mxu0 %v21120_v57  ;;  %17347 = vmatprep.mubr.msk.f32.mxu0 %vm20015_vm0, %v20016_v1 }
0x11cb   :  { %18887 = vmatprep.subr.bf16.mxu0 %v20014_v0 }
0x129c   :  { %v7479_v59 = vpop.f32.mrb[94].mxu0 }
0x129d   :  { %v17331_v20 = vpop.f32.mrb[95].mxu0  ;;  %17348 = vmatmul.mubr.msk.f32.vlgmr.msra.gmra.mrb[96].mxu0 %vm272_vm2, %v7479_v59 }
0x129e   :  { %18889 = vmatpush3.bf16.msra.mxu0 %v20809_v26  ;;  %17358 = vmatprep.mubr.msk.f32.mxu0 %vm20015_vm0, %v20016_v1 }
0x129f   :  { %18890 = vmatprep.subr.bf16.mxu0 %v20014_v0 }
0x12a2   :  { %18892 = vmatpush3.bf16.msra.mxu0 %v20825_v38 }
0x12a3   :  { %18899 = vmatprep.subr.bf16.mxu0 %v20014_v0 }
0x1370   :  { %v7622_v7 = vpop.f32.mrb[96].mxu0 }
0x1371   :  { %v7623_v21 = vadd.f32 %v7622_v7, %v7549_v45  ;;  %v17349_v15 = vpop.f32.mrb[97].mxu0 }
0x1373   :  { %v7626_v29 = vadd.f32 %v21163_v53, %v7623_v21 }
0x1375   :  { %19644 = vtanh.f32 %v7626_v29 }
0x137f   :  { %v19645_v39 = vpop.eup %19644 }
0x1380   :  { %17359 = vmatmul.mubr.msk.f32.vlgmr.msra.gmra.mrb[98].mxu0 %vm346_vm1, %v19645_v39  ;;  %17392 = vmatmul.mubr.msk.f32.vlgmr.msra.gmra.mrb[100].mxu1 %vm346_vm1, %v19645_v39  ;;  %7628 = vst.msk [vmem:[#allocation3 + $0x2] sm:$0x3] %vm6373_vm6, %v19645_v39 }
0x1381   :  { %18901 = vmatpush3.bf16.msra.mxu0 %v20854_v8  ;;  %18919 = vmatpush3.bf16.msra.mxu1 %v20897_v27 }
0x1382   :  { %18902 = vmatprep.subr.bf16.mxu0 %v20014_v0  ;;  %18920 = vmatprep.subr.bf16.mxu1 %v20014_v0 }
0x1383   :  { %17380 = vmatprep.mubr.msk.f32.mxu0 %vm20015_vm0, %v20016_v1  ;;  %17413 = vmatprep.mubr.msk.f32.mxu1 %vm20015_vm0, %v20016_v1 }
0x1385   :  { %18904 = vmatpush3.bf16.msra.mxu0 %v20877_v16  ;;  %18922 = vmatpush3.bf16.msra.mxu1 %v20913_v36 }
0x1386   :  { %18911 = vmatprep.subr.bf16.mxu0 %v20014_v0  ;;  %18929 = vmatprep.subr.bf16.mxu1 %v20014_v0 }
0x1388   :  { %17381 = vmatmul.mubr.msk.f32.vlgmr.msra.gmra.mrb[100].mxu0 %vm346_vm1, %v21259_v23  ;;  %17414 = vmatmul.mubr.msk.f32.vlgmr.msra.gmra.mrb[102].mxu1 %vm346_vm1, %v21259_v23 }
0x1389   :  { %18913 = vmatpush3.bf16.msra.mxu0 %v20895_v28  ;;  %18931 = vmatpush3.bf16.msra.mxu1 %v20931_v48 }
0x138a   :  { %18914 = vmatprep.subr.bf16.mxu0 %v20014_v0  ;;  %18932 = vmatprep.subr.bf16.mxu1 %v20014_v0 }
0x138b   :  { %17402 = vmatprep.mubr.msk.f32.mxu0 %vm20015_vm0, %v20016_v1  ;;  %17435 = vmatprep.mubr.msk.f32.mxu1 %vm20015_vm0, %v20016_v1 }
0x138d   :  { %18916 = vmatpush3.bf16.msra.mxu0 %v20911_v35  ;;  %18934 = vmatpush3.bf16.msra.mxu1 %v20948_v52 }
0x138e   :  { %18923 = vmatprep.subr.bf16.mxu0 %v20014_v0  ;;  %18941 = vmatprep.subr.bf16.mxu1 %v20014_v0 }
0x1390   :  { %17403 = vmatmul.mubr.msk.f32.vlgmr.msra.gmra.mrb[102].mxu0 %vm346_vm1, %v21301_v11  ;;  %17436 = vmatmul.mubr.msk.f32.vlgmr.msra.gmra.mrb[104].mxu1 %vm346_vm1, %v21301_v11 }
0x1391   :  { %18925 = vmatpush3.bf16.msra.mxu0 %v20929_v47  ;;  %18943 = vmatpush3.bf16.msra.mxu1 %v20972_v60 }
0x1392   :  { %18926 = vmatprep.subr.bf16.mxu0 %v20014_v0  ;;  %18944 = vmatprep.subr.bf16.mxu1 %v20014_v0 }
0x1393   :  { %17424 = vmatprep.mubr.msk.f32.mxu0 %vm20015_vm0, %v20016_v1  ;;  %17457 = vmatprep.mubr.msk.f32.mxu1 %vm20015_vm0, %v20016_v1 }
0x1395   :  { %18928 = vmatpush3.bf16.msra.mxu0 %v20946_v46  ;;  %18946 = vmatpush3.bf16.msra.mxu1 %v20995_v25 }
0x1396   :  { %18935 = vmatprep.subr.bf16.mxu0 %v20014_v0  ;;  %18953 = vmatprep.subr.bf16.mxu1 %v20014_v0 }
0x1398   :  { %17425 = vmatmul.mubr.msk.f32.vlgmr.msra.gmra.mrb[104].mxu0 %vm346_vm1, %v19645_v39  ;;  %17458 = vmatmul.mubr.msk.f32.vlgmr.msra.gmra.mrb[106].mxu1 %vm346_vm1, %v19645_v39 }
0x1399   :  { %18937 = vmatpush3.bf16.msra.mxu0 %v20970_v58  ;;  %18955 = vmatpush3.bf16.msra.mxu1 %v21013_v3 }
0x139a   :  { %18938 = vmatprep.subr.bf16.mxu0 %v20014_v0  ;;  %18956 = vmatprep.subr.bf16.mxu1 %v20014_v0 }
0x139b   :  { %17446 = vmatprep.mubr.msk.f32.mxu0 %vm20015_vm0, %v20016_v1  ;;  %17479 = vmatprep.mubr.msk.f32.mxu1 %vm20015_vm0, %v20016_v1 }
0x139d   :  { %18940 = vmatpush3.bf16.msra.mxu0 %v20993_v19  ;;  %18958 = vmatpush3.bf16.msra.mxu1 %v21029_v5 }
0x139e   :  { %18947 = vmatprep.subr.bf16.mxu0 %v20014_v0  ;;  %18965 = vmatprep.subr.bf16.mxu1 %v20014_v0 }
0x13a0   :  { %17447 = vmatmul.mubr.msk.f32.vlgmr.msra.gmra.mrb[106].mxu0 %vm346_vm1, %v21259_v23  ;;  %17480 = vmatmul.mubr.msk.f32.vlgmr.msra.gmra.mrb[108].mxu1 %vm346_vm1, %v21259_v23  ;;  %v7771_v23 = vpop.f32.mrb[98].mxu1 }
0x13a1   :  { %18949 = vmatpush3.bf16.msra.mxu0 %v21011_v2  ;;  %17468 = vmatprep.mubr.msk.f32.mxu0 %vm20015_vm0, %v20016_v1  ;;  %v17371_v4 = vpop.f32.mrb[99].mxu1 }
0x13a2   :  { %18950 = vmatprep.subr.bf16.mxu0 %v20014_v0  ;;  %17497 = vmatprep.mubr.msk.f32.mxu1 %vm20015_vm0, %v20016_v1 }
0x13a5   :  { %18952 = vmatpush3.bf16.msra.mxu0 %v21027_v14 }
0x13a6   :  { %18968 = vmatpush3.bf16.xpose.msk.msra.mxu1 %vm21082_vm4, %v21086_v55  ;;  %18959 = vmatprep.subr.bf16.mxu0 %v20014_v0 }
0x13a7   :  { %18972 = vmatprep.subr.bf16.mxu1 %v20014_v0 }
0x13a8   :  { %17469 = vmatmul.mubr.msk.f32.vlgmr.msra.gmra.mrb[108].mxu0 %vm346_vm1, %v21301_v11 }
0x13a9   :  { %18961 = vmatpush3.bf16.msra.mxu0 %v21048_v24  ;;  %17490 = vmatprep.mubr.msk.f32.mxu0 %vm20015_vm0, %v20016_v1 }
0x13aa   :  { %18962 = vmatprep.subr.bf16.mxu0 %v20014_v0 }
0x13ad   :  { %18964 = vmatpush3.bf16.msra.mxu0 %v21051_v30 }
0x13ae   :  { %18969 = vmatprep.subr.bf16.mxu0 %v20014_v0 }
0x1453   :  { %v7698_v44 = vpop.f32.mrb[98].mxu0  ;;  %v7919_v42 = vpop.f32.mrb[100].mxu1 }
0x1454   :  { %v7772_v17 = vadd.f32 %v7771_v23, %v7698_v44  ;;  %v17360_v45 = vpop.f32.mrb[99].mxu0  ;;  %v17393_v50 = vpop.f32.mrb[101].mxu1 }
0x145b   :  { %v7841_v43 = vpop.f32.mrb[100].mxu0  ;;  %v8059_v49 = vpop.f32.mrb[102].mxu1 }
0x145c   :  { %v7845_v56 = vadd.f32 %v7841_v43, %v7772_v17  ;;  %v17382_v61 = vpop.f32.mrb[101].mxu0  ;;  %v17415_v12 = vpop.f32.mrb[103].mxu1 }
0x145e   :  { %v7846_v13 = vadd.f32 %v21063_v41, %v7845_v56 }
0x1460   :  { %v15398_v18 = vmul.f32 -1.442695, %v7846_v13 }
0x1462   :  { %19646 = vpow2.f32 %v15398_v18 }
0x1463   :  { %v7989_v63 = vpop.f32.mrb[102].mxu0  ;;  %v8207_v59 = vpop.f32.mrb[104].mxu1 }
0x1464   :  { %v7990_v20 = vadd.f32 %v7989_v63, %v7919_v42  ;;  %v17404_v11 = vpop.f32.mrb[103].mxu0  ;;  %v17437_v7 = vpop.f32.mrb[105].mxu1 }
0x1466   :  { %v8063_v21 = vadd.f32 %v8059_v49, %v7990_v20 }
0x1468   :  { %v8064_v15 = vadd.f32 %v21070_v37, %v8063_v21 }
0x146a   :  { %v15402_v29 = vmul.f32 -1.442695, %v8064_v15 }
0x146b   :  { %v8137_v39 = vpop.f32.mrb[104].mxu0  ;;  %v8350_v23 = vpop.f32.mrb[106].mxu1 }
0x146c   :  { %19648 = vpow2.f32 %v15402_v29  ;;  %v8208_v4 = vadd.f32 %v8207_v59, %v8137_v39  ;;  %v17426_v44 = vpop.f32.mrb[105].mxu0  ;;  %v17459_v17 = vpop.f32.mrb[107].mxu1 }
0x146d   :  { %v19647_v45 = vpop.eup %19646 }
0x146e   :  { %v7850_v50 = vadd.f32 1.0, %v19647_v45 }
0x1470   :  { %19650 = vrcp.f32 %v7850_v50 }
0x1473   :  { %v8277_v41 = vpop.f32.mrb[106].mxu0  ;;  %v8490_v43 = vpop.f32.mrb[108].mxu1 }
0x1474   :  { %v8281_v56 = vadd.f32 %v8277_v41, %v8208_v4  ;;  %v17448_v61 = vpop.f32.mrb[107].mxu0  ;;  %v17481_v42 = vpop.f32.mrb[109].mxu1 }
0x1476   :  { %v19649_v12 = vpop.eup %19648  ;;  %v8282_v13 = vadd.f32 %v21077_v34, %v8281_v56 }
0x1477   :  { %v8068_v49 = vadd.f32 1.0, %v19649_v12 }
0x1478   :  { %19652 = vtanh.f32 %v8282_v13 }
0x1479   :  { %19654 = vrcp.f32 %v8068_v49 }
0x147a   :  { %v19651_v11 = vpop.eup %19650 }
0x147b   :  { %v8420_v37 = vpop.f32.mrb[108].mxu0 }
0x147c   :  { %v8421_v18 = vadd.f32 %v8420_v37, %v8350_v23  ;;  %v17470_v63 = vpop.f32.mrb[109].mxu0 }
0x147e   :  { %v8494_v59 = vadd.f32 %v8490_v43, %v8421_v18 }
0x1480   :  { %v8495_v20 = vadd.f32 %v21095_v32, %v8494_v59 }
0x1482   :  { %v19653_v7 = vpop.eup %19652  ;;  %v15409_v21 = vmul.f32 -1.442695, %v8495_v20 }
0x1483   :  { %v19655_v15 = vpop.eup %19654  ;;  %v8503_v29 = vmul.f32 %v19653_v7, %v19651_v11 }
0x1484   :  { %v8502_v39 = vmul.f32 %v19655_v15, %v21256_v6  ;;  %19656 = vpow2.f32 %v15409_v21  ;;  %v21447_v21 = vld [vmem:[%s22224_s1 + $0x6] sm:$0x3] }
0x1486   :  { %v21402_v4 = vadd.f32 %v8503_v29, %v8502_v39 }
0x1488   :  { %19658 = vtanh.f32 %v21402_v4 }
0x148e   :  { %v19657_v34 = vpop.eup %19656 }
0x148f   :  { %v8499_v44 = vadd.f32 1.0, %v19657_v34 }
0x1491   :  { %19660 = vrcp.f32 %v8499_v44 }
0x1492   :  { %v19659_v23 = vpop.eup %19658 }
0x149b   :  { %v19661_v17 = vpop.eup %19660 }
0x149c   :  { %v21405_v45 = vmul.f32 %v19661_v17, %v19659_v23 }
0x149e   :  { %17491 = vmatmul.mubr.msk.f32.vlgmr.msra.gmra.mrb[110].mxu0 %vm346_vm1, %v21405_v45 }
0x149f   :  { %18971 = vmatpush3.bf16.msra.mxu0 %v21086_v55  ;;  %17504 = vmatprep.mubr.msk.f32.mxu0 %vm20015_vm0, %v20016_v1 }
0x14a0   :  { %18978 = vmatprep.subr.bf16.mxu0 %v20014_v0 }
0x1571   :  { %v8576_v32 = vpop.f32.mrb[110].mxu0 }
0x1572   :  { %v8577_v6 = vadd.f32 %v21109_v33, %v8576_v32  ;;  %v17492_v50 = vpop.f32.mrb[111].mxu0 }
0x1574   :  { %17498 = vmatmul.mubr.msk.f32.vlgmr.msra.gmra.mrb[110].mxu1 %vm272_vm2, %v8577_v6 }
0x1575   :  { %18974 = vmatpush3.bf16.msra.mxu1 %v21124_v22  ;;  %17515 = vmatprep.mubr.msk.f32.mxu1 %vm20015_vm0, %v20016_v1 }
0x1576   :  { %18975 = vmatprep.subr.bf16.mxu1 %v20014_v0 }
0x1579   :  { %18977 = vmatpush3.bf16.msra.mxu1 %v21128_v40 }
0x157a   :  { %18987 = vmatprep.subr.bf16.mxu1 %v20014_v0 }
0x157c   :  { %17516 = vmatmul.mubr.msk.f32.vlgmr.msra.gmra.mrb[112].mxu1 %vm346_vm1, %v21405_v45 }
0x157d   :  { %18989 = vmatpush3.bf16.msra.mxu1 %v20811_v31  ;;  %17544 = vmatprep.mubr.msk.f32.mxu1 %vm20015_vm0, %v20016_v1 }
0x157e   :  { %18990 = vmatprep.subr.bf16.mxu1 %v20014_v0 }
0x1581   :  { %18992 = vmatpush3.bf16.msra.mxu1 %v20827_v62 }
0x1582   :  { %18999 = vmatprep.subr.bf16.mxu1 %v20014_v0 }
0x1584   :  { %17545 = vmatmul.mubr.msk.f32.vlgmr.msra.gmra.mrb[114].mxu1 %vm346_vm1, %v21447_v21 }
0x1585   :  { %19001 = vmatpush3.bf16.msra.mxu1 %v20856_v10  ;;  %17566 = vmatprep.mubr.msk.f32.mxu1 %vm20015_vm0, %v20016_v1 }
0x1586   :  { %19002 = vmatprep.subr.bf16.mxu1 %v20014_v0 }
0x1589   :  { %19004 = vmatpush3.bf16.msra.mxu1 %v20879_v9 }
0x158a   :  { %19011 = vmatprep.subr.bf16.mxu1 %v20014_v0 }
0x1647   :  { %v8649_v33 = vpop.f32.mrb[110].mxu1 }
0x1648   :  { %v8650_v41 = vadd.f32 %v8649_v33, %v21115_v51  ;;  %v17499_v43 = vpop.f32.mrb[111].mxu1 }
0x164a   :  { %v8653_v56 = vsel %vm892_vm3, %v8650_v41, -inf }
0x164b   :  { %8654 = vmax.xlane.f32.xlu0 %v8653_v56 }
0x164f   :  { %v8803_v61 = vpop.f32.mrb[112].mxu1 }
0x1650   :  { %v17517_v42 = vpop.f32.mrb[113].mxu1 }
0x1651   :  { %v21546_v42 = vld [vmem:[%s22231_s8] ss:$0 sm:$0xff] }
0x16d8   :  { %v8655_v12 = vpop.xlane.xlu0 %8654 }
0x16d9   :  { %v8656_v13 = vsub.f32 %v8650_v41, %v8655_v12 }
0x16db   :  { %v8657_v49 = vmul.f32 1.442695, %v8656_v13 }
0x16dd   :  { %19662 = vpow2.f32 %v8657_v49 }
0x16e7   :  { %v19663_v37 = vpop.eup %19662 }
0x16e8   :  { %v8659_v18 = vsel %vm892_vm3, %v19663_v37, 0.0 }
0x16e9   :  { %8660 = vadd.xlane.f32.xlu1 %v8659_v18 }
0x1776   :  { %v8661_v63 = vpop.xlane.xlu1 %8660 }
0x1777   :  { %19664 = vrcp.f32 %v8661_v63 }
0x1781   :  { %v19665_v59 = vpop.eup %19664 }
0x1782   :  { %v8663_v20 = vmul.f32 %v19665_v59, %v19663_v37 }
0x1784   :  { %17505 = vmatmul.mubr.msk.f32.vlgmr.msra.gmra.mrb[112].mxu0 %vm272_vm2, %v8663_v20 }
0x1785   :  { %18980 = vmatpush3.bf16.msra.mxu0 %v21120_v57  ;;  %17522 = vmatprep.mubr.msk.f32.mxu0 %vm20015_vm0, %v20016_v1 }
0x1786   :  { %18981 = vmatprep.subr.bf16.mxu0 %v20014_v0 }
0x1857   :  { %v8733_v11 = vpop.f32.mrb[112].mxu0 }
0x1858   :  { %v17506_v7 = vpop.f32.mrb[113].mxu0  ;;  %17523 = vmatmul.mubr.msk.f32.vlgmr.msra.gmra.mrb[114].mxu0 %vm272_vm2, %v8733_v11  ;;  %v21552_v11 = vld [vmem:[%s22231_s8 + $0x1] ss:$0 sm:$0xff] }
0x1859   :  { %18983 = vmatpush3.bf16.msra.mxu0 %v20809_v26  ;;  %17533 = vmatprep.mubr.msk.f32.mxu0 %vm20015_vm0, %v20016_v1 }
0x185a   :  { %18984 = vmatprep.subr.bf16.mxu0 %v20014_v0 }
0x185d   :  { %18986 = vmatpush3.bf16.msra.mxu0 %v20825_v38 }
0x185e   :  { %18993 = vmatprep.subr.bf16.mxu0 %v20014_v0 }
0x192b   :  { %v8876_v15 = vpop.f32.mrb[114].mxu0 }
0x192c   :  { %v8877_v29 = vadd.f32 %v8876_v15, %v8803_v61  ;;  %v17524_v39 = vpop.f32.mrb[115].mxu0 }
0x192e   :  { %v8880_v34 = vadd.f32 %v21163_v53, %v8877_v29  ;;  %v9025_v53 = vpop.f32.mrb[114].mxu1 }
0x192f   :  { %v17546_v23 = vpop.f32.mrb[115].mxu1 }
0x1930   :  { %19666 = vtanh.f32 %v8880_v34 }
0x193a   :  { %v19667_v44 = vpop.eup %19666 }
0x193b   :  { %17534 = vmatmul.mubr.msk.f32.vlgmr.msra.gmra.mrb[116].mxu0 %vm346_vm1, %v19667_v44  ;;  %17567 = vmatmul.mubr.msk.f32.vlgmr.msra.gmra.mrb[116].mxu1 %vm346_vm1, %v19667_v44  ;;  %8882 = vst.msk [vmem:[#allocation3 + $0x4] sm:$0x3] %vm6373_vm6, %v19667_v44 }
0x193c   :  { %18995 = vmatpush3.bf16.msra.mxu0 %v20854_v8  ;;  %19013 = vmatpush3.bf16.msra.mxu1 %v20897_v27 }
0x193d   :  { %18996 = vmatprep.subr.bf16.mxu0 %v20014_v0  ;;  %19014 = vmatprep.subr.bf16.mxu1 %v20014_v0 }
0x193e   :  { %17555 = vmatprep.mubr.msk.f32.mxu0 %vm20015_vm0, %v20016_v1  ;;  %17588 = vmatprep.mubr.msk.f32.mxu1 %vm20015_vm0, %v20016_v1 }
0x1940   :  { %18998 = vmatpush3.bf16.msra.mxu0 %v20877_v16  ;;  %19016 = vmatpush3.bf16.msra.mxu1 %v20913_v36 }
0x1941   :  { %19005 = vmatprep.subr.bf16.mxu0 %v20014_v0  ;;  %19023 = vmatprep.subr.bf16.mxu1 %v20014_v0 }
0x1943   :  { %17556 = vmatmul.mubr.msk.f32.vlgmr.msra.gmra.mrb[118].mxu0 %vm346_vm1, %v21405_v45  ;;  %17589 = vmatmul.mubr.msk.f32.vlgmr.msra.gmra.mrb[118].mxu1 %vm346_vm1, %v21405_v45 }
0x1944   :  { %19007 = vmatpush3.bf16.msra.mxu0 %v20895_v28  ;;  %19025 = vmatpush3.bf16.msra.mxu1 %v20931_v48 }
0x1945   :  { %19008 = vmatprep.subr.bf16.mxu0 %v20014_v0  ;;  %19026 = vmatprep.subr.bf16.mxu1 %v20014_v0 }
0x1946   :  { %17577 = vmatprep.mubr.msk.f32.mxu0 %vm20015_vm0, %v20016_v1  ;;  %17610 = vmatprep.mubr.msk.f32.mxu1 %vm20015_vm0, %v20016_v1 }
0x1948   :  { %19010 = vmatpush3.bf16.msra.mxu0 %v20911_v35  ;;  %19028 = vmatpush3.bf16.msra.mxu1 %v20948_v52 }
0x1949   :  { %19017 = vmatprep.subr.bf16.mxu0 %v20014_v0  ;;  %19035 = vmatprep.subr.bf16.mxu1 %v20014_v0 }
0x194b   :  { %17578 = vmatmul.mubr.msk.f32.vlgmr.msra.gmra.mrb[120].mxu0 %vm346_vm1, %v21447_v21  ;;  %17611 = vmatmul.mubr.msk.f32.vlgmr.msra.gmra.mrb[120].mxu1 %vm346_vm1, %v21447_v21 }
0x194c   :  { %19019 = vmatpush3.bf16.msra.mxu0 %v20929_v47  ;;  %19037 = vmatpush3.bf16.msra.mxu1 %v20972_v60 }
0x194d   :  { %19020 = vmatprep.subr.bf16.mxu0 %v20014_v0  ;;  %19038 = vmatprep.subr.bf16.mxu1 %v20014_v0 }
0x194e   :  { %17599 = vmatprep.mubr.msk.f32.mxu0 %vm20015_vm0, %v20016_v1  ;;  %17632 = vmatprep.mubr.msk.f32.mxu1 %vm20015_vm0, %v20016_v1 }
0x1950   :  { %19022 = vmatpush3.bf16.msra.mxu0 %v20946_v46  ;;  %19040 = vmatpush3.bf16.msra.mxu1 %v20995_v25 }
0x1951   :  { %19029 = vmatprep.subr.bf16.mxu0 %v20014_v0  ;;  %19047 = vmatprep.subr.bf16.mxu1 %v20014_v0 }
0x1953   :  { %17600 = vmatmul.mubr.msk.f32.vlgmr.msra.gmra.mrb[122].mxu0 %vm346_vm1, %v19667_v44  ;;  %17633 = vmatmul.mubr.msk.f32.vlgmr.msra.gmra.mrb[122].mxu1 %vm346_vm1, %v19667_v44 }
0x1954   :  { %19031 = vmatpush3.bf16.msra.mxu0 %v20970_v58  ;;  %19049 = vmatpush3.bf16.msra.mxu1 %v21013_v3 }
0x1955   :  { %19032 = vmatprep.subr.bf16.mxu0 %v20014_v0  ;;  %19050 = vmatprep.subr.bf16.mxu1 %v20014_v0 }
0x1956   :  { %17621 = vmatprep.mubr.msk.f32.mxu0 %vm20015_vm0, %v20016_v1  ;;  %17654 = vmatprep.mubr.msk.f32.mxu1 %vm20015_vm0, %v20016_v1 }
0x1958   :  { %19034 = vmatpush3.bf16.msra.mxu0 %v20993_v19  ;;  %19052 = vmatpush3.bf16.msra.mxu1 %v21029_v5 }
0x1959   :  { %19041 = vmatprep.subr.bf16.mxu0 %v20014_v0  ;;  %19059 = vmatprep.subr.bf16.mxu1 %v20014_v0 }
0x195b   :  { %17622 = vmatmul.mubr.msk.f32.vlgmr.msra.gmra.mrb[124].mxu0 %vm346_vm1, %v21405_v45  ;;  %17655 = vmatmul.mubr.msk.f32.vlgmr.msra.gmra.mrb[124].mxu1 %vm346_vm1, %v21405_v45 }
0x195c   :  { %19043 = vmatpush3.bf16.msra.mxu0 %v21011_v2  ;;  %17643 = vmatprep.mubr.msk.f32.mxu0 %vm20015_vm0, %v20016_v1 }
0x195d   :  { %19044 = vmatprep.subr.bf16.mxu0 %v20014_v0  ;;  %17672 = vmatprep.mubr.msk.f32.mxu1 %vm20015_vm0, %v20016_v1 }
0x1960   :  { %19046 = vmatpush3.bf16.msra.mxu0 %v21027_v14 }
0x1961   :  { %19062 = vmatpush3.bf16.xpose.msk.msra.mxu1 %vm21082_vm4, %v21086_v55  ;;  %19053 = vmatprep.subr.bf16.mxu0 %v20014_v0 }
0x1962   :  { %19066 = vmatprep.subr.bf16.mxu1 %v20014_v0 }
0x1963   :  { %17644 = vmatmul.mubr.msk.f32.vlgmr.msra.gmra.mrb[126].mxu0 %vm346_vm1, %v21447_v21 }
0x1964   :  { %19055 = vmatpush3.bf16.msra.mxu0 %v21048_v24  ;;  %17665 = vmatprep.mubr.msk.f32.mxu0 %vm20015_vm0, %v20016_v1 }
0x1965   :  { %19056 = vmatprep.subr.bf16.mxu0 %v20014_v0 }
0x1968   :  { %19058 = vmatpush3.bf16.msra.mxu0 %v21051_v30 }
0x1969   :  { %19063 = vmatprep.subr.bf16.mxu0 %v20014_v0 }
0x1a0e   :  { %v8952_v17 = vpop.f32.mrb[116].mxu0  ;;  %v9173_v45 = vpop.f32.mrb[116].mxu1 }
0x1a0f   :  { %v9026_v32 = vadd.f32 %v9025_v53, %v8952_v17  ;;  %v17535_v6 = vpop.f32.mrb[117].mxu0  ;;  %v17568_v50 = vpop.f32.mrb[117].mxu1 }
0x1a16   :  { %v9095_v33 = vpop.f32.mrb[118].mxu0  ;;  %v9313_v41 = vpop.f32.mrb[118].mxu1 }
0x1a17   :  { %v9099_v43 = vadd.f32 %v9095_v33, %v9026_v32  ;;  %v17557_v56 = vpop.f32.mrb[119].mxu0  ;;  %v17590_v61 = vpop.f32.mrb[119].mxu1 }
0x1a19   :  { %v9100_v12 = vadd.f32 %v21546_v42, %v9099_v43 }
0x1a1b   :  { %v15420_v13 = vmul.f32 -1.442695, %v9100_v12 }
0x1a1d   :  { %19668 = vpow2.f32 %v15420_v13 }
0x1a1e   :  { %v9243_v49 = vpop.f32.mrb[120].mxu0  ;;  %v9461_v37 = vpop.f32.mrb[120].mxu1 }
0x1a1f   :  { %v9244_v18 = vadd.f32 %v9243_v49, %v9173_v45  ;;  %v17579_v63 = vpop.f32.mrb[121].mxu0  ;;  %v17612_v59 = vpop.f32.mrb[121].mxu1 }
0x1a21   :  { %v9317_v20 = vadd.f32 %v9313_v41, %v9244_v18  ;;  %v21558_v41 = vld [vmem:[%s22231_s8 + $0x2] ss:$0 sm:$0xff] }
0x1a23   :  { %v9318_v7 = vadd.f32 %v21552_v11, %v9317_v20 }
0x1a25   :  { %v15424_v21 = vmul.f32 -1.442695, %v9318_v7 }
0x1a26   :  { %v9391_v15 = vpop.f32.mrb[122].mxu0  ;;  %v9604_v29 = vpop.f32.mrb[122].mxu1 }
0x1a27   :  { %19670 = vpow2.f32 %v15424_v21  ;;  %v9462_v39 = vadd.f32 %v9461_v37, %v9391_v15  ;;  %v17601_v34 = vpop.f32.mrb[123].mxu0  ;;  %v17634_v44 = vpop.f32.mrb[123].mxu1  ;;  %v21564_v37 = vld [vmem:[%s22231_s8 + $0x3] ss:$0 sm:$0xff] }
0x1a28   :  { %v19669_v53 = vpop.eup %19668 }
0x1a29   :  { %v9104_v23 = vadd.f32 1.0, %v19669_v53 }
0x1a2b   :  { %19672 = vrcp.f32 %v9104_v23 }
0x1a2e   :  { %v9531_v17 = vpop.f32.mrb[124].mxu0  ;;  %v9744_v45 = vpop.f32.mrb[124].mxu1 }
0x1a2f   :  { %v9535_v32 = vadd.f32 %v9531_v17, %v9462_v39  ;;  %v17623_v6 = vpop.f32.mrb[125].mxu0  ;;  %v17656_v50 = vpop.f32.mrb[125].mxu1  ;;  %v21579_v17 = vld [vmem:[#allocation10] ss:$0 sm:$0xff] }
0x1a31   :  { %v19671_v33 = vpop.eup %19670  ;;  %v9536_v43 = vadd.f32 %v21558_v41, %v9535_v32 }
0x1a32   :  { %v9322_v56 = vadd.f32 1.0, %v19671_v33 }
0x1a33   :  { %19674 = vtanh.f32 %v9536_v43 }
0x1a34   :  { %19676 = vrcp.f32 %v9322_v56 }
0x1a35   :  { %v19673_v63 = vpop.eup %19672 }
0x1a36   :  { %v9674_v61 = vpop.f32.mrb[126].mxu0 }
0x1a37   :  { %v9675_v12 = vadd.f32 %v9674_v61, %v9604_v29  ;;  %v17645_v13 = vpop.f32.mrb[127].mxu0 }
0x1a39   :  { %v9748_v49 = vadd.f32 %v9744_v45, %v9675_v12 }
0x1a3b   :  { %v9749_v18 = vadd.f32 %v21564_v37, %v9748_v49 }
0x1a3d   :  { %v19675_v59 = vpop.eup %19674  ;;  %v15431_v20 = vmul.f32 -1.442695, %v9749_v18 }
0x1a3e   :  { %v19677_v7 = vpop.eup %19676  ;;  %v9757_v21 = vmul.f32 %v19675_v59, %v19673_v63 }
0x1a3f   :  { %v9756_v15 = vmul.f32 %v19677_v7, %v21402_v4  ;;  %19678 = vpow2.f32 %v15431_v20 }
0x1a41   :  { %v21568_v39 = vadd.f32 %v9757_v21, %v9756_v15 }
0x1a43   :  { %19680 = vtanh.f32 %v21568_v39 }
0x1a49   :  { %v19679_v29 = vpop.eup %19678 }
0x1a4a   :  { %v9753_v34 = vadd.f32 1.0, %v19679_v29  ;;  %v21615_v29 = vld [vmem:[%s22224_s1 + $0x8] sm:$0x3] }
0x1a4c   :  { %19682 = vrcp.f32 %v9753_v34 }
0x1a4d   :  { %v19681_v44 = vpop.eup %19680 }
0x1a56   :  { %v19683_v53 = vpop.eup %19682 }
0x1a57   :  { %v21571_v23 = vmul.f32 %v19683_v53, %v19681_v44 }
0x1a59   :  { %17666 = vmatmul.mubr.msk.f32.vlgmr.msra.gmra.mrb[128].mxu0 %vm346_vm1, %v21571_v23 }
0x1a5a   :  { %19065 = vmatpush3.bf16.msra.mxu0 %v21086_v55  ;;  %17679 = vmatprep.mubr.msk.f32.mxu0 %vm20015_vm0, %v20016_v1 }
0x1a5b   :  { %19072 = vmatprep.subr.bf16.mxu0 %v20014_v0 }
0x1b2c   :  { %v9830_v4 = vpop.f32.mrb[128].mxu0 }
0x1b2d   :  { %v9831_v45 = vadd.f32 %v21579_v17, %v9830_v4  ;;  %v17667_v32 = vpop.f32.mrb[129].mxu0  ;;  %v21625_v4 = vld [vmem:[#allocation15] ss:$0 sm:$0xff] }
0x1b2f   :  { %17673 = vmatmul.mubr.msk.f32.vlgmr.msra.gmra.mrb[126].mxu1 %vm272_vm2, %v9831_v45 }
0x1b30   :  { %19068 = vmatpush3.bf16.msra.mxu1 %v21124_v22  ;;  %17690 = vmatprep.mubr.msk.f32.mxu1 %vm20015_vm0, %v20016_v1 }
0x1b31   :  { %19069 = vmatprep.subr.bf16.mxu1 %v20014_v0 }
0x1b34   :  { %19071 = vmatpush3.bf16.msra.mxu1 %v21128_v40 }
0x1b35   :  { %19081 = vmatprep.subr.bf16.mxu1 %v20014_v0 }
0x1b37   :  { %17691 = vmatmul.mubr.msk.f32.vlgmr.msra.gmra.mrb[128].mxu1 %vm346_vm1, %v21571_v23 }
0x1b38   :  { %19083 = vmatpush3.bf16.msra.mxu1 %v20811_v31  ;;  %17719 = vmatprep.mubr.msk.f32.mxu1 %vm20015_vm0, %v20016_v1 }
0x1b39   :  { %19084 = vmatprep.subr.bf16.mxu1 %v20014_v0 }
0x1b3c   :  { %19086 = vmatpush3.bf16.msra.mxu1 %v20827_v62 }
0x1b3d   :  { %19093 = vmatprep.subr.bf16.mxu1 %v20014_v0 }
0x1b3f   :  { %17720 = vmatmul.mubr.msk.f32.vlgmr.msra.gmra.mrb[130].mxu1 %vm346_vm1, %v21615_v29 }
0x1b40   :  { %19095 = vmatpush3.bf16.msra.mxu1 %v20856_v10  ;;  %17741 = vmatprep.mubr.msk.f32.mxu1 %vm20015_vm0, %v20016_v1 }
0x1b41   :  { %19096 = vmatprep.subr.bf16.mxu1 %v20014_v0 }
0x1b44   :  { %19098 = vmatpush3.bf16.msra.mxu1 %v20879_v9 }
0x1b45   :  { %19105 = vmatprep.subr.bf16.mxu1 %v20014_v0 }
0x1c02   :  { %v9903_v6 = vpop.f32.mrb[126].mxu1 }
0x1c03   :  { %v9904_v50 = vadd.f32 %v9903_v6, %v21115_v51  ;;  %v17674_v33 = vpop.f32.mrb[127].mxu1 }
0x1c05   :  { %v9907_v43 = vsel %vm892_vm3, %v9904_v50, -inf }
0x1c06   :  { %9908 = vmax.xlane.f32.xlu0 %v9907_v43 }
0x1c0a   :  { %v10057_v56 = vpop.f32.mrb[128].mxu1 }
0x1c0b   :  { %v17692_v61 = vpop.f32.mrb[129].mxu1 }
0x1c93   :  { %v9909_v12 = vpop.xlane.xlu0 %9908 }
0x1c94   :  { %v9910_v13 = vsub.f32 %v9904_v50, %v9909_v12 }
0x1c96   :  { %v9911_v49 = vmul.f32 1.442695, %v9910_v13 }
0x1c98   :  { %19684 = vpow2.f32 %v9911_v49 }
0x1ca2   :  { %v19685_v18 = vpop.eup %19684 }
0x1ca3   :  { %v9913_v63 = vsel %vm892_vm3, %v19685_v18, 0.0 }
0x1ca4   :  { %9914 = vadd.xlane.f32.xlu1 %v9913_v63 }
0x1d31   :  { %v9915_v59 = vpop.xlane.xlu1 %9914 }
0x1d32   :  { %19686 = vrcp.f32 %v9915_v59 }
0x1d3c   :  { %v19687_v20 = vpop.eup %19686 }
0x1d3d   :  { %v9917_v7 = vmul.f32 %v19687_v20, %v19685_v18 }
0x1d3f   :  { %17680 = vmatmul.mubr.msk.f32.vlgmr.msra.gmra.mrb[130].mxu0 %vm272_vm2, %v9917_v7 }
0x1d40   :  { %19074 = vmatpush3.bf16.msra.mxu0 %v21120_v57  ;;  %17697 = vmatprep.mubr.msk.f32.mxu0 %vm20015_vm0, %v20016_v1 }
0x1d41   :  { %19075 = vmatprep.subr.bf16.mxu0 %v20014_v0 }
0x1e12   :  { %v9987_v21 = vpop.f32.mrb[130].mxu0 }
0x1e13   :  { %v17681_v15 = vpop.f32.mrb[131].mxu0  ;;  %17698 = vmatmul.mubr.msk.f32.vlgmr.msra.gmra.mrb[132].mxu0 %vm272_vm2, %v9987_v21 }
0x1e14   :  { %19077 = vmatpush3.bf16.msra.mxu0 %v20809_v26  ;;  %17708 = vmatprep.mubr.msk.f32.mxu0 %vm20015_vm0, %v20016_v1 }
0x1e15   :  { %19078 = vmatprep.subr.bf16.mxu0 %v20014_v0 }
0x1e18   :  { %19080 = vmatpush3.bf16.msra.mxu0 %v20825_v38 }
0x1e19   :  { %19087 = vmatprep.subr.bf16.mxu0 %v20014_v0 }
0x1ee6   :  { %v10130_v34 = vpop.f32.mrb[132].mxu0 }
0x1ee7   :  { %v10131_v44 = vadd.f32 %v10130_v34, %v10057_v56  ;;  %v17699_v53 = vpop.f32.mrb[133].mxu0 }
0x1ee9   :  { %v10134_v45 = vadd.f32 %v21625_v4, %v10131_v44 }
0x1eeb   :  { %19688 = vtanh.f32 %v10134_v45 }
0x1ef5   :  { %v19689_v32 = vpop.eup %19688 }
0x1ef6   :  { %17709 = vmatmul.mubr.msk.f32.vlgmr.msra.gmra.mrb[134].mxu0 %vm346_vm1, %v19689_v32  ;;  %17742 = vmatmul.mubr.msk.f32.vlgmr.msra.gmra.mrb[132].mxu1 %vm346_vm1, %v19689_v32  ;;  %10136 = vst.msk [vmem:[#allocation3 + $0x6] sm:$0x3] %vm6373_vm6, %v19689_v32 }
0x1ef7   :  { %19089 = vmatpush3.bf16.msra.mxu0 %v20854_v8  ;;  %19107 = vmatpush3.bf16.msra.mxu1 %v20897_v27 }
0x1ef8   :  { %19090 = vmatprep.subr.bf16.mxu0 %v20014_v0  ;;  %19108 = vmatprep.subr.bf16.mxu1 %v20014_v0 }
0x1ef9   :  { %17730 = vmatprep.mubr.msk.f32.mxu0 %vm20015_vm0, %v20016_v1  ;;  %17763 = vmatprep.mubr.msk.f32.mxu1 %vm20015_vm0, %v20016_v1 }
0x1efb   :  { %19092 = vmatpush3.bf16.msra.mxu0 %v20877_v16  ;;  %19110 = vmatpush3.bf16.msra.mxu1 %v20913_v36 }
0x1efc   :  { %19099 = vmatprep.subr.bf16.mxu0 %v20014_v0  ;;  %19117 = vmatprep.subr.bf16.mxu1 %v20014_v0 }
0x1efe   :  { %17731 = vmatmul.mubr.msk.f32.vlgmr.msra.gmra.mrb[136].mxu0 %vm346_vm1, %v21571_v23  ;;  %17764 = vmatmul.mubr.msk.f32.vlgmr.msra.gmra.mrb[134].mxu1 %vm346_vm1, %v21571_v23 }
0x1eff   :  { %19101 = vmatpush3.bf16.msra.mxu0 %v20895_v28  ;;  %19119 = vmatpush3.bf16.msra.mxu1 %v20931_v48 }
0x1f00   :  { %19102 = vmatprep.subr.bf16.mxu0 %v20014_v0  ;;  %19120 = vmatprep.subr.bf16.mxu1 %v20014_v0 }
0x1f01   :  { %17752 = vmatprep.mubr.msk.f32.mxu0 %vm20015_vm0, %v20016_v1  ;;  %17785 = vmatprep.mubr.msk.f32.mxu1 %vm20015_vm0, %v20016_v1 }
0x1f03   :  { %19104 = vmatpush3.bf16.msra.mxu0 %v20911_v35  ;;  %19122 = vmatpush3.bf16.msra.mxu1 %v20948_v52 }
0x1f04   :  { %19111 = vmatprep.subr.bf16.mxu0 %v20014_v0  ;;  %19129 = vmatprep.subr.bf16.mxu1 %v20014_v0 }
0x1f06   :  { %17753 = vmatmul.mubr.msk.f32.vlgmr.msra.gmra.mrb[138].mxu0 %vm346_vm1, %v21615_v29  ;;  %17786 = vmatmul.mubr.msk.f32.vlgmr.msra.gmra.mrb[136].mxu1 %vm346_vm1, %v21615_v29 }
0x1f07   :  { %19113 = vmatpush3.bf16.msra.mxu0 %v20929_v47  ;;  %19131 = vmatpush3.bf16.msra.mxu1 %v20972_v60 }
0x1f08   :  { %19114 = vmatprep.subr.bf16.mxu0 %v20014_v0  ;;  %19132 = vmatprep.subr.bf16.mxu1 %v20014_v0 }
0x1f09   :  { %17774 = vmatprep.mubr.msk.f32.mxu0 %vm20015_vm0, %v20016_v1  ;;  %17807 = vmatprep.mubr.msk.f32.mxu1 %vm20015_vm0, %v20016_v1 }
0x1f0b   :  { %19116 = vmatpush3.bf16.msra.mxu0 %v20946_v46  ;;  %19134 = vmatpush3.bf16.msra.mxu1 %v20995_v25 }
0x1f0c   :  { %19123 = vmatprep.subr.bf16.mxu0 %v20014_v0  ;;  %19141 = vmatprep.subr.bf16.mxu1 %v20014_v0 }
0x1f0e   :  { %17775 = vmatmul.mubr.msk.f32.vlgmr.msra.gmra.mrb[140].mxu0 %vm346_vm1, %v19689_v32  ;;  %17808 = vmatmul.mubr.msk.f32.vlgmr.msra.gmra.mrb[138].mxu1 %vm346_vm1, %v19689_v32 }
0x1f0f   :  { %19125 = vmatpush3.bf16.msra.mxu0 %v20970_v58  ;;  %19143 = vmatpush3.bf16.msra.mxu1 %v21013_v3 }
0x1f10   :  { %19126 = vmatprep.subr.bf16.mxu0 %v20014_v0  ;;  %19144 = vmatprep.subr.bf16.mxu1 %v20014_v0 }
0x1f11   :  { %17796 = vmatprep.mubr.msk.f32.mxu0 %vm20015_vm0, %v20016_v1  ;;  %17829 = vmatprep.mubr.msk.f32.mxu1 %vm20015_vm0, %v20016_v1 }
0x1f13   :  { %19128 = vmatpush3.bf16.msra.mxu0 %v20993_v19  ;;  %19146 = vmatpush3.bf16.msra.mxu1 %v21029_v5 }
0x1f14   :  { %19135 = vmatprep.subr.bf16.mxu0 %v20014_v0  ;;  %19153 = vmatprep.subr.bf16.mxu1 %v20014_v0 }
0x1f16   :  { %17797 = vmatmul.mubr.msk.f32.vlgmr.msra.gmra.mrb[142].mxu0 %vm346_vm1, %v21571_v23  ;;  %17830 = vmatmul.mubr.msk.f32.vlgmr.msra.gmra.mrb[140].mxu1 %vm346_vm1, %v21571_v23  ;;  %v10279_v23 = vpop.f32.mrb[130].mxu1 }
0x1f17   :  { %19137 = vmatpush3.bf16.msra.mxu0 %v21011_v2  ;;  %17818 = vmatprep.mubr.msk.f32.mxu0 %vm20015_vm0, %v20016_v1  ;;  %v17721_v6 = vpop.f32.mrb[131].mxu1 }
0x1f18   :  { %19138 = vmatprep.subr.bf16.mxu0 %v20014_v0  ;;  %17847 = vmatprep.mubr.msk.f32.mxu1 %vm20015_vm0, %v20016_v1 }
0x1f1b   :  { %19140 = vmatpush3.bf16.msra.mxu0 %v21027_v14 }
0x1f1c   :  { %19156 = vmatpush3.bf16.xpose.msk.msra.mxu1 %vm21082_vm4, %v21086_v55  ;;  %19147 = vmatprep.subr.bf16.mxu0 %v20014_v0 }
0x1f1d   :  { %19160 = vmatprep.subr.bf16.mxu1 %v20014_v0 }
0x1f1e   :  { %17819 = vmatmul.mubr.msk.f32.vlgmr.msra.gmra.mrb[144].mxu0 %vm346_vm1, %v21615_v29 }
0x1f1f   :  { %19149 = vmatpush3.bf16.msra.mxu0 %v21048_v24  ;;  %17840 = vmatprep.mubr.msk.f32.mxu0 %vm20015_vm0, %v20016_v1 }
0x1f20   :  { %19150 = vmatprep.subr.bf16.mxu0 %v20014_v0 }
0x1f23   :  { %19152 = vmatpush3.bf16.msra.mxu0 %v21051_v30 }
0x1f24   :  { %19157 = vmatprep.subr.bf16.mxu0 %v20014_v0 }
0x1fc9   :  { %v10206_v50 = vpop.f32.mrb[134].mxu0  ;;  %v10427_v33 = vpop.f32.mrb[132].mxu1 }
0x1fca   :  { %v10280_v43 = vadd.f32 %v10279_v23, %v10206_v50  ;;  %v17710_v56 = vpop.f32.mrb[135].mxu0  ;;  %v17743_v61 = vpop.f32.mrb[133].mxu1 }
0x1fd1   :  { %v10349_v12 = vpop.f32.mrb[136].mxu0  ;;  %v10567_v13 = vpop.f32.mrb[134].mxu1 }
0x1fd2   :  { %v10353_v49 = vadd.f32 %v10349_v12, %v10280_v43  ;;  %v17732_v18 = vpop.f32.mrb[137].mxu0  ;;  %v17765_v63 = vpop.f32.mrb[135].mxu1 }
0x1fd4   :  { %v10354_v59 = vadd.f32 %v21546_v42, %v10353_v49 }
0x1fd6   :  { %v15442_v20 = vmul.f32 -1.442695, %v10354_v59 }
0x1fd8   :  { %19690 = vpow2.f32 %v15442_v20 }
0x1fd9   :  { %v10497_v7 = vpop.f32.mrb[138].mxu0  ;;  %v10715_v21 = vpop.f32.mrb[136].mxu1 }
0x1fda   :  { %v10498_v15 = vadd.f32 %v10497_v7, %v10427_v33  ;;  %v17754_v29 = vpop.f32.mrb[139].mxu0  ;;  %v17787_v34 = vpop.f32.mrb[137].mxu1 }
0x1fdc   :  { %v10571_v44 = vadd.f32 %v10567_v13, %v10498_v15 }
0x1fde   :  { %v10572_v53 = vadd.f32 %v21552_v11, %v10571_v44 }
0x1fe0   :  { %v15446_v45 = vmul.f32 -1.442695, %v10572_v53 }
0x1fe1   :  { %v10645_v32 = vpop.f32.mrb[140].mxu0  ;;  %v10858_v23 = vpop.f32.mrb[138].mxu1 }
0x1fe2   :  { %19692 = vpow2.f32 %v15446_v45  ;;  %v10716_v6 = vadd.f32 %v10715_v21, %v10645_v32  ;;  %v17776_v50 = vpop.f32.mrb[141].mxu0  ;;  %v17809_v43 = vpop.f32.mrb[139].mxu1 }
0x1fe3   :  { %v19691_v56 = vpop.eup %19690 }
0x1fe4   :  { %v10358_v61 = vadd.f32 1.0, %v19691_v56 }
0x1fe6   :  { %19694 = vrcp.f32 %v10358_v61 }
0x1fe9   :  { %v10785_v12 = vpop.f32.mrb[142].mxu0  ;;  %v10998_v49 = vpop.f32.mrb[140].mxu1 }
0x1fea   :  { %v10789_v18 = vadd.f32 %v10785_v12, %v10716_v6  ;;  %v17798_v63 = vpop.f32.mrb[143].mxu0  ;;  %v17831_v33 = vpop.f32.mrb[141].mxu1 }
0x1fec   :  { %v19693_v59 = vpop.eup %19692  ;;  %v10790_v20 = vadd.f32 %v21558_v41, %v10789_v18 }
0x1fed   :  { %v10576_v13 = vadd.f32 1.0, %v19693_v59 }
0x1fee   :  { %19696 = vtanh.f32 %v10790_v20 }
0x1fef   :  { %19698 = vrcp.f32 %v10576_v13 }
0x1ff0   :  { %v19695_v44 = vpop.eup %19694 }
0x1ff1   :  { %v10928_v7 = vpop.f32.mrb[144].mxu0 }
0x1ff2   :  { %v10929_v15 = vadd.f32 %v10928_v7, %v10858_v23  ;;  %v17820_v29 = vpop.f32.mrb[145].mxu0 }
0x1ff4   :  { %v11002_v21 = vadd.f32 %v10998_v49, %v10929_v15 }
0x1ff6   :  { %v11003_v34 = vadd.f32 %v21564_v37, %v11002_v21 }
0x1ff8   :  { %v19697_v53 = vpop.eup %19696  ;;  %v15453_v45 = vmul.f32 -1.442695, %v11003_v34 }
0x1ff9   :  { %v19699_v32 = vpop.eup %19698  ;;  %v11011_v6 = vmul.f32 %v19697_v53, %v19695_v44 }
0x1ffa   :  { %v11010_v50 = vmul.f32 %v19699_v32, %v21568_v39  ;;  %19700 = vpow2.f32 %v15453_v45 }
0x1ffc   :  { %v21718_v43 = vadd.f32 %v11011_v6, %v11010_v50 }
0x1ffe   :  { %19702 = vtanh.f32 %v21718_v43 }
0x2004   :  { %v19701_v56 = vpop.eup %19700 }
0x2005   :  { %v11007_v61 = vadd.f32 1.0, %v19701_v56 }
0x2007   :  { %19704 = vrcp.f32 %v11007_v61  ;;  %v21763_v61 = vld [vmem:[%s22224_s1 + $0xa] sm:$0x3] }
0x2008   :  { %v19703_v23 = vpop.eup %19702 }
0x2011   :  { %v19705_v12 = vpop.eup %19704 }
0x2012   :  { %v21721_v49 = vmul.f32 %v19705_v12, %v19703_v23 }
0x2014   :  { %17841 = vmatmul.mubr.msk.f32.vlgmr.msra.gmra.mrb[146].mxu0 %vm346_vm1, %v21721_v49 }
0x2015   :  { %19159 = vmatpush3.bf16.msra.mxu0 %v21086_v55  ;;  %17854 = vmatprep.mubr.msk.f32.mxu0 %vm20015_vm0, %v20016_v1 }
0x2016   :  { %19166 = vmatprep.subr.bf16.mxu0 %v20014_v0 }
0x20e7   :  { %v11084_v39 = vpop.f32.mrb[146].mxu0 }
0x20e8   :  { %v11085_v18 = vadd.f32 %v21579_v17, %v11084_v39  ;;  %v17842_v63 = vpop.f32.mrb[147].mxu0 }
0x20ea   :  { %17848 = vmatmul.mubr.msk.f32.vlgmr.msra.gmra.mrb[142].mxu1 %vm272_vm2, %v11085_v18 }
0x20eb   :  { %19162 = vmatpush3.bf16.msra.mxu1 %v21124_v22  ;;  %17865 = vmatprep.mubr.msk.f32.mxu1 %vm20015_vm0, %v20016_v1 }
0x20ec   :  { %19163 = vmatprep.subr.bf16.mxu1 %v20014_v0 }
0x20ef   :  { %19165 = vmatpush3.bf16.msra.mxu1 %v21128_v40 }
0x20f0   :  { %19175 = vmatprep.subr.bf16.mxu1 %v20014_v0 }
0x20f2   :  { %17866 = vmatmul.mubr.msk.f32.vlgmr.msra.gmra.mrb[144].mxu1 %vm346_vm1, %v21721_v49 }
0x20f3   :  { %19177 = vmatpush3.bf16.msra.mxu1 %v20811_v31  ;;  %17894 = vmatprep.mubr.msk.f32.mxu1 %vm20015_vm0, %v20016_v1 }
0x20f4   :  { %19178 = vmatprep.subr.bf16.mxu1 %v20014_v0 }
0x20f7   :  { %19180 = vmatpush3.bf16.msra.mxu1 %v20827_v62 }
0x20f8   :  { %19187 = vmatprep.subr.bf16.mxu1 %v20014_v0 }
0x20fa   :  { %17895 = vmatmul.mubr.msk.f32.vlgmr.msra.gmra.mrb[146].mxu1 %vm346_vm1, %v21763_v61 }
0x20fb   :  { %19189 = vmatpush3.bf16.msra.mxu1 %v20856_v10  ;;  %17916 = vmatprep.mubr.msk.f32.mxu1 %vm20015_vm0, %v20016_v1 }
0x20fc   :  { %19190 = vmatprep.subr.bf16.mxu1 %v20014_v0 }
0x20ff   :  { %19192 = vmatpush3.bf16.msra.mxu1 %v20879_v9 }
0x2100   :  { %19199 = vmatprep.subr.bf16.mxu1 %v20014_v0 }
0x21bd   :  { %v11157_v33 = vpop.f32.mrb[142].mxu1 }
0x21be   :  { %v11158_v59 = vadd.f32 %v11157_v33, %v21115_v51  ;;  %v17849_v20 = vpop.f32.mrb[143].mxu1 }
0x21c0   :  { %v11161_v13 = vsel %vm892_vm3, %v11158_v59, -inf }
0x21c1   :  { %11162 = vmax.xlane.f32.xlu0 %v11161_v13 }
0x21c5   :  { %v11311_v7 = vpop.f32.mrb[144].mxu1 }
0x21c6   :  { %v17867_v15 = vpop.f32.mrb[145].mxu1 }
0x224e   :  { %v11163_v29 = vpop.xlane.xlu0 %11162 }
0x224f   :  { %v11164_v21 = vsub.f32 %v11158_v59, %v11163_v29 }
0x2251   :  { %v11165_v34 = vmul.f32 1.442695, %v11164_v21 }
0x2253   :  { %19706 = vpow2.f32 %v11165_v34 }
0x225d   :  { %v19707_v44 = vpop.eup %19706 }
0x225e   :  { %v11167_v53 = vsel %vm892_vm3, %v19707_v44, 0.0 }
0x225f   :  { %11168 = vadd.xlane.f32.xlu1 %v11167_v53 }
0x22ec   :  { %v11169_v45 = vpop.xlane.xlu1 %11168 }
0x22ed   :  { %19708 = vrcp.f32 %v11169_v45 }
0x22f7   :  { %v19709_v32 = vpop.eup %19708 }
0x22f8   :  { %v11171_v6 = vmul.f32 %v19709_v32, %v19707_v44 }
0x22fa   :  { %17855 = vmatmul.mubr.msk.f32.vlgmr.msra.gmra.mrb[148].mxu0 %vm272_vm2, %v11171_v6 }
0x22fb   :  { %19168 = vmatpush3.bf16.msra.mxu0 %v21120_v57  ;;  %17872 = vmatprep.mubr.msk.f32.mxu0 %vm20015_vm0, %v20016_v1 }
0x22fc   :  { %19169 = vmatprep.subr.bf16.mxu0 %v20014_v0 }
0x23cd   :  { %v11241_v50 = vpop.f32.mrb[148].mxu0 }
0x23ce   :  { %v17856_v56 = vpop.f32.mrb[149].mxu0  ;;  %17873 = vmatmul.mubr.msk.f32.vlgmr.msra.gmra.mrb[150].mxu0 %vm272_vm2, %v11241_v50 }
0x23cf   :  { %19171 = vmatpush3.bf16.msra.mxu0 %v20809_v26  ;;  %17883 = vmatprep.mubr.msk.f32.mxu0 %vm20015_vm0, %v20016_v1 }
0x23d0   :  { %19172 = vmatprep.subr.bf16.mxu0 %v20014_v0 }
0x23d3   :  { %19174 = vmatpush3.bf16.msra.mxu0 %v20825_v38 }
0x23d4   :  { %19181 = vmatprep.subr.bf16.mxu0 %v20014_v0 }
0x24a1   :  { %v11384_v23 = vpop.f32.mrb[150].mxu0 }
0x24a2   :  { %v11385_v12 = vadd.f32 %v11384_v23, %v11311_v7  ;;  %v17874_v39 = vpop.f32.mrb[151].mxu0 }
0x24a4   :  { %v11388_v18 = vadd.f32 %v21625_v4, %v11385_v12 }
0x24a6   :  { %19710 = vtanh.f32 %v11388_v18 }
0x24b0   :  { %v19711_v63 = vpop.eup %19710 }
0x24b1   :  { %17884 = vmatmul.mubr.msk.f32.vlgmr.msra.gmra.mrb[152].mxu0 %vm346_vm1, %v19711_v63  ;;  %17917 = vmatmul.mubr.msk.f32.vlgmr.msra.gmra.mrb[148].mxu1 %vm346_vm1, %v19711_v63  ;;  %11390 = vst.msk [vmem:[#allocation3 + $0x8] sm:$0x3] %vm6373_vm6, %v19711_v63 }
0x24b2   :  { %19183 = vmatpush3.bf16.msra.mxu0 %v20854_v8  ;;  %19201 = vmatpush3.bf16.msra.mxu1 %v20897_v27 }
0x24b3   :  { %19184 = vmatprep.subr.bf16.mxu0 %v20014_v0  ;;  %19202 = vmatprep.subr.bf16.mxu1 %v20014_v0 }
0x24b4   :  { %17905 = vmatprep.mubr.msk.f32.mxu0 %vm20015_vm0, %v20016_v1  ;;  %17938 = vmatprep.mubr.msk.f32.mxu1 %vm20015_vm0, %v20016_v1 }
0x24b6   :  { %19186 = vmatpush3.bf16.msra.mxu0 %v20877_v16  ;;  %19204 = vmatpush3.bf16.msra.mxu1 %v20913_v36 }
0x24b7   :  { %19193 = vmatprep.subr.bf16.mxu0 %v20014_v0  ;;  %19211 = vmatprep.subr.bf16.mxu1 %v20014_v0 }
0x24b9   :  { %17906 = vmatmul.mubr.msk.f32.vlgmr.msra.gmra.mrb[154].mxu0 %vm346_vm1, %v21721_v49  ;;  %17939 = vmatmul.mubr.msk.f32.vlgmr.msra.gmra.mrb[150].mxu1 %vm346_vm1, %v21721_v49 }
0x24ba   :  { %19195 = vmatpush3.bf16.msra.mxu0 %v20895_v28  ;;  %19213 = vmatpush3.bf16.msra.mxu1 %v20931_v48 }
0x24bb   :  { %19196 = vmatprep.subr.bf16.mxu0 %v20014_v0  ;;  %19214 = vmatprep.subr.bf16.mxu1 %v20014_v0 }
0x24bc   :  { %17927 = vmatprep.mubr.msk.f32.mxu0 %vm20015_vm0, %v20016_v1  ;;  %17960 = vmatprep.mubr.msk.f32.mxu1 %vm20015_vm0, %v20016_v1 }
0x24be   :  { %19198 = vmatpush3.bf16.msra.mxu0 %v20911_v35  ;;  %19216 = vmatpush3.bf16.msra.mxu1 %v20948_v52 }
0x24bf   :  { %19205 = vmatprep.subr.bf16.mxu0 %v20014_v0  ;;  %19223 = vmatprep.subr.bf16.mxu1 %v20014_v0 }
0x24c1   :  { %17928 = vmatmul.mubr.msk.f32.vlgmr.msra.gmra.mrb[156].mxu0 %vm346_vm1, %v21763_v61  ;;  %17961 = vmatmul.mubr.msk.f32.vlgmr.msra.gmra.mrb[152].mxu1 %vm346_vm1, %v21763_v61 }
0x24c2   :  { %19207 = vmatpush3.bf16.msra.mxu0 %v20929_v47  ;;  %19225 = vmatpush3.bf16.msra.mxu1 %v20972_v60 }
0x24c3   :  { %19208 = vmatprep.subr.bf16.mxu0 %v20014_v0  ;;  %19226 = vmatprep.subr.bf16.mxu1 %v20014_v0 }
0x24c4   :  { %17949 = vmatprep.mubr.msk.f32.mxu0 %vm20015_vm0, %v20016_v1  ;;  %17982 = vmatprep.mubr.msk.f32.mxu1 %vm20015_vm0, %v20016_v1 }
0x24c6   :  { %19210 = vmatpush3.bf16.msra.mxu0 %v20946_v46  ;;  %19228 = vmatpush3.bf16.msra.mxu1 %v20995_v25 }
0x24c7   :  { %19217 = vmatprep.subr.bf16.mxu0 %v20014_v0  ;;  %19235 = vmatprep.subr.bf16.mxu1 %v20014_v0 }
0x24c9   :  { %17950 = vmatmul.mubr.msk.f32.vlgmr.msra.gmra.mrb[158].mxu0 %vm346_vm1, %v19711_v63  ;;  %17983 = vmatmul.mubr.msk.f32.vlgmr.msra.gmra.mrb[154].mxu1 %vm346_vm1, %v19711_v63 }
0x24ca   :  { %19219 = vmatpush3.bf16.msra.mxu0 %v20970_v58  ;;  %19237 = vmatpush3.bf16.msra.mxu1 %v21013_v3 }
0x24cb   :  { %19220 = vmatprep.subr.bf16.mxu0 %v20014_v0  ;;  %19238 = vmatprep.subr.bf16.mxu1 %v20014_v0 }
0x24cc   :  { %17971 = vmatprep.mubr.msk.f32.mxu0 %vm20015_vm0, %v20016_v1  ;;  %18004 = vmatprep.mubr.msk.f32.mxu1 %vm20015_vm0, %v20016_v1 }
0x24ce   :  { %19222 = vmatpush3.bf16.msra.mxu0 %v20993_v19  ;;  %19240 = vmatpush3.bf16.msra.mxu1 %v21029_v5 }
0x24cf   :  { %19229 = vmatprep.subr.bf16.mxu0 %v20014_v0  ;;  %19247 = vmatprep.subr.bf16.mxu1 %v20014_v0 }
0x24d1   :  { %17972 = vmatmul.mubr.msk.f32.vlgmr.msra.gmra.mrb[160].mxu0 %vm346_vm1, %v21721_v49  ;;  %18005 = vmatmul.mubr.msk.f32.vlgmr.msra.gmra.mrb[156].mxu1 %vm346_vm1, %v21721_v49  ;;  %v11533_v49 = vpop.f32.mrb[146].mxu1 }
0x24d2   :  { %19231 = vmatpush3.bf16.msra.mxu0 %v21011_v2  ;;  %17993 = vmatprep.mubr.msk.f32.mxu0 %vm20015_vm0, %v20016_v1  ;;  %v17896_v33 = vpop.f32.mrb[147].mxu1 }
0x24d3   :  { %19232 = vmatprep.subr.bf16.mxu0 %v20014_v0  ;;  %18022 = vmatprep.mubr.msk.f32.mxu1 %vm20015_vm0, %v20016_v1 }
0x24d6   :  { %19234 = vmatpush3.bf16.msra.mxu0 %v21027_v14 }
0x24d7   :  { %19250 = vmatpush3.bf16.xpose.msk.msra.mxu1 %vm21082_vm4, %v21086_v55  ;;  %19241 = vmatprep.subr.bf16.mxu0 %v20014_v0 }
0x24d8   :  { %19254 = vmatprep.subr.bf16.mxu1 %v20014_v0 }
0x24d9   :  { %17994 = vmatmul.mubr.msk.f32.vlgmr.msra.gmra.mrb[162].mxu0 %vm346_vm1, %v21763_v61 }
0x24da   :  { %19243 = vmatpush3.bf16.msra.mxu0 %v21048_v24  ;;  %18015 = vmatprep.mubr.msk.f32.mxu0 %vm20015_vm0, %v20016_v1 }
0x24db   :  { %19244 = vmatprep.subr.bf16.mxu0 %v20014_v0 }
0x24de   :  { %19246 = vmatpush3.bf16.msra.mxu0 %v21051_v30 }
0x24df   :  { %19251 = vmatprep.subr.bf16.mxu0 %v20014_v0 }
0x2584   :  { %v11460_v59 = vpop.f32.mrb[152].mxu0  ;;  %v11681_v20 = vpop.f32.mrb[148].mxu1 }
0x2585   :  { %v11534_v13 = vadd.f32 %v11533_v49, %v11460_v59  ;;  %v17885_v7 = vpop.f32.mrb[153].mxu0  ;;  %v17918_v15 = vpop.f32.mrb[149].mxu1 }
0x258c   :  { %v11603_v29 = vpop.f32.mrb[154].mxu0  ;;  %v11821_v21 = vpop.f32.mrb[150].mxu1 }
0x258d   :  { %v11607_v34 = vadd.f32 %v11603_v29, %v11534_v13  ;;  %v17907_v44 = vpop.f32.mrb[155].mxu0  ;;  %v17940_v53 = vpop.f32.mrb[151].mxu1 }
0x258f   :  { %v11608_v45 = vadd.f32 %v21546_v42, %v11607_v34 }
0x2591   :  { %v15464_v32 = vmul.f32 -1.442695, %v11608_v45 }
0x2593   :  { %19712 = vpow2.f32 %v15464_v32 }
0x2594   :  { %v11751_v6 = vpop.f32.mrb[156].mxu0  ;;  %v11969_v50 = vpop.f32.mrb[152].mxu1 }
0x2595   :  { %v11752_v56 = vadd.f32 %v11751_v6, %v11681_v20  ;;  %v17929_v61 = vpop.f32.mrb[157].mxu0  ;;  %v17962_v23 = vpop.f32.mrb[153].mxu1 }
0x2597   :  { %v11825_v12 = vadd.f32 %v11821_v21, %v11752_v56 }
0x2599   :  { %v11826_v39 = vadd.f32 %v21552_v11, %v11825_v12 }
0x259b   :  { %v15468_v18 = vmul.f32 -1.442695, %v11826_v39 }
0x259c   :  { %v11899_v63 = vpop.f32.mrb[158].mxu0  ;;  %v12112_v49 = vpop.f32.mrb[154].mxu1 }
0x259d   :  { %19714 = vpow2.f32 %v15468_v18  ;;  %v11970_v33 = vadd.f32 %v11969_v50, %v11899_v63  ;;  %v17951_v59 = vpop.f32.mrb[159].mxu0  ;;  %v17984_v13 = vpop.f32.mrb[155].mxu1 }
0x259e   :  { %v19713_v7 = vpop.eup %19712 }
0x259f   :  { %v11612_v15 = vadd.f32 1.0, %v19713_v7 }
0x25a1   :  { %19716 = vrcp.f32 %v11612_v15 }
0x25a4   :  { %v12039_v42 = vpop.f32.mrb[160].mxu0  ;;  %v12252_v29 = vpop.f32.mrb[156].mxu1 }
0x25a5   :  { %v12043_v34 = vadd.f32 %v12039_v42, %v11970_v33  ;;  %v17973_v44 = vpop.f32.mrb[161].mxu0  ;;  %v18006_v20 = vpop.f32.mrb[157].mxu1 }
0x25a7   :  { %v19715_v53 = vpop.eup %19714  ;;  %v12044_v45 = vadd.f32 %v21558_v41, %v12043_v34 }
0x25a8   :  { %v11830_v21 = vadd.f32 1.0, %v19715_v53 }
0x25a9   :  { %19718 = vtanh.f32 %v12044_v45 }
0x25aa   :  { %19720 = vrcp.f32 %v11830_v21 }
0x25ab   :  { %v19717_v61 = vpop.eup %19716 }
0x25ac   :  { %v12182_v11 = vpop.f32.mrb[162].mxu0 }
0x25ad   :  { %v12183_v32 = vadd.f32 %v12182_v11, %v12112_v49  ;;  %v17995_v6 = vpop.f32.mrb[163].mxu0 }
0x25af   :  { %v12256_v50 = vadd.f32 %v12252_v29, %v12183_v32 }
0x25b1   :  { %v12257_v56 = vadd.f32 %v21564_v37, %v12256_v50 }
0x25b3   :  { %v19719_v23 = vpop.eup %19718  ;;  %v15475_v12 = vmul.f32 -1.442695, %v12257_v56 }
0x25b4   :  { %v19721_v39 = vpop.eup %19720  ;;  %v12265_v18 = vmul.f32 %v19719_v23, %v19717_v61 }
0x25b5   :  { %v12264_v63 = vmul.f32 %v19721_v39, %v21718_v43  ;;  %19722 = vpow2.f32 %v15475_v12  ;;  %v21909_v12 = vld [vmem:[%s22224_s1 + $0xc] sm:$0x3] }
0x25b7   :  { %v21864_v33 = vadd.f32 %v12265_v18, %v12264_v63 }
0x25b9   :  { %19724 = vtanh.f32 %v21864_v33 }
0x25bf   :  { %v19723_v41 = vpop.eup %19722 }
0x25c0   :  { %v12261_v59 = vadd.f32 1.0, %v19723_v41 }
0x25c2   :  { %19726 = vrcp.f32 %v12261_v59 }
0x25c3   :  { %v19725_v49 = vpop.eup %19724 }
0x25cc   :  { %v19727_v13 = vpop.eup %19726 }
0x25cd   :  { %v21867_v7 = vmul.f32 %v19727_v13, %v19725_v49 }
0x25cf   :  { %18016 = vmatmul.mubr.msk.f32.vlgmr.msra.gmra.mrb[164].mxu0 %vm346_vm1, %v21867_v7 }
0x25d0   :  { %19253 = vmatpush3.bf16.msra.mxu0 %v21086_v55  ;;  %18029 = vmatprep.mubr.msk.f32.mxu0 %vm20015_vm0, %v20016_v1 }
0x25d1   :  { %19260 = vmatprep.subr.bf16.mxu0 %v20014_v0 }
0x26a2   :  { %v12338_v37 = vpop.f32.mrb[164].mxu0 }
0x26a3   :  { %v12339_v43 = vadd.f32 %v21579_v17, %v12338_v37  ;;  %v18017_v15 = vpop.f32.mrb[165].mxu0 }
0x26a5   :  { %18023 = vmatmul.mubr.msk.f32.vlgmr.msra.gmra.mrb[158].mxu1 %vm272_vm2, %v12339_v43 }
0x26a6   :  { %19256 = vmatpush3.bf16.msra.mxu1 %v21124_v22  ;;  %18040 = vmatprep.mubr.msk.f32.mxu1 %vm20015_vm0, %v20016_v1 }
0x26a7   :  { %19257 = vmatprep.subr.bf16.mxu1 %v20014_v0 }
0x26aa   :  { %19259 = vmatpush3.bf16.msra.mxu1 %v21128_v40 }
0x26ab   :  { %19269 = vmatprep.subr.bf16.mxu1 %v20014_v0 }
0x26ad   :  { %18041 = vmatmul.mubr.msk.f32.vlgmr.msra.gmra.mrb[160].mxu1 %vm346_vm1, %v21867_v7 }
0x26ae   :  { %19271 = vmatpush3.bf16.msra.mxu1 %v20811_v31  ;;  %18069 = vmatprep.mubr.msk.f32.mxu1 %vm20015_vm0, %v20016_v1 }
0x26af   :  { %19272 = vmatprep.subr.bf16.mxu1 %v20014_v0 }
0x26b2   :  { %19274 = vmatpush3.bf16.msra.mxu1 %v20827_v62 }
0x26b3   :  { %19281 = vmatprep.subr.bf16.mxu1 %v20014_v0 }
0x26b5   :  { %18070 = vmatmul.mubr.msk.f32.vlgmr.msra.gmra.mrb[162].mxu1 %vm346_vm1, %v21909_v12 }
0x26b6   :  { %19283 = vmatpush3.bf16.msra.mxu1 %v20856_v10  ;;  %18091 = vmatprep.mubr.msk.f32.mxu1 %vm20015_vm0, %v20016_v1 }
0x26b7   :  { %19284 = vmatprep.subr.bf16.mxu1 %v20014_v0 }
0x26ba   :  { %19286 = vmatpush3.bf16.msra.mxu1 %v20879_v9 }
0x26bb   :  { %19293 = vmatprep.subr.bf16.mxu1 %v20014_v0 }
0x2778   :  { %v12411_v17 = vpop.f32.mrb[158].mxu1 }
0x2779   :  { %v12412_v42 = vadd.f32 %v12411_v17, %v21115_v51  ;;  %v18024_v29 = vpop.f32.mrb[159].mxu1 }
0x277b   :  { %v12415_v34 = vsel %vm892_vm3, %v12412_v42, -inf }
0x277c   :  { %12416 = vmax.xlane.f32.xlu0 %v12415_v34 }
0x2780   :  { %v12565_v44 = vpop.f32.mrb[160].mxu1 }
0x2781   :  { %v18042_v20 = vpop.f32.mrb[161].mxu1 }
0x2782   :  { %v22008_v20 = vld [vmem:[%s22231_s8] ss:$0 sm:$0xff] }
0x2809   :  { %v12417_v53 = vpop.xlane.xlu0 %12416 }
0x280a   :  { %v12418_v45 = vsub.f32 %v12412_v42, %v12417_v53 }
0x280c   :  { %v12419_v21 = vmul.f32 1.442695, %v12418_v45 }
0x280e   :  { %19728 = vpow2.f32 %v12419_v21 }
0x2818   :  { %v19729_v11 = vpop.eup %19728 }
0x2819   :  { %v12421_v32 = vsel %vm892_vm3, %v19729_v11, 0.0 }
0x281a   :  { %12422 = vadd.xlane.f32.xlu1 %v12421_v32 }
0x28a7   :  { %v12423_v6 = vpop.xlane.xlu1 %12422 }
0x28a8   :  { %19730 = vrcp.f32 %v12423_v6 }
0x28b2   :  { %v19731_v50 = vpop.eup %19730 }
0x28b3   :  { %v12425_v56 = vmul.f32 %v19731_v50, %v19729_v11 }
0x28b5   :  { %18030 = vmatmul.mubr.msk.f32.vlgmr.msra.gmra.mrb[166].mxu0 %vm272_vm2, %v12425_v56 }
0x28b6   :  { %19262 = vmatpush3.bf16.msra.mxu0 %v21120_v57  ;;  %18047 = vmatprep.mubr.msk.f32.mxu0 %vm20015_vm0, %v20016_v1 }
0x28b7   :  { %19263 = vmatprep.subr.bf16.mxu0 %v20014_v0 }
0x2988   :  { %v12495_v61 = vpop.f32.mrb[166].mxu0 }
0x2989   :  { %v18031_v23 = vpop.f32.mrb[167].mxu0  ;;  %18048 = vmatmul.mubr.msk.f32.vlgmr.msra.gmra.mrb[168].mxu0 %vm272_vm2, %v12495_v61  ;;  %v22014_v61 = vld [vmem:[%s22231_s8 + $0x1] ss:$0 sm:$0xff] }
0x298a   :  { %19265 = vmatpush3.bf16.msra.mxu0 %v20809_v26  ;;  %18058 = vmatprep.mubr.msk.f32.mxu0 %vm20015_vm0, %v20016_v1 }
0x298b   :  { %19266 = vmatprep.subr.bf16.mxu0 %v20014_v0 }
0x298e   :  { %19268 = vmatpush3.bf16.msra.mxu0 %v20825_v38 }
0x298f   :  { %19275 = vmatprep.subr.bf16.mxu0 %v20014_v0 }
0x2a5c   :  { %v12638_v39 = vpop.f32.mrb[168].mxu0 }
0x2a5d   :  { %v12639_v18 = vadd.f32 %v12638_v39, %v12565_v44  ;;  %v18049_v63 = vpop.f32.mrb[169].mxu0 }
0x2a5f   :  { %v12642_v41 = vadd.f32 %v21625_v4, %v12639_v18  ;;  %v12787_v4 = vpop.f32.mrb[162].mxu1 }
0x2a60   :  { %v18071_v49 = vpop.f32.mrb[163].mxu1 }
0x2a61   :  { %19732 = vtanh.f32 %v12642_v41 }
0x2a6b   :  { %v19733_v59 = vpop.eup %19732 }
0x2a6c   :  { %18059 = vmatmul.mubr.msk.f32.vlgmr.msra.gmra.mrb[170].mxu0 %vm346_vm1, %v19733_v59  ;;  %18092 = vmatmul.mubr.msk.f32.vlgmr.msra.gmra.mrb[164].mxu1 %vm346_vm1, %v19733_v59  ;;  %12644 = vst.msk [vmem:[#allocation3 + $0xa] sm:$0x3] %vm6373_vm6, %v19733_v59 }
0x2a6d   :  { %19277 = vmatpush3.bf16.msra.mxu0 %v20854_v8  ;;  %19295 = vmatpush3.bf16.msra.mxu1 %v20897_v27 }
0x2a6e   :  { %19278 = vmatprep.subr.bf16.mxu0 %v20014_v0  ;;  %19296 = vmatprep.subr.bf16.mxu1 %v20014_v0 }
0x2a6f   :  { %18080 = vmatprep.mubr.msk.f32.mxu0 %vm20015_vm0, %v20016_v1  ;;  %18113 = vmatprep.mubr.msk.f32.mxu1 %vm20015_vm0, %v20016_v1 }
0x2a71   :  { %19280 = vmatpush3.bf16.msra.mxu0 %v20877_v16  ;;  %19298 = vmatpush3.bf16.msra.mxu1 %v20913_v36 }
0x2a72   :  { %19287 = vmatprep.subr.bf16.mxu0 %v20014_v0  ;;  %19305 = vmatprep.subr.bf16.mxu1 %v20014_v0 }
0x2a74   :  { %18081 = vmatmul.mubr.msk.f32.vlgmr.msra.gmra.mrb[172].mxu0 %vm346_vm1, %v21867_v7  ;;  %18114 = vmatmul.mubr.msk.f32.vlgmr.msra.gmra.mrb[166].mxu1 %vm346_vm1, %v21867_v7 }
0x2a75   :  { %19289 = vmatpush3.bf16.msra.mxu0 %v20895_v28  ;;  %19307 = vmatpush3.bf16.msra.mxu1 %v20931_v48 }
0x2a76   :  { %19290 = vmatprep.subr.bf16.mxu0 %v20014_v0  ;;  %19308 = vmatprep.subr.bf16.mxu1 %v20014_v0 }
0x2a77   :  { %18102 = vmatprep.mubr.msk.f32.mxu0 %vm20015_vm0, %v20016_v1  ;;  %18135 = vmatprep.mubr.msk.f32.mxu1 %vm20015_vm0, %v20016_v1 }
0x2a79   :  { %19292 = vmatpush3.bf16.msra.mxu0 %v20911_v35  ;;  %19310 = vmatpush3.bf16.msra.mxu1 %v20948_v52 }
0x2a7a   :  { %19299 = vmatprep.subr.bf16.mxu0 %v20014_v0  ;;  %19317 = vmatprep.subr.bf16.mxu1 %v20014_v0 }
0x2a7c   :  { %18103 = vmatmul.mubr.msk.f32.vlgmr.msra.gmra.mrb[174].mxu0 %vm346_vm1, %v21909_v12  ;;  %18136 = vmatmul.mubr.msk.f32.vlgmr.msra.gmra.mrb[168].mxu1 %vm346_vm1, %v21909_v12 }
0x2a7d   :  { %19301 = vmatpush3.bf16.msra.mxu0 %v20929_v47  ;;  %19319 = vmatpush3.bf16.msra.mxu1 %v20972_v60 }
0x2a7e   :  { %19302 = vmatprep.subr.bf16.mxu0 %v20014_v0  ;;  %19320 = vmatprep.subr.bf16.mxu1 %v20014_v0 }
0x2a7f   :  { %18124 = vmatprep.mubr.msk.f32.mxu0 %vm20015_vm0, %v20016_v1  ;;  %18157 = vmatprep.mubr.msk.f32.mxu1 %vm20015_vm0, %v20016_v1 }
0x2a81   :  { %19304 = vmatpush3.bf16.msra.mxu0 %v20946_v46  ;;  %19322 = vmatpush3.bf16.msra.mxu1 %v20995_v25 }
0x2a82   :  { %19311 = vmatprep.subr.bf16.mxu0 %v20014_v0  ;;  %19329 = vmatprep.subr.bf16.mxu1 %v20014_v0 }
0x2a84   :  { %18125 = vmatmul.mubr.msk.f32.vlgmr.msra.gmra.mrb[176].mxu0 %vm346_vm1, %v19733_v59  ;;  %18158 = vmatmul.mubr.msk.f32.vlgmr.msra.gmra.mrb[170].mxu1 %vm346_vm1, %v19733_v59 }
0x2a85   :  { %19313 = vmatpush3.bf16.msra.mxu0 %v20970_v58  ;;  %19331 = vmatpush3.bf16.msra.mxu1 %v21013_v3 }
0x2a86   :  { %19314 = vmatprep.subr.bf16.mxu0 %v20014_v0  ;;  %19332 = vmatprep.subr.bf16.mxu1 %v20014_v0 }
0x2a87   :  { %18146 = vmatprep.mubr.msk.f32.mxu0 %vm20015_vm0, %v20016_v1  ;;  %18179 = vmatprep.mubr.msk.f32.mxu1 %vm20015_vm0, %v20016_v1 }
0x2a89   :  { %19316 = vmatpush3.bf16.msra.mxu0 %v20993_v19  ;;  %19334 = vmatpush3.bf16.msra.mxu1 %v21029_v5 }
0x2a8a   :  { %19323 = vmatprep.subr.bf16.mxu0 %v20014_v0  ;;  %19341 = vmatprep.subr.bf16.mxu1 %v20014_v0 }
0x2a8c   :  { %18147 = vmatmul.mubr.msk.f32.vlgmr.msra.gmra.mrb[178].mxu0 %vm346_vm1, %v21867_v7  ;;  %18180 = vmatmul.mubr.msk.f32.vlgmr.msra.gmra.mrb[172].mxu1 %vm346_vm1, %v21867_v7 }
0x2a8d   :  { %19325 = vmatpush3.bf16.msra.mxu0 %v21011_v2  ;;  %18168 = vmatprep.mubr.msk.f32.mxu0 %vm20015_vm0, %v20016_v1 }
0x2a8e   :  { %19326 = vmatprep.subr.bf16.mxu0 %v20014_v0  ;;  %18197 = vmatprep.mubr.msk.f32.mxu1 %vm20015_vm0, %v20016_v1 }
0x2a91   :  { %19328 = vmatpush3.bf16.msra.mxu0 %v21027_v14 }
0x2a92   :  { %19344 = vmatpush3.bf16.xpose.msk.msra.mxu1 %vm21082_vm4, %v21086_v55  ;;  %19335 = vmatprep.subr.bf16.mxu0 %v20014_v0 }
0x2a93   :  { %19348 = vmatprep.subr.bf16.mxu1 %v20014_v0 }
0x2a94   :  { %18169 = vmatmul.mubr.msk.f32.vlgmr.msra.gmra.mrb[180].mxu0 %vm346_vm1, %v21909_v12 }
0x2a95   :  { %19337 = vmatpush3.bf16.msra.mxu0 %v21048_v24  ;;  %18190 = vmatprep.mubr.msk.f32.mxu0 %vm20015_vm0, %v20016_v1 }
0x2a96   :  { %19338 = vmatprep.subr.bf16.mxu0 %v20014_v0 }
0x2a99   :  { %19340 = vmatpush3.bf16.msra.mxu0 %v21051_v30 }
0x2a9a   :  { %19345 = vmatprep.subr.bf16.mxu0 %v20014_v0 }
0x2b3f   :  { %v12714_v13 = vpop.f32.mrb[170].mxu0  ;;  %v12935_v7 = vpop.f32.mrb[164].mxu1 }
0x2b40   :  { %v12788_v37 = vadd.f32 %v12787_v4, %v12714_v13  ;;  %v18060_v43 = vpop.f32.mrb[171].mxu0  ;;  %v18093_v15 = vpop.f32.mrb[165].mxu1 }
0x2b47   :  { %v12857_v17 = vpop.f32.mrb[172].mxu0  ;;  %v13075_v42 = vpop.f32.mrb[166].mxu1 }
0x2b48   :  { %v12861_v29 = vadd.f32 %v12857_v17, %v12788_v37  ;;  %v18082_v34 = vpop.f32.mrb[173].mxu0  ;;  %v18115_v44 = vpop.f32.mrb[167].mxu1 }
0x2b4a   :  { %v12862_v53 = vadd.f32 %v22008_v20, %v12861_v29 }
0x2b4c   :  { %v15486_v45 = vmul.f32 -1.442695, %v12862_v53 }
0x2b4e   :  { %19734 = vpow2.f32 %v15486_v45 }
0x2b4f   :  { %v13005_v21 = vpop.f32.mrb[174].mxu0  ;;  %v13223_v11 = vpop.f32.mrb[168].mxu1 }
0x2b50   :  { %v13006_v32 = vadd.f32 %v13005_v21, %v12935_v7  ;;  %v18104_v6 = vpop.f32.mrb[175].mxu0  ;;  %v18137_v50 = vpop.f32.mrb[169].mxu1 }
0x2b52   :  { %v13079_v56 = vadd.f32 %v13075_v42, %v13006_v32  ;;  %v22020_v42 = vld [vmem:[%s22231_s8 + $0x2] ss:$0 sm:$0xff] }
0x2b54   :  { %v13080_v23 = vadd.f32 %v22014_v61, %v13079_v56 }
0x2b56   :  { %v15490_v12 = vmul.f32 -1.442695, %v13080_v23 }
0x2b57   :  { %v13153_v39 = vpop.f32.mrb[176].mxu0  ;;  %v13366_v18 = vpop.f32.mrb[170].mxu1 }
0x2b58   :  { %19736 = vpow2.f32 %v15490_v12  ;;  %v13224_v63 = vadd.f32 %v13223_v11, %v13153_v39  ;;  %v18126_v41 = vpop.f32.mrb[177].mxu0  ;;  %v18159_v59 = vpop.f32.mrb[171].mxu1  ;;  %v22026_v11 = vld [vmem:[%s22231_s8 + $0x3] ss:$0 sm:$0xff] }
0x2b59   :  { %v19735_v4 = vpop.eup %19734 }
0x2b5a   :  { %v12866_v49 = vadd.f32 1.0, %v19735_v4 }
0x2b5c   :  { %19738 = vrcp.f32 %v12866_v49 }
0x2b5f   :  { %v13293_v13 = vpop.f32.mrb[178].mxu0  ;;  %v13506_v7 = vpop.f32.mrb[172].mxu1 }
0x2b60   :  { %v13297_v37 = vadd.f32 %v13293_v13, %v13224_v63  ;;  %v18148_v43 = vpop.f32.mrb[179].mxu0  ;;  %v18181_v15 = vpop.f32.mrb[173].mxu1  ;;  %v22041_v13 = vld [vmem:[#allocation10] ss:$0 sm:$0xff] }
0x2b62   :  { %v19737_v17 = vpop.eup %19736  ;;  %v13298_v29 = vadd.f32 %v22020_v42, %v13297_v37 }
0x2b63   :  { %v13084_v34 = vadd.f32 1.0, %v19737_v17 }
0x2b64   :  { %19740 = vtanh.f32 %v13298_v29 }
0x2b65   :  { %19742 = vrcp.f32 %v13084_v34 }
0x2b66   :  { %v19739_v6 = vpop.eup %19738 }
0x2b67   :  { %v13436_v44 = vpop.f32.mrb[180].mxu0 }
0x2b68   :  { %v13437_v53 = vadd.f32 %v13436_v44, %v13366_v18  ;;  %v18170_v45 = vpop.f32.mrb[181].mxu0 }
0x2b6a   :  { %v13510_v21 = vadd.f32 %v13506_v7, %v13437_v53 }
0x2b6c   :  { %v13511_v32 = vadd.f32 %v22026_v11, %v13510_v21 }
0x2b6e   :  { %v19741_v50 = vpop.eup %19740  ;;  %v15497_v56 = vmul.f32 -1.442695, %v13511_v32 }
0x2b6f   :  { %v19743_v23 = vpop.eup %19742  ;;  %v13519_v12 = vmul.f32 %v19741_v50, %v19739_v6 }
0x2b70   :  { %v13518_v39 = vmul.f32 %v19743_v23, %v21864_v33  ;;  %19744 = vpow2.f32 %v15497_v56 }
0x2b72   :  { %v22030_v63 = vadd.f32 %v13519_v12, %v13518_v39  ;;  %v22077_v12 = vld [vmem:[%s22224_s1 + $0xe] sm:$0x3] }
0x2b74   :  { %19746 = vtanh.f32 %v22030_v63 }
0x2b7a   :  { %v19745_v18 = vpop.eup %19744 }
0x2b7b   :  { %v13515_v41 = vadd.f32 1.0, %v19745_v18  ;;  %v22087_v18 = vld [vmem:[#allocation15] ss:$0 sm:$0xff] }
0x2b7d   :  { %19748 = vrcp.f32 %v13515_v41 }
0x2b7e   :  { %v19747_v59 = vpop.eup %19746 }
0x2b87   :  { %v19749_v4 = vpop.eup %19748 }
0x2b88   :  { %v22033_v49 = vmul.f32 %v19749_v4, %v19747_v59 }
0x2b8a   :  { %18191 = vmatmul.mubr.msk.f32.vlgmr.msra.gmra.mrb[182].mxu0 %vm346_vm1, %v22033_v49 }
0x2b8b   :  { %19347 = vmatpush3.bf16.msra.mxu0 %v21086_v55  ;;  %18204 = vmatprep.mubr.msk.f32.mxu0 %vm20015_vm0, %v20016_v1 }
0x2b8c   :  { %19354 = vmatprep.subr.bf16.mxu0 %v20014_v0 }
0x2c5d   :  { %v13592_v33 = vpop.f32.mrb[182].mxu0 }
0x2c5e   :  { %v13593_v7 = vadd.f32 %v22041_v13, %v13592_v33  ;;  %v18192_v37 = vpop.f32.mrb[183].mxu0 }
0x2c60   :  { %18198 = vmatmul.mubr.msk.f32.vlgmr.msra.gmra.mrb[174].mxu1 %vm272_vm2, %v13593_v7 }
0x2c61   :  { %19350 = vmatpush3.bf16.msra.mxu1 %v21124_v22  ;;  %18215 = vmatprep.mubr.msk.f32.mxu1 %vm20015_vm0, %v20016_v1 }
0x2c62   :  { %19351 = vmatprep.subr.bf16.mxu1 %v20014_v0 }
0x2c65   :  { %19353 = vmatpush3.bf16.msra.mxu1 %v21128_v40 }
0x2c66   :  { %19363 = vmatprep.subr.bf16.mxu1 %v20014_v0 }
0x2c68   :  { %18216 = vmatmul.mubr.msk.f32.vlgmr.msra.gmra.mrb[176].mxu1 %vm346_vm1, %v22033_v49 }
0x2c69   :  { %19365 = vmatpush3.bf16.msra.mxu1 %v20811_v31  ;;  %18244 = vmatprep.mubr.msk.f32.mxu1 %vm20015_vm0, %v20016_v1 }
0x2c6a   :  { %19366 = vmatprep.subr.bf16.mxu1 %v20014_v0 }
0x2c6d   :  { %19368 = vmatpush3.bf16.msra.mxu1 %v20827_v62 }
0x2c6e   :  { %19375 = vmatprep.subr.bf16.mxu1 %v20014_v0 }
0x2c70   :  { %18245 = vmatmul.mubr.msk.f32.vlgmr.msra.gmra.mrb[178].mxu1 %vm346_vm1, %v22077_v12 }
0x2c71   :  { %19377 = vmatpush3.bf16.msra.mxu1 %v20856_v10  ;;  %18266 = vmatprep.mubr.msk.f32.mxu1 %vm20015_vm0, %v20016_v1 }
0x2c72   :  { %19378 = vmatprep.subr.bf16.mxu1 %v20014_v0 }
0x2c75   :  { %19380 = vmatpush3.bf16.msra.mxu1 %v20879_v9 }
0x2c76   :  { %19387 = vmatprep.subr.bf16.mxu1 %v20014_v0 }
0x2d33   :  { %v13665_v43 = vpop.f32.mrb[174].mxu1 }
0x2d34   :  { %v13666_v15 = vadd.f32 %v13665_v43, %v21115_v51  ;;  %v18199_v17 = vpop.f32.mrb[175].mxu1 }
0x2d36   :  { %v13669_v29 = vsel %vm892_vm3, %v13666_v15, -inf }
0x2d37   :  { %13670 = vmax.xlane.f32.xlu0 %v13669_v29 }
0x2d3b   :  { %v13819_v34 = vpop.f32.mrb[176].mxu1 }
0x2d3c   :  { %v18217_v44 = vpop.f32.mrb[177].mxu1 }
0x2dc4   :  { %v13671_v53 = vpop.xlane.xlu0 %13670 }
0x2dc5   :  { %v13672_v31 = vsub.f32 %v13666_v15, %v13671_v53 }
0x2dc7   :  { %v13673_v45 = vmul.f32 1.442695, %v13672_v31 }
0x2dc9   :  { %19750 = vpow2.f32 %v13673_v45 }
0x2dd3   :  { %v19751_v21 = vpop.eup %19750 }
0x2dd4   :  { %v13675_v32 = vsel %vm892_vm3, %v19751_v21, 0.0 }
0x2dd5   :  { %13676 = vadd.xlane.f32.xlu1 %v13675_v32 }
0x2e62   :  { %v13677_v62 = vpop.xlane.xlu1 %13676 }
0x2e63   :  { %19752 = vrcp.f32 %v13677_v62 }
0x2e6d   :  { %v19753_v6 = vpop.eup %19752 }
0x2e6e   :  { %v13679_v50 = vmul.f32 %v19753_v6, %v19751_v21 }
0x2e70   :  { %18205 = vmatmul.mubr.msk.f32.vlgmr.msra.gmra.mrb[184].mxu0 %vm272_vm2, %v13679_v50 }
0x2e71   :  { %19356 = vmatpush3.bf16.msra.mxu0 %v21120_v57  ;;  %18222 = vmatprep.mubr.msk.f32.mxu0 %vm20015_vm0, %v20016_v1 }
0x2e72   :  { %19357 = vmatprep.subr.bf16.mxu0 %v20014_v0 }
0x2f43   :  { %v13749_v56 = vpop.f32.mrb[184].mxu0 }
0x2f44   :  { %v18206_v23 = vpop.f32.mrb[185].mxu0  ;;  %18223 = vmatmul.mubr.msk.f32.vlgmr.msra.gmra.mrb[186].mxu0 %vm272_vm2, %v13749_v56 }
0x2f45   :  { %19359 = vmatpush3.bf16.msra.mxu0 %v20809_v26  ;;  %18233 = vmatprep.mubr.msk.f32.mxu0 %vm20015_vm0, %v20016_v1 }
0x2f46   :  { %19360 = vmatprep.subr.bf16.mxu0 %v20014_v0 }
0x2f49   :  { %19362 = vmatpush3.bf16.msra.mxu0 %v20825_v38 }
0x2f4a   :  { %19369 = vmatprep.subr.bf16.mxu0 %v20014_v0 }
0x3017   :  { %v13892_v26 = vpop.f32.mrb[186].mxu0 }
0x3018   :  { %v13893_v38 = vadd.f32 %v13892_v26, %v13819_v34  ;;  %v18224_v39 = vpop.f32.mrb[187].mxu0 }
0x301a   :  { %v13896_v41 = vadd.f32 %v22087_v18, %v13893_v38 }
0x301c   :  { %19754 = vtanh.f32 %v13896_v41 }
0x3026   :  { %v19755_v59 = vpop.eup %19754 }
0x3027   :  { %18234 = vmatmul.mubr.msk.f32.vlgmr.msra.gmra.mrb[188].mxu0 %vm346_vm1, %v19755_v59  ;;  %18267 = vmatmul.mubr.msk.f32.vlgmr.msra.gmra.mrb[180].mxu1 %vm346_vm1, %v19755_v59  ;;  %13898 = vst.msk [vmem:[#allocation3 + $0xc] sm:$0x3] %vm6373_vm6, %v19755_v59 }
0x3028   :  { %19371 = vmatpush3.bf16.msra.mxu0 %v20854_v8  ;;  %19389 = vmatpush3.bf16.msra.mxu1 %v20897_v27  ;;  %v14041_v8 = vpop.f32.mrb[178].mxu1 }
0x3029   :  { %19372 = vmatprep.subr.bf16.mxu0 %v20014_v0  ;;  %19390 = vmatprep.subr.bf16.mxu1 %v20014_v0  ;;  %v18246_v10 = vpop.f32.mrb[179].mxu1 }
0x302a   :  { %18255 = vmatprep.mubr.msk.f32.mxu0 %vm20015_vm0, %v20016_v1  ;;  %18288 = vmatprep.mubr.msk.f32.mxu1 %vm20015_vm0, %v20016_v1 }
0x302c   :  { %19374 = vmatpush3.bf16.msra.mxu0 %v20877_v16  ;;  %19392 = vmatpush3.bf16.msra.mxu1 %v20913_v36 }
0x302d   :  { %19381 = vmatprep.subr.bf16.mxu0 %v20014_v0  ;;  %19399 = vmatprep.subr.bf16.mxu1 %v20014_v0 }
0x302f   :  { %18256 = vmatmul.mubr.msk.f32.vlgmr.msra.gmra.mrb[190].mxu0 %vm346_vm1, %v22033_v49  ;;  %18289 = vmatmul.mubr.msk.f32.vlgmr.msra.gmra.mrb[182].mxu1 %vm346_vm1, %v22033_v49 }
0x3030   :  { %19383 = vmatpush3.bf16.msra.mxu0 %v20895_v28  ;;  %19401 = vmatpush3.bf16.msra.mxu1 %v20931_v48 }
0x3031   :  { %19384 = vmatprep.subr.bf16.mxu0 %v20014_v0  ;;  %19402 = vmatprep.subr.bf16.mxu1 %v20014_v0 }
0x3032   :  { %18277 = vmatprep.mubr.msk.f32.mxu0 %vm20015_vm0, %v20016_v1  ;;  %18310 = vmatprep.mubr.msk.f32.mxu1 %vm20015_vm0, %v20016_v1 }
0x3034   :  { %19386 = vmatpush3.bf16.msra.mxu0 %v20911_v35  ;;  %19404 = vmatpush3.bf16.msra.mxu1 %v20948_v52 }
0x3035   :  { %19393 = vmatprep.subr.bf16.mxu0 %v20014_v0  ;;  %19411 = vmatprep.subr.bf16.mxu1 %v20014_v0 }
0x3037   :  { %18278 = vmatmul.mubr.msk.f32.vlgmr.msra.gmra.mrb[192].mxu0 %vm346_vm1, %v22077_v12  ;;  %18311 = vmatmul.mubr.msk.f32.vlgmr.msra.gmra.mrb[184].mxu1 %vm346_vm1, %v22077_v12 }
0x3038   :  { %19395 = vmatpush3.bf16.msra.mxu0 %v20929_v47  ;;  %19413 = vmatpush3.bf16.msra.mxu1 %v20972_v60 }
0x3039   :  { %19396 = vmatprep.subr.bf16.mxu0 %v20014_v0  ;;  %19414 = vmatprep.subr.bf16.mxu1 %v20014_v0 }
0x303a   :  { %18299 = vmatprep.mubr.msk.f32.mxu0 %vm20015_vm0, %v20016_v1  ;;  %18332 = vmatprep.mubr.msk.f32.mxu1 %vm20015_vm0, %v20016_v1 }
0x303c   :  { %19398 = vmatpush3.bf16.msra.mxu0 %v20946_v46  ;;  %19416 = vmatpush3.bf16.msra.mxu1 %v20995_v25 }
0x303d   :  { %19405 = vmatprep.subr.bf16.mxu0 %v20014_v0  ;;  %19423 = vmatprep.subr.bf16.mxu1 %v20014_v0 }
0x303f   :  { %18300 = vmatmul.mubr.msk.f32.vlgmr.msra.gmra.mrb[194].mxu0 %vm346_vm1, %v19755_v59  ;;  %18333 = vmatmul.mubr.msk.f32.vlgmr.msra.gmra.mrb[186].mxu1 %vm346_vm1, %v19755_v59 }
0x3040   :  { %19407 = vmatpush3.bf16.msra.mxu0 %v20970_v58  ;;  %19425 = vmatpush3.bf16.msra.mxu1 %v21013_v3 }
0x3041   :  { %19408 = vmatprep.subr.bf16.mxu0 %v20014_v0  ;;  %19426 = vmatprep.subr.bf16.mxu1 %v20014_v0 }
0x3042   :  { %18321 = vmatprep.mubr.msk.f32.mxu0 %vm20015_vm0, %v20016_v1  ;;  %18354 = vmatprep.mubr.msk.f32.mxu1 %vm20015_vm0, %v20016_v1 }
0x3044   :  { %19410 = vmatpush3.bf16.msra.mxu0 %v20993_v19  ;;  %19428 = vmatpush3.bf16.msra.mxu1 %v21029_v5 }
0x3045   :  { %19417 = vmatprep.subr.bf16.mxu0 %v20014_v0  ;;  %19435 = vmatprep.subr.bf16.mxu1 %v20014_v0 }
0x3047   :  { %18322 = vmatmul.mubr.msk.f32.vlgmr.msra.gmra.mrb[196].mxu0 %vm346_vm1, %v22033_v49  ;;  %18355 = vmatmul.mubr.msk.f32.vlgmr.msra.gmra.mrb[188].mxu1 %vm346_vm1, %v22033_v49 }
0x3048   :  { %19419 = vmatpush3.bf16.msra.mxu0 %v21011_v2  ;;  %18343 = vmatprep.mubr.msk.f32.mxu0 %vm20015_vm0, %v20016_v1 }
0x3049   :  { %19420 = vmatprep.subr.bf16.mxu0 %v20014_v0  ;;  %18372 = vmatprep.mubr.msk.f32.mxu1 %vm20015_vm0, %v20016_v1 }
0x304c   :  { %19422 = vmatpush3.bf16.msra.mxu0 %v21027_v14 }
0x304d   :  { %19438 = vmatpush3.bf16.xpose.msk.msra.mxu1 %vm21082_vm4, %v21086_v55  ;;  %19429 = vmatprep.subr.bf16.mxu0 %v20014_v0 }
0x304e   :  { %19442 = vmatprep.subr.bf16.mxu1 %v20014_v0 }
0x304f   :  { %18344 = vmatmul.mubr.msk.f32.vlgmr.msra.gmra.mrb[198].mxu0 %vm346_vm1, %v22077_v12 }
0x3050   :  { %19431 = vmatpush3.bf16.msra.mxu0 %v21048_v24  ;;  %18365 = vmatprep.mubr.msk.f32.mxu0 %vm20015_vm0, %v20016_v1 }
0x3051   :  { %19432 = vmatprep.subr.bf16.mxu0 %v20014_v0 }
0x3054   :  { %19434 = vmatpush3.bf16.msra.mxu0 %v21051_v30 }
0x3055   :  { %19439 = vmatprep.subr.bf16.mxu0 %v20014_v0 }
0x30fa   :  { %v13968_v16 = vpop.f32.mrb[188].mxu0  ;;  %v14189_v9 = vpop.f32.mrb[180].mxu1 }
0x30fb   :  { %v14042_v28 = vadd.f32 %v14041_v8, %v13968_v16  ;;  %v18235_v27 = vpop.f32.mrb[189].mxu0  ;;  %v18268_v35 = vpop.f32.mrb[181].mxu1 }
0x3102   :  { %v14111_v36 = vpop.f32.mrb[190].mxu0  ;;  %v14329_v47 = vpop.f32.mrb[182].mxu1 }
0x3103   :  { %v14115_v48 = vadd.f32 %v14111_v36, %v14042_v28  ;;  %v18257_v46 = vpop.f32.mrb[191].mxu0  ;;  %v18290_v52 = vpop.f32.mrb[183].mxu1 }
0x3105   :  { %v14116_v58 = vadd.f32 %v22008_v20, %v14115_v48 }
0x3107   :  { %v15508_v60 = vmul.f32 -1.442695, %v14116_v58  ;;  %v15153_v58 = vld [vmem:[#allocation3] sm:$0xff] }
0x3109   :  { %19756 = vpow2.f32 %v15508_v60  ;;  %v267_v60 = vld [vmem:[#allocation16] sm:$0xff] }
0x310a   :  { %v14259_v19 = vpop.f32.mrb[192].mxu0  ;;  %v14477_v25 = vpop.f32.mrb[184].mxu1 }
0x310b   :  { %v14260_v2 = vadd.f32 %v14259_v19, %v14189_v9  ;;  %v18279_v3 = vpop.f32.mrb[193].mxu0  ;;  %v18312_v14 = vpop.f32.mrb[185].mxu1  ;;  %v268_v19 = vld [vmem:[#allocation16 + $0x8] sm:$0xff] }
0x310c   :  { %v270_v3 = vld [vmem:[#allocation16 + $0x18] sm:$0xff] }
0x310d   :  { %v14333_v5 = vadd.f32 %v14329_v47, %v14260_v2  ;;  %v269_v2 = vld [vmem:[#allocation16 + $0x10] sm:$0xff] }
0x310e   :  { %v19455_v14 = vpack.c.bf16 %v270_v3, %v269_v2 }
0x310f   :  { %v14334_v24 = vadd.f32 %v22014_v61, %v14333_v5 }
0x3111   :  { %v15512_v30 = vmul.f32 -1.442695, %v14334_v24 }
0x3112   :  { %v14407_v54 = vpop.f32.mrb[194].mxu0  ;;  %v14620_v4 = vpop.f32.mrb[186].mxu1 }
0x3113   :  { %19758 = vpow2.f32 %v15512_v30  ;;  %v14478_v49 = vadd.f32 %v14477_v25, %v14407_v54  ;;  %v18301_v33 = vpop.f32.mrb[195].mxu0  ;;  %v18334_v7 = vpop.f32.mrb[187].mxu1  ;;  %v19451_v25 = vpack.c.bf16 %v268_v19, %v267_v60 }
0x3114   :  { %v19757_v37 = vpop.eup %19756 }
0x3115   :  { %v14120_v43 = vadd.f32 1.0, %v19757_v37 }
0x3117   :  { %19760 = vrcp.f32 %v14120_v43 }
0x311a   :  { %v14547_v20 = vpop.f32.mrb[196].mxu0  ;;  %v14760_v15 = vpop.f32.mrb[188].mxu1 }
0x311b   :  { %v14551_v17 = vadd.f32 %v14547_v20, %v14478_v49  ;;  %v18323_v29 = vpop.f32.mrb[197].mxu0  ;;  %v18356_v34 = vpop.f32.mrb[189].mxu1 }
0x311d   :  { %v19759_v44 = vpop.eup %19758  ;;  %v14552_v53 = vadd.f32 %v22020_v42, %v14551_v17 }
0x311e   :  { %v14338_v31 = vadd.f32 1.0, %v19759_v44 }
0x311f   :  { %19762 = vtanh.f32 %v14552_v53 }
0x3120   :  { %19764 = vrcp.f32 %v14338_v31 }
0x3121   :  { %v19761_v6 = vpop.eup %19760 }
0x3122   :  { %v14690_v61 = vpop.f32.mrb[198].mxu0 }
0x3123   :  { %v14691_v45 = vadd.f32 %v14690_v61, %v14620_v4  ;;  %v18345_v21 = vpop.f32.mrb[199].mxu0  ;;  %v15527_v4 = vld [vmem:[%s22238_s15] ss:$0 sm:$0xff] }
0x3125   :  { %v14764_v32 = vadd.f32 %v14760_v15, %v14691_v45 }
0x3127   :  { %v14765_v62 = vadd.f32 %v22026_v11, %v14764_v32 }
0x3129   :  { %v19763_v50 = vpop.eup %19762  ;;  %v15519_v56 = vmul.f32 -1.442695, %v14765_v62 }
0x312a   :  { %v19765_v23 = vpop.eup %19764  ;;  %v14773_v12 = vmul.f32 %v19763_v50, %v19761_v6 }
0x312b   :  { %v14772_v26 = vmul.f32 %v19765_v23, %v22030_v63  ;;  %19766 = vpow2.f32 %v15519_v56 }
0x312d   :  { %v14774_v38 = vadd.f32 %v14773_v12, %v14772_v26 }
0x312f   :  { %19768 = vtanh.f32 %v14774_v38 }
0x3135   :  { %v19767_v42 = vpop.eup %19766 }
0x3136   :  { %v14769_v39 = vadd.f32 1.0, %v19767_v42 }
0x3138   :  { %19770 = vrcp.f32 %v14769_v39 }
0x3139   :  { %v19769_v41 = vpop.eup %19768 }
0x3142   :  { %v19771_v59 = vpop.eup %19770 }
0x3143   :  { %v14776_v8 = vmul.f32 %v19771_v59, %v19769_v41 }
0x3145   :  { %18366 = vmatmul.mubr.msk.f32.vlgmr.msra.gmra.mrb[200].mxu0 %vm346_vm1, %v14776_v8 }
0x3146   :  { %19441 = vmatpush3.bf16.msra.mxu0 %v21086_v55  ;;  %18379 = vmatprep.mubr.msk.f32.mxu0 %vm20015_vm0, %v20016_v1 }
0x3147   :  { %19448 = vmatprep.subr.bf16.mxu0 %v20014_v0 }
0x3218   :  { %v14846_v11 = vpop.f32.mrb[200].mxu0 }
0x3219   :  { %v14847_v63 = vadd.f32 %v22041_v13, %v14846_v11  ;;  %v18367_v10 = vpop.f32.mrb[201].mxu0 }
0x321b   :  { %18373 = vmatmul.mubr.msk.f32.vlgmr.msra.gmra.mrb[190].mxu1 %vm272_vm2, %v14847_v63 }
0x321c   :  { %19444 = vmatpush3.bf16.msra.mxu1 %v21124_v22  ;;  %18390 = vmatprep.mubr.msk.f32.mxu1 %vm20015_vm0, %v20016_v1 }
0x321d   :  { %19445 = vmatprep.subr.bf16.mxu1 %v20014_v0 }
0x3220   :  { %19447 = vmatpush3.bf16.msra.mxu1 %v21128_v40 }
0x3223   :  { %18391 = vmatmul.mubr.msk.f32.vlgmr.msra.gmra.mrb[192].mxu1 %vm346_vm1, %v14776_v8 }
0x32ee   :  { %v14919_v55 = vpop.f32.mrb[190].mxu1 }
0x32ef   :  { %v14920_v16 = vadd.f32 %v14919_v55, %v21115_v51  ;;  %v18374_v9 = vpop.f32.mrb[191].mxu1 }
0x32f1   :  { %v14923_v13 = vsel %vm892_vm3, %v14920_v16, -inf }
0x32f2   :  { %14924 = vmax.xlane.f32.xlu0 %v14923_v13 }
0x32f6   :  { %v15073_v28 = vpop.f32.mrb[192].mxu1 }
0x32f7   :  { %v18392_v27 = vpop.f32.mrb[193].mxu1 }
0x337f   :  { %v14925_v35 = vpop.xlane.xlu0 %14924 }
0x3380   :  { %v14926_v22 = vsub.f32 %v14920_v16, %v14925_v35 }
0x3382   :  { %v14927_v36 = vmul.f32 1.442695, %v14926_v22 }
0x3384   :  { %19772 = vpow2.f32 %v14927_v36 }
0x338e   :  { %v19773_v47 = vpop.eup %19772 }
0x338f   :  { %v14929_v0 = vsel %vm892_vm3, %v19773_v47, 0.0 }
0x3390   :  { %14930 = vadd.xlane.f32.xlu1 %v14929_v0 }
0x341d   :  { %v14931_v40 = vpop.xlane.xlu1 %14930 }
0x341e   :  { %19774 = vrcp.f32 %v14931_v40 }
0x3428   :  { %v19775_v48 = vpop.eup %19774 }
0x3429   :  { %v14933_v46 = vmul.f32 %v19775_v48, %v19773_v47 }
0x342b   :  { %18380 = vmatmul.mubr.msk.f32.vlgmr.msra.gmra.mrb[202].mxu0 %vm272_vm2, %v14933_v46 }
0x342c   :  { %19450 = vmatpush3.bf16.msra.mxu0 %v21120_v57  ;;  %18397 = vmatprep.mubr.msk.f32.mxu0 %vm20015_vm0, %v20016_v1 }
0x342d   :  { %19452 = vmatprep.subr.bf16.mxu0 %v19451_v25 }
0x34fe   :  { %v15003_v51 = vpop.f32.mrb[202].mxu0 }
0x34ff   :  { %v18381_v52 = vpop.f32.mrb[203].mxu0  ;;  %18398 = vmatmul.mubr.msk.f32.vlgmr.msra.gmra.mrb[204].mxu0 %vm272_vm2, %v15003_v51 }
0x3500   :  { %18408 = vmatprep.mubr.msk.f32.mxu0 %vm346_vm1, %v15153_v58  ;;  %19454 = vmatpush3.bf16.msra.mxu0 %v19451_v25 }
0x3501   :  { %19456 = vmatprep.subr.bf16.mxu0 %v19455_v14 }
0x3504   :  { %19458 = vmatpush3.bf16.msra.mxu0 %v19455_v14 }
0x35d2   :  { %v15146_v57 = vpop.f32.mrb[204].mxu0 }
0x35d3   :  { %v15147_v5 = vadd.f32 %v15146_v57, %v15073_v28  ;;  %v18399_v1 = vpop.f32.mrb[205].mxu0 }
0x35d5   :  { %v15150_v24 = vadd.f32 %v22087_v18, %v15147_v5 }
0x35d7   :  { %19776 = vtanh.f32 %v15150_v24 }
0x35e1   :  { %v19777_v30 = vpop.eup %19776 }
0x35e2   :  { %15152 = vst.msk [vmem:[#allocation3 + $0xe] sm:$0x3] %vm6373_vm6, %v19777_v30 }
0x35e9   :  { %v15154_v54 = vld [vmem:[#allocation3 + $0x8] sm:$0xff] }
0x35ea   :  { %18409 = vmatmul.mubr.msk.f32.vlgmr.msra.gmra.mrb[206].mxu0 %vm346_vm1, %v15154_v54 }
0x36bd   :  { %v18410_v49 = vpop.f32.mrb[206].mxu0 }
0x36be   :  { %v15239_v33 = vadd.f32 %v18410_v49, %v15527_v4  ;;  %v15233_v7 = vpop.f32.mrb[207].mxu0 }
0x36bf   :  { %v15234_v37 = vadd.f32 %v15527_v4, %v15233_v7 }
0x36c0   :  { %15243 = vst [vmem:[#allocation18 + $0x8] sm:$0xff] %v15239_v33 }
0x36c1   :  { %15242 = vst [vmem:[#allocation18] sm:$0xff] %v15234_v37 }
0x36c2   :  { %19981 = shalt.err (!%p19978_p12)
}
0x36c3   :  { %s19982_s15 = scalar_lea.hbm %s22239_s16, 256 }
0x36c4   :  { %p19983_p13 = scmp.ne.s32.totalorder %s22239_s16, %s19982_s15  ;;  %p19986_p0 = scmp.lt.u32.totalorder %s19982_s15, %s22239_s16 }
0x36c6   :  { %p19988_p1 = pnand %p19986_p0, %p19983_p13 }
0x36c8   :  { %19991 = shalt.err (!%p19988_p1)
}
0x36c9   :  { %15255 = dma.vmem_to_hbm [thread:$0]  %s15250_s9, 256, %s22239_s16, [#allocation6], %s20006_s18, %s20006_s18, %s20007_s19  }
0x36ca   :  { %20002 = dma.done.wait [#allocation6], 256  }
0x36cb   :  { %20003 = vsyncadd [#allocation6], 4294967040 }
0x36cc   :  { %15259 = vsyncpa [#allocation5], 1 }
0x36cd   :  { %15260 = vsyncpa [#allocation8], 1 }
0x36ce   :  { %15261 = vsyncpa [#allocation11], 1 }
0x36cf   :  { %15262 = vsyncpa [#allocation14], 1 }
0x36d0   :  { %15263 = vsyncpa [#allocation17], 1 }
0x36d1   :  { %15264 = vsyncpa [#allocation6], 1 }

</bundles_post_ra>
